<compile_context>
chip_gen: v7x
topology: tpu7x:2x2x1
jax: 0.10.0
libtpu: 0.0.40
codegen_flags: <defaults>
</compile_context>

<pallas_src>
import functools

import jax
import jax.numpy as jnp
from jax import lax
from jax.experimental import pallas as pl
from jax.experimental.pallas import tpu as pltpu


CFG = dict(
    depth=2, img_size=16, add_proprio=True, proprio_dim=4,
    add_lang=True, lang_dim=32, lang_len=8,
    img_feat_dim=3, feat_dim=8, im_channels=16,
    attn_dim=32, attn_heads=2, attn_dim_head=16,
    img_patch_size=8, final_dim=8, self_cross_ver=0,
    add_corr=False, add_pixel_loc=False, add_depth=False, pe_fix=True,
    num_img=3,
)

# Order of weight arrays fed to the fused kernel (after the 3 data inputs).
_WEIGHT_NAMES = (
    "w_pre_big", "b_pre_big", "w_patch", "b_patch",
    "w_prop", "b_prop", "w_lang", "b_lang", "pos_emb",
    "w_bef", "b_bef",
    "ln1_g", "ln1_b", "w_q", "w_k", "w_v", "b_q", "b_k", "b_v",
    "w_o", "b_o", "ln2_g", "ln2_b", "w_ff1", "b_ff1", "w_ff2", "b_ff2",
    "w_aft", "b_aft",
    "w_up", "b_up", "w_hm_big", "b_hm", "mat_sf", "b_feat",
)


# ----------------------------------------------------------------------------
# Fused kernel (one grid step = `bt` samples; everything lives in VMEM/vregs)
# ----------------------------------------------------------------------------
def _mvt_fused_kernel(x_ref, prop_ref, lang_ref, *rest, cfg, bt):
    n_w = len(_WEIGHT_NAMES)
    w = dict(zip(_WEIGHT_NAMES, rest[:n_w]))
    trans_ref, feat_ref = rest[n_w], rest[n_w + 1]

    imc = cfg["im_channels"]
    npp = (cfg["img_size"] // cfg["img_patch_size"]) ** 2
    nimg = cfg["num_img"]
    nt = nimg * npp                           # image tokens per sample
    L = cfg["lang_len"]
    heads = cfg["attn_heads"]
    dh = cfg["attn_dim_head"]
    fd = cfg["final_dim"]
    feat_dim = cfg["feat_dim"]
    d_seq = 2 * imc
    S = L + nt
    S_pad = ((S + 7) // 8) * 8               # sublane-aligned per-sample seq len
    scale = dh ** -0.5
    f32 = jnp.float32
    bf16 = jnp.bfloat16

    def dot(a, b):                            # bf16 MXU, f32 accumulation
        return jnp.dot(a.astype(bf16), b.astype(bf16), preferred_element_type=f32)

    def relu(t):
        return jnp.maximum(t, 0.0)

    def ln(x, g, b, eps=1e-5):
        mu = jnp.mean(x, axis=-1, keepdims=True)
        var = jnp.mean((x - mu) ** 2, axis=-1, keepdims=True)
        return (x - mu) * lax.rsqrt(var + eps) * g + b

    # -- batch-folded preprocess 1x1 conv (block-diag matmul) + patchify conv --
    xp = x_ref[...]                                                   # (bt*nt, p*p*cin)
    h1 = relu(dot(xp, w["w_pre_big"][...]) + w["b_pre_big"][...])     # (bt*nt, p*p*imc)
    x_img = relu(dot(h1, w["w_patch"][...]) + w["b_patch"][...])      # (bt*nt, imc)

    pr = relu(dot(prop_ref[...][:, 0, :], w["w_prop"][...])
              + w["b_prop"][...])                                     # (bt, imc)
    lang_tok = relu(dot(lang_ref[...], w["w_lang"][...])
                    + w["b_lang"][...])                               # (bt*L, d_seq)

    # -- assemble padded per-sample token sequence as a value (no scratch) -----
    pos = w["pos_emb"][...]                                           # (nt, d_seq)
    pieces = []
    pad_blk = jnp.zeros((S_pad - S, d_seq), f32) if S_pad > S else None
    for b in range(bt):
        img_b = jnp.concatenate(
            [x_img[b * nt:(b + 1) * nt, :],
             jnp.broadcast_to(pr[b:b + 1, :], (nt, imc))], axis=1) + pos
        pieces.append(lang_tok[b * L:(b + 1) * L, :])
        pieces.append(img_b)
        if pad_blk is not None:
            pieces.append(pad_blk)
    seq = jnp.concatenate(pieces, axis=0) if len(pieces) > 1 else pieces[0]

    # -- fc_bef_attn + transformer (self_cross_ver=0, eval mode) ---------------
    xf = dot(seq, w["w_bef"][...]) + w["b_bef"][...]                  # (bt*S_pad, attn_dim)

    # additive mask for padded key positions (per-sample local index >= S)
    kmask = jnp.where(
        lax.broadcasted_iota(jnp.int32, (1, S_pad), 1) < S, 0.0, -1e9).astype(f32)

    for li in range(cfg["depth"]):
        h = ln(xf, w["ln1_g"][li], w["ln1_b"][li])
        attn_acc = jnp.zeros_like(xf)
        for hd in range(heads):
            # per-head pre-split weights: projections batch-folded over bt*S_pad rows
            q = dot(h, w["w_q"][li, hd]) + w["b_q"][li, hd]           # (bt*S_pad, dh)
            k = dot(h, w["w_k"][li, hd]) + w["b_k"][li, hd]
            v = dot(h, w["w_v"][li, hd]) + w["b_v"][li, hd]
            o_parts = []
            for b in range(bt):                    # per-sample scores (no cross-batch)
                r0, r1 = b * S_pad, (b + 1) * S_pad
                s = lax.dot_general(
                    q[r0:r1, :].astype(bf16), k[r0:r1, :].astype(bf16),
                    (((1,), (1,)), ((), ())), preferred_element_type=f32) * scale
                s = s + kmask
                s = s - jnp.max(s, axis=-1, keepdims=True)
                e = jnp.exp(s)
                pa = e / jnp.sum(e, axis=-1, keepdims=True)           # exact division
                o_parts.append(dot(pa, v[r0:r1, :]))                  # (S_pad, dh)
            o_cat = jnp.concatenate(o_parts, axis=0) if bt > 1 else o_parts[0]
            # head-merge folded into the output projection (no concat over heads)
            attn_acc = attn_acc + dot(o_cat, w["w_o"][li, hd])
        xf = xf + attn_acc + w["b_o"][li]
        h2 = ln(xf, w["ln2_g"][li], w["ln2_b"][li])
        ff = relu(dot(h2, w["w_ff1"][li]) + w["b_ff1"][li])
        xf = xf + dot(ff, w["w_ff2"][li]) + w["b_ff2"][li]

    # -- fc_aft_attn + fused per-view decoder (one pass over all rows) ---------
    # (lang/pad rows go through the decoder matmuls too; they are never read,
    #  avoiding any sublane relayout of the 12 image rows per sample.)
    y = dot(xf, w["w_aft"][...]) + w["b_aft"][...]                    # (bt*S_pad, d_seq)
    u = relu(dot(y, w["w_up"][...]) + w["b_up"][...])                 # (bt*S_pad, fd*p*p), fd-major
    hm = dot(u, w["w_hm_big"][...]) + w["b_hm"][...]                  # (bt*S_pad, p*p) logits

    b_feat = w["b_feat"][...]
    for b in range(bt):
        base = b * S_pad + L
        trans_ref[b] = hm[base:base + nt, :]                          # single (nt, p*p) store
        feat_b = jnp.zeros((1, feat_dim), f32)
        for vi in range(nimg):
            r0 = base + vi * npp
            hm_v = hm[r0:r0 + npp, :]                                 # (npp, p*p)
            u_v = u[r0:r0 + npp, :]                                   # (npp, fd*p*p)
            m = jnp.max(jnp.max(hm_v, axis=-1, keepdims=True), axis=0, keepdims=True)
            e = jnp.exp(hm_v - m)
            z = jnp.sum(jnp.sum(e, axis=-1, keepdims=True), axis=0, keepdims=True)
            psm = e / z                                               # softmax over view, exact
            psm_exp = jnp.concatenate([psm] * fd, axis=1)             # fd-major expansion
            pooled = jnp.sum(psm_exp * u_v, axis=0, keepdims=True)    # (1, fd*p*p)
            feat_b = feat_b + dot(pooled, w["mat_sf"][vi])            # mat_s folded into w_feat
        feat_ref[b] = feat_b + b_feat


# ----------------------------------------------------------------------------
# Parameter init (canonical f32 params, PyTorch-like shapes)
# ----------------------------------------------------------------------------
def _dense_p(key, fan_in, fan_out):
    w = jax.random.normal(key, (fan_in, fan_out), jnp.float32) / jnp.sqrt(fan_in)
    b = jnp.zeros((1, fan_out), jnp.float32)
    return w, b


def init_params(key, cfg):
    imc = cfg["im_channels"]
    p = cfg["img_patch_size"]
    d_seq = 2 * imc                                  # add_proprio=True
    attn_dim = cfg["attn_dim"]
    inner = cfg["attn_heads"] * cfg["attn_dim_head"]
    np_ = cfg["img_size"] // p
    n_img_tok = cfg["num_img"] * np_ * np_

    keys = iter(jax.random.split(key, 64))
    params = {}
    params["w_pre"], params["b_pre"] = _dense_p(next(keys), cfg["img_feat_dim"], imc)
    params["w_patch"], params["b_patch"] = _dense_p(next(keys), p * p * imc, imc)
    params["w_prop"], params["b_prop"] = _dense_p(next(keys), cfg["proprio_dim"], imc)
    params["w_lang"], params["b_lang"] = _dense_p(next(keys), cfg["lang_dim"], d_seq)
    params["pos_emb"] = 0.02 * jax.random.normal(
        next(keys), (n_img_tok, d_seq), jnp.float32)
    params["w_bef"], params["b_bef"] = _dense_p(next(keys), d_seq, attn_dim)

    layers = []
    for _ in range(cfg["depth"]):
        lp = {}
        lp["ln1_g"] = jnp.ones((1, attn_dim), jnp.float32)
        lp["ln1_b"] = jnp.zeros((1, attn_dim), jnp.float32)
        lp["w_qkv"], lp["b_qkv"] = _dense_p(next(keys), attn_dim, 3 * inner)
        lp["w_o"], lp["b_o"] = _dense_p(next(keys), inner, attn_dim)
        lp["ln2_g"] = jnp.ones((1, attn_dim), jnp.float32)
        lp["ln2_b"] = jnp.zeros((1, attn_dim), jnp.float32)
        lp["w_ff1"], lp["b_ff1"] = _dense_p(next(keys), attn_dim, 4 * attn_dim)
        lp["w_ff2"], lp["b_ff2"] = _dense_p(next(keys), 4 * attn_dim, attn_dim)
        layers.append(lp)
    params["layers"] = layers

    params["w_aft"], params["b_aft"] = _dense_p(next(keys), attn_dim, d_seq)
    params["w_up"], params["b_up"] = _dense_p(next(keys), d_seq, p * p * cfg["final_dim"])
    params["w_hm"], params["b_hm"] = _dense_p(next(keys), cfg["final_dim"], 1)
    params["w_feat"], params["b_feat"] = _dense_p(
        next(keys), cfg["num_img"] * cfg["final_dim"], cfg["feat_dim"])
    return params


# ----------------------------------------------------------------------------
# One-time kernel-layout preparation (host side): kron weights, per-head split,
# fd-major decoder layout, folded mat_s, bf16 matmul weights.
# ----------------------------------------------------------------------------
def prepare_kernel_params(params, cfg):
    p = cfg["img_patch_size"]
    pp = p * p
    fd = cfg["final_dim"]
    heads = cfg["attn_heads"]
    dh = cfg["attn_dim_head"]
    attn_dim = cfg["attn_dim"]
    inner = heads * dh
    nimg = cfg["num_img"]
    f32 = jnp.float32
    bf16 = jnp.bfloat16
    eye_pp = jnp.eye(pp, dtype=f32)

    kp = {}
    # 1x1 preprocess conv (cin -> imc) as a block-diag matmul on patch-flattened pixels.
    kp["w_pre_big"] = jnp.kron(eye_pp, params["w_pre"]).astype(bf16)      # (pp*cin, pp*imc)
    kp["b_pre_big"] = jnp.tile(params["b_pre"], (1, pp)).astype(f32)
    kp["w_patch"] = params["w_patch"].astype(bf16)
    kp["b_patch"] = params["b_patch"]
    kp["w_prop"] = params["w_prop"].astype(bf16)
    kp["b_prop"] = params["b_prop"]
    kp["w_lang"] = params["w_lang"].astype(bf16)
    kp["b_lang"] = params["b_lang"]
    kp["pos_emb"] = params["pos_emb"]
    kp["w_bef"] = params["w_bef"].astype(bf16)
    kp["b_bef"] = params["b_bef"]

    # Per-head pre-split QKV / out-proj (avoid in-kernel lane-offset head slicing).
    def split_heads(wmat):                       # (attn_dim, inner) -> (heads, attn_dim, dh)
        return jnp.transpose(wmat.reshape(attn_dim, heads, dh), (1, 0, 2))

    def split_bias(bvec):                        # (1, inner) -> (heads, 1, dh)
        return jnp.transpose(bvec.reshape(1, heads, dh), (1, 0, 2))

    acc = {k: [] for k in ("w_q", "w_k", "w_v", "b_q", "b_k", "b_v", "w_o", "b_o",
                           "ln1_g", "ln1_b", "ln2_g", "ln2_b",
                           "w_ff1", "b_ff1", "w_ff2", "b_ff2")}
    for lp in params["layers"]:
        wqkv, bqkv = lp["w_qkv"], lp["b_qkv"]
        acc["w_q"].append(split_heads(wqkv[:, :inner]))
        acc["w_k"].append(split_heads(wqkv[:, inner:2 * inner]))
        acc["w_v"].append(split_heads(wqkv[:, 2 * inner:]))
        acc["b_q"].append(split_bias(bqkv[:, :inner]))
        acc["b_k"].append(split_bias(bqkv[:, inner:2 * inner]))
        acc["b_v"].append(split_bias(bqkv[:, 2 * inner:]))
        acc["w_o"].append(lp["w_o"].reshape(heads, dh, attn_dim))
        acc["b_o"].append(lp["b_o"])
        acc["ln1_g"].append(lp["ln1_g"])
        acc["ln1_b"].append(lp["ln1_b"])
        acc["ln2_g"].append(lp["ln2_g"])
        acc["ln2_b"].append(lp["ln2_b"])
        acc["w_ff1"].append(lp["w_ff1"])
        acc["b_ff1"].append(lp["b_ff1"])
        acc["w_ff2"].append(lp["w_ff2"])
        acc["b_ff2"].append(lp["b_ff2"])
    for name in ("w_q", "w_k", "w_v", "w_o", "w_ff1", "w_ff2"):
        kp[name] = jnp.stack(acc[name]).astype(bf16)
    for name in ("b_q", "b_k", "b_v", "b_o", "ln1_g", "ln1_b", "ln2_g", "ln2_b",
                 "b_ff1", "b_ff2"):
        kp[name] = jnp.stack(acc[name])

    kp["w_aft"] = params["w_aft"].astype(bf16)
    kp["b_aft"] = params["b_aft"]

    # Decoder: reorder w_up / b_up columns to fd-major (feature f at column f*pp+q),
    # so the in-kernel softmax expansion is a plain lane concat of fd copies.
    d_seq = params["w_up"].shape[0]
    w_up3 = params["w_up"].reshape(d_seq, pp, fd)
    kp["w_up"] = jnp.transpose(w_up3, (0, 2, 1)).reshape(d_seq, fd * pp).astype(bf16)
    b_up3 = params["b_up"].reshape(1, pp, fd)
    kp["b_up"] = jnp.transpose(b_up3, (0, 2, 1)).reshape(1, fd * pp)
    # Heatmap 1x1 conv (fd -> 1) as a block-diag matmul from fd-major features.
    kp["w_hm_big"] = jnp.kron(params["w_hm"], eye_pp).astype(bf16)        # (fd*pp, pp)
    kp["b_hm"] = params["b_hm"]
    # Fold the pixel-sum (mat_s) into the final per-view feature projection.
    kp["mat_sf"] = jnp.stack([
        jnp.repeat(params["w_feat"][v * fd:(v + 1) * fd, :], pp, axis=0)
        for v in range(nimg)]).astype(bf16)                               # (nimg, fd*pp, feat_dim)
    kp["b_feat"] = params["b_feat"]
    return kp


# ----------------------------------------------------------------------------
# Forward (one fused pallas_call; batch tiled over the grid)
# ----------------------------------------------------------------------------
def _pick_bt(bs, nt):
    """Batch tile: keep image-row blocks sublane-aligned, grid >= 2 when possible
    (feeds both v7x TensorCores via the 'parallel' grid axis)."""
    if bs % 2 == 0:
        bt = bs // 2
        if (bt * nt) % 8 == 0:
            return bt
    return bs


def mvt_forward(kparams, img, proprio, lang_emb, cfg, bt=None):
    bs, nimg, cin, H, W = img.shape
    p = cfg["img_patch_size"]
    np_ = H // p
    npp = np_ * np_
    nt = nimg * npp
    feat_dim = cfg["feat_dim"]
    L = cfg["lang_len"]

    if bt is None:
        bt = _pick_bt(bs, nt)
    assert bs % bt == 0
    grid = (bs // bt,)

    # Patch-ordered pixel layout: rows (sample, view, patch), cols (py, px, c_in).
    x = jnp.transpose(img, (0, 1, 3, 4, 2))
    x = x.reshape(bs, nimg, np_, p, np_, p, cin)
    x = jnp.transpose(x, (0, 1, 2, 4, 3, 5, 6)).reshape(bs * nt, p * p * cin)
    prop3 = proprio.reshape(bs, 1, -1)
    lang2 = lang_emb.reshape(bs * L, -1)

    weights = [kparams[name] for name in _WEIGHT_NAMES]

    in_specs = [
        pl.BlockSpec((bt * nt, p * p * cin), lambda i: (i, 0)),
        pl.BlockSpec((bt, 1, proprio.shape[-1]), lambda i: (i, 0, 0)),
        pl.BlockSpec((bt * L, lang_emb.shape[-1]), lambda i: (i, 0)),
    ] + [pl.BlockSpec(wa.shape, lambda i, nd=wa.ndim: (0,) * nd) for wa in weights]

    out_shapes = (
        jax.ShapeDtypeStruct((bs, nt, p * p), jnp.float32),     # heatmap, patch order
        jax.ShapeDtypeStruct((bs, 1, feat_dim), jnp.float32),   # pooled features
    )
    out_specs = (
        pl.BlockSpec((bt, nt, p * p), lambda i: (i, 0, 0)),
        pl.BlockSpec((bt, 1, feat_dim), lambda i: (i, 0, 0)),
    )

    trans_po, feat = pl.pallas_call(
        functools.partial(_mvt_fused_kernel, cfg=cfg, bt=bt),
        out_shape=out_shapes,
        grid=grid,
        in_specs=in_specs,
        out_specs=out_specs,
        compiler_params=pltpu.CompilerParams(dimension_semantics=("parallel",)),
    )(x, prop3, lang2, *weights)

    # Tiny wrapper-side reorder of the patch-ordered heatmap back to (H, W).
    trans = trans_po.reshape(bs, nimg, np_, np_, p, p)
    trans = jnp.transpose(trans, (0, 1, 2, 4, 3, 5)).reshape(bs, nimg, H, W)
    feat = feat.reshape(bs, feat_dim)
    return {"trans": trans, "feat": feat}


# ----------------------------------------------------------------------------
# Driver
# ----------------------------------------------------------------------------
if __name__ == "__main__":
    key = jax.random.PRNGKey(0)
    kpar, ki, kpr, kl = jax.random.split(key, 4)
    params = init_params(kpar, CFG)
    kparams = prepare_kernel_params(params, CFG)

    bs = 4  # even batch -> bt=2 per grid step, grid=(2,) keeps both v7x TCs busy
    img = jax.random.normal(
        ki, (bs, CFG["num_img"], CFG["img_feat_dim"], CFG["img_size"], CFG["img_size"]),
        jnp.float32)
    proprio = jax.random.normal(kpr, (bs, CFG["proprio_dim"]), jnp.float32)
    lang_emb = jax.random.normal(kl, (bs, CFG["lang_len"], CFG["lang_dim"]), jnp.float32)

    fwd = jax.jit(functools.partial(mvt_forward, cfg=CFG))
    out = fwd(kparams, img, proprio, lang_emb)
    jax.block_until_ready(out)

    assert out["trans"].shape == (bs, CFG["num_img"], CFG["img_size"], CFG["img_size"])
    assert out["feat"].shape == (bs, CFG["feat_dim"])
    print("KERNEL_OK")
</pallas_src>

<mosaic_0001>
module attributes {stable_mosaic.version = 11 : i64} {
  func.func @_mvt_fused_kernel(%arg0: i32, %arg1: memref<24x192xf32, #tpu.memory_space<vmem>>, %arg2: memref<2x1x4xf32, #tpu.memory_space<vmem>>, %arg3: memref<16x32xf32, #tpu.memory_space<vmem>>, %arg4: memref<192x1024xbf16, #tpu.memory_space<vmem>>, %arg5: memref<1x1024xf32, #tpu.memory_space<vmem>>, %arg6: memref<1024x16xbf16, #tpu.memory_space<vmem>>, %arg7: memref<1x16xf32, #tpu.memory_space<vmem>>, %arg8: memref<4x16xbf16, #tpu.memory_space<vmem>>, %arg9: memref<1x16xf32, #tpu.memory_space<vmem>>, %arg10: memref<32x32xbf16, #tpu.memory_space<vmem>>, %arg11: memref<1x32xf32, #tpu.memory_space<vmem>>, %arg12: memref<12x32xf32, #tpu.memory_space<vmem>>, %arg13: memref<32x32xbf16, #tpu.memory_space<vmem>>, %arg14: memref<1x32xf32, #tpu.memory_space<vmem>>, %arg15: memref<2x1x32xf32, #tpu.memory_space<vmem>>, %arg16: memref<2x1x32xf32, #tpu.memory_space<vmem>>, %arg17: memref<2x2x32x16xbf16, #tpu.memory_space<vmem>>, %arg18: memref<2x2x32x16xbf16, #tpu.memory_space<vmem>>, %arg19: memref<2x2x32x16xbf16, #tpu.memory_space<vmem>>, %arg20: memref<2x2x1x16xf32, #tpu.memory_space<vmem>>, %arg21: memref<2x2x1x16xf32, #tpu.memory_space<vmem>>, %arg22: memref<2x2x1x16xf32, #tpu.memory_space<vmem>>, %arg23: memref<2x2x16x32xbf16, #tpu.memory_space<vmem>>, %arg24: memref<2x1x32xf32, #tpu.memory_space<vmem>>, %arg25: memref<2x1x32xf32, #tpu.memory_space<vmem>>, %arg26: memref<2x1x32xf32, #tpu.memory_space<vmem>>, %arg27: memref<2x32x128xbf16, #tpu.memory_space<vmem>>, %arg28: memref<2x1x128xf32, #tpu.memory_space<vmem>>, %arg29: memref<2x128x32xbf16, #tpu.memory_space<vmem>>, %arg30: memref<2x1x32xf32, #tpu.memory_space<vmem>>, %arg31: memref<32x32xbf16, #tpu.memory_space<vmem>>, %arg32: memref<1x32xf32, #tpu.memory_space<vmem>>, %arg33: memref<32x512xbf16, #tpu.memory_space<vmem>>, %arg34: memref<1x512xf32, #tpu.memory_space<vmem>>, %arg35: memref<512x64xbf16, #tpu.memory_space<vmem>>, %arg36: memref<1x1xf32, #tpu.memory_space<vmem>>, %arg37: memref<3x512x8xbf16, #tpu.memory_space<vmem>>, %arg38: memref<1x8xf32, #tpu.memory_space<vmem>>, %arg39: memref<2x12x64xf32, #tpu.memory_space<vmem>>, %arg40: memref<2x1x8xf32, #tpu.memory_space<vmem>>) attributes {dimension_semantics = [#tpu.dimension_semantics<parallel>], iteration_bounds = array<i64: 2>, scalar_prefetch = 0 : i64, scratch_operands = 0 : i64, tpu.core_type = #tpu.core_type<tc>, window_params = [{transform_indices = @transform_0, window_bounds = array<i64: 24, 192>}, {transform_indices = @transform_1, window_bounds = array<i64: 2, 1, 4>}, {transform_indices = @transform_2, window_bounds = array<i64: 16, 32>}, {pipeline_mode = #tpu.pipeline_mode<synchronous>, transform_indices = @transform_3, window_bounds = array<i64: 192, 1024>}, {pipeline_mode = #tpu.pipeline_mode<synchronous>, transform_indices = @transform_4, window_bounds = array<i64: 1, 1024>}, {pipeline_mode = #tpu.pipeline_mode<synchronous>, transform_indices = @transform_5, window_bounds = array<i64: 1024, 16>}, {pipeline_mode = #tpu.pipeline_mode<synchronous>, transform_indices = @transform_6, window_bounds = array<i64: 1, 16>}, {pipeline_mode = #tpu.pipeline_mode<synchronous>, transform_indices = @transform_7, window_bounds = array<i64: 4, 16>}, {pipeline_mode = #tpu.pipeline_mode<synchronous>, transform_indices = @transform_8, window_bounds = array<i64: 1, 16>}, {pipeline_mode = #tpu.pipeline_mode<synchronous>, transform_indices = @transform_9, window_bounds = array<i64: 32, 32>}, {pipeline_mode = #tpu.pipeline_mode<synchronous>, transform_indices = @transform_10, window_bounds = array<i64: 1, 32>}, {pipeline_mode = #tpu.pipeline_mode<synchronous>, transform_indices = @transform_11, window_bounds = array<i64: 12, 32>}, {pipeline_mode = #tpu.pipeline_mode<synchronous>, transform_indices = @transform_12, window_bounds = array<i64: 32, 32>}, {pipeline_mode = #tpu.pipeline_mode<synchronous>, transform_indices = @transform_13, window_bounds = array<i64: 1, 32>}, {pipeline_mode = #tpu.pipeline_mode<synchronous>, transform_indices = @transform_14, window_bounds = array<i64: 2, 1, 32>}, {pipeline_mode = #tpu.pipeline_mode<synchronous>, transform_indices = @transform_15, window_bounds = array<i64: 2, 1, 32>}, {pipeline_mode = #tpu.pipeline_mode<synchronous>, transform_indices = @transform_16, window_bounds = array<i64: 2, 2, 32, 16>}, {pipeline_mode = #tpu.pipeline_mode<synchronous>, transform_indices = @transform_17, window_bounds = array<i64: 2, 2, 32, 16>}, {pipeline_mode = #tpu.pipeline_mode<synchronous>, transform_indices = @transform_18, window_bounds = array<i64: 2, 2, 32, 16>}, {pipeline_mode = #tpu.pipeline_mode<synchronous>, transform_indices = @transform_19, window_bounds = array<i64: 2, 2, 1, 16>}, {pipeline_mode = #tpu.pipeline_mode<synchronous>, transform_indices = @transform_20, window_bounds = array<i64: 2, 2, 1, 16>}, {pipeline_mode = #tpu.pipeline_mode<synchronous>, transform_indices = @transform_21, window_bounds = array<i64: 2, 2, 1, 16>}, {pipeline_mode = #tpu.pipeline_mode<synchronous>, transform_indices = @transform_22, window_bounds = array<i64: 2, 2, 16, 32>}, {pipeline_mode = #tpu.pipeline_mode<synchronous>, transform_indices = @transform_23, window_bounds = array<i64: 2, 1, 32>}, {pipeline_mode = #tpu.pipeline_mode<synchronous>, transform_indices = @transform_24, window_bounds = array<i64: 2, 1, 32>}, {pipeline_mode = #tpu.pipeline_mode<synchronous>, transform_indices = @transform_25, window_bounds = array<i64: 2, 1, 32>}, {pipeline_mode = #tpu.pipeline_mode<synchronous>, transform_indices = @transform_26, window_bounds = array<i64: 2, 32, 128>}, {pipeline_mode = #tpu.pipeline_mode<synchronous>, transform_indices = @transform_27, window_bounds = array<i64: 2, 1, 128>}, {pipeline_mode = #tpu.pipeline_mode<synchronous>, transform_indices = @transform_28, window_bounds = array<i64: 2, 128, 32>}, {pipeline_mode = #tpu.pipeline_mode<synchronous>, transform_indices = @transform_29, window_bounds = array<i64: 2, 1, 32>}, {pipeline_mode = #tpu.pipeline_mode<synchronous>, transform_indices = @transform_30, window_bounds = array<i64: 32, 32>}, {pipeline_mode = #tpu.pipeline_mode<synchronous>, transform_indices = @transform_31, window_bounds = array<i64: 1, 32>}, {pipeline_mode = #tpu.pipeline_mode<synchronous>, transform_indices = @transform_32, window_bounds = array<i64: 32, 512>}, {pipeline_mode = #tpu.pipeline_mode<synchronous>, transform_indices = @transform_33, window_bounds = array<i64: 1, 512>}, {pipeline_mode = #tpu.pipeline_mode<synchronous>, transform_indices = @transform_34, window_bounds = array<i64: 512, 64>}, {pipeline_mode = #tpu.pipeline_mode<synchronous>, transform_indices = @transform_35, window_bounds = array<i64: 1, 1>}, {pipeline_mode = #tpu.pipeline_mode<synchronous>, transform_indices = @transform_36, window_bounds = array<i64: 3, 512, 8>}, {pipeline_mode = #tpu.pipeline_mode<synchronous>, transform_indices = @transform_37, window_bounds = array<i64: 1, 8>}, {transform_indices = @transform_38, window_bounds = array<i64: 2, 12, 64>}, {transform_indices = @transform_39, window_bounds = array<i64: 2, 1, 8>}]} {
    %c0 = arith.constant 0 : index
    %c0_0 = arith.constant 0 : index
    %0 = vector.load %arg1[%c0, %c0_0] : memref<24x192xf32, #tpu.memory_space<vmem>>, vector<24x192xf32>
    %c0_1 = arith.constant 0 : index
    %c0_2 = arith.constant 0 : index
    %1 = vector.load %arg4[%c0_1, %c0_2] : memref<192x1024xbf16, #tpu.memory_space<vmem>>, vector<192x1024xbf16>
    %2 = arith.truncf %0 : vector<24x192xf32> to vector<24x192xbf16>
    %cst = arith.constant dense<0.000000e+00> : vector<24x1024xf32>
    %3 = tpu.matmul %2, %1, %cst {dimension_numbers = #tpu.dot_dimension_numbers<[1], [0], [0], [1], [0, 0, 1, 1], [], []>} : vector<24x192xbf16>, vector<192x1024xbf16>, vector<24x1024xf32> -> vector<24x1024xf32>
    %c0_3 = arith.constant 0 : index
    %c0_4 = arith.constant 0 : index
    %4 = vector.load %arg5[%c0_3, %c0_4] : memref<1x1024xf32, #tpu.memory_space<vmem>>, vector<1x1024xf32>
    %5 = vector.broadcast %4 : vector<1x1024xf32> to vector<24x1024xf32>
    %6 = arith.addf %3, %5 : vector<24x1024xf32>
    %cst_5 = arith.constant 0.000000e+00 : f32
    %7 = vector.broadcast %cst_5 : f32 to vector<24x1024xf32>
    %8 = arith.maximumf %6, %7 : vector<24x1024xf32>
    %c0_6 = arith.constant 0 : index
    %c0_7 = arith.constant 0 : index
    %9 = vector.load %arg6[%c0_6, %c0_7] : memref<1024x16xbf16, #tpu.memory_space<vmem>>, vector<1024x16xbf16>
    %10 = arith.truncf %8 : vector<24x1024xf32> to vector<24x1024xbf16>
    %cst_8 = arith.constant dense<0.000000e+00> : vector<24x16xf32>
    %11 = tpu.matmul %10, %9, %cst_8 {dimension_numbers = #tpu.dot_dimension_numbers<[1], [0], [0], [1], [0, 0, 1, 1], [], []>} : vector<24x1024xbf16>, vector<1024x16xbf16>, vector<24x16xf32> -> vector<24x16xf32>
    %c0_9 = arith.constant 0 : index
    %c0_10 = arith.constant 0 : index
    %12 = vector.load %arg7[%c0_9, %c0_10] : memref<1x16xf32, #tpu.memory_space<vmem>>, vector<1x16xf32>
    %13 = vector.broadcast %12 : vector<1x16xf32> to vector<24x16xf32>
    %14 = arith.addf %11, %13 : vector<24x16xf32>
    %cst_11 = arith.constant 0.000000e+00 : f32
    %15 = vector.broadcast %cst_11 : f32 to vector<24x16xf32>
    %16 = arith.maximumf %14, %15 : vector<24x16xf32>
    %c0_12 = arith.constant 0 : index
    %c0_13 = arith.constant 0 : index
    %c0_14 = arith.constant 0 : index
    %17 = vector.load %arg2[%c0_12, %c0_13, %c0_14] : memref<2x1x4xf32, #tpu.memory_space<vmem>>, vector<2x1x4xf32>
    %18 = vector.shape_cast %17 : vector<2x1x4xf32> to vector<2x4xf32>
    %c0_15 = arith.constant 0 : index
    %c0_16 = arith.constant 0 : index
    %19 = vector.load %arg8[%c0_15, %c0_16] : memref<4x16xbf16, #tpu.memory_space<vmem>>, vector<4x16xbf16>
    %20 = arith.truncf %18 : vector<2x4xf32> to vector<2x4xbf16>
    %cst_17 = arith.constant dense<0.000000e+00> : vector<2x16xf32>
    %21 = tpu.matmul %20, %19, %cst_17 {dimension_numbers = #tpu.dot_dimension_numbers<[1], [0], [0], [1], [0, 0, 1, 1], [], []>} : vector<2x4xbf16>, vector<4x16xbf16>, vector<2x16xf32> -> vector<2x16xf32>
    %c0_18 = arith.constant 0 : index
    %c0_19 = arith.constant 0 : index
    %22 = vector.load %arg9[%c0_18, %c0_19] : memref<1x16xf32, #tpu.memory_space<vmem>>, vector<1x16xf32>
    %23 = vector.broadcast %22 : vector<1x16xf32> to vector<2x16xf32>
    %24 = arith.addf %21, %23 : vector<2x16xf32>
    %cst_20 = arith.constant 0.000000e+00 : f32
    %25 = vector.broadcast %cst_20 : f32 to vector<2x16xf32>
    %26 = arith.maximumf %24, %25 : vector<2x16xf32>
    %c0_21 = arith.constant 0 : index
    %c0_22 = arith.constant 0 : index
    %27 = vector.load %arg3[%c0_21, %c0_22] : memref<16x32xf32, #tpu.memory_space<vmem>>, vector<16x32xf32>
    %c0_23 = arith.constant 0 : index
    %c0_24 = arith.constant 0 : index
    %28 = vector.load %arg10[%c0_23, %c0_24] : memref<32x32xbf16, #tpu.memory_space<vmem>>, vector<32x32xbf16>
    %29 = arith.truncf %27 : vector<16x32xf32> to vector<16x32xbf16>
    %cst_25 = arith.constant dense<0.000000e+00> : vector<16x32xf32>
    %30 = tpu.matmul %29, %28, %cst_25 {dimension_numbers = #tpu.dot_dimension_numbers<[1], [0], [0], [1], [0, 0, 1, 1], [], []>} : vector<16x32xbf16>, vector<32x32xbf16>, vector<16x32xf32> -> vector<16x32xf32>
    %c0_26 = arith.constant 0 : index
    %c0_27 = arith.constant 0 : index
    %31 = vector.load %arg11[%c0_26, %c0_27] : memref<1x32xf32, #tpu.memory_space<vmem>>, vector<1x32xf32>
    %32 = vector.broadcast %31 : vector<1x32xf32> to vector<16x32xf32>
    %33 = arith.addf %30, %32 : vector<16x32xf32>
    %cst_28 = arith.constant 0.000000e+00 : f32
    %34 = vector.broadcast %cst_28 : f32 to vector<16x32xf32>
    %35 = arith.maximumf %33, %34 : vector<16x32xf32>
    %c0_29 = arith.constant 0 : index
    %c0_30 = arith.constant 0 : index
    %36 = vector.load %arg12[%c0_29, %c0_30] : memref<12x32xf32, #tpu.memory_space<vmem>>, vector<12x32xf32>
    %cst_31 = arith.constant 0.000000e+00 : f32
    %37 = vector.broadcast %cst_31 : f32 to vector<4x32xf32>
    %38 = vector.extract_strided_slice %16 {offsets = [0, 0], sizes = [12, 16], strides = [1, 1]} : vector<24x16xf32> to vector<12x16xf32>
    %39 = vector.extract_strided_slice %26 {offsets = [0, 0], sizes = [1, 16], strides = [1, 1]} : vector<2x16xf32> to vector<1x16xf32>
    %40 = vector.shape_cast %39 : vector<1x16xf32> to vector<1x16xf32>
    %41 = vector.broadcast %40 : vector<1x16xf32> to vector<12x16xf32>
    %42 = tpu.concatenate %38, %41 in 1 : vector<12x16xf32>, vector<12x16xf32> -> vector<12x32xf32>
    %43 = arith.addf %42, %36 : vector<12x32xf32>
    %44 = vector.extract_strided_slice %35 {offsets = [0, 0], sizes = [8, 32], strides = [1, 1]} : vector<16x32xf32> to vector<8x32xf32>
    %45 = vector.extract_strided_slice %16 {offsets = [12, 0], sizes = [12, 16], strides = [1, 1]} : vector<24x16xf32> to vector<12x16xf32>
    %46 = vector.extract_strided_slice %26 {offsets = [1, 0], sizes = [1, 16], strides = [1, 1]} : vector<2x16xf32> to vector<1x16xf32>
    %47 = vector.shape_cast %46 : vector<1x16xf32> to vector<1x16xf32>
    %48 = vector.broadcast %47 : vector<1x16xf32> to vector<12x16xf32>
    %49 = tpu.concatenate %45, %48 in 1 : vector<12x16xf32>, vector<12x16xf32> -> vector<12x32xf32>
    %50 = arith.addf %49, %36 : vector<12x32xf32>
    %51 = vector.extract_strided_slice %35 {offsets = [8, 0], sizes = [8, 32], strides = [1, 1]} : vector<16x32xf32> to vector<8x32xf32>
    %52 = tpu.concatenate %44, %43, %37, %51, %50, %37 in 0 : vector<8x32xf32>, vector<12x32xf32>, vector<4x32xf32>, vector<8x32xf32>, vector<12x32xf32>, vector<4x32xf32> -> vector<48x32xf32>
    %c0_32 = arith.constant 0 : index
    %c0_33 = arith.constant 0 : index
    %53 = vector.load %arg13[%c0_32, %c0_33] : memref<32x32xbf16, #tpu.memory_space<vmem>>, vector<32x32xbf16>
    %54 = arith.truncf %52 : vector<48x32xf32> to vector<48x32xbf16>
    %cst_34 = arith.constant dense<0.000000e+00> : vector<48x32xf32>
    %55 = tpu.matmul %54, %53, %cst_34 {dimension_numbers = #tpu.dot_dimension_numbers<[1], [0], [0], [1], [0, 0, 1, 1], [], []>} : vector<48x32xbf16>, vector<32x32xbf16>, vector<48x32xf32> -> vector<48x32xf32>
    %c0_35 = arith.constant 0 : index
    %c0_36 = arith.constant 0 : index
    %56 = vector.load %arg14[%c0_35, %c0_36] : memref<1x32xf32, #tpu.memory_space<vmem>>, vector<1x32xf32>
    %57 = vector.broadcast %56 : vector<1x32xf32> to vector<48x32xf32>
    %58 = arith.addf %55, %57 : vector<48x32xf32>
    %59 = tpu.iota {dimensions = array<i32: 1>} : vector<1x24xi32>
    %c20_i32 = arith.constant 20 : i32
    %60 = vector.broadcast %c20_i32 : i32 to vector<1x24xi32>
    %61 = arith.cmpi slt, %59, %60 : vector<1x24xi32>
    %cst_37 = arith.constant 0.000000e+00 : f32
    %cst_38 = arith.constant -1.000000e+09 : f32
    %62 = vector.broadcast %cst_37 : f32 to vector<1x24xf32>
    %63 = vector.broadcast %cst_38 : f32 to vector<1x24xf32>
    %64 = arith.select %61, %62, %63 : vector<1x24xi1>, vector<1x24xf32>
    %c0_39 = arith.constant 0 : index
    %c0_40 = arith.constant 0 : index
    %c0_41 = arith.constant 0 : index
    %65 = vector.load %arg15[%c0_39, %c0_40, %c0_41] : memref<2x1x32xf32, #tpu.memory_space<vmem>>, vector<1x1x32xf32>
    %66 = vector.shape_cast %65 : vector<1x1x32xf32> to vector<1x32xf32>
    %c0_42 = arith.constant 0 : index
    %c0_43 = arith.constant 0 : index
    %c0_44 = arith.constant 0 : index
    %67 = vector.load %arg16[%c0_42, %c0_43, %c0_44] : memref<2x1x32xf32, #tpu.memory_space<vmem>>, vector<1x1x32xf32>
    %68 = vector.shape_cast %67 : vector<1x1x32xf32> to vector<1x32xf32>
    %cst_45 = arith.constant dense<0.000000e+00> : vector<48xf32>
    %69 = vector.multi_reduction <add>, %58, %cst_45 [1] : vector<48x32xf32> to vector<48xf32>
    %70 = vector.shape_cast %69 : vector<48xf32> to vector<48x1xf32>
    %cst_46 = arith.constant 3.200000e+01 : f32
    %71 = vector.broadcast %cst_46 : f32 to vector<48x1xf32>
    %72 = arith.divf %70, %71 : vector<48x1xf32>
    %73 = vector.broadcast %72 : vector<48x1xf32> to vector<48x32xf32>
    %74 = arith.subf %58, %73 : vector<48x32xf32>
    %75 = arith.mulf %74, %74 : vector<48x32xf32>
    %cst_47 = arith.constant dense<0.000000e+00> : vector<48xf32>
    %76 = vector.multi_reduction <add>, %75, %cst_47 [1] : vector<48x32xf32> to vector<48xf32>
    %77 = vector.shape_cast %76 : vector<48xf32> to vector<48x1xf32>
    %cst_48 = arith.constant 3.200000e+01 : f32
    %78 = vector.broadcast %cst_48 : f32 to vector<48x1xf32>
    %79 = arith.divf %77, %78 : vector<48x1xf32>
    %80 = vector.broadcast %72 : vector<48x1xf32> to vector<48x32xf32>
    %81 = arith.subf %58, %80 : vector<48x32xf32>
    %cst_49 = arith.constant 9.99999974E-6 : f32
    %82 = vector.broadcast %cst_49 : f32 to vector<48x1xf32>
    %83 = arith.addf %79, %82 : vector<48x1xf32>
    %84 = math.rsqrt %83 : vector<48x1xf32>
    %85 = vector.broadcast %84 : vector<48x1xf32> to vector<48x32xf32>
    %86 = arith.mulf %81, %85 : vector<48x32xf32>
    %87 = vector.broadcast %66 : vector<1x32xf32> to vector<48x32xf32>
    %88 = arith.mulf %86, %87 : vector<48x32xf32>
    %89 = vector.broadcast %68 : vector<1x32xf32> to vector<48x32xf32>
    %90 = arith.addf %88, %89 : vector<48x32xf32>
    %cst_50 = arith.constant 0.000000e+00 : f32
    %91 = vector.broadcast %cst_50 : f32 to vector<48x32xf32>
    %c0_51 = arith.constant 0 : index
    %c0_52 = arith.constant 0 : index
    %c0_53 = arith.constant 0 : index
    %c0_54 = arith.constant 0 : index
    %92 = vector.load %arg17[%c0_51, %c0_52, %c0_53, %c0_54] : memref<2x2x32x16xbf16, #tpu.memory_space<vmem>>, vector<1x1x32x16xbf16>
    %93 = vector.shape_cast %92 : vector<1x1x32x16xbf16> to vector<32x16xbf16>
    %94 = arith.truncf %90 : vector<48x32xf32> to vector<48x32xbf16>
    %cst_55 = arith.constant dense<0.000000e+00> : vector<48x16xf32>
    %95 = tpu.matmul %94, %93, %cst_55 {dimension_numbers = #tpu.dot_dimension_numbers<[1], [0], [0], [1], [0, 0, 1, 1], [], []>} : vector<48x32xbf16>, vector<32x16xbf16>, vector<48x16xf32> -> vector<48x16xf32>
    %c0_56 = arith.constant 0 : index
    %c0_57 = arith.constant 0 : index
    %c0_58 = arith.constant 0 : index
    %c0_59 = arith.constant 0 : index
    %96 = vector.load %arg20[%c0_56, %c0_57, %c0_58, %c0_59] : memref<2x2x1x16xf32, #tpu.memory_space<vmem>>, vector<1x1x1x16xf32>
    %97 = vector.shape_cast %96 : vector<1x1x1x16xf32> to vector<1x16xf32>
    %98 = vector.broadcast %97 : vector<1x16xf32> to vector<48x16xf32>
    %99 = arith.addf %95, %98 : vector<48x16xf32>
    %c0_60 = arith.constant 0 : index
    %c0_61 = arith.constant 0 : index
    %c0_62 = arith.constant 0 : index
    %c0_63 = arith.constant 0 : index
    %100 = vector.load %arg18[%c0_60, %c0_61, %c0_62, %c0_63] : memref<2x2x32x16xbf16, #tpu.memory_space<vmem>>, vector<1x1x32x16xbf16>
    %101 = vector.shape_cast %100 : vector<1x1x32x16xbf16> to vector<32x16xbf16>
    %102 = arith.truncf %90 : vector<48x32xf32> to vector<48x32xbf16>
    %cst_64 = arith.constant dense<0.000000e+00> : vector<48x16xf32>
    %103 = tpu.matmul %102, %101, %cst_64 {dimension_numbers = #tpu.dot_dimension_numbers<[1], [0], [0], [1], [0, 0, 1, 1], [], []>} : vector<48x32xbf16>, vector<32x16xbf16>, vector<48x16xf32> -> vector<48x16xf32>
    %c0_65 = arith.constant 0 : index
    %c0_66 = arith.constant 0 : index
    %c0_67 = arith.constant 0 : index
    %c0_68 = arith.constant 0 : index
    %104 = vector.load %arg21[%c0_65, %c0_66, %c0_67, %c0_68] : memref<2x2x1x16xf32, #tpu.memory_space<vmem>>, vector<1x1x1x16xf32>
    %105 = vector.shape_cast %104 : vector<1x1x1x16xf32> to vector<1x16xf32>
    %106 = vector.broadcast %105 : vector<1x16xf32> to vector<48x16xf32>
    %107 = arith.addf %103, %106 : vector<48x16xf32>
    %c0_69 = arith.constant 0 : index
    %c0_70 = arith.constant 0 : index
    %c0_71 = arith.constant 0 : index
    %c0_72 = arith.constant 0 : index
    %108 = vector.load %arg19[%c0_69, %c0_70, %c0_71, %c0_72] : memref<2x2x32x16xbf16, #tpu.memory_space<vmem>>, vector<1x1x32x16xbf16>
    %109 = vector.shape_cast %108 : vector<1x1x32x16xbf16> to vector<32x16xbf16>
    %110 = arith.truncf %90 : vector<48x32xf32> to vector<48x32xbf16>
    %cst_73 = arith.constant dense<0.000000e+00> : vector<48x16xf32>
    %111 = tpu.matmul %110, %109, %cst_73 {dimension_numbers = #tpu.dot_dimension_numbers<[1], [0], [0], [1], [0, 0, 1, 1], [], []>} : vector<48x32xbf16>, vector<32x16xbf16>, vector<48x16xf32> -> vector<48x16xf32>
    %c0_74 = arith.constant 0 : index
    %c0_75 = arith.constant 0 : index
    %c0_76 = arith.constant 0 : index
    %c0_77 = arith.constant 0 : index
    %112 = vector.load %arg22[%c0_74, %c0_75, %c0_76, %c0_77] : memref<2x2x1x16xf32, #tpu.memory_space<vmem>>, vector<1x1x1x16xf32>
    %113 = vector.shape_cast %112 : vector<1x1x1x16xf32> to vector<1x16xf32>
    %114 = vector.broadcast %113 : vector<1x16xf32> to vector<48x16xf32>
    %115 = arith.addf %111, %114 : vector<48x16xf32>
    %116 = vector.extract_strided_slice %99 {offsets = [0, 0], sizes = [24, 16], strides = [1, 1]} : vector<48x16xf32> to vector<24x16xf32>
    %117 = arith.truncf %116 : vector<24x16xf32> to vector<24x16xbf16>
    %118 = vector.extract_strided_slice %107 {offsets = [0, 0], sizes = [24, 16], strides = [1, 1]} : vector<48x16xf32> to vector<24x16xf32>
    %119 = arith.truncf %118 : vector<24x16xf32> to vector<24x16xbf16>
    %cst_78 = arith.constant dense<0.000000e+00> : vector<24x24xf32>
    %120 = tpu.matmul %117, %119, %cst_78 {dimension_numbers = #tpu.dot_dimension_numbers<[1], [1], [0], [0], [0, 0, 1, 0], [], []>} : vector<24x16xbf16>, vector<24x16xbf16>, vector<24x24xf32> -> vector<24x24xf32>
    %cst_79 = arith.constant 2.500000e-01 : f32
    %121 = vector.broadcast %cst_79 : f32 to vector<24x24xf32>
    %122 = arith.mulf %120, %121 : vector<24x24xf32>
    %123 = vector.broadcast %64 : vector<1x24xf32> to vector<24x24xf32>
    %124 = arith.addf %122, %123 : vector<24x24xf32>
    %cst_80 = arith.constant dense<0xFF800000> : vector<24xf32>
    %125 = vector.multi_reduction <maximumf>, %124, %cst_80 [1] : vector<24x24xf32> to vector<24xf32>
    %126 = vector.shape_cast %125 : vector<24xf32> to vector<24x1xf32>
    %127 = vector.broadcast %126 : vector<24x1xf32> to vector<24x24xf32>
    %128 = arith.subf %124, %127 : vector<24x24xf32>
    %129 = math.exp %128 : vector<24x24xf32>
    %cst_81 = arith.constant dense<0.000000e+00> : vector<24xf32>
    %130 = vector.multi_reduction <add>, %129, %cst_81 [1] : vector<24x24xf32> to vector<24xf32>
    %131 = vector.shape_cast %130 : vector<24xf32> to vector<24x1xf32>
    %132 = vector.broadcast %131 : vector<24x1xf32> to vector<24x24xf32>
    %133 = arith.divf %129, %132 : vector<24x24xf32>
    %134 = vector.extract_strided_slice %115 {offsets = [0, 0], sizes = [24, 16], strides = [1, 1]} : vector<48x16xf32> to vector<24x16xf32>
    %135 = arith.truncf %133 : vector<24x24xf32> to vector<24x24xbf16>
    %136 = arith.truncf %134 : vector<24x16xf32> to vector<24x16xbf16>
    %cst_82 = arith.constant dense<0.000000e+00> : vector<24x16xf32>
    %137 = tpu.matmul %135, %136, %cst_82 {dimension_numbers = #tpu.dot_dimension_numbers<[1], [0], [0], [1], [0, 0, 1, 1], [], []>} : vector<24x24xbf16>, vector<24x16xbf16>, vector<24x16xf32> -> vector<24x16xf32>
    %138 = vector.extract_strided_slice %99 {offsets = [24, 0], sizes = [24, 16], strides = [1, 1]} : vector<48x16xf32> to vector<24x16xf32>
    %139 = arith.truncf %138 : vector<24x16xf32> to vector<24x16xbf16>
    %140 = vector.extract_strided_slice %107 {offsets = [24, 0], sizes = [24, 16], strides = [1, 1]} : vector<48x16xf32> to vector<24x16xf32>
    %141 = arith.truncf %140 : vector<24x16xf32> to vector<24x16xbf16>
    %cst_83 = arith.constant dense<0.000000e+00> : vector<24x24xf32>
    %142 = tpu.matmul %139, %141, %cst_83 {dimension_numbers = #tpu.dot_dimension_numbers<[1], [1], [0], [0], [0, 0, 1, 0], [], []>} : vector<24x16xbf16>, vector<24x16xbf16>, vector<24x24xf32> -> vector<24x24xf32>
    %cst_84 = arith.constant 2.500000e-01 : f32
    %143 = vector.broadcast %cst_84 : f32 to vector<24x24xf32>
    %144 = arith.mulf %142, %143 : vector<24x24xf32>
    %145 = vector.broadcast %64 : vector<1x24xf32> to vector<24x24xf32>
    %146 = arith.addf %144, %145 : vector<24x24xf32>
    %cst_85 = arith.constant dense<0xFF800000> : vector<24xf32>
    %147 = vector.multi_reduction <maximumf>, %146, %cst_85 [1] : vector<24x24xf32> to vector<24xf32>
    %148 = vector.shape_cast %147 : vector<24xf32> to vector<24x1xf32>
    %149 = vector.broadcast %148 : vector<24x1xf32> to vector<24x24xf32>
    %150 = arith.subf %146, %149 : vector<24x24xf32>
    %151 = math.exp %150 : vector<24x24xf32>
    %cst_86 = arith.constant dense<0.000000e+00> : vector<24xf32>
    %152 = vector.multi_reduction <add>, %151, %cst_86 [1] : vector<24x24xf32> to vector<24xf32>
    %153 = vector.shape_cast %152 : vector<24xf32> to vector<24x1xf32>
    %154 = vector.broadcast %153 : vector<24x1xf32> to vector<24x24xf32>
    %155 = arith.divf %151, %154 : vector<24x24xf32>
    %156 = vector.extract_strided_slice %115 {offsets = [24, 0], sizes = [24, 16], strides = [1, 1]} : vector<48x16xf32> to vector<24x16xf32>
    %157 = arith.truncf %155 : vector<24x24xf32> to vector<24x24xbf16>
    %158 = arith.truncf %156 : vector<24x16xf32> to vector<24x16xbf16>
    %cst_87 = arith.constant dense<0.000000e+00> : vector<24x16xf32>
    %159 = tpu.matmul %157, %158, %cst_87 {dimension_numbers = #tpu.dot_dimension_numbers<[1], [0], [0], [1], [0, 0, 1, 1], [], []>} : vector<24x24xbf16>, vector<24x16xbf16>, vector<24x16xf32> -> vector<24x16xf32>
    %160 = tpu.concatenate %137, %159 in 0 : vector<24x16xf32>, vector<24x16xf32> -> vector<48x16xf32>
    %c0_88 = arith.constant 0 : index
    %c0_89 = arith.constant 0 : index
    %c0_90 = arith.constant 0 : index
    %c0_91 = arith.constant 0 : index
    %161 = vector.load %arg23[%c0_88, %c0_89, %c0_90, %c0_91] : memref<2x2x16x32xbf16, #tpu.memory_space<vmem>>, vector<1x1x16x32xbf16>
    %162 = vector.shape_cast %161 : vector<1x1x16x32xbf16> to vector<16x32xbf16>
    %163 = arith.truncf %160 : vector<48x16xf32> to vector<48x16xbf16>
    %cst_92 = arith.constant dense<0.000000e+00> : vector<48x32xf32>
    %164 = tpu.matmul %163, %162, %cst_92 {dimension_numbers = #tpu.dot_dimension_numbers<[1], [0], [0], [1], [0, 0, 1, 1], [], []>} : vector<48x16xbf16>, vector<16x32xbf16>, vector<48x32xf32> -> vector<48x32xf32>
    %165 = arith.addf %91, %164 : vector<48x32xf32>
    %c0_93 = arith.constant 0 : index
    %c1 = arith.constant 1 : index
    %c0_94 = arith.constant 0 : index
    %c0_95 = arith.constant 0 : index
    %166 = vector.load %arg17[%c0_93, %c1, %c0_94, %c0_95] : memref<2x2x32x16xbf16, #tpu.memory_space<vmem>>, vector<1x1x32x16xbf16>
    %167 = vector.shape_cast %166 : vector<1x1x32x16xbf16> to vector<32x16xbf16>
    %168 = arith.truncf %90 : vector<48x32xf32> to vector<48x32xbf16>
    %cst_96 = arith.constant dense<0.000000e+00> : vector<48x16xf32>
    %169 = tpu.matmul %168, %167, %cst_96 {dimension_numbers = #tpu.dot_dimension_numbers<[1], [0], [0], [1], [0, 0, 1, 1], [], []>} : vector<48x32xbf16>, vector<32x16xbf16>, vector<48x16xf32> -> vector<48x16xf32>
    %c0_97 = arith.constant 0 : index
    %c1_98 = arith.constant 1 : index
    %c0_99 = arith.constant 0 : index
    %c0_100 = arith.constant 0 : index
    %170 = vector.load %arg20[%c0_97, %c1_98, %c0_99, %c0_100] : memref<2x2x1x16xf32, #tpu.memory_space<vmem>>, vector<1x1x1x16xf32>
    %171 = vector.shape_cast %170 : vector<1x1x1x16xf32> to vector<1x16xf32>
    %172 = vector.broadcast %171 : vector<1x16xf32> to vector<48x16xf32>
    %173 = arith.addf %169, %172 : vector<48x16xf32>
    %c0_101 = arith.constant 0 : index
    %c1_102 = arith.constant 1 : index
    %c0_103 = arith.constant 0 : index
    %c0_104 = arith.constant 0 : index
    %174 = vector.load %arg18[%c0_101, %c1_102, %c0_103, %c0_104] : memref<2x2x32x16xbf16, #tpu.memory_space<vmem>>, vector<1x1x32x16xbf16>
    %175 = vector.shape_cast %174 : vector<1x1x32x16xbf16> to vector<32x16xbf16>
    %176 = arith.truncf %90 : vector<48x32xf32> to vector<48x32xbf16>
    %cst_105 = arith.constant dense<0.000000e+00> : vector<48x16xf32>
    %177 = tpu.matmul %176, %175, %cst_105 {dimension_numbers = #tpu.dot_dimension_numbers<[1], [0], [0], [1], [0, 0, 1, 1], [], []>} : vector<48x32xbf16>, vector<32x16xbf16>, vector<48x16xf32> -> vector<48x16xf32>
    %c0_106 = arith.constant 0 : index
    %c1_107 = arith.constant 1 : index
    %c0_108 = arith.constant 0 : index
    %c0_109 = arith.constant 0 : index
    %178 = vector.load %arg21[%c0_106, %c1_107, %c0_108, %c0_109] : memref<2x2x1x16xf32, #tpu.memory_space<vmem>>, vector<1x1x1x16xf32>
    %179 = vector.shape_cast %178 : vector<1x1x1x16xf32> to vector<1x16xf32>
    %180 = vector.broadcast %179 : vector<1x16xf32> to vector<48x16xf32>
    %181 = arith.addf %177, %180 : vector<48x16xf32>
    %c0_110 = arith.constant 0 : index
    %c1_111 = arith.constant 1 : index
    %c0_112 = arith.constant 0 : index
    %c0_113 = arith.constant 0 : index
    %182 = vector.load %arg19[%c0_110, %c1_111, %c0_112, %c0_113] : memref<2x2x32x16xbf16, #tpu.memory_space<vmem>>, vector<1x1x32x16xbf16>
    %183 = vector.shape_cast %182 : vector<1x1x32x16xbf16> to vector<32x16xbf16>
    %184 = arith.truncf %90 : vector<48x32xf32> to vector<48x32xbf16>
    %cst_114 = arith.constant dense<0.000000e+00> : vector<48x16xf32>
    %185 = tpu.matmul %184, %183, %cst_114 {dimension_numbers = #tpu.dot_dimension_numbers<[1], [0], [0], [1], [0, 0, 1, 1], [], []>} : vector<48x32xbf16>, vector<32x16xbf16>, vector<48x16xf32> -> vector<48x16xf32>
    %c0_115 = arith.constant 0 : index
    %c1_116 = arith.constant 1 : index
    %c0_117 = arith.constant 0 : index
    %c0_118 = arith.constant 0 : index
    %186 = vector.load %arg22[%c0_115, %c1_116, %c0_117, %c0_118] : memref<2x2x1x16xf32, #tpu.memory_space<vmem>>, vector<1x1x1x16xf32>
    %187 = vector.shape_cast %186 : vector<1x1x1x16xf32> to vector<1x16xf32>
    %188 = vector.broadcast %187 : vector<1x16xf32> to vector<48x16xf32>
    %189 = arith.addf %185, %188 : vector<48x16xf32>
    %190 = vector.extract_strided_slice %173 {offsets = [0, 0], sizes = [24, 16], strides = [1, 1]} : vector<48x16xf32> to vector<24x16xf32>
    %191 = arith.truncf %190 : vector<24x16xf32> to vector<24x16xbf16>
    %192 = vector.extract_strided_slice %181 {offsets = [0, 0], sizes = [24, 16], strides = [1, 1]} : vector<48x16xf32> to vector<24x16xf32>
    %193 = arith.truncf %192 : vector<24x16xf32> to vector<24x16xbf16>
    %cst_119 = arith.constant dense<0.000000e+00> : vector<24x24xf32>
    %194 = tpu.matmul %191, %193, %cst_119 {dimension_numbers = #tpu.dot_dimension_numbers<[1], [1], [0], [0], [0, 0, 1, 0], [], []>} : vector<24x16xbf16>, vector<24x16xbf16>, vector<24x24xf32> -> vector<24x24xf32>
    %cst_120 = arith.constant 2.500000e-01 : f32
    %195 = vector.broadcast %cst_120 : f32 to vector<24x24xf32>
    %196 = arith.mulf %194, %195 : vector<24x24xf32>
    %197 = vector.broadcast %64 : vector<1x24xf32> to vector<24x24xf32>
    %198 = arith.addf %196, %197 : vector<24x24xf32>
    %cst_121 = arith.constant dense<0xFF800000> : vector<24xf32>
    %199 = vector.multi_reduction <maximumf>, %198, %cst_121 [1] : vector<24x24xf32> to vector<24xf32>
    %200 = vector.shape_cast %199 : vector<24xf32> to vector<24x1xf32>
    %201 = vector.broadcast %200 : vector<24x1xf32> to vector<24x24xf32>
    %202 = arith.subf %198, %201 : vector<24x24xf32>
    %203 = math.exp %202 : vector<24x24xf32>
    %cst_122 = arith.constant dense<0.000000e+00> : vector<24xf32>
    %204 = vector.multi_reduction <add>, %203, %cst_122 [1] : vector<24x24xf32> to vector<24xf32>
    %205 = vector.shape_cast %204 : vector<24xf32> to vector<24x1xf32>
    %206 = vector.broadcast %205 : vector<24x1xf32> to vector<24x24xf32>
    %207 = arith.divf %203, %206 : vector<24x24xf32>
    %208 = vector.extract_strided_slice %189 {offsets = [0, 0], sizes = [24, 16], strides = [1, 1]} : vector<48x16xf32> to vector<24x16xf32>
    %209 = arith.truncf %207 : vector<24x24xf32> to vector<24x24xbf16>
    %210 = arith.truncf %208 : vector<24x16xf32> to vector<24x16xbf16>
    %cst_123 = arith.constant dense<0.000000e+00> : vector<24x16xf32>
    %211 = tpu.matmul %209, %210, %cst_123 {dimension_numbers = #tpu.dot_dimension_numbers<[1], [0], [0], [1], [0, 0, 1, 1], [], []>} : vector<24x24xbf16>, vector<24x16xbf16>, vector<24x16xf32> -> vector<24x16xf32>
    %212 = vector.extract_strided_slice %173 {offsets = [24, 0], sizes = [24, 16], strides = [1, 1]} : vector<48x16xf32> to vector<24x16xf32>
    %213 = arith.truncf %212 : vector<24x16xf32> to vector<24x16xbf16>
    %214 = vector.extract_strided_slice %181 {offsets = [24, 0], sizes = [24, 16], strides = [1, 1]} : vector<48x16xf32> to vector<24x16xf32>
    %215 = arith.truncf %214 : vector<24x16xf32> to vector<24x16xbf16>
    %cst_124 = arith.constant dense<0.000000e+00> : vector<24x24xf32>
    %216 = tpu.matmul %213, %215, %cst_124 {dimension_numbers = #tpu.dot_dimension_numbers<[1], [1], [0], [0], [0, 0, 1, 0], [], []>} : vector<24x16xbf16>, vector<24x16xbf16>, vector<24x24xf32> -> vector<24x24xf32>
    %cst_125 = arith.constant 2.500000e-01 : f32
    %217 = vector.broadcast %cst_125 : f32 to vector<24x24xf32>
    %218 = arith.mulf %216, %217 : vector<24x24xf32>
    %219 = vector.broadcast %64 : vector<1x24xf32> to vector<24x24xf32>
    %220 = arith.addf %218, %219 : vector<24x24xf32>
    %cst_126 = arith.constant dense<0xFF800000> : vector<24xf32>
    %221 = vector.multi_reduction <maximumf>, %220, %cst_126 [1] : vector<24x24xf32> to vector<24xf32>
    %222 = vector.shape_cast %221 : vector<24xf32> to vector<24x1xf32>
    %223 = vector.broadcast %222 : vector<24x1xf32> to vector<24x24xf32>
    %224 = arith.subf %220, %223 : vector<24x24xf32>
    %225 = math.exp %224 : vector<24x24xf32>
    %cst_127 = arith.constant dense<0.000000e+00> : vector<24xf32>
    %226 = vector.multi_reduction <add>, %225, %cst_127 [1] : vector<24x24xf32> to vector<24xf32>
    %227 = vector.shape_cast %226 : vector<24xf32> to vector<24x1xf32>
    %228 = vector.broadcast %227 : vector<24x1xf32> to vector<24x24xf32>
    %229 = arith.divf %225, %228 : vector<24x24xf32>
    %230 = vector.extract_strided_slice %189 {offsets = [24, 0], sizes = [24, 16], strides = [1, 1]} : vector<48x16xf32> to vector<24x16xf32>
    %231 = arith.truncf %229 : vector<24x24xf32> to vector<24x24xbf16>
    %232 = arith.truncf %230 : vector<24x16xf32> to vector<24x16xbf16>
    %cst_128 = arith.constant dense<0.000000e+00> : vector<24x16xf32>
    %233 = tpu.matmul %231, %232, %cst_128 {dimension_numbers = #tpu.dot_dimension_numbers<[1], [0], [0], [1], [0, 0, 1, 1], [], []>} : vector<24x24xbf16>, vector<24x16xbf16>, vector<24x16xf32> -> vector<24x16xf32>
    %234 = tpu.concatenate %211, %233 in 0 : vector<24x16xf32>, vector<24x16xf32> -> vector<48x16xf32>
    %c0_129 = arith.constant 0 : index
    %c1_130 = arith.constant 1 : index
    %c0_131 = arith.constant 0 : index
    %c0_132 = arith.constant 0 : index
    %235 = vector.load %arg23[%c0_129, %c1_130, %c0_131, %c0_132] : memref<2x2x16x32xbf16, #tpu.memory_space<vmem>>, vector<1x1x16x32xbf16>
    %236 = vector.shape_cast %235 : vector<1x1x16x32xbf16> to vector<16x32xbf16>
    %237 = arith.truncf %234 : vector<48x16xf32> to vector<48x16xbf16>
    %cst_133 = arith.constant dense<0.000000e+00> : vector<48x32xf32>
    %238 = tpu.matmul %237, %236, %cst_133 {dimension_numbers = #tpu.dot_dimension_numbers<[1], [0], [0], [1], [0, 0, 1, 1], [], []>} : vector<48x16xbf16>, vector<16x32xbf16>, vector<48x32xf32> -> vector<48x32xf32>
    %239 = arith.addf %165, %238 : vector<48x32xf32>
    %240 = arith.addf %58, %239 : vector<48x32xf32>
    %c0_134 = arith.constant 0 : index
    %c0_135 = arith.constant 0 : index
    %c0_136 = arith.constant 0 : index
    %241 = vector.load %arg24[%c0_134, %c0_135, %c0_136] : memref<2x1x32xf32, #tpu.memory_space<vmem>>, vector<1x1x32xf32>
    %242 = vector.shape_cast %241 : vector<1x1x32xf32> to vector<1x32xf32>
    %243 = vector.broadcast %242 : vector<1x32xf32> to vector<48x32xf32>
    %244 = arith.addf %240, %243 : vector<48x32xf32>
    %c0_137 = arith.constant 0 : index
    %c0_138 = arith.constant 0 : index
    %c0_139 = arith.constant 0 : index
    %245 = vector.load %arg25[%c0_137, %c0_138, %c0_139] : memref<2x1x32xf32, #tpu.memory_space<vmem>>, vector<1x1x32xf32>
    %246 = vector.shape_cast %245 : vector<1x1x32xf32> to vector<1x32xf32>
    %c0_140 = arith.constant 0 : index
    %c0_141 = arith.constant 0 : index
    %c0_142 = arith.constant 0 : index
    %247 = vector.load %arg26[%c0_140, %c0_141, %c0_142] : memref<2x1x32xf32, #tpu.memory_space<vmem>>, vector<1x1x32xf32>
    %248 = vector.shape_cast %247 : vector<1x1x32xf32> to vector<1x32xf32>
    %cst_143 = arith.constant dense<0.000000e+00> : vector<48xf32>
    %249 = vector.multi_reduction <add>, %244, %cst_143 [1] : vector<48x32xf32> to vector<48xf32>
    %250 = vector.shape_cast %249 : vector<48xf32> to vector<48x1xf32>
    %cst_144 = arith.constant 3.200000e+01 : f32
    %251 = vector.broadcast %cst_144 : f32 to vector<48x1xf32>
    %252 = arith.divf %250, %251 : vector<48x1xf32>
    %253 = vector.broadcast %252 : vector<48x1xf32> to vector<48x32xf32>
    %254 = arith.subf %244, %253 : vector<48x32xf32>
    %255 = arith.mulf %254, %254 : vector<48x32xf32>
    %cst_145 = arith.constant dense<0.000000e+00> : vector<48xf32>
    %256 = vector.multi_reduction <add>, %255, %cst_145 [1] : vector<48x32xf32> to vector<48xf32>
    %257 = vector.shape_cast %256 : vector<48xf32> to vector<48x1xf32>
    %cst_146 = arith.constant 3.200000e+01 : f32
    %258 = vector.broadcast %cst_146 : f32 to vector<48x1xf32>
    %259 = arith.divf %257, %258 : vector<48x1xf32>
    %260 = vector.broadcast %252 : vector<48x1xf32> to vector<48x32xf32>
    %261 = arith.subf %244, %260 : vector<48x32xf32>
    %cst_147 = arith.constant 9.99999974E-6 : f32
    %262 = vector.broadcast %cst_147 : f32 to vector<48x1xf32>
    %263 = arith.addf %259, %262 : vector<48x1xf32>
    %264 = math.rsqrt %263 : vector<48x1xf32>
    %265 = vector.broadcast %264 : vector<48x1xf32> to vector<48x32xf32>
    %266 = arith.mulf %261, %265 : vector<48x32xf32>
    %267 = vector.broadcast %246 : vector<1x32xf32> to vector<48x32xf32>
    %268 = arith.mulf %266, %267 : vector<48x32xf32>
    %269 = vector.broadcast %248 : vector<1x32xf32> to vector<48x32xf32>
    %270 = arith.addf %268, %269 : vector<48x32xf32>
    %c0_148 = arith.constant 0 : index
    %c0_149 = arith.constant 0 : index
    %c0_150 = arith.constant 0 : index
    %271 = vector.load %arg27[%c0_148, %c0_149, %c0_150] : memref<2x32x128xbf16, #tpu.memory_space<vmem>>, vector<1x32x128xbf16>
    %272 = vector.shape_cast %271 : vector<1x32x128xbf16> to vector<32x128xbf16>
    %273 = arith.truncf %270 : vector<48x32xf32> to vector<48x32xbf16>
    %cst_151 = arith.constant dense<0.000000e+00> : vector<48x128xf32>
    %274 = tpu.matmul %273, %272, %cst_151 {dimension_numbers = #tpu.dot_dimension_numbers<[1], [0], [0], [1], [0, 0, 1, 1], [], []>} : vector<48x32xbf16>, vector<32x128xbf16>, vector<48x128xf32> -> vector<48x128xf32>
    %c0_152 = arith.constant 0 : index
    %c0_153 = arith.constant 0 : index
    %c0_154 = arith.constant 0 : index
    %275 = vector.load %arg28[%c0_152, %c0_153, %c0_154] : memref<2x1x128xf32, #tpu.memory_space<vmem>>, vector<1x1x128xf32>
    %276 = vector.shape_cast %275 : vector<1x1x128xf32> to vector<1x128xf32>
    %277 = vector.broadcast %276 : vector<1x128xf32> to vector<48x128xf32>
    %278 = arith.addf %274, %277 : vector<48x128xf32>
    %cst_155 = arith.constant 0.000000e+00 : f32
    %279 = vector.broadcast %cst_155 : f32 to vector<48x128xf32>
    %280 = arith.maximumf %278, %279 : vector<48x128xf32>
    %c0_156 = arith.constant 0 : index
    %c0_157 = arith.constant 0 : index
    %c0_158 = arith.constant 0 : index
    %281 = vector.load %arg29[%c0_156, %c0_157, %c0_158] : memref<2x128x32xbf16, #tpu.memory_space<vmem>>, vector<1x128x32xbf16>
    %282 = vector.shape_cast %281 : vector<1x128x32xbf16> to vector<128x32xbf16>
    %283 = arith.truncf %280 : vector<48x128xf32> to vector<48x128xbf16>
    %cst_159 = arith.constant dense<0.000000e+00> : vector<48x32xf32>
    %284 = tpu.matmul %283, %282, %cst_159 {dimension_numbers = #tpu.dot_dimension_numbers<[1], [0], [0], [1], [0, 0, 1, 1], [], []>} : vector<48x128xbf16>, vector<128x32xbf16>, vector<48x32xf32> -> vector<48x32xf32>
    %285 = arith.addf %244, %284 : vector<48x32xf32>
    %c0_160 = arith.constant 0 : index
    %c0_161 = arith.constant 0 : index
    %c0_162 = arith.constant 0 : index
    %286 = vector.load %arg30[%c0_160, %c0_161, %c0_162] : memref<2x1x32xf32, #tpu.memory_space<vmem>>, vector<1x1x32xf32>
    %287 = vector.shape_cast %286 : vector<1x1x32xf32> to vector<1x32xf32>
    %288 = vector.broadcast %287 : vector<1x32xf32> to vector<48x32xf32>
    %289 = arith.addf %285, %288 : vector<48x32xf32>
    %c1_163 = arith.constant 1 : index
    %c0_164 = arith.constant 0 : index
    %c0_165 = arith.constant 0 : index
    %290 = vector.load %arg15[%c1_163, %c0_164, %c0_165] : memref<2x1x32xf32, #tpu.memory_space<vmem>>, vector<1x1x32xf32>
    %291 = vector.shape_cast %290 : vector<1x1x32xf32> to vector<1x32xf32>
    %c1_166 = arith.constant 1 : index
    %c0_167 = arith.constant 0 : index
    %c0_168 = arith.constant 0 : index
    %292 = vector.load %arg16[%c1_166, %c0_167, %c0_168] : memref<2x1x32xf32, #tpu.memory_space<vmem>>, vector<1x1x32xf32>
    %293 = vector.shape_cast %292 : vector<1x1x32xf32> to vector<1x32xf32>
    %cst_169 = arith.constant dense<0.000000e+00> : vector<48xf32>
    %294 = vector.multi_reduction <add>, %289, %cst_169 [1] : vector<48x32xf32> to vector<48xf32>
    %295 = vector.shape_cast %294 : vector<48xf32> to vector<48x1xf32>
    %cst_170 = arith.constant 3.200000e+01 : f32
    %296 = vector.broadcast %cst_170 : f32 to vector<48x1xf32>
    %297 = arith.divf %295, %296 : vector<48x1xf32>
    %298 = vector.broadcast %297 : vector<48x1xf32> to vector<48x32xf32>
    %299 = arith.subf %289, %298 : vector<48x32xf32>
    %300 = arith.mulf %299, %299 : vector<48x32xf32>
    %cst_171 = arith.constant dense<0.000000e+00> : vector<48xf32>
    %301 = vector.multi_reduction <add>, %300, %cst_171 [1] : vector<48x32xf32> to vector<48xf32>
    %302 = vector.shape_cast %301 : vector<48xf32> to vector<48x1xf32>
    %cst_172 = arith.constant 3.200000e+01 : f32
    %303 = vector.broadcast %cst_172 : f32 to vector<48x1xf32>
    %304 = arith.divf %302, %303 : vector<48x1xf32>
    %305 = vector.broadcast %297 : vector<48x1xf32> to vector<48x32xf32>
    %306 = arith.subf %289, %305 : vector<48x32xf32>
    %cst_173 = arith.constant 9.99999974E-6 : f32
    %307 = vector.broadcast %cst_173 : f32 to vector<48x1xf32>
    %308 = arith.addf %304, %307 : vector<48x1xf32>
    %309 = math.rsqrt %308 : vector<48x1xf32>
    %310 = vector.broadcast %309 : vector<48x1xf32> to vector<48x32xf32>
    %311 = arith.mulf %306, %310 : vector<48x32xf32>
    %312 = vector.broadcast %291 : vector<1x32xf32> to vector<48x32xf32>
    %313 = arith.mulf %311, %312 : vector<48x32xf32>
    %314 = vector.broadcast %293 : vector<1x32xf32> to vector<48x32xf32>
    %315 = arith.addf %313, %314 : vector<48x32xf32>
    %cst_174 = arith.constant 0.000000e+00 : f32
    %316 = vector.broadcast %cst_174 : f32 to vector<48x32xf32>
    %c1_175 = arith.constant 1 : index
    %c0_176 = arith.constant 0 : index
    %c0_177 = arith.constant 0 : index
    %c0_178 = arith.constant 0 : index
    %317 = vector.load %arg17[%c1_175, %c0_176, %c0_177, %c0_178] : memref<2x2x32x16xbf16, #tpu.memory_space<vmem>>, vector<1x1x32x16xbf16>
    %318 = vector.shape_cast %317 : vector<1x1x32x16xbf16> to vector<32x16xbf16>
    %319 = arith.truncf %315 : vector<48x32xf32> to vector<48x32xbf16>
    %cst_179 = arith.constant dense<0.000000e+00> : vector<48x16xf32>
    %320 = tpu.matmul %319, %318, %cst_179 {dimension_numbers = #tpu.dot_dimension_numbers<[1], [0], [0], [1], [0, 0, 1, 1], [], []>} : vector<48x32xbf16>, vector<32x16xbf16>, vector<48x16xf32> -> vector<48x16xf32>
    %c1_180 = arith.constant 1 : index
    %c0_181 = arith.constant 0 : index
    %c0_182 = arith.constant 0 : index
    %c0_183 = arith.constant 0 : index
    %321 = vector.load %arg20[%c1_180, %c0_181, %c0_182, %c0_183] : memref<2x2x1x16xf32, #tpu.memory_space<vmem>>, vector<1x1x1x16xf32>
    %322 = vector.shape_cast %321 : vector<1x1x1x16xf32> to vector<1x16xf32>
    %323 = vector.broadcast %322 : vector<1x16xf32> to vector<48x16xf32>
    %324 = arith.addf %320, %323 : vector<48x16xf32>
    %c1_184 = arith.constant 1 : index
    %c0_185 = arith.constant 0 : index
    %c0_186 = arith.constant 0 : index
    %c0_187 = arith.constant 0 : index
    %325 = vector.load %arg18[%c1_184, %c0_185, %c0_186, %c0_187] : memref<2x2x32x16xbf16, #tpu.memory_space<vmem>>, vector<1x1x32x16xbf16>
    %326 = vector.shape_cast %325 : vector<1x1x32x16xbf16> to vector<32x16xbf16>
    %327 = arith.truncf %315 : vector<48x32xf32> to vector<48x32xbf16>
    %cst_188 = arith.constant dense<0.000000e+00> : vector<48x16xf32>
    %328 = tpu.matmul %327, %326, %cst_188 {dimension_numbers = #tpu.dot_dimension_numbers<[1], [0], [0], [1], [0, 0, 1, 1], [], []>} : vector<48x32xbf16>, vector<32x16xbf16>, vector<48x16xf32> -> vector<48x16xf32>
    %c1_189 = arith.constant 1 : index
    %c0_190 = arith.constant 0 : index
    %c0_191 = arith.constant 0 : index
    %c0_192 = arith.constant 0 : index
    %329 = vector.load %arg21[%c1_189, %c0_190, %c0_191, %c0_192] : memref<2x2x1x16xf32, #tpu.memory_space<vmem>>, vector<1x1x1x16xf32>
    %330 = vector.shape_cast %329 : vector<1x1x1x16xf32> to vector<1x16xf32>
    %331 = vector.broadcast %330 : vector<1x16xf32> to vector<48x16xf32>
    %332 = arith.addf %328, %331 : vector<48x16xf32>
    %c1_193 = arith.constant 1 : index
    %c0_194 = arith.constant 0 : index
    %c0_195 = arith.constant 0 : index
    %c0_196 = arith.constant 0 : index
    %333 = vector.load %arg19[%c1_193, %c0_194, %c0_195, %c0_196] : memref<2x2x32x16xbf16, #tpu.memory_space<vmem>>, vector<1x1x32x16xbf16>
    %334 = vector.shape_cast %333 : vector<1x1x32x16xbf16> to vector<32x16xbf16>
    %335 = arith.truncf %315 : vector<48x32xf32> to vector<48x32xbf16>
    %cst_197 = arith.constant dense<0.000000e+00> : vector<48x16xf32>
    %336 = tpu.matmul %335, %334, %cst_197 {dimension_numbers = #tpu.dot_dimension_numbers<[1], [0], [0], [1], [0, 0, 1, 1], [], []>} : vector<48x32xbf16>, vector<32x16xbf16>, vector<48x16xf32> -> vector<48x16xf32>
    %c1_198 = arith.constant 1 : index
    %c0_199 = arith.constant 0 : index
    %c0_200 = arith.constant 0 : index
    %c0_201 = arith.constant 0 : index
    %337 = vector.load %arg22[%c1_198, %c0_199, %c0_200, %c0_201] : memref<2x2x1x16xf32, #tpu.memory_space<vmem>>, vector<1x1x1x16xf32>
    %338 = vector.shape_cast %337 : vector<1x1x1x16xf32> to vector<1x16xf32>
    %339 = vector.broadcast %338 : vector<1x16xf32> to vector<48x16xf32>
    %340 = arith.addf %336, %339 : vector<48x16xf32>
    %341 = vector.extract_strided_slice %324 {offsets = [0, 0], sizes = [24, 16], strides = [1, 1]} : vector<48x16xf32> to vector<24x16xf32>
    %342 = arith.truncf %341 : vector<24x16xf32> to vector<24x16xbf16>
    %343 = vector.extract_strided_slice %332 {offsets = [0, 0], sizes = [24, 16], strides = [1, 1]} : vector<48x16xf32> to vector<24x16xf32>
    %344 = arith.truncf %343 : vector<24x16xf32> to vector<24x16xbf16>
    %cst_202 = arith.constant dense<0.000000e+00> : vector<24x24xf32>
    %345 = tpu.matmul %342, %344, %cst_202 {dimension_numbers = #tpu.dot_dimension_numbers<[1], [1], [0], [0], [0, 0, 1, 0], [], []>} : vector<24x16xbf16>, vector<24x16xbf16>, vector<24x24xf32> -> vector<24x24xf32>
    %cst_203 = arith.constant 2.500000e-01 : f32
    %346 = vector.broadcast %cst_203 : f32 to vector<24x24xf32>
    %347 = arith.mulf %345, %346 : vector<24x24xf32>
    %348 = vector.broadcast %64 : vector<1x24xf32> to vector<24x24xf32>
    %349 = arith.addf %347, %348 : vector<24x24xf32>
    %cst_204 = arith.constant dense<0xFF800000> : vector<24xf32>
    %350 = vector.multi_reduction <maximumf>, %349, %cst_204 [1] : vector<24x24xf32> to vector<24xf32>
    %351 = vector.shape_cast %350 : vector<24xf32> to vector<24x1xf32>
    %352 = vector.broadcast %351 : vector<24x1xf32> to vector<24x24xf32>
    %353 = arith.subf %349, %352 : vector<24x24xf32>
    %354 = math.exp %353 : vector<24x24xf32>
    %cst_205 = arith.constant dense<0.000000e+00> : vector<24xf32>
    %355 = vector.multi_reduction <add>, %354, %cst_205 [1] : vector<24x24xf32> to vector<24xf32>
    %356 = vector.shape_cast %355 : vector<24xf32> to vector<24x1xf32>
    %357 = vector.broadcast %356 : vector<24x1xf32> to vector<24x24xf32>
    %358 = arith.divf %354, %357 : vector<24x24xf32>
    %359 = vector.extract_strided_slice %340 {offsets = [0, 0], sizes = [24, 16], strides = [1, 1]} : vector<48x16xf32> to vector<24x16xf32>
    %360 = arith.truncf %358 : vector<24x24xf32> to vector<24x24xbf16>
    %361 = arith.truncf %359 : vector<24x16xf32> to vector<24x16xbf16>
    %cst_206 = arith.constant dense<0.000000e+00> : vector<24x16xf32>
    %362 = tpu.matmul %360, %361, %cst_206 {dimension_numbers = #tpu.dot_dimension_numbers<[1], [0], [0], [1], [0, 0, 1, 1], [], []>} : vector<24x24xbf16>, vector<24x16xbf16>, vector<24x16xf32> -> vector<24x16xf32>
    %363 = vector.extract_strided_slice %324 {offsets = [24, 0], sizes = [24, 16], strides = [1, 1]} : vector<48x16xf32> to vector<24x16xf32>
    %364 = arith.truncf %363 : vector<24x16xf32> to vector<24x16xbf16>
    %365 = vector.extract_strided_slice %332 {offsets = [24, 0], sizes = [24, 16], strides = [1, 1]} : vector<48x16xf32> to vector<24x16xf32>
    %366 = arith.truncf %365 : vector<24x16xf32> to vector<24x16xbf16>
    %cst_207 = arith.constant dense<0.000000e+00> : vector<24x24xf32>
    %367 = tpu.matmul %364, %366, %cst_207 {dimension_numbers = #tpu.dot_dimension_numbers<[1], [1], [0], [0], [0, 0, 1, 0], [], []>} : vector<24x16xbf16>, vector<24x16xbf16>, vector<24x24xf32> -> vector<24x24xf32>
    %cst_208 = arith.constant 2.500000e-01 : f32
    %368 = vector.broadcast %cst_208 : f32 to vector<24x24xf32>
    %369 = arith.mulf %367, %368 : vector<24x24xf32>
    %370 = vector.broadcast %64 : vector<1x24xf32> to vector<24x24xf32>
    %371 = arith.addf %369, %370 : vector<24x24xf32>
    %cst_209 = arith.constant dense<0xFF800000> : vector<24xf32>
    %372 = vector.multi_reduction <maximumf>, %371, %cst_209 [1] : vector<24x24xf32> to vector<24xf32>
    %373 = vector.shape_cast %372 : vector<24xf32> to vector<24x1xf32>
    %374 = vector.broadcast %373 : vector<24x1xf32> to vector<24x24xf32>
    %375 = arith.subf %371, %374 : vector<24x24xf32>
    %376 = math.exp %375 : vector<24x24xf32>
    %cst_210 = arith.constant dense<0.000000e+00> : vector<24xf32>
    %377 = vector.multi_reduction <add>, %376, %cst_210 [1] : vector<24x24xf32> to vector<24xf32>
    %378 = vector.shape_cast %377 : vector<24xf32> to vector<24x1xf32>
    %379 = vector.broadcast %378 : vector<24x1xf32> to vector<24x24xf32>
    %380 = arith.divf %376, %379 : vector<24x24xf32>
    %381 = vector.extract_strided_slice %340 {offsets = [24, 0], sizes = [24, 16], strides = [1, 1]} : vector<48x16xf32> to vector<24x16xf32>
    %382 = arith.truncf %380 : vector<24x24xf32> to vector<24x24xbf16>
    %383 = arith.truncf %381 : vector<24x16xf32> to vector<24x16xbf16>
    %cst_211 = arith.constant dense<0.000000e+00> : vector<24x16xf32>
    %384 = tpu.matmul %382, %383, %cst_211 {dimension_numbers = #tpu.dot_dimension_numbers<[1], [0], [0], [1], [0, 0, 1, 1], [], []>} : vector<24x24xbf16>, vector<24x16xbf16>, vector<24x16xf32> -> vector<24x16xf32>
    %385 = tpu.concatenate %362, %384 in 0 : vector<24x16xf32>, vector<24x16xf32> -> vector<48x16xf32>
    %c1_212 = arith.constant 1 : index
    %c0_213 = arith.constant 0 : index
    %c0_214 = arith.constant 0 : index
    %c0_215 = arith.constant 0 : index
    %386 = vector.load %arg23[%c1_212, %c0_213, %c0_214, %c0_215] : memref<2x2x16x32xbf16, #tpu.memory_space<vmem>>, vector<1x1x16x32xbf16>
    %387 = vector.shape_cast %386 : vector<1x1x16x32xbf16> to vector<16x32xbf16>
    %388 = arith.truncf %385 : vector<48x16xf32> to vector<48x16xbf16>
    %cst_216 = arith.constant dense<0.000000e+00> : vector<48x32xf32>
    %389 = tpu.matmul %388, %387, %cst_216 {dimension_numbers = #tpu.dot_dimension_numbers<[1], [0], [0], [1], [0, 0, 1, 1], [], []>} : vector<48x16xbf16>, vector<16x32xbf16>, vector<48x32xf32> -> vector<48x32xf32>
    %390 = arith.addf %316, %389 : vector<48x32xf32>
    %c1_217 = arith.constant 1 : index
    %c1_218 = arith.constant 1 : index
    %c0_219 = arith.constant 0 : index
    %c0_220 = arith.constant 0 : index
    %391 = vector.load %arg17[%c1_217, %c1_218, %c0_219, %c0_220] : memref<2x2x32x16xbf16, #tpu.memory_space<vmem>>, vector<1x1x32x16xbf16>
    %392 = vector.shape_cast %391 : vector<1x1x32x16xbf16> to vector<32x16xbf16>
    %393 = arith.truncf %315 : vector<48x32xf32> to vector<48x32xbf16>
    %cst_221 = arith.constant dense<0.000000e+00> : vector<48x16xf32>
    %394 = tpu.matmul %393, %392, %cst_221 {dimension_numbers = #tpu.dot_dimension_numbers<[1], [0], [0], [1], [0, 0, 1, 1], [], []>} : vector<48x32xbf16>, vector<32x16xbf16>, vector<48x16xf32> -> vector<48x16xf32>
    %c1_222 = arith.constant 1 : index
    %c1_223 = arith.constant 1 : index
    %c0_224 = arith.constant 0 : index
    %c0_225 = arith.constant 0 : index
    %395 = vector.load %arg20[%c1_222, %c1_223, %c0_224, %c0_225] : memref<2x2x1x16xf32, #tpu.memory_space<vmem>>, vector<1x1x1x16xf32>
    %396 = vector.shape_cast %395 : vector<1x1x1x16xf32> to vector<1x16xf32>
    %397 = vector.broadcast %396 : vector<1x16xf32> to vector<48x16xf32>
    %398 = arith.addf %394, %397 : vector<48x16xf32>
    %c1_226 = arith.constant 1 : index
    %c1_227 = arith.constant 1 : index
    %c0_228 = arith.constant 0 : index
    %c0_229 = arith.constant 0 : index
    %399 = vector.load %arg18[%c1_226, %c1_227, %c0_228, %c0_229] : memref<2x2x32x16xbf16, #tpu.memory_space<vmem>>, vector<1x1x32x16xbf16>
    %400 = vector.shape_cast %399 : vector<1x1x32x16xbf16> to vector<32x16xbf16>
    %401 = arith.truncf %315 : vector<48x32xf32> to vector<48x32xbf16>
    %cst_230 = arith.constant dense<0.000000e+00> : vector<48x16xf32>
    %402 = tpu.matmul %401, %400, %cst_230 {dimension_numbers = #tpu.dot_dimension_numbers<[1], [0], [0], [1], [0, 0, 1, 1], [], []>} : vector<48x32xbf16>, vector<32x16xbf16>, vector<48x16xf32> -> vector<48x16xf32>
    %c1_231 = arith.constant 1 : index
    %c1_232 = arith.constant 1 : index
    %c0_233 = arith.constant 0 : index
    %c0_234 = arith.constant 0 : index
    %403 = vector.load %arg21[%c1_231, %c1_232, %c0_233, %c0_234] : memref<2x2x1x16xf32, #tpu.memory_space<vmem>>, vector<1x1x1x16xf32>
    %404 = vector.shape_cast %403 : vector<1x1x1x16xf32> to vector<1x16xf32>
    %405 = vector.broadcast %404 : vector<1x16xf32> to vector<48x16xf32>
    %406 = arith.addf %402, %405 : vector<48x16xf32>
    %c1_235 = arith.constant 1 : index
    %c1_236 = arith.constant 1 : index
    %c0_237 = arith.constant 0 : index
    %c0_238 = arith.constant 0 : index
    %407 = vector.load %arg19[%c1_235, %c1_236, %c0_237, %c0_238] : memref<2x2x32x16xbf16, #tpu.memory_space<vmem>>, vector<1x1x32x16xbf16>
    %408 = vector.shape_cast %407 : vector<1x1x32x16xbf16> to vector<32x16xbf16>
    %409 = arith.truncf %315 : vector<48x32xf32> to vector<48x32xbf16>
    %cst_239 = arith.constant dense<0.000000e+00> : vector<48x16xf32>
    %410 = tpu.matmul %409, %408, %cst_239 {dimension_numbers = #tpu.dot_dimension_numbers<[1], [0], [0], [1], [0, 0, 1, 1], [], []>} : vector<48x32xbf16>, vector<32x16xbf16>, vector<48x16xf32> -> vector<48x16xf32>
    %c1_240 = arith.constant 1 : index
    %c1_241 = arith.constant 1 : index
    %c0_242 = arith.constant 0 : index
    %c0_243 = arith.constant 0 : index
    %411 = vector.load %arg22[%c1_240, %c1_241, %c0_242, %c0_243] : memref<2x2x1x16xf32, #tpu.memory_space<vmem>>, vector<1x1x1x16xf32>
    %412 = vector.shape_cast %411 : vector<1x1x1x16xf32> to vector<1x16xf32>
    %413 = vector.broadcast %412 : vector<1x16xf32> to vector<48x16xf32>
    %414 = arith.addf %410, %413 : vector<48x16xf32>
    %415 = vector.extract_strided_slice %398 {offsets = [0, 0], sizes = [24, 16], strides = [1, 1]} : vector<48x16xf32> to vector<24x16xf32>
    %416 = arith.truncf %415 : vector<24x16xf32> to vector<24x16xbf16>
    %417 = vector.extract_strided_slice %406 {offsets = [0, 0], sizes = [24, 16], strides = [1, 1]} : vector<48x16xf32> to vector<24x16xf32>
    %418 = arith.truncf %417 : vector<24x16xf32> to vector<24x16xbf16>
    %cst_244 = arith.constant dense<0.000000e+00> : vector<24x24xf32>
    %419 = tpu.matmul %416, %418, %cst_244 {dimension_numbers = #tpu.dot_dimension_numbers<[1], [1], [0], [0], [0, 0, 1, 0], [], []>} : vector<24x16xbf16>, vector<24x16xbf16>, vector<24x24xf32> -> vector<24x24xf32>
    %cst_245 = arith.constant 2.500000e-01 : f32
    %420 = vector.broadcast %cst_245 : f32 to vector<24x24xf32>
    %421 = arith.mulf %419, %420 : vector<24x24xf32>
    %422 = vector.broadcast %64 : vector<1x24xf32> to vector<24x24xf32>
    %423 = arith.addf %421, %422 : vector<24x24xf32>
    %cst_246 = arith.constant dense<0xFF800000> : vector<24xf32>
    %424 = vector.multi_reduction <maximumf>, %423, %cst_246 [1] : vector<24x24xf32> to vector<24xf32>
    %425 = vector.shape_cast %424 : vector<24xf32> to vector<24x1xf32>
    %426 = vector.broadcast %425 : vector<24x1xf32> to vector<24x24xf32>
    %427 = arith.subf %423, %426 : vector<24x24xf32>
    %428 = math.exp %427 : vector<24x24xf32>
    %cst_247 = arith.constant dense<0.000000e+00> : vector<24xf32>
    %429 = vector.multi_reduction <add>, %428, %cst_247 [1] : vector<24x24xf32> to vector<24xf32>
    %430 = vector.shape_cast %429 : vector<24xf32> to vector<24x1xf32>
    %431 = vector.broadcast %430 : vector<24x1xf32> to vector<24x24xf32>
    %432 = arith.divf %428, %431 : vector<24x24xf32>
    %433 = vector.extract_strided_slice %414 {offsets = [0, 0], sizes = [24, 16], strides = [1, 1]} : vector<48x16xf32> to vector<24x16xf32>
    %434 = arith.truncf %432 : vector<24x24xf32> to vector<24x24xbf16>
    %435 = arith.truncf %433 : vector<24x16xf32> to vector<24x16xbf16>
    %cst_248 = arith.constant dense<0.000000e+00> : vector<24x16xf32>
    %436 = tpu.matmul %434, %435, %cst_248 {dimension_numbers = #tpu.dot_dimension_numbers<[1], [0], [0], [1], [0, 0, 1, 1], [], []>} : vector<24x24xbf16>, vector<24x16xbf16>, vector<24x16xf32> -> vector<24x16xf32>
    %437 = vector.extract_strided_slice %398 {offsets = [24, 0], sizes = [24, 16], strides = [1, 1]} : vector<48x16xf32> to vector<24x16xf32>
    %438 = arith.truncf %437 : vector<24x16xf32> to vector<24x16xbf16>
    %439 = vector.extract_strided_slice %406 {offsets = [24, 0], sizes = [24, 16], strides = [1, 1]} : vector<48x16xf32> to vector<24x16xf32>
    %440 = arith.truncf %439 : vector<24x16xf32> to vector<24x16xbf16>
    %cst_249 = arith.constant dense<0.000000e+00> : vector<24x24xf32>
    %441 = tpu.matmul %438, %440, %cst_249 {dimension_numbers = #tpu.dot_dimension_numbers<[1], [1], [0], [0], [0, 0, 1, 0], [], []>} : vector<24x16xbf16>, vector<24x16xbf16>, vector<24x24xf32> -> vector<24x24xf32>
    %cst_250 = arith.constant 2.500000e-01 : f32
    %442 = vector.broadcast %cst_250 : f32 to vector<24x24xf32>
    %443 = arith.mulf %441, %442 : vector<24x24xf32>
    %444 = vector.broadcast %64 : vector<1x24xf32> to vector<24x24xf32>
    %445 = arith.addf %443, %444 : vector<24x24xf32>
    %cst_251 = arith.constant dense<0xFF800000> : vector<24xf32>
    %446 = vector.multi_reduction <maximumf>, %445, %cst_251 [1] : vector<24x24xf32> to vector<24xf32>
    %447 = vector.shape_cast %446 : vector<24xf32> to vector<24x1xf32>
    %448 = vector.broadcast %447 : vector<24x1xf32> to vector<24x24xf32>
    %449 = arith.subf %445, %448 : vector<24x24xf32>
    %450 = math.exp %449 : vector<24x24xf32>
    %cst_252 = arith.constant dense<0.000000e+00> : vector<24xf32>
    %451 = vector.multi_reduction <add>, %450, %cst_252 [1] : vector<24x24xf32> to vector<24xf32>
    %452 = vector.shape_cast %451 : vector<24xf32> to vector<24x1xf32>
    %453 = vector.broadcast %452 : vector<24x1xf32> to vector<24x24xf32>
    %454 = arith.divf %450, %453 : vector<24x24xf32>
    %455 = vector.extract_strided_slice %414 {offsets = [24, 0], sizes = [24, 16], strides = [1, 1]} : vector<48x16xf32> to vector<24x16xf32>
    %456 = arith.truncf %454 : vector<24x24xf32> to vector<24x24xbf16>
    %457 = arith.truncf %455 : vector<24x16xf32> to vector<24x16xbf16>
    %cst_253 = arith.constant dense<0.000000e+00> : vector<24x16xf32>
    %458 = tpu.matmul %456, %457, %cst_253 {dimension_numbers = #tpu.dot_dimension_numbers<[1], [0], [0], [1], [0, 0, 1, 1], [], []>} : vector<24x24xbf16>, vector<24x16xbf16>, vector<24x16xf32> -> vector<24x16xf32>
    %459 = tpu.concatenate %436, %458 in 0 : vector<24x16xf32>, vector<24x16xf32> -> vector<48x16xf32>
    %c1_254 = arith.constant 1 : index
    %c1_255 = arith.constant 1 : index
    %c0_256 = arith.constant 0 : index
    %c0_257 = arith.constant 0 : index
    %460 = vector.load %arg23[%c1_254, %c1_255, %c0_256, %c0_257] : memref<2x2x16x32xbf16, #tpu.memory_space<vmem>>, vector<1x1x16x32xbf16>
    %461 = vector.shape_cast %460 : vector<1x1x16x32xbf16> to vector<16x32xbf16>
    %462 = arith.truncf %459 : vector<48x16xf32> to vector<48x16xbf16>
    %cst_258 = arith.constant dense<0.000000e+00> : vector<48x32xf32>
    %463 = tpu.matmul %462, %461, %cst_258 {dimension_numbers = #tpu.dot_dimension_numbers<[1], [0], [0], [1], [0, 0, 1, 1], [], []>} : vector<48x16xbf16>, vector<16x32xbf16>, vector<48x32xf32> -> vector<48x32xf32>
    %464 = arith.addf %390, %463 : vector<48x32xf32>
    %465 = arith.addf %289, %464 : vector<48x32xf32>
    %c1_259 = arith.constant 1 : index
    %c0_260 = arith.constant 0 : index
    %c0_261 = arith.constant 0 : index
    %466 = vector.load %arg24[%c1_259, %c0_260, %c0_261] : memref<2x1x32xf32, #tpu.memory_space<vmem>>, vector<1x1x32xf32>
    %467 = vector.shape_cast %466 : vector<1x1x32xf32> to vector<1x32xf32>
    %468 = vector.broadcast %467 : vector<1x32xf32> to vector<48x32xf32>
    %469 = arith.addf %465, %468 : vector<48x32xf32>
    %c1_262 = arith.constant 1 : index
    %c0_263 = arith.constant 0 : index
    %c0_264 = arith.constant 0 : index
    %470 = vector.load %arg25[%c1_262, %c0_263, %c0_264] : memref<2x1x32xf32, #tpu.memory_space<vmem>>, vector<1x1x32xf32>
    %471 = vector.shape_cast %470 : vector<1x1x32xf32> to vector<1x32xf32>
    %c1_265 = arith.constant 1 : index
    %c0_266 = arith.constant 0 : index
    %c0_267 = arith.constant 0 : index
    %472 = vector.load %arg26[%c1_265, %c0_266, %c0_267] : memref<2x1x32xf32, #tpu.memory_space<vmem>>, vector<1x1x32xf32>
    %473 = vector.shape_cast %472 : vector<1x1x32xf32> to vector<1x32xf32>
    %cst_268 = arith.constant dense<0.000000e+00> : vector<48xf32>
    %474 = vector.multi_reduction <add>, %469, %cst_268 [1] : vector<48x32xf32> to vector<48xf32>
    %475 = vector.shape_cast %474 : vector<48xf32> to vector<48x1xf32>
    %cst_269 = arith.constant 3.200000e+01 : f32
    %476 = vector.broadcast %cst_269 : f32 to vector<48x1xf32>
    %477 = arith.divf %475, %476 : vector<48x1xf32>
    %478 = vector.broadcast %477 : vector<48x1xf32> to vector<48x32xf32>
    %479 = arith.subf %469, %478 : vector<48x32xf32>
    %480 = arith.mulf %479, %479 : vector<48x32xf32>
    %cst_270 = arith.constant dense<0.000000e+00> : vector<48xf32>
    %481 = vector.multi_reduction <add>, %480, %cst_270 [1] : vector<48x32xf32> to vector<48xf32>
    %482 = vector.shape_cast %481 : vector<48xf32> to vector<48x1xf32>
    %cst_271 = arith.constant 3.200000e+01 : f32
    %483 = vector.broadcast %cst_271 : f32 to vector<48x1xf32>
    %484 = arith.divf %482, %483 : vector<48x1xf32>
    %485 = vector.broadcast %477 : vector<48x1xf32> to vector<48x32xf32>
    %486 = arith.subf %469, %485 : vector<48x32xf32>
    %cst_272 = arith.constant 9.99999974E-6 : f32
    %487 = vector.broadcast %cst_272 : f32 to vector<48x1xf32>
    %488 = arith.addf %484, %487 : vector<48x1xf32>
    %489 = math.rsqrt %488 : vector<48x1xf32>
    %490 = vector.broadcast %489 : vector<48x1xf32> to vector<48x32xf32>
    %491 = arith.mulf %486, %490 : vector<48x32xf32>
    %492 = vector.broadcast %471 : vector<1x32xf32> to vector<48x32xf32>
    %493 = arith.mulf %491, %492 : vector<48x32xf32>
    %494 = vector.broadcast %473 : vector<1x32xf32> to vector<48x32xf32>
    %495 = arith.addf %493, %494 : vector<48x32xf32>
    %c1_273 = arith.constant 1 : index
    %c0_274 = arith.constant 0 : index
    %c0_275 = arith.constant 0 : index
    %496 = vector.load %arg27[%c1_273, %c0_274, %c0_275] : memref<2x32x128xbf16, #tpu.memory_space<vmem>>, vector<1x32x128xbf16>
    %497 = vector.shape_cast %496 : vector<1x32x128xbf16> to vector<32x128xbf16>
    %498 = arith.truncf %495 : vector<48x32xf32> to vector<48x32xbf16>
    %cst_276 = arith.constant dense<0.000000e+00> : vector<48x128xf32>
    %499 = tpu.matmul %498, %497, %cst_276 {dimension_numbers = #tpu.dot_dimension_numbers<[1], [0], [0], [1], [0, 0, 1, 1], [], []>} : vector<48x32xbf16>, vector<32x128xbf16>, vector<48x128xf32> -> vector<48x128xf32>
    %c1_277 = arith.constant 1 : index
    %c0_278 = arith.constant 0 : index
    %c0_279 = arith.constant 0 : index
    %500 = vector.load %arg28[%c1_277, %c0_278, %c0_279] : memref<2x1x128xf32, #tpu.memory_space<vmem>>, vector<1x1x128xf32>
    %501 = vector.shape_cast %500 : vector<1x1x128xf32> to vector<1x128xf32>
    %502 = vector.broadcast %501 : vector<1x128xf32> to vector<48x128xf32>
    %503 = arith.addf %499, %502 : vector<48x128xf32>
    %cst_280 = arith.constant 0.000000e+00 : f32
    %504 = vector.broadcast %cst_280 : f32 to vector<48x128xf32>
    %505 = arith.maximumf %503, %504 : vector<48x128xf32>
    %c1_281 = arith.constant 1 : index
    %c0_282 = arith.constant 0 : index
    %c0_283 = arith.constant 0 : index
    %506 = vector.load %arg29[%c1_281, %c0_282, %c0_283] : memref<2x128x32xbf16, #tpu.memory_space<vmem>>, vector<1x128x32xbf16>
    %507 = vector.shape_cast %506 : vector<1x128x32xbf16> to vector<128x32xbf16>
    %508 = arith.truncf %505 : vector<48x128xf32> to vector<48x128xbf16>
    %cst_284 = arith.constant dense<0.000000e+00> : vector<48x32xf32>
    %509 = tpu.matmul %508, %507, %cst_284 {dimension_numbers = #tpu.dot_dimension_numbers<[1], [0], [0], [1], [0, 0, 1, 1], [], []>} : vector<48x128xbf16>, vector<128x32xbf16>, vector<48x32xf32> -> vector<48x32xf32>
    %510 = arith.addf %469, %509 : vector<48x32xf32>
    %c1_285 = arith.constant 1 : index
    %c0_286 = arith.constant 0 : index
    %c0_287 = arith.constant 0 : index
    %511 = vector.load %arg30[%c1_285, %c0_286, %c0_287] : memref<2x1x32xf32, #tpu.memory_space<vmem>>, vector<1x1x32xf32>
    %512 = vector.shape_cast %511 : vector<1x1x32xf32> to vector<1x32xf32>
    %513 = vector.broadcast %512 : vector<1x32xf32> to vector<48x32xf32>
    %514 = arith.addf %510, %513 : vector<48x32xf32>
    %c0_288 = arith.constant 0 : index
    %c0_289 = arith.constant 0 : index
    %515 = vector.load %arg31[%c0_288, %c0_289] : memref<32x32xbf16, #tpu.memory_space<vmem>>, vector<32x32xbf16>
    %516 = arith.truncf %514 : vector<48x32xf32> to vector<48x32xbf16>
    %cst_290 = arith.constant dense<0.000000e+00> : vector<48x32xf32>
    %517 = tpu.matmul %516, %515, %cst_290 {dimension_numbers = #tpu.dot_dimension_numbers<[1], [0], [0], [1], [0, 0, 1, 1], [], []>} : vector<48x32xbf16>, vector<32x32xbf16>, vector<48x32xf32> -> vector<48x32xf32>
    %c0_291 = arith.constant 0 : index
    %c0_292 = arith.constant 0 : index
    %518 = vector.load %arg32[%c0_291, %c0_292] : memref<1x32xf32, #tpu.memory_space<vmem>>, vector<1x32xf32>
    %519 = vector.broadcast %518 : vector<1x32xf32> to vector<48x32xf32>
    %520 = arith.addf %517, %519 : vector<48x32xf32>
    %c0_293 = arith.constant 0 : index
    %c0_294 = arith.constant 0 : index
    %521 = vector.load %arg33[%c0_293, %c0_294] : memref<32x512xbf16, #tpu.memory_space<vmem>>, vector<32x512xbf16>
    %522 = arith.truncf %520 : vector<48x32xf32> to vector<48x32xbf16>
    %cst_295 = arith.constant dense<0.000000e+00> : vector<48x512xf32>
    %523 = tpu.matmul %522, %521, %cst_295 {dimension_numbers = #tpu.dot_dimension_numbers<[1], [0], [0], [1], [0, 0, 1, 1], [], []>} : vector<48x32xbf16>, vector<32x512xbf16>, vector<48x512xf32> -> vector<48x512xf32>
    %c0_296 = arith.constant 0 : index
    %c0_297 = arith.constant 0 : index
    %524 = vector.load %arg34[%c0_296, %c0_297] : memref<1x512xf32, #tpu.memory_space<vmem>>, vector<1x512xf32>
    %525 = vector.broadcast %524 : vector<1x512xf32> to vector<48x512xf32>
    %526 = arith.addf %523, %525 : vector<48x512xf32>
    %cst_298 = arith.constant 0.000000e+00 : f32
    %527 = vector.broadcast %cst_298 : f32 to vector<48x512xf32>
    %528 = arith.maximumf %526, %527 : vector<48x512xf32>
    %c0_299 = arith.constant 0 : index
    %c0_300 = arith.constant 0 : index
    %529 = vector.load %arg35[%c0_299, %c0_300] : memref<512x64xbf16, #tpu.memory_space<vmem>>, vector<512x64xbf16>
    %530 = arith.truncf %528 : vector<48x512xf32> to vector<48x512xbf16>
    %cst_301 = arith.constant dense<0.000000e+00> : vector<48x64xf32>
    %531 = tpu.matmul %530, %529, %cst_301 {dimension_numbers = #tpu.dot_dimension_numbers<[1], [0], [0], [1], [0, 0, 1, 1], [], []>} : vector<48x512xbf16>, vector<512x64xbf16>, vector<48x64xf32> -> vector<48x64xf32>
    %c0_302 = arith.constant 0 : index
    %c0_303 = arith.constant 0 : index
    %532 = vector.load %arg36[%c0_302, %c0_303] : memref<1x1xf32, #tpu.memory_space<vmem>>, vector<1x1xf32>
    %533 = vector.broadcast %532 : vector<1x1xf32> to vector<48x64xf32>
    %534 = arith.addf %531, %533 : vector<48x64xf32>
    %c0_304 = arith.constant 0 : index
    %c0_305 = arith.constant 0 : index
    %535 = vector.load %arg38[%c0_304, %c0_305] : memref<1x8xf32, #tpu.memory_space<vmem>>, vector<1x8xf32>
    %536 = vector.extract_strided_slice %534 {offsets = [8, 0], sizes = [12, 64], strides = [1, 1]} : vector<48x64xf32> to vector<12x64xf32>
    %c0_306 = arith.constant 0 : index
    %c0_307 = arith.constant 0 : index
    %c0_308 = arith.constant 0 : index
    %537 = vector.load %arg39[%c0_306, %c0_307, %c0_308] : memref<2x12x64xf32, #tpu.memory_space<vmem>>, vector<1x12x64xf32>
    %538 = vector.shape_cast %537 : vector<1x12x64xf32> to vector<12x64xf32>
    %539 = vector.shape_cast %536 : vector<12x64xf32> to vector<1x12x64xf32>
    tpu.vector_store %arg39[%c0_306, %c0_307, %c0_308], %539 {strides = array<i32>} : memref<2x12x64xf32, #tpu.memory_space<vmem>>, vector<1x12x64xf32>,
    %cst_309 = arith.constant 0.000000e+00 : f32
    %540 = vector.broadcast %cst_309 : f32 to vector<1x8xf32>
    %541 = vector.extract_strided_slice %534 {offsets = [8, 0], sizes = [4, 64], strides = [1, 1]} : vector<48x64xf32> to vector<4x64xf32>
    %542 = vector.extract_strided_slice %528 {offsets = [8, 0], sizes = [4, 512], strides = [1, 1]} : vector<48x512xf32> to vector<4x512xf32>
    %cst_310 = arith.constant dense<0xFF800000> : vector<4xf32>
    %543 = vector.multi_reduction <maximumf>, %541, %cst_310 [1] : vector<4x64xf32> to vector<4xf32>
    %544 = vector.shape_cast %543 : vector<4xf32> to vector<4x1xf32>
    %cst_311 = arith.constant dense<0xFF800000> : vector<1xf32>
    %545 = vector.multi_reduction <maximumf>, %544, %cst_311 [0] : vector<4x1xf32> to vector<1xf32>
    %546 = vector.shape_cast %545 : vector<1xf32> to vector<1x1xf32>
    %547 = vector.broadcast %546 : vector<1x1xf32> to vector<4x64xf32>
    %548 = arith.subf %541, %547 : vector<4x64xf32>
    %549 = math.exp %548 : vector<4x64xf32>
    %cst_312 = arith.constant dense<0.000000e+00> : vector<4xf32>
    %550 = vector.multi_reduction <add>, %549, %cst_312 [1] : vector<4x64xf32> to vector<4xf32>
    %551 = vector.shape_cast %550 : vector<4xf32> to vector<4x1xf32>
    %cst_313 = arith.constant dense<0.000000e+00> : vector<1xf32>
    %552 = vector.multi_reduction <add>, %551, %cst_313 [0] : vector<4x1xf32> to vector<1xf32>
    %553 = vector.shape_cast %552 : vector<1xf32> to vector<1x1xf32>
    %554 = vector.broadcast %553 : vector<1x1xf32> to vector<4x64xf32>
    %555 = arith.divf %549, %554 : vector<4x64xf32>
    %556 = tpu.concatenate %555, %555, %555, %555, %555, %555, %555, %555 in 1 : vector<4x64xf32>, vector<4x64xf32>, vector<4x64xf32>, vector<4x64xf32>, vector<4x64xf32>, vector<4x64xf32>, vector<4x64xf32>, vector<4x64xf32> -> vector<4x512xf32>
    %557 = arith.mulf %556, %542 : vector<4x512xf32>
    %cst_314 = arith.constant dense<0.000000e+00> : vector<512xf32>
    %558 = vector.multi_reduction <add>, %557, %cst_314 [0] : vector<4x512xf32> to vector<512xf32>
    %559 = vector.shape_cast %558 : vector<512xf32> to vector<1x512xf32>
    %c0_315 = arith.constant 0 : index
    %c0_316 = arith.constant 0 : index
    %c0_317 = arith.constant 0 : index
    %560 = vector.load %arg37[%c0_315, %c0_316, %c0_317] : memref<3x512x8xbf16, #tpu.memory_space<vmem>>, vector<1x512x8xbf16>
    %561 = vector.shape_cast %560 : vector<1x512x8xbf16> to vector<512x8xbf16>
    %562 = arith.truncf %559 : vector<1x512xf32> to vector<1x512xbf16>
    %cst_318 = arith.constant dense<0.000000e+00> : vector<1x8xf32>
    %563 = tpu.matmul %562, %561, %cst_318 {dimension_numbers = #tpu.dot_dimension_numbers<[1], [0], [0], [1], [0, 0, 1, 1], [], []>} : vector<1x512xbf16>, vector<512x8xbf16>, vector<1x8xf32> -> vector<1x8xf32>
    %564 = arith.addf %540, %563 : vector<1x8xf32>
    %565 = vector.extract_strided_slice %534 {offsets = [12, 0], sizes = [4, 64], strides = [1, 1]} : vector<48x64xf32> to vector<4x64xf32>
    %566 = vector.extract_strided_slice %528 {offsets = [12, 0], sizes = [4, 512], strides = [1, 1]} : vector<48x512xf32> to vector<4x512xf32>
    %cst_319 = arith.constant dense<0xFF800000> : vector<4xf32>
    %567 = vector.multi_reduction <maximumf>, %565, %cst_319 [1] : vector<4x64xf32> to vector<4xf32>
    %568 = vector.shape_cast %567 : vector<4xf32> to vector<4x1xf32>
    %cst_320 = arith.constant dense<0xFF800000> : vector<1xf32>
    %569 = vector.multi_reduction <maximumf>, %568, %cst_320 [0] : vector<4x1xf32> to vector<1xf32>
    %570 = vector.shape_cast %569 : vector<1xf32> to vector<1x1xf32>
    %571 = vector.broadcast %570 : vector<1x1xf32> to vector<4x64xf32>
    %572 = arith.subf %565, %571 : vector<4x64xf32>
    %573 = math.exp %572 : vector<4x64xf32>
    %cst_321 = arith.constant dense<0.000000e+00> : vector<4xf32>
    %574 = vector.multi_reduction <add>, %573, %cst_321 [1] : vector<4x64xf32> to vector<4xf32>
    %575 = vector.shape_cast %574 : vector<4xf32> to vector<4x1xf32>
    %cst_322 = arith.constant dense<0.000000e+00> : vector<1xf32>
    %576 = vector.multi_reduction <add>, %575, %cst_322 [0] : vector<4x1xf32> to vector<1xf32>
    %577 = vector.shape_cast %576 : vector<1xf32> to vector<1x1xf32>
    %578 = vector.broadcast %577 : vector<1x1xf32> to vector<4x64xf32>
    %579 = arith.divf %573, %578 : vector<4x64xf32>
    %580 = tpu.concatenate %579, %579, %579, %579, %579, %579, %579, %579 in 1 : vector<4x64xf32>, vector<4x64xf32>, vector<4x64xf32>, vector<4x64xf32>, vector<4x64xf32>, vector<4x64xf32>, vector<4x64xf32>, vector<4x64xf32> -> vector<4x512xf32>
    %581 = arith.mulf %580, %566 : vector<4x512xf32>
    %cst_323 = arith.constant dense<0.000000e+00> : vector<512xf32>
    %582 = vector.multi_reduction <add>, %581, %cst_323 [0] : vector<4x512xf32> to vector<512xf32>
    %583 = vector.shape_cast %582 : vector<512xf32> to vector<1x512xf32>
    %c1_324 = arith.constant 1 : index
    %c0_325 = arith.constant 0 : index
    %c0_326 = arith.constant 0 : index
    %584 = vector.load %arg37[%c1_324, %c0_325, %c0_326] : memref<3x512x8xbf16, #tpu.memory_space<vmem>>, vector<1x512x8xbf16>
    %585 = vector.shape_cast %584 : vector<1x512x8xbf16> to vector<512x8xbf16>
    %586 = arith.truncf %583 : vector<1x512xf32> to vector<1x512xbf16>
    %cst_327 = arith.constant dense<0.000000e+00> : vector<1x8xf32>
    %587 = tpu.matmul %586, %585, %cst_327 {dimension_numbers = #tpu.dot_dimension_numbers<[1], [0], [0], [1], [0, 0, 1, 1], [], []>} : vector<1x512xbf16>, vector<512x8xbf16>, vector<1x8xf32> -> vector<1x8xf32>
    %588 = arith.addf %564, %587 : vector<1x8xf32>
    %589 = vector.extract_strided_slice %534 {offsets = [16, 0], sizes = [4, 64], strides = [1, 1]} : vector<48x64xf32> to vector<4x64xf32>
    %590 = vector.extract_strided_slice %528 {offsets = [16, 0], sizes = [4, 512], strides = [1, 1]} : vector<48x512xf32> to vector<4x512xf32>
    %cst_328 = arith.constant dense<0xFF800000> : vector<4xf32>
    %591 = vector.multi_reduction <maximumf>, %589, %cst_328 [1] : vector<4x64xf32> to vector<4xf32>
    %592 = vector.shape_cast %591 : vector<4xf32> to vector<4x1xf32>
    %cst_329 = arith.constant dense<0xFF800000> : vector<1xf32>
    %593 = vector.multi_reduction <maximumf>, %592, %cst_329 [0] : vector<4x1xf32> to vector<1xf32>
    %594 = vector.shape_cast %593 : vector<1xf32> to vector<1x1xf32>
    %595 = vector.broadcast %594 : vector<1x1xf32> to vector<4x64xf32>
    %596 = arith.subf %589, %595 : vector<4x64xf32>
    %597 = math.exp %596 : vector<4x64xf32>
    %cst_330 = arith.constant dense<0.000000e+00> : vector<4xf32>
    %598 = vector.multi_reduction <add>, %597, %cst_330 [1] : vector<4x64xf32> to vector<4xf32>
    %599 = vector.shape_cast %598 : vector<4xf32> to vector<4x1xf32>
    %cst_331 = arith.constant dense<0.000000e+00> : vector<1xf32>
    %600 = vector.multi_reduction <add>, %599, %cst_331 [0] : vector<4x1xf32> to vector<1xf32>
    %601 = vector.shape_cast %600 : vector<1xf32> to vector<1x1xf32>
    %602 = vector.broadcast %601 : vector<1x1xf32> to vector<4x64xf32>
    %603 = arith.divf %597, %602 : vector<4x64xf32>
    %604 = tpu.concatenate %603, %603, %603, %603, %603, %603, %603, %603 in 1 : vector<4x64xf32>, vector<4x64xf32>, vector<4x64xf32>, vector<4x64xf32>, vector<4x64xf32>, vector<4x64xf32>, vector<4x64xf32>, vector<4x64xf32> -> vector<4x512xf32>
    %605 = arith.mulf %604, %590 : vector<4x512xf32>
    %cst_332 = arith.constant dense<0.000000e+00> : vector<512xf32>
    %606 = vector.multi_reduction <add>, %605, %cst_332 [0] : vector<4x512xf32> to vector<512xf32>
    %607 = vector.shape_cast %606 : vector<512xf32> to vector<1x512xf32>
    %c2 = arith.constant 2 : index
    %c0_333 = arith.constant 0 : index
    %c0_334 = arith.constant 0 : index
    %608 = vector.load %arg37[%c2, %c0_333, %c0_334] : memref<3x512x8xbf16, #tpu.memory_space<vmem>>, vector<1x512x8xbf16>
    %609 = vector.shape_cast %608 : vector<1x512x8xbf16> to vector<512x8xbf16>
    %610 = arith.truncf %607 : vector<1x512xf32> to vector<1x512xbf16>
    %cst_335 = arith.constant dense<0.000000e+00> : vector<1x8xf32>
    %611 = tpu.matmul %610, %609, %cst_335 {dimension_numbers = #tpu.dot_dimension_numbers<[1], [0], [0], [1], [0, 0, 1, 1], [], []>} : vector<1x512xbf16>, vector<512x8xbf16>, vector<1x8xf32> -> vector<1x8xf32>
    %612 = arith.addf %588, %611 : vector<1x8xf32>
    %613 = arith.addf %612, %535 : vector<1x8xf32>
    %c0_336 = arith.constant 0 : index
    %c0_337 = arith.constant 0 : index
    %c0_338 = arith.constant 0 : index
    %614 = vector.load %arg40[%c0_336, %c0_337, %c0_338] : memref<2x1x8xf32, #tpu.memory_space<vmem>>, vector<1x1x8xf32>
    %615 = vector.shape_cast %614 : vector<1x1x8xf32> to vector<1x8xf32>
    %616 = vector.shape_cast %613 : vector<1x8xf32> to vector<1x1x8xf32>
    tpu.vector_store %arg40[%c0_336, %c0_337, %c0_338], %616 {strides = array<i32>} : memref<2x1x8xf32, #tpu.memory_space<vmem>>, vector<1x1x8xf32>,
    %617 = vector.extract_strided_slice %534 {offsets = [32, 0], sizes = [12, 64], strides = [1, 1]} : vector<48x64xf32> to vector<12x64xf32>
    %c1_339 = arith.constant 1 : index
    %c0_340 = arith.constant 0 : index
    %c0_341 = arith.constant 0 : index
    %618 = vector.load %arg39[%c1_339, %c0_340, %c0_341] : memref<2x12x64xf32, #tpu.memory_space<vmem>>, vector<1x12x64xf32>
    %619 = vector.shape_cast %618 : vector<1x12x64xf32> to vector<12x64xf32>
    %620 = vector.shape_cast %617 : vector<12x64xf32> to vector<1x12x64xf32>
    tpu.vector_store %arg39[%c1_339, %c0_340, %c0_341], %620 {strides = array<i32>} : memref<2x12x64xf32, #tpu.memory_space<vmem>>, vector<1x12x64xf32>,
    %cst_342 = arith.constant 0.000000e+00 : f32
    %621 = vector.broadcast %cst_342 : f32 to vector<1x8xf32>
    %622 = vector.extract_strided_slice %534 {offsets = [32, 0], sizes = [4, 64], strides = [1, 1]} : vector<48x64xf32> to vector<4x64xf32>
    %623 = vector.extract_strided_slice %528 {offsets = [32, 0], sizes = [4, 512], strides = [1, 1]} : vector<48x512xf32> to vector<4x512xf32>
    %cst_343 = arith.constant dense<0xFF800000> : vector<4xf32>
    %624 = vector.multi_reduction <maximumf>, %622, %cst_343 [1] : vector<4x64xf32> to vector<4xf32>
    %625 = vector.shape_cast %624 : vector<4xf32> to vector<4x1xf32>
    %cst_344 = arith.constant dense<0xFF800000> : vector<1xf32>
    %626 = vector.multi_reduction <maximumf>, %625, %cst_344 [0] : vector<4x1xf32> to vector<1xf32>
    %627 = vector.shape_cast %626 : vector<1xf32> to vector<1x1xf32>
    %628 = vector.broadcast %627 : vector<1x1xf32> to vector<4x64xf32>
    %629 = arith.subf %622, %628 : vector<4x64xf32>
    %630 = math.exp %629 : vector<4x64xf32>
    %cst_345 = arith.constant dense<0.000000e+00> : vector<4xf32>
    %631 = vector.multi_reduction <add>, %630, %cst_345 [1] : vector<4x64xf32> to vector<4xf32>
    %632 = vector.shape_cast %631 : vector<4xf32> to vector<4x1xf32>
    %cst_346 = arith.constant dense<0.000000e+00> : vector<1xf32>
    %633 = vector.multi_reduction <add>, %632, %cst_346 [0] : vector<4x1xf32> to vector<1xf32>
    %634 = vector.shape_cast %633 : vector<1xf32> to vector<1x1xf32>
    %635 = vector.broadcast %634 : vector<1x1xf32> to vector<4x64xf32>
    %636 = arith.divf %630, %635 : vector<4x64xf32>
    %637 = tpu.concatenate %636, %636, %636, %636, %636, %636, %636, %636 in 1 : vector<4x64xf32>, vector<4x64xf32>, vector<4x64xf32>, vector<4x64xf32>, vector<4x64xf32>, vector<4x64xf32>, vector<4x64xf32>, vector<4x64xf32> -> vector<4x512xf32>
    %638 = arith.mulf %637, %623 : vector<4x512xf32>
    %cst_347 = arith.constant dense<0.000000e+00> : vector<512xf32>
    %639 = vector.multi_reduction <add>, %638, %cst_347 [0] : vector<4x512xf32> to vector<512xf32>
    %640 = vector.shape_cast %639 : vector<512xf32> to vector<1x512xf32>
    %c0_348 = arith.constant 0 : index
    %c0_349 = arith.constant 0 : index
    %c0_350 = arith.constant 0 : index
    %641 = vector.load %arg37[%c0_348, %c0_349, %c0_350] : memref<3x512x8xbf16, #tpu.memory_space<vmem>>, vector<1x512x8xbf16>
    %642 = vector.shape_cast %641 : vector<1x512x8xbf16> to vector<512x8xbf16>
    %643 = arith.truncf %640 : vector<1x512xf32> to vector<1x512xbf16>
    %cst_351 = arith.constant dense<0.000000e+00> : vector<1x8xf32>
    %644 = tpu.matmul %643, %642, %cst_351 {dimension_numbers = #tpu.dot_dimension_numbers<[1], [0], [0], [1], [0, 0, 1, 1], [], []>} : vector<1x512xbf16>, vector<512x8xbf16>, vector<1x8xf32> -> vector<1x8xf32>
    %645 = arith.addf %621, %644 : vector<1x8xf32>
    %646 = vector.extract_strided_slice %534 {offsets = [36, 0], sizes = [4, 64], strides = [1, 1]} : vector<48x64xf32> to vector<4x64xf32>
    %647 = vector.extract_strided_slice %528 {offsets = [36, 0], sizes = [4, 512], strides = [1, 1]} : vector<48x512xf32> to vector<4x512xf32>
    %cst_352 = arith.constant dense<0xFF800000> : vector<4xf32>
    %648 = vector.multi_reduction <maximumf>, %646, %cst_352 [1] : vector<4x64xf32> to vector<4xf32>
    %649 = vector.shape_cast %648 : vector<4xf32> to vector<4x1xf32>
    %cst_353 = arith.constant dense<0xFF800000> : vector<1xf32>
    %650 = vector.multi_reduction <maximumf>, %649, %cst_353 [0] : vector<4x1xf32> to vector<1xf32>
    %651 = vector.shape_cast %650 : vector<1xf32> to vector<1x1xf32>
    %652 = vector.broadcast %651 : vector<1x1xf32> to vector<4x64xf32>
    %653 = arith.subf %646, %652 : vector<4x64xf32>
    %654 = math.exp %653 : vector<4x64xf32>
    %cst_354 = arith.constant dense<0.000000e+00> : vector<4xf32>
    %655 = vector.multi_reduction <add>, %654, %cst_354 [1] : vector<4x64xf32> to vector<4xf32>
    %656 = vector.shape_cast %655 : vector<4xf32> to vector<4x1xf32>
    %cst_355 = arith.constant dense<0.000000e+00> : vector<1xf32>
    %657 = vector.multi_reduction <add>, %656, %cst_355 [0] : vector<4x1xf32> to vector<1xf32>
    %658 = vector.shape_cast %657 : vector<1xf32> to vector<1x1xf32>
    %659 = vector.broadcast %658 : vector<1x1xf32> to vector<4x64xf32>
    %660 = arith.divf %654, %659 : vector<4x64xf32>
    %661 = tpu.concatenate %660, %660, %660, %660, %660, %660, %660, %660 in 1 : vector<4x64xf32>, vector<4x64xf32>, vector<4x64xf32>, vector<4x64xf32>, vector<4x64xf32>, vector<4x64xf32>, vector<4x64xf32>, vector<4x64xf32> -> vector<4x512xf32>
    %662 = arith.mulf %661, %647 : vector<4x512xf32>
    %cst_356 = arith.constant dense<0.000000e+00> : vector<512xf32>
    %663 = vector.multi_reduction <add>, %662, %cst_356 [0] : vector<4x512xf32> to vector<512xf32>
    %664 = vector.shape_cast %663 : vector<512xf32> to vector<1x512xf32>
    %c1_357 = arith.constant 1 : index
    %c0_358 = arith.constant 0 : index
    %c0_359 = arith.constant 0 : index
    %665 = vector.load %arg37[%c1_357, %c0_358, %c0_359] : memref<3x512x8xbf16, #tpu.memory_space<vmem>>, vector<1x512x8xbf16>
    %666 = vector.shape_cast %665 : vector<1x512x8xbf16> to vector<512x8xbf16>
    %667 = arith.truncf %664 : vector<1x512xf32> to vector<1x512xbf16>
    %cst_360 = arith.constant dense<0.000000e+00> : vector<1x8xf32>
    %668 = tpu.matmul %667, %666, %cst_360 {dimension_numbers = #tpu.dot_dimension_numbers<[1], [0], [0], [1], [0, 0, 1, 1], [], []>} : vector<1x512xbf16>, vector<512x8xbf16>, vector<1x8xf32> -> vector<1x8xf32>
    %669 = arith.addf %645, %668 : vector<1x8xf32>
    %670 = vector.extract_strided_slice %534 {offsets = [40, 0], sizes = [4, 64], strides = [1, 1]} : vector<48x64xf32> to vector<4x64xf32>
    %671 = vector.extract_strided_slice %528 {offsets = [40, 0], sizes = [4, 512], strides = [1, 1]} : vector<48x512xf32> to vector<4x512xf32>
    %cst_361 = arith.constant dense<0xFF800000> : vector<4xf32>
    %672 = vector.multi_reduction <maximumf>, %670, %cst_361 [1] : vector<4x64xf32> to vector<4xf32>
    %673 = vector.shape_cast %672 : vector<4xf32> to vector<4x1xf32>
    %cst_362 = arith.constant dense<0xFF800000> : vector<1xf32>
    %674 = vector.multi_reduction <maximumf>, %673, %cst_362 [0] : vector<4x1xf32> to vector<1xf32>
    %675 = vector.shape_cast %674 : vector<1xf32> to vector<1x1xf32>
    %676 = vector.broadcast %675 : vector<1x1xf32> to vector<4x64xf32>
    %677 = arith.subf %670, %676 : vector<4x64xf32>
    %678 = math.exp %677 : vector<4x64xf32>
    %cst_363 = arith.constant dense<0.000000e+00> : vector<4xf32>
    %679 = vector.multi_reduction <add>, %678, %cst_363 [1] : vector<4x64xf32> to vector<4xf32>
    %680 = vector.shape_cast %679 : vector<4xf32> to vector<4x1xf32>
    %cst_364 = arith.constant dense<0.000000e+00> : vector<1xf32>
    %681 = vector.multi_reduction <add>, %680, %cst_364 [0] : vector<4x1xf32> to vector<1xf32>
    %682 = vector.shape_cast %681 : vector<1xf32> to vector<1x1xf32>
    %683 = vector.broadcast %682 : vector<1x1xf32> to vector<4x64xf32>
    %684 = arith.divf %678, %683 : vector<4x64xf32>
    %685 = tpu.concatenate %684, %684, %684, %684, %684, %684, %684, %684 in 1 : vector<4x64xf32>, vector<4x64xf32>, vector<4x64xf32>, vector<4x64xf32>, vector<4x64xf32>, vector<4x64xf32>, vector<4x64xf32>, vector<4x64xf32> -> vector<4x512xf32>
    %686 = arith.mulf %685, %671 : vector<4x512xf32>
    %cst_365 = arith.constant dense<0.000000e+00> : vector<512xf32>
    %687 = vector.multi_reduction <add>, %686, %cst_365 [0] : vector<4x512xf32> to vector<512xf32>
    %688 = vector.shape_cast %687 : vector<512xf32> to vector<1x512xf32>
    %c2_366 = arith.constant 2 : index
    %c0_367 = arith.constant 0 : index
    %c0_368 = arith.constant 0 : index
    %689 = vector.load %arg37[%c2_366, %c0_367, %c0_368] : memref<3x512x8xbf16, #tpu.memory_space<vmem>>, vector<1x512x8xbf16>
    %690 = vector.shape_cast %689 : vector<1x512x8xbf16> to vector<512x8xbf16>
    %691 = arith.truncf %688 : vector<1x512xf32> to vector<1x512xbf16>
    %cst_369 = arith.constant dense<0.000000e+00> : vector<1x8xf32>
    %692 = tpu.matmul %691, %690, %cst_369 {dimension_numbers = #tpu.dot_dimension_numbers<[1], [0], [0], [1], [0, 0, 1, 1], [], []>} : vector<1x512xbf16>, vector<512x8xbf16>, vector<1x8xf32> -> vector<1x8xf32>
    %693 = arith.addf %669, %692 : vector<1x8xf32>
    %694 = arith.addf %693, %535 : vector<1x8xf32>
    %c1_370 = arith.constant 1 : index
    %c0_371 = arith.constant 0 : index
    %c0_372 = arith.constant 0 : index
    %695 = vector.load %arg40[%c1_370, %c0_371, %c0_372] : memref<2x1x8xf32, #tpu.memory_space<vmem>>, vector<1x1x8xf32>
    %696 = vector.shape_cast %695 : vector<1x1x8xf32> to vector<1x8xf32>
    %697 = vector.shape_cast %694 : vector<1x8xf32> to vector<1x1x8xf32>
    tpu.vector_store %arg40[%c1_370, %c0_371, %c0_372], %697 {strides = array<i32>} : memref<2x1x8xf32, #tpu.memory_space<vmem>>, vector<1x1x8xf32>,
    return
  }
  func.func @transform_0(%arg0: i32) -> (i32, i32) {
    %c0_i32 = arith.constant 0 : i32
    %c0_i32_0 = arith.constant 0 : i32
    return %arg0, %c0_i32 : i32, i32
  }
  func.func @transform_1(%arg0: i32) -> (i32, i32, i32) {
    %c0_i32 = arith.constant 0 : i32
    %c0_i32_0 = arith.constant 0 : i32
    %c0_i32_1 = arith.constant 0 : i32
    return %arg0, %c0_i32, %c0_i32_0 : i32, i32, i32
  }
  func.func @transform_2(%arg0: i32) -> (i32, i32) {
    %c0_i32 = arith.constant 0 : i32
    %c0_i32_0 = arith.constant 0 : i32
    return %arg0, %c0_i32 : i32, i32
  }
  func.func @transform_3(%arg0: i32) -> (i32, i32) {
    %c0_i32 = arith.constant 0 : i32
    %c0_i32_0 = arith.constant 0 : i32
    %c0_i32_1 = arith.constant 0 : i32
    return %c0_i32, %c0_i32_0 : i32, i32
  }
  func.func @transform_4(%arg0: i32) -> (i32, i32) {
    %c0_i32 = arith.constant 0 : i32
    %c0_i32_0 = arith.constant 0 : i32
    %c0_i32_1 = arith.constant 0 : i32
    return %c0_i32, %c0_i32_0 : i32, i32
  }
  func.func @transform_5(%arg0: i32) -> (i32, i32) {
    %c0_i32 = arith.constant 0 : i32
    %c0_i32_0 = arith.constant 0 : i32
    %c0_i32_1 = arith.constant 0 : i32
    return %c0_i32, %c0_i32_0 : i32, i32
  }
  func.func @transform_6(%arg0: i32) -> (i32, i32) {
    %c0_i32 = arith.constant 0 : i32
    %c0_i32_0 = arith.constant 0 : i32
    %c0_i32_1 = arith.constant 0 : i32
    return %c0_i32, %c0_i32_0 : i32, i32
  }
  func.func @transform_7(%arg0: i32) -> (i32, i32) {
    %c0_i32 = arith.constant 0 : i32
    %c0_i32_0 = arith.constant 0 : i32
    %c0_i32_1 = arith.constant 0 : i32
    return %c0_i32, %c0_i32_0 : i32, i32
  }
  func.func @transform_8(%arg0: i32) -> (i32, i32) {
    %c0_i32 = arith.constant 0 : i32
    %c0_i32_0 = arith.constant 0 : i32
    %c0_i32_1 = arith.constant 0 : i32
    return %c0_i32, %c0_i32_0 : i32, i32
  }
  func.func @transform_9(%arg0: i32) -> (i32, i32) {
    %c0_i32 = arith.constant 0 : i32
    %c0_i32_0 = arith.constant 0 : i32
    %c0_i32_1 = arith.constant 0 : i32
    return %c0_i32, %c0_i32_0 : i32, i32
  }
  func.func @transform_10(%arg0: i32) -> (i32, i32) {
    %c0_i32 = arith.constant 0 : i32
    %c0_i32_0 = arith.constant 0 : i32
    %c0_i32_1 = arith.constant 0 : i32
    return %c0_i32, %c0_i32_0 : i32, i32
  }
  func.func @transform_11(%arg0: i32) -> (i32, i32) {
    %c0_i32 = arith.constant 0 : i32
    %c0_i32_0 = arith.constant 0 : i32
    %c0_i32_1 = arith.constant 0 : i32
    return %c0_i32, %c0_i32_0 : i32, i32
  }
  func.func @transform_12(%arg0: i32) -> (i32, i32) {
    %c0_i32 = arith.constant 0 : i32
    %c0_i32_0 = arith.constant 0 : i32
    %c0_i32_1 = arith.constant 0 : i32
    return %c0_i32, %c0_i32_0 : i32, i32
  }
  func.func @transform_13(%arg0: i32) -> (i32, i32) {
    %c0_i32 = arith.constant 0 : i32
    %c0_i32_0 = arith.constant 0 : i32
    %c0_i32_1 = arith.constant 0 : i32
    return %c0_i32, %c0_i32_0 : i32, i32
  }
  func.func @transform_14(%arg0: i32) -> (i32, i32, i32) {
    %c0_i32 = arith.constant 0 : i32
    %c0_i32_0 = arith.constant 0 : i32
    %c0_i32_1 = arith.constant 0 : i32
    %c0_i32_2 = arith.constant 0 : i32
    return %c0_i32, %c0_i32_0, %c0_i32_1 : i32, i32, i32
  }
  func.func @transform_15(%arg0: i32) -> (i32, i32, i32) {
    %c0_i32 = arith.constant 0 : i32
    %c0_i32_0 = arith.constant 0 : i32
    %c0_i32_1 = arith.constant 0 : i32
    %c0_i32_2 = arith.constant 0 : i32
    return %c0_i32, %c0_i32_0, %c0_i32_1 : i32, i32, i32
  }
  func.func @transform_16(%arg0: i32) -> (i32, i32, i32, i32) {
    %c0_i32 = arith.constant 0 : i32
    %c0_i32_0 = arith.constant 0 : i32
    %c0_i32_1 = arith.constant 0 : i32
    %c0_i32_2 = arith.constant 0 : i32
    %c0_i32_3 = arith.constant 0 : i32
    return %c0_i32, %c0_i32_0, %c0_i32_1, %c0_i32_2 : i32, i32, i32, i32
  }
  func.func @transform_17(%arg0: i32) -> (i32, i32, i32, i32) {
    %c0_i32 = arith.constant 0 : i32
    %c0_i32_0 = arith.constant 0 : i32
    %c0_i32_1 = arith.constant 0 : i32
    %c0_i32_2 = arith.constant 0 : i32
    %c0_i32_3 = arith.constant 0 : i32
    return %c0_i32, %c0_i32_0, %c0_i32_1, %c0_i32_2 : i32, i32, i32, i32
  }
  func.func @transform_18(%arg0: i32) -> (i32, i32, i32, i32) {
    %c0_i32 = arith.constant 0 : i32
    %c0_i32_0 = arith.constant 0 : i32
    %c0_i32_1 = arith.constant 0 : i32
    %c0_i32_2 = arith.constant 0 : i32
    %c0_i32_3 = arith.constant 0 : i32
    return %c0_i32, %c0_i32_0, %c0_i32_1, %c0_i32_2 : i32, i32, i32, i32
  }
  func.func @transform_19(%arg0: i32) -> (i32, i32, i32, i32) {
    %c0_i32 = arith.constant 0 : i32
    %c0_i32_0 = arith.constant 0 : i32
    %c0_i32_1 = arith.constant 0 : i32
    %c0_i32_2 = arith.constant 0 : i32
    %c0_i32_3 = arith.constant 0 : i32
    return %c0_i32, %c0_i32_0, %c0_i32_1, %c0_i32_2 : i32, i32, i32, i32
  }
  func.func @transform_20(%arg0: i32) -> (i32, i32, i32, i32) {
    %c0_i32 = arith.constant 0 : i32
    %c0_i32_0 = arith.constant 0 : i32
    %c0_i32_1 = arith.constant 0 : i32
    %c0_i32_2 = arith.constant 0 : i32
    %c0_i32_3 = arith.constant 0 : i32
    return %c0_i32, %c0_i32_0, %c0_i32_1, %c0_i32_2 : i32, i32, i32, i32
  }
  func.func @transform_21(%arg0: i32) -> (i32, i32, i32, i32) {
    %c0_i32 = arith.constant 0 : i32
    %c0_i32_0 = arith.constant 0 : i32
    %c0_i32_1 = arith.constant 0 : i32
    %c0_i32_2 = arith.constant 0 : i32
    %c0_i32_3 = arith.constant 0 : i32
    return %c0_i32, %c0_i32_0, %c0_i32_1, %c0_i32_2 : i32, i32, i32, i32
  }
  func.func @transform_22(%arg0: i32) -> (i32, i32, i32, i32) {
    %c0_i32 = arith.constant 0 : i32
    %c0_i32_0 = arith.constant 0 : i32
    %c0_i32_1 = arith.constant 0 : i32
    %c0_i32_2 = arith.constant 0 : i32
    %c0_i32_3 = arith.constant 0 : i32
    return %c0_i32, %c0_i32_0, %c0_i32_1, %c0_i32_2 : i32, i32, i32, i32
  }
  func.func @transform_23(%arg0: i32) -> (i32, i32, i32) {
    %c0_i32 = arith.constant 0 : i32
    %c0_i32_0 = arith.constant 0 : i32
    %c0_i32_1 = arith.constant 0 : i32
    %c0_i32_2 = arith.constant 0 : i32
    return %c0_i32, %c0_i32_0, %c0_i32_1 : i32, i32, i32
  }
  func.func @transform_24(%arg0: i32) -> (i32, i32, i32) {
    %c0_i32 = arith.constant 0 : i32
    %c0_i32_0 = arith.constant 0 : i32
    %c0_i32_1 = arith.constant 0 : i32
    %c0_i32_2 = arith.constant 0 : i32
    return %c0_i32, %c0_i32_0, %c0_i32_1 : i32, i32, i32
  }
  func.func @transform_25(%arg0: i32) -> (i32, i32, i32) {
    %c0_i32 = arith.constant 0 : i32
    %c0_i32_0 = arith.constant 0 : i32
    %c0_i32_1 = arith.constant 0 : i32
    %c0_i32_2 = arith.constant 0 : i32
    return %c0_i32, %c0_i32_0, %c0_i32_1 : i32, i32, i32
  }
  func.func @transform_26(%arg0: i32) -> (i32, i32, i32) {
    %c0_i32 = arith.constant 0 : i32
    %c0_i32_0 = arith.constant 0 : i32
    %c0_i32_1 = arith.constant 0 : i32
    %c0_i32_2 = arith.constant 0 : i32
    return %c0_i32, %c0_i32_0, %c0_i32_1 : i32, i32, i32
  }
  func.func @transform_27(%arg0: i32) -> (i32, i32, i32) {
    %c0_i32 = arith.constant 0 : i32
    %c0_i32_0 = arith.constant 0 : i32
    %c0_i32_1 = arith.constant 0 : i32
    %c0_i32_2 = arith.constant 0 : i32
    return %c0_i32, %c0_i32_0, %c0_i32_1 : i32, i32, i32
  }
  func.func @transform_28(%arg0: i32) -> (i32, i32, i32) {
    %c0_i32 = arith.constant 0 : i32
    %c0_i32_0 = arith.constant 0 : i32
    %c0_i32_1 = arith.constant 0 : i32
    %c0_i32_2 = arith.constant 0 : i32
    return %c0_i32, %c0_i32_0, %c0_i32_1 : i32, i32, i32
  }
  func.func @transform_29(%arg0: i32) -> (i32, i32, i32) {
    %c0_i32 = arith.constant 0 : i32
    %c0_i32_0 = arith.constant 0 : i32
    %c0_i32_1 = arith.constant 0 : i32
    %c0_i32_2 = arith.constant 0 : i32
    return %c0_i32, %c0_i32_0, %c0_i32_1 : i32, i32, i32
  }
  func.func @transform_30(%arg0: i32) -> (i32, i32) {
    %c0_i32 = arith.constant 0 : i32
    %c0_i32_0 = arith.constant 0 : i32
    %c0_i32_1 = arith.constant 0 : i32
    return %c0_i32, %c0_i32_0 : i32, i32
  }
  func.func @transform_31(%arg0: i32) -> (i32, i32) {
    %c0_i32 = arith.constant 0 : i32
    %c0_i32_0 = arith.constant 0 : i32
    %c0_i32_1 = arith.constant 0 : i32
    return %c0_i32, %c0_i32_0 : i32, i32
  }
  func.func @transform_32(%arg0: i32) -> (i32, i32) {
    %c0_i32 = arith.constant 0 : i32
    %c0_i32_0 = arith.constant 0 : i32
    %c0_i32_1 = arith.constant 0 : i32
    return %c0_i32, %c0_i32_0 : i32, i32
  }
  func.func @transform_33(%arg0: i32) -> (i32, i32) {
    %c0_i32 = arith.constant 0 : i32
    %c0_i32_0 = arith.constant 0 : i32
    %c0_i32_1 = arith.constant 0 : i32
    return %c0_i32, %c0_i32_0 : i32, i32
  }
  func.func @transform_34(%arg0: i32) -> (i32, i32) {
    %c0_i32 = arith.constant 0 : i32
    %c0_i32_0 = arith.constant 0 : i32
    %c0_i32_1 = arith.constant 0 : i32
    return %c0_i32, %c0_i32_0 : i32, i32
  }
  func.func @transform_35(%arg0: i32) -> (i32, i32) {
    %c0_i32 = arith.constant 0 : i32
    %c0_i32_0 = arith.constant 0 : i32
    %c0_i32_1 = arith.constant 0 : i32
    return %c0_i32, %c0_i32_0 : i32, i32
  }
  func.func @transform_36(%arg0: i32) -> (i32, i32, i32) {
    %c0_i32 = arith.constant 0 : i32
    %c0_i32_0 = arith.constant 0 : i32
    %c0_i32_1 = arith.constant 0 : i32
    %c0_i32_2 = arith.constant 0 : i32
    return %c0_i32, %c0_i32_0, %c0_i32_1 : i32, i32, i32
  }
  func.func @transform_37(%arg0: i32) -> (i32, i32) {
    %c0_i32 = arith.constant 0 : i32
    %c0_i32_0 = arith.constant 0 : i32
    %c0_i32_1 = arith.constant 0 : i32
    return %c0_i32, %c0_i32_0 : i32, i32
  }
  func.func @transform_38(%arg0: i32) -> (i32, i32, i32) {
    %c0_i32 = arith.constant 0 : i32
    %c0_i32_0 = arith.constant 0 : i32
    %c0_i32_1 = arith.constant 0 : i32
    return %arg0, %c0_i32, %c0_i32_0 : i32, i32, i32
  }
  func.func @transform_39(%arg0: i32) -> (i32, i32, i32) {
    %c0_i32 = arith.constant 0 : i32
    %c0_i32_0 = arith.constant 0 : i32
    %c0_i32_1 = arith.constant 0 : i32
    return %arg0, %c0_i32, %c0_i32_0 : i32, i32, i32
  }
}

</mosaic_0001>

<bundles_post_ra>
// kernel: mvt_forward.1
= control target key start
LH: loop header
LB: loop body
LE: loop exit
PB: predicated region body
PF: predicated region fallthrough
CT: control target
= control target key end

     0   :  { %s12821_s6 = smov 1   ;;  %s12822_s10 = smov 2   ;;  %s14950_s0 = inlined_call_operand.smem [shape: u32[40], index: -1, kind: input, shape index: {}] }
   0x1   :  { %s12876_s5 = sld [smem:[%s14950_s0]]   ;;  %s12823_s14 = smov 3  }
   0x2   :  { %s12881_s9 = sld [smem:[%s14950_s0 + %s12821_s6]]   ;;  %s12824_s18 = smov 4  }
   0x3   :  { %s12886_s13 = sld [smem:[%s14950_s0 + %s12822_s10]]   ;;  %s12825_s22 = smov 5  }
   0x4   :  { %s12891_s17 = sld [smem:[%s14950_s0 + %s12823_s14]]   ;;  %s12826_s26 = smov 6  }
   0x5   :  { %s12896_s21 = sld [smem:[%s14950_s0 + %s12824_s18]]   ;;  %s12827_s30 = smov 7  }
   0x6   :  { %s12901_s25 = sld [smem:[%s14950_s0 + %s12825_s22]]   ;;  %s12828_s4 = smov 8  }
   0x7   :  { %14984 = sst [smem:[#allocation6_spill]] %s12876_s5  ;;  %s12829_s10 = smov 9  }
   0x8   :  { %14985 = sst [smem:[#allocation7_spill]] %s12881_s9  ;;  %s12830_s15 = smov 10  }
   0x9   :  { %14986 = sst [smem:[#allocation8_spill]] %s12886_s13  ;;  %s12831_s20 = smov 11  }
   0xa   :  { %14987 = sst [smem:[#allocation9_spill]] %s12891_s17  ;;  %s12833_s1 = smov 13  }
   0xb   :  { %14988 = sst [smem:[#allocation10_spill]] %s12896_s21  ;;  %s12834_s7 = smov 14  }
   0xc   :  { %14989 = sst [smem:[#allocation11_spill]] %s12901_s25  ;;  %s12836_s22 = smov 16  }
   0xd   :  { %s12906_s29 = sld [smem:[%s14950_s0 + %s12826_s26]]   ;;  %s12832_s26 = smov 12  }
   0xe   :  { %s12911_s3 = sld [smem:[%s14950_s0 + %s12827_s30]]   ;;  %s12837_s28 = smov 17  }
   0xf   :  { %s12916_s8 = sld [smem:[%s14950_s0 + %s12828_s4]]   ;;  %s12856_s23 = smov 36  }
  0x10   :  { %s12921_s14 = sld [smem:[%s14950_s0 + %s12829_s10]]   ;;  %s12858_s10 = smov 38  }
  0x11   :  { %s12926_s19 = sld [smem:[%s14950_s0 + %s12830_s15]]   ;;  %s12835_s15 = smov 15  }
  0x12   :  { %s12931_s24 = sld [smem:[%s14950_s0 + %s12831_s20]]   ;;  %s12859_s16 = smov 39  }
  0x13   :  { %14990 = sst [smem:[#allocation12_spill]] %s12906_s29 }
  0x14   :  { %14991 = sst [smem:[#allocation13_spill]] %s12911_s3 }
  0x15   :  { %14992 = sst [smem:[#allocation14_spill]] %s12916_s8 }
  0x16   :  { %14993 = sst [smem:[#allocation15_spill]] %s12921_s14 }
  0x17   :  { %14994 = sst [smem:[#allocation16_spill]] %s12926_s19 }
  0x18   :  { %14995 = sst [smem:[#allocation17_spill]] %s12931_s24 }
  0x19   :  { %s12936_s30 = sld [smem:[%s14950_s0 + %s12832_s26]]  }
  0x1a   :  { %s12941_s6 = sld [smem:[%s14950_s0 + %s12833_s1]]   ;;  %s12857_s1 = smov 37  }
  0x1b   :  { %s12946_s12 = sld [smem:[%s14950_s0 + %s12834_s7]]   ;;  %s12838_s7 = smov 18  }
  0x1c   :  { %s12951_s20 = sld [smem:[%s14950_s0 + %s12835_s15]]   ;;  %s12839_s15 = smov 19  }
  0x1d   :  { %s12956_s27 = sld [smem:[%s14950_s0 + %s12836_s22]]   ;;  %s12840_s22 = smov 20  }
  0x1e   :  { %s12961_s4 = sld [smem:[%s14950_s0 + %s12837_s28]]   ;;  %s12841_s28 = smov 21  }
  0x20   :  { %14996 = sst [smem:[#allocation18_spill]] %s12941_s6 }
  0x21   :  { %14997 = sst [smem:[#allocation19_spill]] %s12946_s12 }
  0x22   :  { %14998 = sst [smem:[#allocation20_spill]] %s12951_s20 }
  0x23   :  { %14999 = sst [smem:[#allocation21_spill]] %s12956_s27 }
  0x24   :  { %15000 = sst [smem:[#allocation22_spill]] %s12961_s4 }
  0x25   :  { %s12966_s12 = sld [smem:[%s14950_s0 + %s12838_s7]]   ;;  %s12842_s7 = smov 22  }
  0x26   :  { %s12971_s20 = sld [smem:[%s14950_s0 + %s12839_s15]]   ;;  %s12843_s15 = smov 23  }
  0x27   :  { %s12976_s27 = sld [smem:[%s14950_s0 + %s12840_s22]]   ;;  %s12844_s22 = smov 24  }
  0x28   :  { %s12981_s4 = sld [smem:[%s14950_s0 + %s12841_s28]]   ;;  %s12845_s28 = smov 25  }
  0x29   :  { %s13069_s6 = sld [smem:[%s14950_s0 + %s12859_s16]]  }
  0x2b   :  { %15001 = sst [smem:[#allocation23_spill]] %s12966_s12 }
  0x2c   :  { %15002 = sst [smem:[#allocation24_spill]] %s12971_s20 }
  0x2d   :  { %15003 = sst [smem:[#allocation25_spill]] %s12976_s27 }
  0x2e   :  { %15004 = sst [smem:[#allocation26_spill]] %s12981_s4 }
  0x2f   :  { %s12986_s12 = sld [smem:[%s14950_s0 + %s12842_s7]]   ;;  %s12846_s7 = smov 26  }
  0x30   :  { %s12991_s20 = sld [smem:[%s14950_s0 + %s12843_s15]]   ;;  %s12847_s15 = smov 27  }
  0x31   :  { %s12996_s27 = sld [smem:[%s14950_s0 + %s12844_s22]]   ;;  %s12848_s22 = smov 28  }
  0x32   :  { %s13001_s4 = sld [smem:[%s14950_s0 + %s12845_s28]]   ;;  %s12849_s28 = smov 29  }
  0x35   :  { %15005 = sst [smem:[#allocation27_spill]] %s12986_s12 }
  0x36   :  { %15006 = sst [smem:[#allocation28_spill]] %s12991_s20 }
  0x37   :  { %15007 = sst [smem:[#allocation29_spill]] %s12996_s27 }
  0x38   :  { %15008 = sst [smem:[#allocation30_spill]] %s13001_s4 }
  0x39   :  { %s13006_s12 = sld [smem:[%s14950_s0 + %s12846_s7]]   ;;  %s12850_s7 = smov 30  }
  0x3a   :  { %s13011_s20 = sld [smem:[%s14950_s0 + %s12847_s15]]   ;;  %s12851_s15 = smov 31  }
  0x3b   :  { %s13016_s27 = sld [smem:[%s14950_s0 + %s12848_s22]]   ;;  %s12852_s22 = smov 32  }
  0x3c   :  { %s13021_s4 = sld [smem:[%s14950_s0 + %s12849_s28]]   ;;  %s12853_s28 = smov 33  }
  0x3f   :  { %15009 = sst [smem:[#allocation31_spill]] %s13006_s12 }
  0x40   :  { %15010 = sst [smem:[#allocation32_spill]] %s13011_s20 }
  0x41   :  { %15011 = sst [smem:[#allocation33_spill]] %s13016_s27 }
  0x42   :  { %15012 = sst [smem:[#allocation34_spill]] %s13021_s4 }
  0x43   :  { %s13026_s12 = sld [smem:[%s14950_s0 + %s12850_s7]]   ;;  %s12854_s7 = smov 34  }
  0x44   :  { %s13031_s20 = sld [smem:[%s14950_s0 + %s12851_s15]]   ;;  %s12855_s15 = smov 35  }
  0x45   :  { %s13036_s27 = sld [smem:[%s14950_s0 + %s12852_s22]]  }
  0x46   :  { %s13041_s4 = sld [smem:[%s14950_s0 + %s12853_s28]]  }
  0x49   :  { %15013 = sst [smem:[#allocation35_spill]] %s13026_s12 }
  0x4a   :  { %15014 = sst [smem:[#allocation36_spill]] %s13031_s20 }
  0x4b   :  { %15015 = sst [smem:[#allocation37_spill]] %s13036_s27 }
  0x4c   :  { %15016 = sst [smem:[#allocation38_spill]] %s13041_s4 }
  0x4d   :  { %s13046_s12 = sld [smem:[%s14950_s0 + %s12854_s7]]  }
  0x4e   :  { %s10033_s20 = sld [smem:[%s14950_s0 + %s12855_s15]]  }
  0x4f   :  { %s13054_s27 = sld [smem:[%s14950_s0 + %s12856_s23]]  }
  0x50   :  { %s13059_s4 = sld [smem:[%s14950_s0 + %s12857_s1]]  }
  0x53   :  { %15017 = sst [smem:[#allocation39_spill]] %s13046_s12 }
  0x54   :  { %s13064_s12 = sld [smem:[%s14950_s0 + %s12858_s10]]   ;;  %v85_v0 = vstv %s10033_s20 }
  0x55   :  { %86 = vst [vmem:[#allocation2] sm:$0x1] %v85_v0 }
  0x56   :  { %15018 = sst [smem:[#allocation40_spill]] %s13059_s4 }
  0x5a   :  { %15019 = sst [smem:[#allocation41_spill]] %s13064_s12 }
  0x5b   :  { %87 = vsyncpa [#allocation4], 0 }
  0x5c   :  { %89 = vsyncpa [#allocation4 + $0x1], 0  ;;  %s13071_s23 = smov 0   ;;  %s13073_s22 = smov 0  }
  0x5d   :  { %s13075_s26 = smov 0   ;;  %s13077_s1 = smov 0  }
  0x5e LB: > { %s15020_s25 = sld [smem:[#allocation11_spill]]  ;;  %s15021_s24 = sld [smem:[#allocation17_spill]]  ;;  %s12819_s1 = sphi %s13077_s1, %s15064_s1   ;;  %s12815_s26 = sphi %s13075_s26, %s15063_s26   ;;  %s12811_s22 = sphi %s13073_s22, %s15062_s22   ;;  %s12807_s23 = sphi %s13071_s23, %s15061_s23  }
  0x5f   : > { %s15022_s17 = sld [smem:[#allocation9_spill]]  ;;  %s15023_s14 = sld [smem:[#allocation15_spill]] }
  0x60   : > { %s13092_s0 = sadd.s32 4294967295, %s12819_s1   ;;  %s10039_s20 = sadd.s32 4294967294, %s12819_s1  }
  0x61   : > { %s13096_s28 = sadd.s32 1, %s12819_s1   ;;  %s941_s2 = sadd.s32 1, %s12815_s26 }
  0x62   : > { %s938_s10 = ssub.s32 %s12819_s1, %s13096_s28  ;;  %p951_p0 = scmp.ne.s32.totalorder %s12815_s26, %s12811_s22 }
  0x63   : > { %p939_p1 = scmp.eq.s32.totalorder %s938_s10, 0  ;;  %p952_p2 = scmp.eq.s32.totalorder %s13092_s0, 1 }
  0x64   : > { %p957_p3 = scmp.ne.s32.totalorder %s12811_s22, %s12807_s23  ;;  %p958_p4 = scmp.eq.s32.totalorder %s10039_s20, 1 }
  0x65   : > { %s13107_s7 = scalar_select %p939_p1, %s12815_s26, %s941_s2  }
  0x66   : > { %p13109_p5 = por %p952_p2, %p951_p0  ;;  %p13113_p6 = por %p958_p4, %p957_p3 }
  0x67   : > { %p10042_p7 = scmp.ge.s32.totalorder %s12819_s1, 1  ;;  %p1108_p8 = scmp.lt.s32.totalorder %s12819_s1, 3 }
  0x69   : > { %p1109_p9 = pnand %p10042_p7, %p1108_p8 }
  0x6a   : > { %v1253_v1 = vld [vmem:[%s15022_s17] sm:$0xff] (!%p1109_p9)  ;;  %v1254_v3 = vld [vmem:[%s15022_s17 + $0x8] sm:$0xff] (!%p1109_p9)  ;;  %s1220_s15 = smul.u32 (!%p1109_p9), 3, %s13092_s0  ;;  %s15027_s5 = sld [smem:[#allocation6_spill]] (!%p1109_p9)  ;;  %vm1875_vm0 = vcmask (!%p1109_p9), 523264   ;;  %vm2864_vm1 = vcmask (!%p1109_p9), 1041408  }
  0x6b   : > { %1112 = sbr.rel (%p1109_p9) target bundleno = 8723 (0x2213), region = 172  ;;  %v1257_v2 = vld [vmem:[%s15022_s17 + $0x20] sm:$0xff] (!%p1109_p9)  ;;  %v1258_v6 = vld [vmem:[%s15022_s17 + $0x28] sm:$0xff] (!%p1109_p9)  ;;  %s15028_s21 = sld [smem:[#allocation10_spill]] (!%p1109_p9)  ;;  %vm2857_vm2 = vcmask (!%p1109_p9), 1041409   ;;  %vm12861_vm3 = vmmov (!%p1109_p9), 0  }
  0x6c   : > { %v10053_v4 = vcombine.high (!%p1109_p9), %v1253_v1, %v1257_v2  ;;  %v10052_v5 = vcombine.low (!%p1109_p9), %v1253_v1, %v1257_v2  ;;  %v1261_v7 = vld [vmem:[%s15022_s17 + $0x40] sm:$0xff] (!%p1109_p9)  ;;  %v10055_v9 = vcombine.high (!%p1109_p9), %v1254_v3, %v1258_v6  ;;  %v10054_v10 = vcombine.low (!%p1109_p9), %v1254_v3, %v1258_v6  ;;  %v1262_v12 = vld [vmem:[%s15022_s17 + $0x48] sm:$0xff] (!%p1109_p9)  ;;  %p13129_p10 = scmp.lt.s32.totalorder (!%p1109_p9), %s1220_s15, 5  ;;  %s10046_s10 = sshll.u32 (!%p1109_p9), %s13092_s0, 1 }
  0x6d   : > { %v1265_v8 = vld [vmem:[%s15022_s17 + $0x60] sm:$0xff] (!%p1109_p9)  ;;  %v1266_v13 = vld [vmem:[%s15022_s17 + $0x68] sm:$0xff] (!%p1109_p9)  ;;  %p1228_p11 = scmp.lt.s32.totalorder (!%p1109_p9), %s10046_s10, 3  ;;  %s15029_s9 = sld [smem:[#allocation7_spill]] (!%p1109_p9)  ;;  %vm2860_vm4 = vcmask (!%p1109_p9), 31744   ;;  %vm2935_vm5 = vcmask (!%p1109_p9), 261120  }
  0x6e   : > { %v10061_v11 = vcombine.high (!%p1109_p9), %v1261_v7, %v1265_v8  ;;  %v1269_v14 = vld [vmem:[%s15022_s17 + $0x80] sm:$0xff] (!%p1109_p9)  ;;  %1882 = vmatprep.subr.bf16.mxu0 (!%p1109_p9), %v10053_v4  ;;  %v10063_v15 = vcombine.high (!%p1109_p9), %v1262_v12, %v1266_v13  ;;  %v1270_v17 = vld [vmem:[%s15022_s17 + $0x88] sm:$0xff] (!%p1109_p9)  ;;  %1933 = vmatprep.subr.bf16.mxu1 (!%p1109_p9), %v10055_v9  ;;  %v10060_v19 = vcombine.low (!%p1109_p9), %v1261_v7, %v1265_v8  ;;  %s15030_s3 = sld [smem:[#allocation13_spill]] (!%p1109_p9)  ;;  %s15031_s13 = sld [smem:[#allocation8_spill]] (!%p1109_p9)  ;;  %vm2992_vm6 = vcmask (!%p1109_p9), 130048  }
  0x6f   : > { %v1273_v16 = vld [vmem:[%s15022_s17 + $0xa0] sm:$0xff] (!%p1109_p9)  ;;  %v1274_v18 = vld [vmem:[%s15022_s17 + $0xa8] sm:$0xff] (!%p1109_p9)  ;;  %1883 = vmatpush1.bf16.msra.mxu0 (!%p1109_p9), %v10052_v5  ;;  %1934 = vmatpush1.bf16.msra.mxu1 (!%p1109_p9), %v10054_v10  ;;  %v10062_v20 = vcombine.low (!%p1109_p9), %v1262_v12, %v1266_v13  ;;  %s15032_s29 = sld [smem:[#allocation12_spill]] (!%p1109_p9)  ;;  %s15033_s8 = sld [smem:[#allocation14_spill]] (!%p1109_p9)  ;;  %vm3009_vm7 = vcmask (!%p1109_p9), 1043456   ;;  %vm3549_vm9 = vcmask (!%p1109_p9), 195584  }
  0x70   : > { %1884 = vmatprep.subr.bf16.mxu0 (!%p1109_p9), %v10061_v11  ;;  %v10069_v21 = vcombine.high (!%p1109_p9), %v1269_v14, %v1273_v16  ;;  %1935 = vmatprep.subr.bf16.mxu1 (!%p1109_p9), %v10063_v15  ;;  %v10071_v22 = vcombine.high (!%p1109_p9), %v1270_v17, %v1274_v18  ;;  %v1277_v23 = vld [vmem:[%s15022_s17 + $0xc0] sm:$0xff] (!%p1109_p9)  ;;  %v1278_v25 = vld [vmem:[%s15022_s17 + $0xc8] sm:$0xff] (!%p1109_p9)  ;;  %v10068_v27 = vcombine.low (!%p1109_p9), %v1269_v14, %v1273_v16  ;;  %s15034_s19 = sld [smem:[#allocation16_spill]] (!%p1109_p9)  ;;  %s15057_s12 = sld [smem:[#allocation41_spill]] (!%p1109_p9)  ;;  %vm7540_vm10 = vcmask (!%p1109_p9), 523268  }
  0x71   : > { %v1281_v24 = vld [vmem:[%s15022_s17 + $0xe0] sm:$0xff] (!%p1109_p9)  ;;  %v1282_v26 = vld [vmem:[%s15022_s17 + $0xe8] sm:$0xff] (!%p1109_p9)  ;;  %v10070_v28 = vcombine.low (!%p1109_p9), %v1270_v17, %v1274_v18  ;;  %vm7408_vm11 = vcmask (!%p1109_p9), 519168   ;;  %vm7544_vm12 = vcmask (!%p1109_p9), 1047556   ;;  %s15058_s4 = sld [smem:[#allocation40_spill]] (!%p1109_p9)  ;;  %vm8637_vm13 = vcmask (!%p1109_p9), 57344  }
  0x72   : > { %s15066_s15 = smov (!%p13129_p10, %s1220_s15), 5  ;;  %v10077_v29 = vcombine.high %v1277_v23, %v1281_v24  ;;  %v10079_v30 = vcombine.high %v1278_v25, %v1282_v26  ;;  %v1285_v31 = vld [vmem:[%s15022_s17 + $0x100] sm:$0xff]  ;;  %v1286_v33 = vld [vmem:[%s15022_s17 + $0x108] sm:$0xff]  ;;  %v10076_v35 = vcombine.low %v1277_v23, %v1281_v24  ;;  %v10078_v36 = vcombine.low %v1278_v25, %v1282_v26  ;;  %s15068_s10 = smov (!%p1228_p11, %s10046_s10), 3 }
  0x73   : > { %1885 = vmatpush1.bf16.msra.mxu0 %v10060_v19  ;;  %1936 = vmatpush1.bf16.msra.mxu1 %v10062_v20  ;;  %v1289_v32 = vld [vmem:[%s15022_s17 + $0x120] sm:$0xff]  ;;  %s10980_s20 = sshll.u32 %s15066_s15, 4  ;;  %v1290_v34 = vld [vmem:[%s15022_s17 + $0x128] sm:$0xff]  ;;  %s1230_s15 = scalar_lea.vmem %s15029_s9, %s15068_s10 }
  0x74   : > { %1886 = vmatprep.subr.bf16.mxu0 %v10069_v21  ;;  %1937 = vmatprep.subr.bf16.mxu1 %v10071_v22  ;;  %v10085_v37 = vcombine.high %v1285_v31, %v1289_v32  ;;  %s13147_s2 = scalar_lea.vmem %s15027_s5, %s10980_s20  ;;  %v10087_v38 = vcombine.high %v1286_v33, %v1290_v34  ;;  %v1293_v39 = vld [vmem:[%s15022_s17 + $0x140] sm:$0xff]  ;;  %v1294_v41 = vld [vmem:[%s15022_s17 + $0x148] sm:$0xff]  ;;  %v10084_v43 = vcombine.low %v1285_v31, %v1289_v32  ;;  %v1255_v31 = vld [vmem:[%s15022_s17 + $0x10] sm:$0xff]  ;;  %s10048_s18 = sshll.u32 %s15068_s10, 3 }
  0x75   : > { %v1297_v40 = vld [vmem:[%s15022_s17 + $0x160] sm:$0xff]  ;;  %v1298_v42 = vld [vmem:[%s15022_s17 + $0x168] sm:$0xff]  ;;  %v1250_v45 = vld [vmem:[%s13147_s2 + $0x18] sm:$0xff]  ;;  %v10086_v46 = vcombine.low %v1286_v33, %v1290_v34  ;;  %s1236_s20 = scalar_lea.vmem %s15031_s13, %s10048_s18  ;;  %s15036_s18 = sld [smem:[#allocation22_spill]] }
  0x76   : > { %v1248_v44 = vld [vmem:[%s13147_s2 + $0x8] sm:$0xff]  ;;  %v10093_v47 = vcombine.high %v1293_v39, %v1297_v40  ;;  %v10095_v49 = vcombine.high %v1294_v41, %v1298_v42  ;;  %v1301_v50 = vld [vmem:[%s15022_s17 + $0x180] sm:$0xff]  ;;  %v10092_v54 = vcombine.low %v1293_v39, %v1297_v40  ;;  %v10094_v55 = vcombine.low %v1294_v41, %v1298_v42  ;;  %v1259_v34 = vld [vmem:[%s15022_s17 + $0x30] sm:$0xff]  ;;  %s15041_s5 = sld [smem:[#allocation24_spill]]  ;;  %s15043_s9 = sld [smem:[#allocation26_spill]] }
  0x77   : > { %1887 = vmatpush1.bf16.msra.mxu0 %v10068_v27  ;;  %1938 = vmatpush1.bf16.msra.mxu1 %v10070_v28  ;;  %v13155_v48 = vpack.c.bf16 %v1250_v45, %v1248_v44  ;;  %v1305_v51 = vld [vmem:[%s15022_s17 + $0x1a0] sm:$0xff]  ;;  %v1302_v52 = vld [vmem:[%s15022_s17 + $0x188] sm:$0xff]  ;;  %v1260_v39 = vld [vmem:[%s15022_s17 + $0x38] sm:$0xff]  ;;  %v10057_v44 = vcombine.high %v1255_v31, %v1259_v34  ;;  %s15044_s13 = sld [smem:[#allocation27_spill]] }
  0x78   : > { %1888 = vmatprep.subr.bf16.mxu0 %v10077_v29  ;;  %1939 = vmatprep.subr.bf16.mxu1 %v10079_v30  ;;  %v1306_v53 = vld [vmem:[%s15022_s17 + $0x1a8] sm:$0xff]  ;;  %v10101_v56 = vcombine.high %v1301_v50, %v1305_v51  ;;  %v1309_v58 = vld [vmem:[%s15022_s17 + $0x1c0] sm:$0xff]  ;;  %v10100_v62 = vcombine.low %v1301_v50, %v1305_v51  ;;  %v1263_v41 = vld [vmem:[%s15022_s17 + $0x50] sm:$0xff]  ;;  %v10056_v51 = vcombine.low %v1255_v31, %v1259_v34 }
  0x79   : > { %10148 = vmatprep.mubr.msk.bf16.mxu0 %vm1875_vm0, %v13155_v48  ;;  %10150 = vmatprep.mubr.msk.bf16.mxu1 %vm1875_vm0, %v13155_v48  ;;  %v10103_v57 = vcombine.high %v1302_v52, %v1306_v53  ;;  %v1313_v59 = vld [vmem:[%s15022_s17 + $0x1e0] sm:$0xff]  ;;  %v1310_v60 = vld [vmem:[%s15022_s17 + $0x1c8] sm:$0xff]  ;;  %v10102_v63 = vcombine.low %v1302_v52, %v1306_v53  ;;  %v1267_v42 = vld [vmem:[%s15022_s17 + $0x70] sm:$0xff] }
  0x7a   : > { %v1314_v61 = vld [vmem:[%s15022_s17 + $0x1e8] sm:$0xff]  ;;  %v10109_v0 = vcombine.high %v1309_v58, %v1313_v59  ;;  %v1317_v2 = vld [vmem:[%s15022_s17 + $0x200] sm:$0xff]  ;;  %v10108_v6 = vcombine.low %v1309_v58, %v1313_v59  ;;  %v1264_v45 = vld [vmem:[%s15022_s17 + $0x58] sm:$0xff] }
  0x7b   : > { %1889 = vmatpush1.bf16.msra.mxu0 %v10076_v35  ;;  %1940 = vmatpush1.bf16.msra.mxu1 %v10078_v36  ;;  %v10111_v1 = vcombine.high %v1310_v60, %v1314_v61  ;;  %v1321_v3 = vld [vmem:[%s15022_s17 + $0x220] sm:$0xff]  ;;  %v1318_v4 = vld [vmem:[%s15022_s17 + $0x208] sm:$0xff]  ;;  %v10110_v7 = vcombine.low %v1310_v60, %v1314_v61  ;;  %v1271_v52 = vld [vmem:[%s15022_s17 + $0x90] sm:$0xff]  ;;  %v10064_v60 = vcombine.low %v1263_v41, %v1267_v42 }
  0x7c   : > { %1890 = vmatprep.subr.bf16.mxu0 %v10085_v37  ;;  %1941 = vmatprep.subr.bf16.mxu1 %v10087_v38  ;;  %v1322_v5 = vld [vmem:[%s15022_s17 + $0x228] sm:$0xff]  ;;  %v10117_v8 = vcombine.high %v1317_v2, %v1321_v3  ;;  %v1325_v10 = vld [vmem:[%s15022_s17 + $0x240] sm:$0xff]  ;;  %v10116_v14 = vcombine.low %v1317_v2, %v1321_v3  ;;  %v1249_v37 = vld [vmem:[%s13147_s2 + $0x10] sm:$0xff] }
  0x7d   : > { %v10119_v9 = vcombine.high %v1318_v4, %v1322_v5  ;;  %v1329_v11 = vld [vmem:[%s15022_s17 + $0x260] sm:$0xff]  ;;  %v1326_v12 = vld [vmem:[%s15022_s17 + $0x248] sm:$0xff]  ;;  %v10118_v15 = vcombine.low %v1318_v4, %v1322_v5  ;;  %v1256_v38 = vld [vmem:[%s15022_s17 + $0x18] sm:$0xff] }
  0x7e   : > { %v1330_v13 = vld [vmem:[%s15022_s17 + $0x268] sm:$0xff]  ;;  %v10125_v16 = vcombine.high %v1325_v10, %v1329_v11  ;;  %v1333_v17 = vld [vmem:[%s15022_s17 + $0x280] sm:$0xff]  ;;  %v10124_v22 = vcombine.low %v1325_v10, %v1329_v11  ;;  %v10058_v53 = vcombine.low %v1256_v38, %v1260_v39  ;;  %v1276_v59 = vld [vmem:[%s15022_s17 + $0xb8] sm:$0xff] }
  0x7f   : > { %1891 = vmatpush1.bf16.msra.mxu0 %v10084_v43  ;;  %1942 = vmatpush1.bf16.msra.mxu1 %v10086_v46  ;;  %v1337_v18 = vld [vmem:[%s15022_s17 + $0x2a0] sm:$0xff]  ;;  %v10127_v19 = vcombine.high %v1326_v12, %v1330_v13  ;;  %v1334_v20 = vld [vmem:[%s15022_s17 + $0x288] sm:$0xff]  ;;  %v10126_v24 = vcombine.low %v1326_v12, %v1330_v13  ;;  %v10059_v46 = vcombine.high %v1256_v38, %v1260_v39  ;;  %v1279_v61 = vld [vmem:[%s15022_s17 + $0xd0] sm:$0xff] }
  0x80   : > { %1892 = vmatprep.subr.bf16.mxu0 %v10093_v47  ;;  %1943 = vmatprep.subr.bf16.mxu1 %v10095_v49  ;;  %v1338_v21 = vld [vmem:[%s15022_s17 + $0x2a8] sm:$0xff]  ;;  %v1341_v23 = vld [vmem:[%s15022_s17 + $0x2c0] sm:$0xff]  ;;  %v10133_v25 = vcombine.high %v1333_v17, %v1337_v18  ;;  %v10132_v30 = vcombine.low %v1333_v17, %v1337_v18  ;;  %v1268_v47 = vld [vmem:[%s15022_s17 + $0x78] sm:$0xff] }
  0x81   : > { %v1345_v26 = vld [vmem:[%s15022_s17 + $0x2e0] sm:$0xff]  ;;  %v10135_v27 = vcombine.high %v1334_v20, %v1338_v21  ;;  %v1342_v28 = vld [vmem:[%s15022_s17 + $0x2c8] sm:$0xff]  ;;  %v10134_v32 = vcombine.low %v1334_v20, %v1338_v21  ;;  %v1280_v3 = vld [vmem:[%s15022_s17 + $0xd8] sm:$0xff] }
  0x82   : > { %v1346_v29 = vld [vmem:[%s15022_s17 + $0x2e8] sm:$0xff]  ;;  %v10141_v33 = vcombine.high %v1341_v23, %v1345_v26  ;;  %v1247_v36 = vld [vmem:[%s13147_s2] sm:$0xff]  ;;  %v10140_v40 = vcombine.low %v1341_v23, %v1345_v26  ;;  %v1284_v4 = vld [vmem:[%s15022_s17 + $0xf8] sm:$0xff] }
  0x83   : > { %1893 = vmatpush1.bf16.msra.mxu0 %v10092_v54  ;;  %1944 = vmatpush1.bf16.msra.mxu1 %v10094_v55  ;;  %v10143_v35 = vcombine.high %v1342_v28, %v1346_v29  ;;  %v10142_v43 = vcombine.low %v1342_v28, %v1346_v29  ;;  %v13195_v49 = vpack.c.bf16 %v1249_v37, %v1247_v36  ;;  %v1252_v50 = vld [vmem:[%s13147_s2 + $0x28] sm:$0xff]  ;;  %v1275_v55 = vld [vmem:[%s15022_s17 + $0xb0] sm:$0xff]  ;;  %v1288_v11 = vld [vmem:[%s15022_s17 + $0x118] sm:$0xff] }
  0x84   : > { %1894 = vmatprep.subr.bf16.mxu0 %v10101_v56  ;;  %1945 = vmatprep.subr.bf16.mxu1 %v10103_v57  ;;  %v10065_v54 = vcombine.high %v1263_v41, %v1267_v42  ;;  %v10067_v56 = vcombine.high %v1264_v45, %v1268_v47  ;;  %v1272_v57 = vld [vmem:[%s15022_s17 + $0x98] sm:$0xff]  ;;  %v13201_v58 = vpack.c.bf16 %v1252_v50, %v1252_v50  ;;  %v1303_v23 = vld [vmem:[%s15022_s17 + $0x190] sm:$0xff] }
  0x85   : > { %v10075_v2 = vcombine.high %v1272_v57, %v1276_v59  ;;  %v1292_v12 = vld [vmem:[%s15022_s17 + $0x138] sm:$0xff]  ;;  %v10083_v13 = vcombine.high %v1280_v3, %v1284_v4  ;;  %v10082_v17 = vcombine.low %v1280_v3, %v1284_v4  ;;  %v1315_v31 = vld [vmem:[%s15022_s17 + $0x1f0] sm:$0xff] }
  0x86   : > { %v1300_v20 = vld [vmem:[%s15022_s17 + $0x178] sm:$0xff]  ;;  %v10091_v21 = vcombine.high %v1288_v11, %v1292_v12  ;;  %v1319_v38 = vld [vmem:[%s15022_s17 + $0x210] sm:$0xff] }
  0x87   : > { %1895 = vmatpush1.bf16.msra.mxu0 %v10100_v62  ;;  %1946 = vmatpush1.bf16.msra.mxu1 %v10102_v63  ;;  %v1251_v62 = vld [vmem:[%s13147_s2 + $0x20] sm:$0xff]  ;;  %v10066_v63 = vcombine.low %v1264_v45, %v1268_v47  ;;  %v1308_v28 = vld [vmem:[%s15022_s17 + $0x1b8] sm:$0xff]  ;;  %v1323_v39 = vld [vmem:[%s15022_s17 + $0x230] sm:$0xff]  ;;  %s14970_s2 = smov 16  }
  0x88   : > { %1896 = vmatprep.subr.bf16.mxu0 %v10109_v0  ;;  %1947 = vmatprep.subr.bf16.mxu1 %v10111_v1  ;;  %v10073_v0 = vcombine.high %v1271_v52, %v1275_v55  ;;  %v1283_v1 = vld [vmem:[%s15022_s17 + $0xf0] sm:$0xff]  ;;  %v13213_v5 = vpack.c.bf16 %v1251_v62, %v1251_v62  ;;  %v1312_v34 = vld [vmem:[%s15022_s17 + $0x1d8] sm:$0xff] }
  0x89   : > { %v10081_v10 = vcombine.high %v1279_v61, %v1283_v1  ;;  %v1320_v42 = vld [vmem:[%s15022_s17 + $0x218] sm:$0xff]  ;;  %v1331_v47 = vld [vmem:[%s15022_s17 + $0x270] sm:$0xff] }
  0x8a   : > { %v1340_v62 = vld [vmem:[%s15022_s17 + $0x2b8] sm:$0xff] }
  0x8b   : > { %1897 = vmatpush1.bf16.msra.mxu0 %v10108_v6  ;;  %1948 = vmatpush1.bf16.msra.mxu1 %v10110_v7  ;;  %v10072_v6 = vcombine.low %v1271_v52, %v1275_v55  ;;  %v1287_v7 = vld [vmem:[%s15022_s17 + $0x110] sm:$0xff]  ;;  %v1328_v52 = vld [vmem:[%s15022_s17 + $0x258] sm:$0xff]  ;;  %v10120_v55 = vcombine.low %v1319_v38, %v1323_v39 }
  0x8c   : > { %1898 = vmatprep.subr.bf16.mxu0 %v10117_v8  ;;  %1949 = vmatprep.subr.bf16.mxu1 %v10119_v9  ;;  %v1291_v8 = vld [vmem:[%s15022_s17 + $0x130] sm:$0xff]  ;;  %v10074_v9 = vcombine.low %v1272_v57, %v1276_v59 }
  0x8d   : > { %v10089_v18 = vcombine.high %v1287_v7, %v1291_v8  ;;  %v1339_v57 = vld [vmem:[%s15022_s17 + $0x2b0] sm:$0xff] }
  0x8f   : > { %1899 = vmatpush1.bf16.msra.mxu0 %v10116_v14  ;;  %1950 = vmatpush1.bf16.msra.mxu1 %v10118_v15  ;;  %v10080_v14 = vcombine.low %v1279_v61, %v1283_v1  ;;  %v1295_v15 = vld [vmem:[%s15022_s17 + $0x150] sm:$0xff]  ;;  %v1336_v61 = vld [vmem:[%s15022_s17 + $0x298] sm:$0xff] }
  0x90   : > { %1900 = vmatprep.subr.bf16.mxu0 %v10125_v16  ;;  %1951 = vmatprep.subr.bf16.mxu1 %v10127_v19  ;;  %v1299_v16 = vld [vmem:[%s15022_s17 + $0x170] sm:$0xff]  ;;  %v1296_v19 = vld [vmem:[%s15022_s17 + $0x158] sm:$0xff] }
  0x91   : > { %v10097_v26 = vcombine.high %v1295_v15, %v1299_v16  ;;  %v10099_v29 = vcombine.high %v1296_v19, %v1300_v20  ;;  %v1343_v1 = vld [vmem:[%s15022_s17 + $0x2d0] sm:$0xff] }
  0x93   : > { %1901 = vmatpush1.bf16.msra.mxu0 %v10124_v22  ;;  %1952 = vmatpush1.bf16.msra.mxu1 %v10126_v24  ;;  %v10088_v22 = vcombine.low %v1287_v7, %v1291_v8  ;;  %v1307_v24 = vld [vmem:[%s15022_s17 + $0x1b0] sm:$0xff]  ;;  %v1348_v7 = vld [vmem:[%s15022_s17 + $0x2f8] sm:$0xff]  ;;  %v10139_v8 = vcombine.high %v1336_v61, %v1340_v62 }
  0x94   : > { %1902 = vmatprep.subr.bf16.mxu0 %v10133_v25  ;;  %1953 = vmatprep.subr.bf16.mxu1 %v10135_v27  ;;  %v10090_v25 = vcombine.low %v1288_v11, %v1292_v12  ;;  %v1304_v27 = vld [vmem:[%s15022_s17 + $0x198] sm:$0xff]  ;;  %v10104_v37 = vcombine.low %v1303_v23, %v1307_v24 }
  0x95   : > { %v10107_v36 = vcombine.high %v1304_v27, %v1308_v28 }
  0x97   : > { %1903 = vmatpush1.bf16.msra.mxu0 %v10132_v30  ;;  %1954 = vmatpush1.bf16.msra.mxu1 %v10134_v32  ;;  %v10096_v30 = vcombine.low %v1295_v15, %v1299_v16  ;;  %v10098_v32 = vcombine.low %v1296_v19, %v1300_v20  ;;  %v12237_v15 = vld [vmem:[%s15020_s25 + $0xc0] sm:$0xff]   ;;  %v12239_v19 = vld [vmem:[%s15020_s25 + $0x48] sm:$0xff]  }
  0x98   : > { %1904 = vmatprep.subr.bf16.mxu0 %v10141_v33  ;;  %1955 = vmatprep.subr.bf16.mxu1 %v10143_v35  ;;  %v10105_v33 = vcombine.high %v1303_v23, %v1307_v24  ;;  %v1316_v35 = vld [vmem:[%s15022_s17 + $0x1f8] sm:$0xff]  ;;  %v12241_v20 = vld [vmem:[%s15020_s25 + $0xc8] sm:$0xff]   ;;  %v12243_v23 = vld [vmem:[%s15020_s25 + $0x50] sm:$0xff]  }
  0x99   : > { %v10114_v50 = vcombine.low %v1312_v34, %v1316_v35  ;;  %v12245_v24 = vld [vmem:[%s15020_s25 + $0xd0] sm:$0xff]  }
  0x9b   : > { %1905 = vmatpush1.bf16.msra.mxu0 %v10140_v40  ;;  %1956 = vmatpush1.bf16.msra.mxu1 %v10142_v43  ;;  %v10106_v40 = vcombine.low %v1304_v27, %v1308_v28  ;;  %v1324_v43 = vld [vmem:[%s15022_s17 + $0x238] sm:$0xff] }
  0x9c   : > { %1984 = vmatprep.subr.bf16.mxu0 %v10057_v44  ;;  %2035 = vmatprep.subr.bf16.mxu1 %v10059_v46  ;;  %v10115_v44 = vcombine.high %v1312_v34, %v1316_v35  ;;  %v1327_v46 = vld [vmem:[%s15022_s17 + $0x250] sm:$0xff]  ;;  %v10122_v59 = vcombine.low %v1320_v42, %v1324_v43  ;;  %v12249_v27 = vld [vmem:[%s15020_s25 + $0xd8] sm:$0xff]   ;;  %v12258_v34 = vld [vmem:[%s15020_s25 + $0xa8] sm:$0xff]  }
  0x9d   : > { %v12250_v28 = vld [vmem:[%s15020_s25 + $0x98] sm:$0xff]   ;;  %v12259_v35 = vld [vmem:[%s15020_s25 + $0x70] sm:$0xff]  }
  0x9e   : > { %1915 = vmatmul.mubr.bf16.vlgmr.msra.gmra.mrb[0].mxu0 %v13195_v49  ;;  %1966 = vmatmul.mubr.bf16.vlgmr.msra.gmra.mrb[0].mxu1 %v13195_v49 }
  0x9f   : > { %1985 = vmatpush1.bf16.msra.mxu0 %v10056_v51  ;;  %2036 = vmatpush1.bf16.msra.mxu1 %v10058_v53  ;;  %v10121_v51 = vcombine.high %v1319_v38, %v1323_v39  ;;  %v1332_v53 = vld [vmem:[%s15022_s17 + $0x278] sm:$0xff]  ;;  %v12262_v38 = vld [vmem:[%s15020_s25 + $0xb0] sm:$0xff]  }
  0xa0   : > { %1986 = vmatprep.subr.bf16.mxu0 %v10065_v54  ;;  %2037 = vmatprep.subr.bf16.mxu1 %v10067_v56  ;;  %v10123_v54 = vcombine.high %v1320_v42, %v1324_v43  ;;  %v1335_v56 = vld [vmem:[%s15022_s17 + $0x290] sm:$0xff]  ;;  %v10130_v3 = vcombine.low %v1328_v52, %v1332_v53  ;;  %v12263_v39 = vld [vmem:[%s15020_s25 + $0x78] sm:$0xff]   ;;  %v12267_v43 = vld [vmem:[%s15020_s25 + $0x140] sm:$0xff]  }
  0xa1   : > { %10149 = vmatprep.mubr.msk.bf16.mxu0 %vm1875_vm0, %v13201_v58  ;;  %10151 = vmatprep.mubr.msk.bf16.mxu1 %vm1875_vm0, %v13201_v58  ;;  %v10137_v4 = vcombine.high %v1335_v56, %v1339_v57  ;;  %v12266_v42 = vld [vmem:[%s15020_s25 + $0xb8] sm:$0xff]  }
  0xa3   : > { %1987 = vmatpush1.bf16.msra.mxu0 %v10064_v60  ;;  %2038 = vmatpush1.bf16.msra.mxu1 %v10066_v63  ;;  %v10129_v60 = vcombine.high %v1327_v46, %v1331_v47  ;;  %v10131_v63 = vcombine.high %v1328_v52, %v1332_v53  ;;  %v13309_v53 = vld [vmem:[%s15028_s21] sm:$0xff]  ;;  %s15048_s21 = sld [smem:[#allocation29_spill]] }
  0xa4   : > { %1988 = vmatprep.subr.bf16.mxu0 %v10073_v0  ;;  %2039 = vmatprep.subr.bf16.mxu1 %v10075_v2  ;;  %v10128_v0 = vcombine.low %v1327_v46, %v1331_v47  ;;  %v1347_v2 = vld [vmem:[%s15022_s17 + $0x2f0] sm:$0xff] }
  0xa5   : > { %v10145_v11 = vcombine.high %v1343_v1, %v1347_v2 }
  0xa6   : > { %1925 = vmatmul.mubr.bf16.gmra.mrb[4].mxu0 %v13213_v5  ;;  %1976 = vmatmul.mubr.bf16.gmra.mrb[4].mxu1 %v13213_v5 }
  0xa7   : > { %1989 = vmatpush1.bf16.msra.mxu0 %v10072_v6  ;;  %2040 = vmatpush1.bf16.msra.mxu1 %v10074_v9  ;;  %v1344_v6 = vld [vmem:[%s15022_s17 + $0x2d8] sm:$0xff]  ;;  %v10136_v9 = vcombine.low %v1335_v56, %v1339_v57 }
  0xa8   : > { %1990 = vmatprep.subr.bf16.mxu0 %v10081_v10  ;;  %2041 = vmatprep.subr.bf16.mxu1 %v10083_v13  ;;  %v10138_v10 = vcombine.low %v1336_v61, %v1340_v62  ;;  %v10147_v12 = vcombine.high %v1344_v6, %v1348_v7  ;;  %v12235_v13 = vld [vmem:[%s15020_s25 + $0x40] sm:$0xff]   ;;  %v10146_v16 = vcombine.low %v1344_v6, %v1348_v7 }
  0xa9   : > { %10152 = vmatprep.mubr.msk.bf16.mxu0 %vm1875_vm0, %v13155_v48  ;;  %10154 = vmatprep.mubr.msk.bf16.mxu1 %vm1875_vm0, %v13155_v48  ;;  %v1311_v48 = vld [vmem:[%s15022_s17 + $0x1d0] sm:$0xff]  ;;  %s15046_s17 = sld [smem:[#allocation31_spill]] }
  0xaa   : > { %v10113_v41 = vcombine.high %v1311_v48, %v1315_v31  ;;  %v10112_v45 = vcombine.low %v1311_v48, %v1315_v31  ;;  %v12252_v48 = vld [vmem:[%s15020_s25 + $0x20] sm:$0xff]  }
  0xab   : > { %1991 = vmatpush1.bf16.msra.mxu0 %v10080_v14  ;;  %2042 = vmatpush1.bf16.msra.mxu1 %v10082_v17  ;;  %v10144_v14 = vcombine.low %v1343_v1, %v1347_v2  ;;  %v12236_v17 = vld [vmem:[%s15020_s25] sm:$0xff]  }
  0xac   : > { %1992 = vmatprep.subr.bf16.mxu0 %v10089_v18  ;;  %2043 = vmatprep.subr.bf16.mxu1 %v10091_v21  ;;  %v12238_v18 = vld [vmem:[%s15020_s25 + $0x80] sm:$0xff]   ;;  %v12240_v21 = vld [vmem:[%s15020_s25 + $0x8] sm:$0xff]  }
  0xad   : > { %v12254_v31 = vld [vmem:[%s15020_s25 + $0xa0] sm:$0xff]  }
  0xaf   : > { %1993 = vmatpush1.bf16.msra.mxu0 %v10088_v22  ;;  %2044 = vmatpush1.bf16.msra.mxu1 %v10090_v25  ;;  %v12242_v22 = vld [vmem:[%s15020_s25 + $0x88] sm:$0xff]   ;;  %v12244_v25 = vld [vmem:[%s15020_s25 + $0x10] sm:$0xff]  }
  0xb0   : > { %1994 = vmatprep.subr.bf16.mxu0 %v10097_v26  ;;  %2045 = vmatprep.subr.bf16.mxu1 %v10099_v29  ;;  %v12246_v26 = vld [vmem:[%s15020_s25 + $0x90] sm:$0xff]   ;;  %v12251_v29 = vld [vmem:[%s15020_s25 + $0x60] sm:$0xff]  }
  0xb3   : > { %1995 = vmatpush1.bf16.msra.mxu0 %v10096_v30  ;;  %2046 = vmatpush1.bf16.msra.mxu1 %v10098_v32  ;;  %v12253_v30 = vld [vmem:[%s15020_s25 + $0xe0] sm:$0xff]   ;;  %v12255_v32 = vld [vmem:[%s15020_s25 + $0x68] sm:$0xff]  }
  0xb4   : > { %1996 = vmatprep.subr.bf16.mxu0 %v10105_v33  ;;  %2047 = vmatprep.subr.bf16.mxu1 %v10107_v36  ;;  %v12257_v33 = vld [vmem:[%s15020_s25 + $0xe8] sm:$0xff]   ;;  %v12260_v36 = vld [vmem:[%s15020_s25 + $0x30] sm:$0xff]  }
  0xb7   : > { %1997 = vmatpush1.bf16.msra.mxu0 %v10104_v37  ;;  %2048 = vmatpush1.bf16.msra.mxu1 %v10106_v40  ;;  %v12261_v37 = vld [vmem:[%s15020_s25 + $0xf0] sm:$0xff]   ;;  %v12264_v40 = vld [vmem:[%s15020_s25 + $0x38] sm:$0xff]  }
  0xb8   : > { %1998 = vmatprep.subr.bf16.mxu0 %v10113_v41  ;;  %2049 = vmatprep.subr.bf16.mxu1 %v10115_v44  ;;  %v12265_v41 = vld [vmem:[%s15020_s25 + $0xf8] sm:$0xff]   ;;  %v12269_v44 = vld [vmem:[%s15020_s25 + $0x1c0] sm:$0xff]  }
  0xbb   : > { %1999 = vmatpush1.bf16.msra.mxu0 %v10112_v45  ;;  %2050 = vmatpush1.bf16.msra.mxu1 %v10114_v50  ;;  %v1355_v45 = vlaneseq }
  0xbc   : > { %2000 = vmatprep.subr.bf16.mxu0 %v10121_v51  ;;  %2051 = vmatprep.subr.bf16.mxu1 %v10123_v54 }
  0xbd   : > { %v13298_v46 = vshrl.u32 %v1355_v45, 7 }
  0xbf   : > { %2001 = vmatpush1.bf16.msra.mxu0 %v10120_v55  ;;  %2052 = vmatpush1.bf16.msra.mxu1 %v10122_v59  ;;  %v13301_v47 = vsub.s32 0, %v13298_v46  ;;  %v13304_v50 = vsub.s32 1, %v13298_v46  ;;  %v1365_v51 = vsub.s32 2, %v13298_v46  ;;  %v1369_v52 = vsub.s32 3, %v13298_v46 }
  0xc0   : > { %2002 = vmatprep.subr.bf16.mxu0 %v10129_v60  ;;  %2053 = vmatprep.subr.bf16.mxu1 %v10131_v63 }
  0xc1   : > { %v1358_v54 = vrot.slane %v13309_v53, %v13301_v47  ;;  %v1362_v55 = vrot.slane %v13309_v53, %v13304_v50  ;;  %v1366_v56 = vrot.slane %v13309_v53, %v1365_v51  ;;  %v1370_v57 = vrot.slane %v13309_v53, %v1369_v52 }
  0xc3   : > { %2003 = vmatpush1.bf16.msra.mxu0 %v10128_v0  ;;  %2054 = vmatpush1.bf16.msra.mxu1 %v10130_v3 }
  0xc4   : > { %2004 = vmatprep.subr.bf16.mxu0 %v10137_v4  ;;  %2055 = vmatprep.subr.bf16.mxu1 %v10139_v8 }
  0xc7   : > { %2005 = vmatpush1.bf16.msra.mxu0 %v10136_v9  ;;  %2056 = vmatpush1.bf16.msra.mxu1 %v10138_v10 }
  0xc8   : > { %2006 = vmatprep.subr.bf16.mxu0 %v10145_v11  ;;  %2057 = vmatprep.subr.bf16.mxu1 %v10147_v12 }
  0xcb   : > { %2007 = vmatpush1.bf16.msra.mxu0 %v10144_v14  ;;  %2058 = vmatpush1.bf16.msra.mxu1 %v10146_v16 }
  0xcc   : > { %10983 = vmatprep.subr.bf16.mxu0 %v12235_v13  ;;  %11011 = vmatprep.subr.bf16.mxu1 %v12237_v15 }
  0xce   : > { %2017 = vmatmul.mubr.bf16.vlgmr.msra.gmra.mrb[8].mxu0 %v13195_v49  ;;  %2068 = vmatmul.mubr.bf16.vlgmr.msra.gmra.mrb[8].mxu1 %v13195_v49  ;;  %v12247_v49 = vld [vmem:[%s15020_s25 + $0x58] sm:$0xff]  }
  0xcf   : > { %10153 = vmatprep.mubr.msk.bf16.mxu0 %vm1875_vm0, %v13201_v58  ;;  %10155 = vmatprep.mubr.msk.bf16.mxu1 %vm1875_vm0, %v13201_v58  ;;  %v12248_v58 = vld [vmem:[%s15020_s25 + $0x18] sm:$0xff]  }
  0xd0   : > { %10984 = vmatpush3.bf16.msra.mxu0 %v12236_v17  ;;  %11012 = vmatpush3.bf16.msra.mxu1 %v12238_v18 }
  0xd1   : > { %10985 = vmatprep.subr.bf16.mxu0 %v12239_v19  ;;  %11013 = vmatprep.subr.bf16.mxu1 %v12241_v20  ;;  %v12268_v19 = vld [vmem:[%s15020_s25 + $0x100] sm:$0xff]  }
  0xd4   : > { %10986 = vmatpush3.bf16.msra.mxu0 %v12240_v21  ;;  %11014 = vmatpush3.bf16.msra.mxu1 %v12242_v22  ;;  %v12270_v22 = vld [vmem:[%s15020_s25 + $0x180] sm:$0xff]  }
  0xd5   : > { %10987 = vmatprep.subr.bf16.mxu0 %v12243_v23  ;;  %11015 = vmatprep.subr.bf16.mxu1 %v12245_v24  ;;  %v12271_v23 = vld [vmem:[%s15020_s25 + $0x148] sm:$0xff]  }
  0xd6   : > { %2027 = vmatmul.mubr.bf16.gmra.mrb[12].mxu0 %v13213_v5  ;;  %2078 = vmatmul.mubr.bf16.gmra.mrb[12].mxu1 %v13213_v5  ;;  %v12256_v5 = vld [vmem:[%s15020_s25 + $0x28] sm:$0xff]  }
  0xd8   : > { %10988 = vmatpush3.bf16.msra.mxu0 %v12244_v25  ;;  %11016 = vmatpush3.bf16.msra.mxu1 %v12246_v26  ;;  %v12273_v26 = vld [vmem:[%s15020_s25 + $0x1c8] sm:$0xff]  }
  0xd9   : > { %10989 = vmatprep.subr.bf16.mxu0 %v12247_v49  ;;  %11017 = vmatprep.subr.bf16.mxu1 %v12249_v27 }
  0xdc   : > { %10990 = vmatpush3.bf16.msra.mxu0 %v12248_v58  ;;  %11018 = vmatpush3.bf16.msra.mxu1 %v12250_v28 }
  0xdd   : > { %10991 = vmatprep.subr.bf16.mxu0 %v12251_v29  ;;  %11019 = vmatprep.subr.bf16.mxu1 %v12253_v30  ;;  %v12272_v30 = vld [vmem:[%s15020_s25 + $0x108] sm:$0xff]  }
  0xe0   : > { %10992 = vmatpush3.bf16.msra.mxu0 %v12252_v48  ;;  %11020 = vmatpush3.bf16.msra.mxu1 %v12254_v31 }
  0xe1   : > { %10993 = vmatprep.subr.bf16.mxu0 %v12255_v32  ;;  %11021 = vmatprep.subr.bf16.mxu1 %v12257_v33  ;;  %v12274_v33 = vld [vmem:[%s15020_s25 + $0x188] sm:$0xff]  }
  0xe4   : > { %10994 = vmatpush3.bf16.msra.mxu0 %v12256_v5  ;;  %11022 = vmatpush3.bf16.msra.mxu1 %v12258_v34 }
  0xe5   : > { %10995 = vmatprep.subr.bf16.mxu0 %v12259_v35  ;;  %11023 = vmatprep.subr.bf16.mxu1 %v12261_v37 }
  0xe8   : > { %10996 = vmatpush3.bf16.msra.mxu0 %v12260_v36  ;;  %11024 = vmatpush3.bf16.msra.mxu1 %v12262_v38  ;;  %v12275_v38 = vld [vmem:[%s15020_s25 + $0x150] sm:$0xff]  }
  0xe9   : > { %10997 = vmatprep.subr.bf16.mxu0 %v12263_v39  ;;  %11025 = vmatprep.subr.bf16.mxu1 %v12265_v41 }
  0xec   : > { %10998 = vmatpush3.bf16.msra.mxu0 %v12264_v40  ;;  %11026 = vmatpush3.bf16.msra.mxu1 %v12266_v42  ;;  %v12277_v42 = vld [vmem:[%s15020_s25 + $0x1d0] sm:$0xff]  }
  0xed   : > { %11039 = vmatprep.subr.bf16.mxu0 %v12267_v43  ;;  %11067 = vmatprep.subr.bf16.mxu1 %v12269_v44 }
 0x171   : > { %v1916_v59 = vpop.f32.mrb[0].mxu0  ;;  %v1967_v62 = vpop.f32.mrb[0].mxu1 }
 0x172   : > { %v1917_v60 = vadd.f32 %v1916_v59, %v1358_v54  ;;  %v1918_v61 = vpop.f32.mrb[1].mxu0  ;;  %v1968_v1 = vadd.f32 %v1967_v62, %v1366_v56  ;;  %v1969_v2 = vpop.f32.mrb[1].mxu1  ;;  %v12280_v62 = vld [vmem:[%s15020_s25 + $0x118] sm:$0xff]  }
 0x173   : > { %v1919_v63 = vadd.f32 %v1918_v61, %v1362_v55  ;;  %v1920_v0 = vpop.f32.mrb[2].mxu0  ;;  %v1970_v7 = vadd.f32 %v1969_v2, %v1370_v57  ;;  %v1971_v8 = vpop.f32.mrb[2].mxu1  ;;  %v12281_v61 = vld [vmem:[%s15020_s25 + $0x1d8] sm:$0xff]   ;;  %v12284_v2 = vld [vmem:[%s15020_s25 + $0x120] sm:$0xff]  }
 0x174   : > { %v2086_v3 = vmax.f32 %v1917_v60, 0.0  ;;  %v1921_v4 = vadd.f32 %v1920_v0, %v1358_v54  ;;  %v1922_v6 = vpop.f32.mrb[3].mxu0  ;;  %v2088_v10 = vmax.f32 %v1968_v1, 0.0  ;;  %v1972_v12 = vadd.f32 %v1971_v8, %v1366_v56  ;;  %v1973_v13 = vpop.f32.mrb[3].mxu1  ;;  %v12283_v0 = vld [vmem:[%s15020_s25 + $0x160] sm:$0xff]   ;;  %v12290_v8 = vld [vmem:[%s15020_s25 + $0x1a8] sm:$0xff]  }
 0x175   : > { %v2087_v9 = vmax.f32 %v1919_v63, 0.0  ;;  %v1923_v11 = vadd.f32 %v1922_v6, %v1362_v55  ;;  %v2089_v15 = vmax.f32 %v1970_v7, 0.0  ;;  %v1974_v16 = vadd.f32 %v1973_v13, %v1370_v57  ;;  %v12282_v63 = vld [vmem:[%s15020_s25 + $0x198] sm:$0xff]   ;;  %v12285_v1 = vld [vmem:[%s15020_s25 + $0x1e0] sm:$0xff]   ;;  %v12289_v6 = vld [vmem:[%s15020_s25 + $0x1e8] sm:$0xff]  }
 0x176   : > { %v2094_v14 = vmax.f32 %v1921_v4, 0.0  ;;  %v2096_v18 = vmax.f32 %v1972_v12, 0.0  ;;  %v12287_v4 = vld [vmem:[%s15020_s25 + $0x168] sm:$0xff]   ;;  %v12294_v12 = vld [vmem:[%s15020_s25 + $0x1b0] sm:$0xff]   ;;  %v12295_v13 = vld [vmem:[%s15020_s25 + $0x178] sm:$0xff]  }
 0x177   : > { %v2095_v17 = vmax.f32 %v1923_v11, 0.0  ;;  %v2097_v21 = vmax.f32 %v1974_v16, 0.0  ;;  %v12288_v7 = vld [vmem:[%s15020_s25 + $0x128] sm:$0xff]   ;;  %v12292_v11 = vld [vmem:[%s15020_s25 + $0x130] sm:$0xff]   ;;  %v12298_v16 = vld [vmem:[%s15020_s25 + $0x1b8] sm:$0xff]  }
 0x178   : > { %v2238_v20 = vpack.c.bf16 %v2094_v14, %v2086_v3  ;;  %v2240_v25 = vpack.c.bf16 %v2096_v18, %v2088_v10  ;;  %v12286_v3 = vld [vmem:[%s15020_s25 + $0x1a0] sm:$0xff]   ;;  %v12293_v10 = vld [vmem:[%s15020_s25 + $0x1f0] sm:$0xff]   ;;  %v12297_v14 = vld [vmem:[%s15020_s25 + $0x1f8] sm:$0xff]   ;;  %v12860_v18 = vmov 0.0  }
 0x179   : > { %v2239_v24 = vpack.c.bf16 %v2095_v17, %v2087_v9  ;;  %v1926_v49 = vpop.f32.mrb[4].mxu0  ;;  %v2241_v27 = vpack.c.bf16 %v2097_v21, %v2089_v15  ;;  %v1977_v29 = vpop.f32.mrb[4].mxu1  ;;  %v12291_v9 = vld [vmem:[%s15020_s25 + $0x170] sm:$0xff]   ;;  %v12296_v15 = vld [vmem:[%s15020_s25 + $0x138] sm:$0xff]   ;;  %v1373_v17 = vsub.s32 4, %v13298_v46  ;;  %v1385_v21 = vsub.s32 7, %v13298_v46 }
 0x17a   : > { %v1927_v58 = vadd.f32 %v1926_v49, %v1358_v54  ;;  %v1928_v28 = vpop.f32.mrb[5].mxu0  ;;  %v1978_v32 = vadd.f32 %v1977_v29, %v1366_v56  ;;  %v1979_v5 = vpop.f32.mrb[5].mxu1  ;;  %v12276_v54 = vld [vmem:[%s15020_s25 + $0x110] sm:$0xff]  }
 0x17b   : > { %2677 = vmatprep.mubr.bf16.mxu0 %v2239_v24  ;;  %v1929_v48 = vadd.f32 %v1928_v28, %v1362_v55  ;;  %v1930_v31 = vpop.f32.mrb[6].mxu0  ;;  %2725 = vmatprep.mubr.bf16.mxu1 %v2241_v27  ;;  %v1980_v36 = vadd.f32 %v1979_v5, %v1370_v57  ;;  %v1981_v37 = vpop.f32.mrb[6].mxu1  ;;  %v12278_v56 = vld [vmem:[%s15020_s25 + $0x190] sm:$0xff]   ;;  %v12279_v57 = vld [vmem:[%s15020_s25 + $0x158] sm:$0xff]   ;;  %s15050_s25 = sld [smem:[#allocation32_spill]] }
 0x17c   : > { %2678 = vmatmul.mubr.bf16.vlgmr.msra.gmra.mrb[16].mxu0 %v2238_v20  ;;  %v2102_v34 = vmax.f32 %v1927_v58, 0.0  ;;  %v1931_v35 = vpop.f32.mrb[7].mxu0  ;;  %2726 = vmatmul.mubr.bf16.vlgmr.msra.gmra.mrb[16].mxu1 %v2240_v25  ;;  %v2104_v40 = vmax.f32 %v1978_v32, 0.0  ;;  %v1982_v41 = vpop.f32.mrb[7].mxu1  ;;  %v1381_v20 = vsub.s32 6, %v13298_v46  ;;  %v1386_v25 = vrot.slane %v13309_v53, %v1385_v21  ;;  %v12300_v21 = vld [vmem:[%s15023_s14 + $0x8] sm:$0xff]  }
 0x17d   : > { %11040 = vmatpush3.bf16.msra.mxu0 %v12268_v19  ;;  %v2103_v39 = vmax.f32 %v1929_v48, 0.0  ;;  %11068 = vmatpush3.bf16.msra.mxu1 %v12270_v22  ;;  %v2105_v43 = vmax.f32 %v1980_v36, 0.0  ;;  %v1377_v19 = vsub.s32 5, %v13298_v46  ;;  %v1374_v22 = vrot.slane %v13309_v53, %v1373_v17  ;;  %v2841_v41 = vld [vmem:[%s1230_s15 + $0x1] sm:$0x1] }
 0x17e   : > { %11041 = vmatprep.subr.bf16.mxu0 %v12271_v23  ;;  %11069 = vmatprep.subr.bf16.mxu1 %v12273_v26  ;;  %v2246_v55 = vpack.c.bf16 %v2102_v34, %v2102_v34  ;;  %v2248_v60 = vpack.c.bf16 %v2104_v40, %v2104_v40  ;;  %v1382_v24 = vrot.slane %v13309_v53, %v1381_v20 }
 0x17f   : > { %v2247_v44 = vpack.c.bf16 %v2103_v39, %v2103_v39  ;;  %v2249_v59 = vpack.c.bf16 %v2105_v43, %v2105_v43  ;;  %v1378_v23 = vrot.slane %v13309_v53, %v1377_v19 }
 0x181   : > { %11042 = vmatpush3.bf16.msra.mxu0 %v12272_v30  ;;  %2685 = vmatprep.mubr.bf16.mxu0 %v2247_v44 }
 0x182   : > { %11070 = vmatpush3.bf16.msra.mxu1 %v12274_v33  ;;  %11043 = vmatprep.subr.bf16.mxu0 %v12275_v38 }
 0x183   : > { %11071 = vmatprep.subr.bf16.mxu1 %v12277_v42  ;;  %2733 = vmatprep.mubr.bf16.mxu1 %v2249_v59 }
 0x184   : > { %2686 = vmatmul.mubr.bf16.gmra.mrb[20].mxu0 %v2246_v55  ;;  %2734 = vmatmul.mubr.bf16.gmra.mrb[20].mxu1 %v2248_v60 }
 0x185   : > { %11044 = vmatpush3.bf16.msra.mxu0 %v12276_v54  ;;  %v2842_v54 = vld [vmem:[%s15030_s3] sm:$0x3]  ;;  %s15040_s3 = sld [smem:[#allocation23_spill]] }
 0x186   : > { %11072 = vmatpush3.bf16.msra.mxu1 %v12278_v56  ;;  %11045 = vmatprep.subr.bf16.mxu0 %v12279_v57 }
 0x187   : > { %11073 = vmatprep.subr.bf16.mxu1 %v12281_v61  ;;  %v2844_v61 = vpack.c.bf16 %v2841_v41, %v2841_v41 }
 0x189   : > { %11046 = vmatpush3.bf16.msra.mxu0 %v12280_v62 }
 0x18a   : > { %11074 = vmatpush3.bf16.msra.mxu1 %v12282_v63  ;;  %11047 = vmatprep.subr.bf16.mxu0 %v12283_v0 }
 0x18b   : > { %11075 = vmatprep.subr.bf16.mxu1 %v12285_v1 }
 0x18d   : > { %11048 = vmatpush3.bf16.msra.mxu0 %v12284_v2  ;;  %v2866_v2 = vsel %vm2864_vm1, %v2842_v54, 0 }
 0x18e   : > { %11076 = vmatpush3.bf16.msra.mxu1 %v12286_v3  ;;  %11049 = vmatprep.subr.bf16.mxu0 %v12287_v4  ;;  %v2840_v3 = vld [vmem:[%s1230_s15] sm:$0x1]  ;;  %s15035_s15 = sld [smem:[#allocation18_spill]] }
 0x18f   : > { %11077 = vmatprep.subr.bf16.mxu1 %v12289_v6  ;;  %v12299_v4 = vld [vmem:[%s15023_s14] sm:$0xff]   ;;  %s15045_s14 = sld [smem:[#allocation28_spill]] }
 0x191   : > { %11050 = vmatpush3.bf16.msra.mxu0 %v12288_v7 }
 0x192   : > { %11078 = vmatpush3.bf16.msra.mxu1 %v12290_v8  ;;  %11051 = vmatprep.subr.bf16.mxu0 %v12291_v9 }
 0x193   : > { %11079 = vmatprep.subr.bf16.mxu1 %v12293_v10 }
 0x195   : > { %11052 = vmatpush3.bf16.msra.mxu0 %v12292_v11 }
 0x196   : > { %11080 = vmatpush3.bf16.msra.mxu1 %v12294_v12  ;;  %11053 = vmatprep.subr.bf16.mxu0 %v12295_v13 }
 0x197   : > { %11081 = vmatprep.subr.bf16.mxu1 %v12297_v14 }
 0x199   : > { %11054 = vmatpush3.bf16.msra.mxu0 %v12296_v15  ;;  %v2843_v15 = vpack.c.bf16 %v2840_v3, %v2840_v3 }
 0x19a   : > { %11082 = vmatpush3.bf16.msra.mxu1 %v12298_v16  ;;  %11614 = vmatprep.subr.bf16.mxu0 %v12860_v18  ;;  %v2855_v16 = vunpack.c.l.b16 %v2844_v61 }
 0x19b   : > { %11620 = vmatprep.subr.bf16.mxu1 %v12860_v18 }
 0x1a1   : > { %v2018_v26 = vpop.f32.mrb[8].mxu0  ;;  %v2069_v58 = vpop.f32.mrb[8].mxu1 }
 0x1a2   : > { %v2019_v49 = vadd.f32 %v2018_v26, %v1374_v22  ;;  %v2020_v27 = vpop.f32.mrb[9].mxu0  ;;  %v2070_v30 = vadd.f32 %v2069_v58, %v1382_v24  ;;  %v2071_v48 = vpop.f32.mrb[9].mxu1  ;;  %v2856_v26 = vrot.slane %v2855_v16, 7  ;;  %v2909_v58 = vld [vmem:[%s1236_s20] sm:$0xff] }
 0x1a3   : > { %v2021_v28 = vadd.f32 %v2020_v27, %v1378_v23  ;;  %v2022_v29 = vpop.f32.mrb[10].mxu0  ;;  %v2072_v5 = vadd.f32 %v2071_v48, %v1386_v25  ;;  %v2073_v33 = vpop.f32.mrb[10].mxu1  ;;  %v12301_v48 = vld [vmem:[%s12936_s30] sm:$0xff]  }
 0x1a4   : > { %v2023_v31 = vadd.f32 %v2022_v29, %v1374_v22  ;;  %v2024_v32 = vpop.f32.mrb[11].mxu0  ;;  %v2092_v34 = vmax.f32 %v2070_v30, 0.0  ;;  %v2074_v36 = vadd.f32 %v2073_v33, %v1382_v24  ;;  %v2075_v37 = vpop.f32.mrb[11].mxu1  ;;  %v2090_v38 = vmax.f32 %v2019_v49, 0.0 }
 0x1a5   : > { %v2025_v35 = vadd.f32 %v2024_v32, %v1378_v23  ;;  %v2093_v39 = vmax.f32 %v2072_v5, 0.0  ;;  %v2076_v40 = vadd.f32 %v2075_v37, %v1386_v25  ;;  %v2091_v42 = vmax.f32 %v2021_v28, 0.0  ;;  %v2910_v28 = vld [vmem:[%s1236_s20 + $0x8] sm:$0xff]  ;;  %v10156_v32 = vld [vmem:[%s15032_s29] ss:$0 sm:$0xff]  ;;  %s15037_s20 = sld [smem:[#allocation21_spill]] }
 0x1a6   : > { %v2098_v53 = vmax.f32 %v2023_v31, 0.0  ;;  %v2100_v44 = vmax.f32 %v2074_v36, 0.0  ;;  %v2915_v30 = vpack.c.bf16 %v2910_v28, %v2909_v58  ;;  %s15051_s29 = sld [smem:[#allocation34_spill]] }
 0x1a7   : > { %v2099_v43 = vmax.f32 %v2025_v35, 0.0  ;;  %v2101_v56 = vmax.f32 %v2076_v40, 0.0 }
 0x1a8   : > { %v2242_v55 = vpack.c.bf16 %v2098_v53, %v2090_v38  ;;  %v2244_v59 = vpack.c.bf16 %v2100_v44, %v2092_v34 }
 0x1a9   : > { %v2243_v57 = vpack.c.bf16 %v2099_v43, %v2091_v42  ;;  %v2028_v60 = vpop.f32.mrb[12].mxu0  ;;  %v2245_v62 = vpack.c.bf16 %v2101_v56, %v2093_v39  ;;  %v2079_v1 = vpop.f32.mrb[12].mxu1 }
 0x1aa   : > { %v2029_v63 = vadd.f32 %v2028_v60, %v1374_v22  ;;  %v2030_v0 = vpop.f32.mrb[13].mxu0  ;;  %v2080_v8 = vadd.f32 %v2079_v1, %v1382_v24  ;;  %v2081_v9 = vpop.f32.mrb[13].mxu1 }
 0x1ab   : > { %v2031_v6 = vadd.f32 %v2030_v0, %v1378_v23  ;;  %v2032_v7 = vpop.f32.mrb[14].mxu0  ;;  %2773 = vmatprep.mubr.bf16.mxu0 %v2243_v57  ;;  %2821 = vmatprep.mubr.bf16.mxu1 %v2245_v62  ;;  %v2082_v11 = vadd.f32 %v2081_v9, %v1386_v25  ;;  %v2083_v12 = vpop.f32.mrb[14].mxu1  ;;  %v2854_v25 = vunpack.c.l.b16 %v2843_v15 }
 0x1ac   : > { %v2033_v10 = vpop.f32.mrb[15].mxu0  ;;  %2774 = vmatmul.mubr.bf16.vlgmr.msra.gmra.mrb[24].mxu0 %v2242_v55  ;;  %v2108_v14 = vmax.f32 %v2080_v8, 0.0  ;;  %2822 = vmatmul.mubr.bf16.vlgmr.msra.gmra.mrb[24].mxu1 %v2244_v59  ;;  %v2084_v17 = vpop.f32.mrb[15].mxu1  ;;  %v2106_v19 = vmax.f32 %v2029_v63, 0.0 }
 0x1ad   : > { %v2107_v13 = vmax.f32 %v2031_v6, 0.0  ;;  %11615 = vmatpush3.bf16.msra.mxu0 %v2866_v2  ;;  %v2109_v20 = vmax.f32 %v2082_v11, 0.0  ;;  %11621 = vmatpush3.bf16.msra.mxu1 %v12299_v4  ;;  %v2858_v27 = vsel %vm2857_vm2, %v2856_v26, %v2854_v25 }
 0x1ae   : > { %11628 = vmatprep.subr.bf16.mxu0 %v12860_v18  ;;  %11622 = vmatprep.subr.bf16.mxu1 %v12860_v18  ;;  %v2252_v24 = vpack.c.bf16 %v2108_v14, %v2108_v14  ;;  %v2250_v49 = vpack.c.bf16 %v2106_v19, %v2106_v19  ;;  %v2859_v29 = vpack.c.b16 %v2858_v27, %v2858_v27  ;;  %v12302_v27 = vld [vmem:[%s12936_s30 + $0x8] sm:$0xff]  }
 0x1af   : > { %v2251_v22 = vpack.c.bf16 %v2107_v13, %v2107_v13  ;;  %v2253_v23 = vpack.c.bf16 %v2109_v20, %v2109_v20 }
 0x1b1   : > { %2781 = vmatprep.mubr.bf16.mxu0 %v2251_v22  ;;  %2829 = vmatprep.mubr.bf16.mxu1 %v2253_v23 }
 0x1b2   : > { %11623 = vmatpush3.bf16.msra.mxu1 %v12300_v21 }
 0x1b3   : > { %11644 = vmatprep.subr.bf16.mxu1 %v12860_v18 }
 0x1b4   : > { %2782 = vmatmul.mubr.bf16.gmra.mrb[28].mxu0 %v2250_v49  ;;  %2830 = vmatmul.mubr.bf16.gmra.mrb[28].mxu1 %v2252_v24 }
 0x1b5   : > { %11616 = vmatprep.mubr.msk.bf16.mxu0 %vm12861_vm3, %v12860_v18  ;;  %11624 = vmatprep.mubr.msk.bf16.mxu1 %vm12861_vm3, %v12860_v18 }
 0x1bc   : > { %11617 = vmatmul.mubr.msk.bf16.vlgmr.msra.gmra.mrb[32].mxu0 %vm2860_vm4, %v2859_v29  ;;  %11625 = vmatmul.mubr.msk.bf16.vlgmr.msra.gmra.mrb[32].mxu1 %vm2935_vm5, %v2915_v30 }
 0x1bd   : > { %11632 = vmatprep.mubr.msk.bf16.mxu0 %vm12861_vm3, %v12860_v18  ;;  %11648 = vmatprep.mubr.msk.bf16.mxu1 %vm12861_vm3, %v12860_v18 }
 0x1be   : > { %11629 = vmatpush3.bf16.msra.mxu0 %v12301_v48 }
 0x1bf   : > { %11630 = vmatprep.subr.bf16.mxu0 %v12860_v18 }
 0x1c2   : > { %11631 = vmatpush3.bf16.msra.mxu0 %v12302_v27 }
 0x1c3   : > { %11660 = vmatprep.subr.bf16.mxu0 %v12860_v18 }
 0x24f   : > { %v10999_v31 = vpop.f32.mrb[16].mxu0  ;;  %v11027_v33 = vpop.f32.mrb[16].mxu1 }
 0x250   : > { %v11000_v5 = vpop.f32.mrb[17].mxu0  ;;  %v11028_v36 = vpop.f32.mrb[17].mxu1 }
 0x251   : > { %v11001_v34 = vadd.f32 %v11000_v5, %v10999_v31  ;;  %v11002_v35 = vpop.f32.mrb[18].mxu0  ;;  %v11029_v38 = vadd.f32 %v11028_v36, %v11027_v33  ;;  %v11030_v53 = vpop.f32.mrb[18].mxu1 }
 0x252   : > { %v11003_v37 = vpop.f32.mrb[19].mxu0  ;;  %v11031_v41 = vpop.f32.mrb[19].mxu1 }
 0x253   : > { %v2680_v39 = vadd.f32 %v11001_v34, %v10156_v32  ;;  %v11004_v40 = vadd.f32 %v11003_v37, %v11002_v35  ;;  %v11032_v42 = vadd.f32 %v11031_v41, %v11030_v53 }
 0x255   : > { %v2683_v43 = vadd.f32 %v11004_v40, %v10156_v32  ;;  %v2728_v44 = vadd.f32 %v11029_v38, %v2680_v39 }
 0x257   : > { %v2731_v54 = vadd.f32 %v11032_v42, %v2683_v43  ;;  %v11005_v55 = vpop.f32.mrb[20].mxu0  ;;  %v11033_v57 = vpop.f32.mrb[20].mxu1  ;;  %v10223_v43 = vld [vmem:[%s15034_s19] ss:$0 sm:$0xff]  ;;  %s15047_s19 = sld [smem:[#allocation33_spill]] }
 0x258   : > { %v11006_v56 = vpop.f32.mrb[21].mxu0  ;;  %v11034_v61 = vpop.f32.mrb[21].mxu1 }
 0x259   : > { %v11007_v59 = vadd.f32 %v11006_v56, %v11005_v55  ;;  %v11008_v60 = vpop.f32.mrb[22].mxu0  ;;  %v11035_v63 = vadd.f32 %v11034_v61, %v11033_v57  ;;  %v11036_v0 = vpop.f32.mrb[22].mxu1  ;;  %v2983_v55 = vld [vmem:[%s15021_s24 + $0x8] sm:$0xf] }
 0x25a   : > { %v11009_v62 = vpop.f32.mrb[23].mxu0  ;;  %v11037_v2 = vpop.f32.mrb[23].mxu1  ;;  %v3011_v60 = vrot.slane %v2983_v55, 4 }
 0x25b   : > { %v2688_v1 = vadd.f32 %v11007_v59, %v10156_v32  ;;  %v10221_v32 = vld [vmem:[%s15033_s8] ss:$0 sm:$0xff]  ;;  %s15042_s8 = sld [smem:[#allocation25_spill]] }
 0x25d   : > { %v2736_v3 = vadd.f32 %v11035_v63, %v2688_v1 }
 0x27f   : > { %v11055_v4 = vpop.f32.mrb[24].mxu0  ;;  %v11083_v7 = vpop.f32.mrb[24].mxu1 }
 0x280   : > { %v11056_v6 = vpop.f32.mrb[25].mxu0  ;;  %v11084_v10 = vpop.f32.mrb[25].mxu1 }
 0x281   : > { %v11057_v8 = vadd.f32 %v11056_v6, %v11055_v4  ;;  %v11058_v9 = vpop.f32.mrb[26].mxu0  ;;  %v11085_v12 = vadd.f32 %v11084_v10, %v11083_v7  ;;  %v11086_v13 = vpop.f32.mrb[26].mxu1 }
 0x282   : > { %v11059_v11 = vpop.f32.mrb[27].mxu0  ;;  %v11087_v16 = vpop.f32.mrb[27].mxu1 }
 0x283   : > { %v2776_v14 = vadd.f32 %v11057_v8, %v2728_v44  ;;  %v11060_v15 = vadd.f32 %v11059_v11, %v11058_v9  ;;  %v11088_v17 = vadd.f32 %v11087_v16, %v11086_v13 }
 0x285   : > { %v2779_v19 = vadd.f32 %v11060_v15, %v2731_v54  ;;  %v2824_v20 = vadd.f32 %v11085_v12, %v2776_v14  ;;  %v2982_v54 = vld [vmem:[%s15021_s24] sm:$0xff]  ;;  %s15049_s24 = sld [smem:[#allocation30_spill]] }
 0x286   : > { %v3010_v61 = vrot.slane %v2982_v54, 4 }
 0x287   : > { %v2827_v21 = vadd.f32 %v11088_v17, %v2779_v19  ;;  %v11061_v22 = vpop.f32.mrb[28].mxu0  ;;  %v11089_v24 = vpop.f32.mrb[28].mxu1  ;;  %v2837_v57 = vmax.f32 %v2824_v20, 0.0 }
 0x288   : > { %v11062_v23 = vpop.f32.mrb[29].mxu0  ;;  %v11090_v49 = vpop.f32.mrb[29].mxu1  ;;  %v3012_v7 = vsel %vm3009_vm7, %v3010_v61, %v3011_v60 }
 0x289   : > { %v11063_v25 = vadd.f32 %v11062_v23, %v11061_v22  ;;  %v11064_v26 = vpop.f32.mrb[30].mxu0  ;;  %v11091_v28 = vadd.f32 %v11090_v49, %v11089_v24  ;;  %v11092_v29 = vpop.f32.mrb[30].mxu1  ;;  %v2838_v59 = vmax.f32 %v2827_v21, 0.0  ;;  %v10227_v22 = vld [vmem:[%s15035_s15] ss:$0 sm:$0xff]  ;;  %s15038_s15 = sld [smem:[#allocation19_spill]] }
 0x28a   : > { %v11065_v58 = vpop.f32.mrb[31].mxu0  ;;  %v11093_v48 = vpop.f32.mrb[31].mxu1 }
 0x28b   : > { %v2784_v30 = vadd.f32 %v11063_v25, %v2736_v3 }
 0x28d   : > { %v2832_v31 = vadd.f32 %v11091_v28, %v2784_v30 }
 0x28f   : > { %v2902_v5 = vpop.f32.mrb[32].mxu0  ;;  %v2973_v35 = vpop.f32.mrb[32].mxu1  ;;  %v2839_v6 = vmax.f32 %v2832_v31, 0.0 }
 0x290   : > { %v2903_v33 = vadd.f32 %v10221_v32, %v2902_v5  ;;  %v11618_v34 = vpop.f32.mrb[33].mxu0  ;;  %v11626_v37 = vpop.f32.mrb[33].mxu1  ;;  %v2974_v44 = vadd.f32 %v10223_v43, %v2973_v35 }
 0x291   : > { %v2905_v36 = vpop.f32.mrb[34].mxu0  ;;  %v2976_v39 = vpop.f32.mrb[34].mxu1 }
 0x292   : > { %v2908_v38 = vmax.f32 %v2903_v33, 0.0  ;;  %v11619_v53 = vpop.f32.mrb[35].mxu0  ;;  %v11627_v40 = vpop.f32.mrb[35].mxu1  ;;  %v2977_v56 = vadd.f32 %v10223_v43, %v2976_v39  ;;  %v2980_v62 = vmax.f32 %v2974_v44, 0.0 }
 0x294   : > { %v2987_v41 = vrot.slane %v2908_v38, %v13301_v47  ;;  %v3000_v42 = vrot.slane %v2908_v38, %v13304_v50  ;;  %v2981_v0 = vmax.f32 %v2977_v56, 0.0 }
 0x296   : > { %2989 = vrot.lane.b32.xlu0 %v2987_v41, %s14970_s2 }
 0x29a   : > { %3002 = vrot.lane.b32.xlu0 %v3000_v42, %s14970_s2  ;;  %s15039_s2 = sld [smem:[#allocation20_spill]] }
 0x308   : > { %v2990_v63 = vpop.permute.xlu0 %2989 }
 0x309   : > { %v2993_v1 = vsel %vm2992_vm6, %v2837_v57, %v2990_v63  ;;  %v2994_v2 = vsel %vm2992_vm6, %v2838_v59, %v2990_v63 }
 0x30a   : > { %v2995_v3 = vadd.f32 %v2993_v1, %v2982_v54  ;;  %v2996_v4 = vadd.f32 %v2994_v2, %v2983_v55 }
 0x30c   : > { %v3024_v8 = vsel %vm3009_vm7, %v2996_v4, 0.0  ;;  %v3030_v9 = vpack.c.bf16 %v2995_v3, %v2980_v62  ;;  %v3003_v10 = vpop.permute.xlu0 %3002 }
 0x30d   : > { %v3005_v11 = vsel %vm2992_vm6, %v2838_v59, %v3003_v10  ;;  %v3006_v12 = vsel %vm2992_vm6, %v2839_v6, %v3003_v10  ;;  %v3031_v13 = vpack.c.bf16 %v2981_v0, %v3024_v8 }
 0x30e   : > { %v3015_v14 = vadd.f32 %v3010_v61, %v3005_v11  ;;  %v3016_v15 = vadd.f32 %v3012_v7, %v3006_v12  ;;  %11633 = vmatmul.mubr.msk.bf16.vlgmr.msra.gmra.mrb[36].mxu0 %vm2935_vm5, %v3030_v9 }
 0x30f   : > { %11636 = vmatprep.mubr.msk.bf16.mxu0 %vm12861_vm3, %v12860_v18 }
 0x310   : > { %v3019_v16 = vrot.slane %v3015_v14, 4  ;;  %v3020_v17 = vrot.slane %v3016_v15, 4 }
 0x312   : > { %v3025_v19 = vsel %vm3009_vm7, %v3020_v17, 0.0  ;;  %v3021_v20 = vsel %vm3009_vm7, %v3019_v16, %v3020_v17 }
 0x313   : > { %v3032_v21 = vpack.c.bf16 %v3025_v19, %v3021_v20  ;;  %v12303_v20 = vld [vmem:[%s15036_s18] sm:$0xff]  }
 0x314   : > { %11661 = vmatpush3.bf16.msra.mxu0 %v12303_v20 }
 0x315   : > { %11662 = vmatprep.subr.bf16.mxu0 %v12860_v18 }
 0x316   : > { %11637 = vmatmul.mubr.msk.bf16.gmra.mrb[40].mxu0 %vm2935_vm5, %v3031_v13 }
 0x317   : > { %11640 = vmatprep.mubr.msk.bf16.mxu0 %vm12861_vm3, %v12860_v18 }
 0x31e   : > { %11641 = vmatmul.mubr.msk.bf16.gmra.mrb[44].mxu0 %vm2935_vm5, %v3032_v21  ;;  %v12304_v21 = vld [vmem:[%s15037_s20] sm:$0xff]  }
 0x31f   : > { %11664 = vmatprep.mubr.msk.bf16.mxu0 %vm12861_vm3, %v12860_v18  ;;  %11645 = vmatpush3.bf16.msra.mxu1 %v12304_v21 }
 0x320   : > { %11646 = vmatprep.subr.bf16.mxu1 %v12860_v18 }
 0x3e1   : > { %v3095_v23 = vpop.f32.mrb[36].mxu0 }
 0x3e2   : > { %v13414_v24 = vadd.f32 %v10227_v22, %v3095_v23  ;;  %v11634_v25 = vpop.f32.mrb[37].mxu0  ;;  %v12306_v23 = vld [vmem:[%s15036_s18 + $0x8] sm:$0xff]  }
 0x3e3   : > { %v3098_v26 = vpop.f32.mrb[38].mxu0  ;;  %11663 = vmatpush3.bf16.msra.mxu0 %v12306_v23 }
 0x3e4   : > { %v13416_v49 = vadd.f32 %v10227_v22, %v3098_v26  ;;  %v11635_v27 = vpop.f32.mrb[39].mxu0  ;;  %v3124_v58 = vsel %vm2935_vm5, %v13414_v24, 0.0 }
 0x3e5   : > { %3125 = vadd.xlane.f32.xlu1 %v3124_v58 }
 0x3e6   : > { %v3127_v28 = vsel %vm2935_vm5, %v13416_v49, 0.0 }
 0x3e9   : > { %3128 = vadd.xlane.f32.xlu1 %v3127_v28  ;;  %v3103_v29 = vpop.f32.mrb[40].mxu0 }
 0x3ea   : > { %v13422_v30 = vadd.f32 %v10227_v22, %v3103_v29  ;;  %v11638_v48 = vpop.f32.mrb[41].mxu0 }
 0x3eb   : > { %v3106_v31 = vpop.f32.mrb[42].mxu0 }
 0x3ec   : > { %v13424_v32 = vadd.f32 %v10227_v22, %v3106_v31  ;;  %v11639_v5 = vpop.f32.mrb[43].mxu0  ;;  %v3130_v33 = vsel %vm2935_vm5, %v13422_v30, 0.0 }
 0x3ed   : > { %3131 = vadd.xlane.f32.xlu0 %v3130_v33 }
 0x3ee   : > { %v3133_v34 = vsel %vm2935_vm5, %v13424_v32, 0.0 }
 0x3ef   : > { %3134 = vadd.xlane.f32.xlu1 %v3133_v34 }
 0x3f1   : > { %v3111_v35 = vpop.f32.mrb[44].mxu0 }
 0x3f2   : > { %v13430_v36 = vadd.f32 %v10227_v22, %v3111_v35  ;;  %v11642_v37 = vpop.f32.mrb[45].mxu0 }
 0x3f3   : > { %v3114_v38 = vpop.f32.mrb[46].mxu0 }
 0x3f4   : > { %v13432_v53 = vadd.f32 %v10227_v22, %v3114_v38  ;;  %v11643_v39 = vpop.f32.mrb[47].mxu0  ;;  %v3136_v40 = vsel %vm2935_vm5, %v13430_v36, 0.0  ;;  %v12305_v22 = vld [vmem:[%s15037_s20 + $0x8] sm:$0xff]  }
 0x3f5   : > { %3137 = vadd.xlane.f32.xlu1 %v3136_v40  ;;  %11647 = vmatpush3.bf16.msra.mxu1 %v12305_v22  ;;  %v10233_v40 = vld [vmem:[%s15038_s15] ss:$0 sm:$0xff] }
 0x3f6   : > { %v3139_v41 = vsel %vm2935_vm5, %v13432_v53, 0.0  ;;  %11676 = vmatprep.subr.bf16.mxu1 %v12860_v18 }
 0x3f9   : > { %3140 = vadd.xlane.f32.xlu1 %v3139_v41 }
 0x472   : > { %v3126_v42 = vpop.xlane.xlu1 %3125 }
 0x473   : > { %v3143_v43 = vmul.f32 0.03125, %v3126_v42 }
 0x475   : > { %v3149_v44 = vsub.f32 %v13414_v24, %v3143_v43 }
 0x476   : > { %v3129_v54 = vpop.xlane.xlu1 %3128 }
 0x477   : > { %v3144_v55 = vmul.f32 0.03125, %v3129_v54  ;;  %v3155_v56 = vmul.f32 %v3149_v44, %v3149_v44 }
 0x479   : > { %v13440_v57 = vsub.f32 %v13416_v49, %v3144_v55  ;;  %v3161_v59 = vsel %vm2935_vm5, %v3155_v56, 0.0 }
 0x47a   : > { %v3132_v60 = vpop.xlane.xlu0 %3131  ;;  %3162 = vadd.xlane.f32.xlu1 %v3161_v59  ;;  %v10234_v59 = vld [vmem:[%s15039_s2] ss:$0 sm:$0xff] }
 0x47b   : > { %v3145_v61 = vmul.f32 0.03125, %v3132_v60  ;;  %v3156_v62 = vmul.f32 %v13440_v57, %v13440_v57 }
 0x47c   : > { %v3135_v63 = vpop.xlane.xlu1 %3134 }
 0x47d   : > { %v13446_v0 = vsub.f32 %v13422_v30, %v3145_v61  ;;  %v3146_v1 = vmul.f32 0.03125, %v3135_v63  ;;  %v3164_v2 = vsel %vm2935_vm5, %v3156_v62, 0.0 }
 0x47e   : > { %3165 = vadd.xlane.f32.xlu1 %v3164_v2 }
 0x47f   : > { %v13450_v3 = vsub.f32 %v13424_v32, %v3146_v1  ;;  %v3157_v4 = vmul.f32 %v13446_v0, %v13446_v0 }
 0x481   : > { %v3167_v6 = vsel %vm2935_vm5, %v3157_v4, 0.0  ;;  %v3158_v7 = vmul.f32 %v13450_v3, %v13450_v3 }
 0x482   : > { %v3138_v8 = vpop.xlane.xlu1 %3137  ;;  %3168 = vadd.xlane.f32.xlu1 %v3167_v6  ;;  %v12307_v6 = vld [vmem:[%s15040_s3] sm:$0xff]  }
 0x483   : > { %v3147_v9 = vmul.f32 0.03125, %v3138_v8  ;;  %v3170_v11 = vsel %vm2935_vm5, %v3158_v7, 0.0 }
 0x485   : > { %v13458_v10 = vsub.f32 %v13430_v36, %v3147_v9  ;;  %v12308_v9 = vld [vmem:[%s15040_s3 + $0x8] sm:$0xff]  }
 0x486   : > { %3171 = vadd.xlane.f32.xlu1 %v3170_v11  ;;  %v3141_v12 = vpop.xlane.xlu1 %3140 }
 0x487   : > { %v3148_v13 = vmul.f32 0.03125, %v3141_v12  ;;  %v3159_v14 = vmul.f32 %v13458_v10, %v13458_v10 }
 0x489   : > { %v13464_v15 = vsub.f32 %v13432_v53, %v3148_v13  ;;  %v3173_v16 = vsel %vm2935_vm5, %v3159_v14, 0.0 }
 0x48a   : > { %3174 = vadd.xlane.f32.xlu1 %v3173_v16 }
 0x48b   : > { %v3160_v17 = vmul.f32 %v13464_v15, %v13464_v15 }
 0x48d   : > { %v3176_v19 = vsel %vm2935_vm5, %v3160_v17, 0.0 }
 0x48e   : > { %3177 = vadd.xlane.f32.xlu0 %v3176_v19 }
 0x507   : > { %v3163_v25 = vpop.xlane.xlu1 %3162 }
 0x508   : > { %v3179_v26 = vmul.f32 0.03125, %v3163_v25  ;;  %v10241_v25 = vld [vmem:[%s15042_s8] ss:$0 sm:$0xff] }
 0x50a   : > { %v3185_v27 = vadd.f32 1e-05, %v3179_v26 }
 0x50b   : > { %v3166_v58 = vpop.xlane.xlu1 %3165 }
 0x50c   : > { %12589 = vrsqrt.f32 %v3185_v27  ;;  %v3180_v28 = vmul.f32 0.03125, %v3166_v58 }
 0x50e   : > { %v3186_v29 = vadd.f32 1e-05, %v3180_v28 }
 0x50f   : > { %v3169_v48 = vpop.xlane.xlu1 %3168 }
 0x510   : > { %12591 = vrsqrt.f32 %v3186_v29  ;;  %v3181_v31 = vmul.f32 0.03125, %v3169_v48 }
 0x512   : > { %v3187_v5 = vadd.f32 1e-05, %v3181_v31 }
 0x513   : > { %v3172_v33 = vpop.xlane.xlu1 %3171 }
 0x514   : > { %12593 = vrsqrt.f32 %v3187_v5  ;;  %v3182_v34 = vmul.f32 0.03125, %v3172_v33 }
 0x516   : > { %v12590_v35 = vpop.eup %12589  ;;  %v3188_v37 = vadd.f32 1e-05, %v3182_v34 }
 0x517   : > { %v3197_v38 = vmul.f32 %v12590_v35, %v3149_v44  ;;  %v3175_v39 = vpop.xlane.xlu1 %3174 }
 0x518   : > { %12595 = vrsqrt.f32 %v3188_v37  ;;  %v3183_v41 = vmul.f32 0.03125, %v3175_v39 }
 0x519   : > { %v3209_v54 = vmul.f32 %v10233_v40, %v3197_v38 }
 0x51a   : > { %v12592_v42 = vpop.eup %12591  ;;  %v3189_v43 = vadd.f32 1e-05, %v3183_v41 }
 0x51b   : > { %v3198_v55 = vmul.f32 %v12592_v42, %v13440_v57  ;;  %v3178_v56 = vpop.xlane.xlu0 %3177  ;;  %v3221_v1 = vadd.f32 %v10234_v59, %v3209_v54 }
 0x51c   : > { %12597 = vrsqrt.f32 %v3189_v43  ;;  %v3184_v60 = vmul.f32 0.03125, %v3178_v56 }
 0x51d   : > { %v3210_v61 = vmul.f32 %v10233_v40, %v3198_v55 }
 0x51e   : > { %v12594_v62 = vpop.eup %12593  ;;  %v3190_v63 = vadd.f32 1e-05, %v3184_v60 }
 0x51f   : > { %v3222_v44 = vadd.f32 %v10234_v59, %v3210_v61  ;;  %v3199_v2 = vmul.f32 %v12594_v62, %v13446_v0 }
 0x520   : > { %12599 = vrsqrt.f32 %v3190_v63 }
 0x521   : > { %v13481_v4 = vpack.c.bf16 %v3222_v44, %v3221_v1  ;;  %v3211_v8 = vmul.f32 %v10233_v40, %v3199_v2 }
 0x522   : > { %v12596_v7 = vpop.eup %12595 }
 0x523   : > { %v3200_v57 = vmul.f32 %v12596_v7, %v13450_v3  ;;  %11649 = vmatmul.mubr.msk.bf16.vlgmr.msra.gmra.mrb[36].mxu1 %vm2935_vm5, %v13481_v4  ;;  %11665 = vmatmul.mubr.msk.bf16.vlgmr.msra.gmra.mrb[48].mxu0 %vm2935_vm5, %v13481_v4  ;;  %v3223_v12 = vadd.f32 %v10234_v59, %v3211_v8 }
 0x524   : > { %11652 = vmatprep.mubr.msk.bf16.mxu1 %vm12861_vm3, %v12860_v18  ;;  %11668 = vmatprep.mubr.msk.bf16.mxu0 %vm12861_vm3, %v12860_v18 }
 0x525   : > { %v3212_v0 = vmul.f32 %v10233_v40, %v3200_v57  ;;  %11677 = vmatpush3.bf16.msra.mxu1 %v12307_v6 }
 0x526   : > { %v12598_v11 = vpop.eup %12597  ;;  %11678 = vmatprep.subr.bf16.mxu1 %v12860_v18 }
 0x527   : > { %v3224_v3 = vadd.f32 %v10234_v59, %v3212_v0  ;;  %v3201_v13 = vmul.f32 %v12598_v11, %v13458_v10 }
 0x529   : > { %v13496_v14 = vpack.c.bf16 %v3224_v3, %v3223_v12  ;;  %11679 = vmatpush3.bf16.msra.mxu1 %v12308_v9  ;;  %v3213_v17 = vmul.f32 %v10233_v40, %v3201_v13 }
 0x52a   : > { %v12600_v16 = vpop.eup %12599 }
 0x52b   : > { %v3202_v19 = vmul.f32 %v12600_v16, %v13464_v15  ;;  %11653 = vmatmul.mubr.msk.bf16.gmra.mrb[40].mxu1 %vm2935_vm5, %v13496_v14  ;;  %11669 = vmatmul.mubr.msk.bf16.gmra.mrb[52].mxu0 %vm2935_vm5, %v13496_v14  ;;  %v3225_v20 = vadd.f32 %v10234_v59, %v3213_v17  ;;  %v13526_v15 = vld [vmem:[%s15041_s5] ss:$0 sm:$0xff] }
 0x52c   : > { %11656 = vmatprep.mubr.msk.bf16.mxu1 %vm12861_vm3, %v12860_v18  ;;  %11672 = vmatprep.mubr.msk.bf16.mxu0 %vm12861_vm3, %v12860_v18 }
 0x52d   : > { %v3214_v10 = vmul.f32 %v10233_v40, %v3202_v19 }
 0x52f   : > { %v3226_v21 = vadd.f32 %v10234_v59, %v3214_v10 }
 0x531   : > { %v13507_v22 = vpack.c.bf16 %v3226_v21, %v3225_v20  ;;  %v10247_v21 = vld [vmem:[%s15043_s9] ss:$0 sm:$0xff] }
 0x533   : > { %11657 = vmatmul.mubr.msk.bf16.gmra.mrb[44].mxu1 %vm2935_vm5, %v13507_v22  ;;  %11673 = vmatmul.mubr.msk.bf16.gmra.mrb[56].mxu0 %vm2935_vm5, %v13507_v22 }
 0x534   : > { %11680 = vmatprep.mubr.msk.bf16.mxu1 %vm12861_vm3, %v12860_v18 }
 0x53b   : > { %11681 = vmatmul.mubr.msk.bf16.vlgmr.msra.gmra.mrb[48].mxu1 %vm2935_vm5, %v13481_v4 }
 0x53c   : > { %11684 = vmatprep.mubr.msk.bf16.mxu1 %vm12861_vm3, %v12860_v18 }
 0x543   : > { %11685 = vmatmul.mubr.msk.bf16.gmra.mrb[52].mxu1 %vm2935_vm5, %v13496_v14 }
 0x544   : > { %11688 = vmatprep.mubr.msk.bf16.mxu1 %vm12861_vm3, %v12860_v18 }
 0x54b   : > { %11689 = vmatmul.mubr.msk.bf16.gmra.mrb[56].mxu1 %vm2935_vm5, %v13507_v22 }
 0x5f6   : > { %v3296_v23 = vpop.f32.mrb[36].mxu1  ;;  %v3376_v26 = vpop.f32.mrb[48].mxu0 }
 0x5f7   : > { %v11650_v27 = vpop.f32.mrb[37].mxu1  ;;  %v11666_v58 = vpop.f32.mrb[49].mxu0  ;;  %v3297_v48 = vadd.f32 %v13526_v15, %v3296_v23  ;;  %v3377_v31 = vadd.f32 %v10241_v25, %v3376_v26 }
 0x5f8   : > { %v3299_v28 = vpop.f32.mrb[38].mxu1  ;;  %v3379_v29 = vpop.f32.mrb[50].mxu0 }
 0x5f9   : > { %v3300_v5 = vadd.f32 %v13526_v15, %v3299_v28  ;;  %v3380_v33 = vadd.f32 %v10241_v25, %v3379_v29  ;;  %v11651_v34 = vpop.f32.mrb[39].mxu1  ;;  %v11667_v35 = vpop.f32.mrb[51].mxu0 }
 0x5fb   : > { %v3479_v37 = vpack.c.bf16 %v3300_v5, %v3297_v48  ;;  %v3481_v38 = vpack.c.bf16 %v3380_v33, %v3377_v31 }
 0x5fd   : > { %12124 = vmatprep.subr.msk.bf16.mxu0 %vm2992_vm6, %v3481_v38  ;;  %11696 = vmatprep.mubr.msk.bf16.mxu0 %vm2992_vm6, %v3479_v37  ;;  %v3490_v39 = vsel %vm2992_vm6, %v3481_v38, 0 }
 0x5fe   : > { %v3304_v40 = vpop.f32.mrb[40].mxu1  ;;  %v3384_v41 = vpop.f32.mrb[52].mxu0  ;;  %11693 = vmatpush3.bf16.xpose.msra.mxu0 %v3490_v39  ;;  %v12309_v39 = vld [vmem:[%s15036_s18 + $0x10] sm:$0xff]  }
 0x5ff   : > { %v3385_v42 = vadd.f32 %v10241_v25, %v3384_v41  ;;  %v11654_v43 = vpop.f32.mrb[41].mxu1  ;;  %v11670_v54 = vpop.f32.mrb[53].mxu0  ;;  %v3305_v63 = vadd.f32 %v13526_v15, %v3304_v40 }
 0x600   : > { %v3307_v55 = vpop.f32.mrb[42].mxu1  ;;  %v3387_v56 = vpop.f32.mrb[54].mxu0  ;;  %v12310_v43 = vld [vmem:[%s15036_s18 + $0x18] sm:$0xff]  }
 0x601   : > { %v3482_v59 = vpack.c.bf16 %v3385_v42, %v3385_v42  ;;  %v11655_v60 = vpop.f32.mrb[43].mxu1  ;;  %v11671_v61 = vpop.f32.mrb[55].mxu0  ;;  %v3308_v2 = vadd.f32 %v13526_v15, %v3307_v55  ;;  %v3388_v6 = vadd.f32 %v10241_v25, %v3387_v56  ;;  %v3480_v19 = vpack.c.bf16 %v3305_v63, %v3305_v63 }
 0x603   : > { %12125 = vmatprep.subr.msk.bf16.mxu0 %vm2992_vm6, %v3482_v59  ;;  %v3493_v62 = vsel %vm2992_vm6, %v3482_v59, 0 }
 0x606   : > { %v3312_v1 = vpop.f32.mrb[44].mxu1  ;;  %v3392_v44 = vpop.f32.mrb[56].mxu0  ;;  %11695 = vmatpush3.bf16.xpose.msra.mxu0 %v3493_v62  ;;  %v3119_v62 = vand.u32 127, %v1355_v45 }
 0x607   : > { %v3313_v7 = vadd.f32 %v13526_v15, %v3312_v1  ;;  %v3393_v8 = vadd.f32 %v10241_v25, %v3392_v44  ;;  %v11658_v57 = vpop.f32.mrb[45].mxu1  ;;  %v11674_v0 = vpop.f32.mrb[57].mxu0  ;;  %v12863_v1 = vmov -1e+09  }
 0x608   : > { %v3315_v9 = vpop.f32.mrb[46].mxu1  ;;  %v3395_v11 = vpop.f32.mrb[58].mxu0  ;;  %vm3120_vm8 = vcmp.lt.s32.totalorder %v3119_v62, 20 }
 0x609   : > { %v3644_v12 = vpack.c.bf16 %v3313_v7, %v3308_v2  ;;  %v3646_v3 = vpack.c.bf16 %v3393_v8, %v3388_v6  ;;  %v3396_v13 = vadd.f32 %v10241_v25, %v3395_v11  ;;  %v11659_v16 = vpop.f32.mrb[47].mxu1  ;;  %v11675_v17 = vpop.f32.mrb[59].mxu0  ;;  %v3316_v5 = vadd.f32 %v13526_v15, %v3315_v9 }
 0x60a   : > { %v13572_v44 = vsel %vm3120_vm8, 0.0, %v12863_v1 }
 0x60b   : > { %12127 = vmatprep.subr.msk.bf16.mxu0 %vm2992_vm6, %v3646_v3  ;;  %v3647_v10 = vpack.c.bf16 %v3396_v13, %v3396_v13  ;;  %v3655_v20 = vsel %vm2992_vm6, %v3646_v3, 0  ;;  %v3645_v40 = vpack.c.bf16 %v3316_v5, %v3316_v5 }
 0x60d   : > { %11697 = vmatmul.mubr.msk.bf16.vlgmr.msra.gmra.mrb[60].mxu0 %vm2992_vm6, %v3480_v19  ;;  %v3658_v48 = vsel %vm2992_vm6, %v3647_v10, 0 }
 0x60e   : > { %v3456_v23 = vpop.f32.mrb[48].mxu1  ;;  %11709 = vmatpush3.bf16.xpose.msra.mxu0 %v3655_v20  ;;  %11712 = vmatprep.mubr.msk.bf16.mxu0 %vm2992_vm6, %v3644_v12 }
 0x60f   : > { %v11682_v26 = vpop.f32.mrb[49].mxu1  ;;  %12128 = vmatprep.subr.msk.bf16.mxu0 %vm2992_vm6, %v3647_v10  ;;  %v3457_v25 = vadd.f32 %v10247_v21, %v3456_v23 }
 0x610   : > { %v3459_v27 = vpop.f32.mrb[50].mxu1 }
 0x611   : > { %v3460_v58 = vadd.f32 %v10247_v21, %v3459_v27  ;;  %v11683_v28 = vpop.f32.mrb[51].mxu1 }
 0x612   : > { %v10277_v28 = vld [vmem:[%s15042_s8 + $0x1] ss:$0 sm:$0xff] }
 0x613   : > { %v3585_v29 = vpack.c.bf16 %v3460_v58, %v3457_v25 }
 0x615   : > { %11700 = vmatprep.subr.bf16.mxu1 %v3585_v29 }
 0x616   : > { %v3464_v31 = vpop.f32.mrb[52].mxu1  ;;  %11701 = vmatpush3.bf16.msra.mxu1 %v3585_v29  ;;  %11711 = vmatpush3.bf16.xpose.msra.mxu0 %v3658_v48 }
 0x617   : > { %v3465_v33 = vadd.f32 %v10247_v21, %v3464_v31  ;;  %v11686_v34 = vpop.f32.mrb[53].mxu1  ;;  %11740 = vmatprep.subr.bf16.mxu0 %v12860_v18 }
 0x618   : > { %v3467_v35 = vpop.f32.mrb[54].mxu1 }
 0x619   : > { %v3586_v37 = vpack.c.bf16 %v3465_v33, %v3465_v33  ;;  %v11687_v38 = vpop.f32.mrb[55].mxu1  ;;  %v3468_v15 = vadd.f32 %v10247_v21, %v3467_v35 }
 0x61b   : > { %v3594_v41 = vsel %vm3009_vm7, %v3586_v37, 0  ;;  %12126 = vmatprep.subr.msk.bf16.mxu1 %vm3009_vm7, %v3586_v37 }
 0x61c   : > { %11703 = vmatpush3.bf16.msra.mxu1 %v3594_v41 }
 0x61d   : > { %11713 = vmatmul.mubr.msk.bf16.vlgmr.msra.gmra.mrb[64].mxu0 %vm2992_vm6, %v3645_v40 }
 0x61e   : > { %v3472_v42 = vpop.f32.mrb[56].mxu1  ;;  %11741 = vmatpush3.bf16.msra.mxu0 %v12309_v39  ;;  %11744 = vmatprep.mubr.msk.bf16.mxu0 %vm12861_vm3, %v12860_v18 }
 0x61f   : > { %v3473_v54 = vadd.f32 %v10247_v21, %v3472_v42  ;;  %v11690_v55 = vpop.f32.mrb[57].mxu1  ;;  %11742 = vmatprep.subr.bf16.mxu0 %v12860_v18 }
 0x620   : > { %v3475_v56 = vpop.f32.mrb[58].mxu1 }
 0x621   : > { %v13556_v59 = vpack.c.bf16 %v3473_v54, %v3468_v15  ;;  %v13558_v60 = vadd.f32 %v10247_v21, %v3475_v56  ;;  %v11691_v61 = vpop.f32.mrb[59].mxu1 }
 0x622   : > { %11743 = vmatpush3.bf16.msra.mxu0 %v12310_v43 }
 0x623   : > { %11716 = vmatprep.subr.bf16.mxu1 %v13556_v59 }
 0x625   : > { %11745 = vmatmul.mubr.msk.bf16.vlgmr.msra.gmra.mrb[68].mxu0 %vm2935_vm5, %v13481_v4 }
 0x626   : > { %11748 = vmatprep.mubr.msk.bf16.mxu0 %vm12861_vm3, %v12860_v18 }
 0x62d   : > { %11749 = vmatmul.mubr.msk.bf16.gmra.mrb[72].mxu0 %vm2935_vm5, %v13496_v14 }
 0x62e   : > { %11752 = vmatprep.mubr.msk.bf16.mxu0 %vm12861_vm3, %v12860_v18 }
 0x635   : > { %11753 = vmatmul.mubr.msk.bf16.gmra.mrb[76].mxu0 %vm2935_vm5, %v13507_v22 }
 0x6e0   : > { %v11698_v63 = vpop.f32.mrb[60].mxu0 }
 0x6e1   : > { %v3529_v2 = vpop.f32.mrb[61].mxu0  ;;  %v3545_v6 = vmul.f32 0.25, %v11698_v63 }
 0x6e2   : > { %v3543_v7 = vmul.f32 0.25, %v3529_v2  ;;  %v11699_v8 = vpop.f32.mrb[62].mxu0 }
 0x6e3   : > { %v3532_v57 = vpop.f32.mrb[63].mxu0  ;;  %v3548_v45 = vadd.f32 %v3545_v6, %v13572_v44 }
 0x6e4   : > { %v3544_v0 = vmul.f32 0.25, %v3532_v57  ;;  %v3546_v9 = vadd.f32 %v3543_v7, %v13572_v44 }
 0x6e5   : > { %v3556_v13 = vsel %vm3549_vm9, %v3548_v45, -inf }
 0x6e6   : > { %v3550_v11 = vsel %vm3549_vm9, %v3546_v9, -inf  ;;  %v3547_v12 = vadd.f32 %v3544_v0, %v13572_v44 }
 0x6e7   : > { %3551 = vmax.xlane.f32.xlu1 %v3550_v11 }
 0x6e8   : > { %v3553_v3 = vsel %vm3549_vm9, %v3547_v12, -inf }
 0x6e9   : > { %3554 = vmax.xlane.f32.xlu0 %v3553_v3 }
 0x6eb   : > { %3557 = vmax.xlane.f32.xlu1 %v3556_v13 }
 0x6f0   : > { %v11714_v16 = vpop.f32.mrb[64].mxu0 }
 0x6f1   : > { %v3694_v17 = vpop.f32.mrb[65].mxu0  ;;  %v3710_v19 = vmul.f32 0.25, %v11714_v16 }
 0x6f2   : > { %v3708_v10 = vmul.f32 0.25, %v3694_v17  ;;  %v11715_v20 = vpop.f32.mrb[66].mxu0 }
 0x6f3   : > { %v3697_v21 = vpop.f32.mrb[67].mxu0  ;;  %v13584_v58 = vadd.f32 %v3710_v19, %v13572_v44 }
 0x6f4   : > { %v3709_v23 = vmul.f32 0.25, %v3697_v21  ;;  %v3711_v26 = vadd.f32 %v3708_v10, %v13572_v44 }
 0x6f5   : > { %v3720_v33 = vsel %vm3549_vm9, %v13584_v58, -inf }
 0x6f6   : > { %v3714_v27 = vsel %vm3549_vm9, %v3711_v26, -inf  ;;  %v3712_v25 = vadd.f32 %v3709_v23, %v13572_v44 }
 0x6f7   : > { %3715 = vmax.xlane.f32.xlu0 %v3714_v27 }
 0x6f8   : > { %v3954_v29 = vpop.f32.mrb[68].mxu0  ;;  %v3717_v48 = vsel %vm3549_vm9, %v3712_v25, -inf }
 0x6f9   : > { %v11746_v31 = vpop.f32.mrb[69].mxu0  ;;  %3718 = vmax.xlane.f32.xlu1 %v3717_v48  ;;  %v3955_v34 = vadd.f32 %v10277_v28, %v3954_v29 }
 0x6fa   : > { %v3957_v5 = vpop.f32.mrb[70].mxu0 }
 0x6fb   : > { %v3958_v35 = vadd.f32 %v10277_v28, %v3957_v5  ;;  %v11747_v37 = vpop.f32.mrb[71].mxu0  ;;  %3721 = vmax.xlane.f32.xlu0 %v3720_v33 }
 0x6fd   : > { %v4061_v38 = vpack.c.bf16 %v3958_v35, %v3955_v34 }
 0x6ff   : > { %12130 = vmatprep.subr.msk.bf16.mxu0 %vm2992_vm6, %v4061_v38  ;;  %v4070_v39 = vsel %vm2992_vm6, %v4061_v38, 0 }
 0x700   : > { %v3962_v40 = vpop.f32.mrb[72].mxu0  ;;  %11773 = vmatpush3.bf16.xpose.msra.mxu0 %v4070_v39 }
 0x701   : > { %v3963_v41 = vadd.f32 %v10277_v28, %v3962_v40  ;;  %v11750_v42 = vpop.f32.mrb[73].mxu0 }
 0x702   : > { %v3965_v43 = vpop.f32.mrb[74].mxu0 }
 0x703   : > { %v4062_v15 = vpack.c.bf16 %v3963_v41, %v3963_v41  ;;  %v3966_v54 = vadd.f32 %v10277_v28, %v3965_v43  ;;  %v11751_v55 = vpop.f32.mrb[75].mxu0 }
 0x705   : > { %12131 = vmatprep.subr.msk.bf16.mxu0 %vm2992_vm6, %v4062_v15  ;;  %v4073_v56 = vsel %vm2992_vm6, %v4062_v15, 0 }
 0x708   : > { %v3970_v61 = vpop.f32.mrb[76].mxu0  ;;  %11775 = vmatpush3.bf16.xpose.msra.mxu0 %v4073_v56 }
 0x709   : > { %v3971_v62 = vadd.f32 %v10277_v28, %v3970_v61  ;;  %v11754_v63 = vpop.f32.mrb[77].mxu0 }
 0x70a   : > { %v3973_v1 = vpop.f32.mrb[78].mxu0 }
 0x70b   : > { %v13594_v2 = vpack.c.bf16 %v3971_v62, %v3966_v54  ;;  %v13596_v6 = vadd.f32 %v10277_v28, %v3973_v1  ;;  %v11755_v7 = vpop.f32.mrb[79].mxu0 }
 0x70c   : > { %v3750_v7 = vpack.c.bf16 %v13558_v60, %v13558_v60 }
 0x774   : > { %v3552_v8 = vpop.xlane.xlu1 %3551 }
 0x775   : > { %v3559_v57 = vsub.f32 %v3546_v9, %v3552_v8 }
 0x776   : > { %v3555_v0 = vpop.xlane.xlu0 %3554 }
 0x777   : > { %v3562_v11 = vmul.f32 1.442695, %v3559_v57  ;;  %v3560_v3 = vsub.f32 %v3547_v12, %v3555_v0  ;;  %v3758_v57 = vsel %vm3009_vm7, %v3750_v7, 0 }
 0x778   : > { %v3558_v13 = vpop.xlane.xlu1 %3557 }
 0x779   : > { %12601 = vpow2.f32 %v3562_v11  ;;  %v3564_v16 = vmul.f32 1.442695, %v3560_v3  ;;  %v3561_v17 = vsub.f32 %v3548_v45, %v3558_v13 }
 0x77b   : > { %12603 = vpow2.f32 %v3564_v16  ;;  %v3566_v19 = vmul.f32 1.442695, %v3561_v17 }
 0x77d   : > { %12605 = vpow2.f32 %v3566_v19  ;;  %v12311_v19 = vld [vmem:[%s15037_s20 + $0x10] sm:$0xff]  }
 0x783   : > { %v12602_v10 = vpop.eup %12601 }
 0x784   : > { %v3716_v20 = vpop.xlane.xlu0 %3715  ;;  %v3568_v21 = vsel %vm3549_vm9, %v12602_v10, 0.0 }
 0x785   : > { %v12604_v23 = vpop.eup %12603  ;;  %v3723_v27 = vsub.f32 %v3711_v26, %v3716_v20  ;;  %3569 = vadd.xlane.f32.xlu1 %v3568_v21  ;;  %v12313_v20 = vld [vmem:[%s15040_s3 + $0x10] sm:$0xff]   ;;  %v12314_v21 = vld [vmem:[%s15040_s3 + $0x18] sm:$0xff]  }
 0x786   : > { %v3719_v28 = vpop.xlane.xlu1 %3718  ;;  %v3571_v9 = vsel %vm3549_vm9, %v12604_v23, 0.0 }
 0x787   : > { %v12606_v29 = vpop.eup %12605  ;;  %v3726_v48 = vmul.f32 1.442695, %v3723_v27  ;;  %v3724_v12 = vsub.f32 %v3712_v25, %v3719_v28  ;;  %3572 = vadd.xlane.f32.xlu0 %v3571_v9  ;;  %v4234_v27 = vsel %vm2992_vm6, %v13594_v2, 0 }
 0x788   : > { %v3722_v31 = vpop.xlane.xlu0 %3721  ;;  %v3574_v45 = vsel %vm3549_vm9, %v12606_v29, 0.0 }
 0x789   : > { %12607 = vpow2.f32 %v3726_v48  ;;  %v3728_v5 = vmul.f32 1.442695, %v3724_v12  ;;  %v3725_v33 = vsub.f32 %v13584_v58, %v3722_v31  ;;  %3575 = vadd.xlane.f32.xlu1 %v3574_v45 }
 0x78b   : > { %12609 = vpow2.f32 %v3728_v5  ;;  %v3730_v34 = vmul.f32 1.442695, %v3725_v33  ;;  %v10266_v33 = vld [vmem:[%s15041_s5 + $0x1] ss:$0 sm:$0xff] }
 0x78d   : > { %12611 = vpow2.f32 %v3730_v34 }
 0x793   : > { %v12608_v26 = vpop.eup %12607 }
 0x794   : > { %v3732_v35 = vsel %vm3549_vm9, %v12608_v26, 0.0 }
 0x795   : > { %v12610_v37 = vpop.eup %12609  ;;  %3733 = vadd.xlane.f32.xlu0 %v3732_v35 }
 0x796   : > { %v3735_v38 = vsel %vm3549_vm9, %v12610_v37, 0.0 }
 0x797   : > { %v12612_v25 = vpop.eup %12611  ;;  %3736 = vadd.xlane.f32.xlu1 %v3735_v38 }
 0x798   : > { %v3738_v39 = vsel %vm3549_vm9, %v12612_v25, 0.0 }
 0x799   : > { %3739 = vadd.xlane.f32.xlu0 %v3738_v39 }
 0x812   : > { %v3570_v40 = vpop.xlane.xlu1 %3569 }
 0x813   : > { %12613 = vrcp.f32 %v3570_v40 }
 0x814   : > { %v3573_v41 = vpop.xlane.xlu0 %3572 }
 0x815   : > { %12615 = vrcp.f32 %v3573_v41 }
 0x816   : > { %v3576_v58 = vpop.xlane.xlu1 %3575 }
 0x817   : > { %12617 = vrcp.f32 %v3576_v58 }
 0x81d   : > { %v12614_v42 = vpop.eup %12613 }
 0x81e   : > { %v3578_v15 = vmul.f32 %v12614_v42, %v12602_v10  ;;  %v12312_v10 = vld [vmem:[%s15037_s20 + $0x18] sm:$0xff]  }
 0x81f   : > { %v12616_v43 = vpop.eup %12615 }
 0x820   : > { %v3580_v54 = vmul.f32 %v12616_v43, %v12604_v23  ;;  %v4226_v23 = vpack.c.bf16 %v13596_v6, %v13596_v6 }
 0x821   : > { %v12618_v55 = vpop.eup %12617 }
 0x822   : > { %v3582_v56 = vmul.f32 %v12618_v55, %v12606_v29  ;;  %v3734_v61 = vpop.xlane.xlu0 %3733  ;;  %v3583_v62 = vpack.c.bf16 %v3580_v54, %v3578_v15  ;;  %v4237_v28 = vsel %vm2992_vm6, %v4226_v23, 0 }
 0x823   : > { %12619 = vrcp.f32 %v3734_v61 }
 0x824   : > { %v3584_v63 = vpack.c.bf16 %v3582_v56, %v3582_v56  ;;  %v3737_v1 = vpop.xlane.xlu1 %3736  ;;  %11704 = vmatprep.mubr.msk.bf16.mxu1 %vm3549_vm9, %v3583_v62 }
 0x825   : > { %12621 = vrcp.f32 %v3737_v1 }
 0x826   : > { %11705 = vmatmul.mubr.msk.bf16.vlgmr.msra.gmra.mrb[60].mxu1 %vm3549_vm9, %v3584_v63  ;;  %v3740_v8 = vpop.xlane.xlu0 %3739 }
 0x827   : > { %11717 = vmatpush3.bf16.msra.mxu1 %v13556_v59  ;;  %12623 = vrcp.f32 %v3740_v8 }
 0x828   : > { %12129 = vmatprep.subr.msk.bf16.mxu1 %vm3009_vm7, %v3750_v7  ;;  %v12315_v7 = vld [vmem:[%s15044_s13] sm:$0xff]  }
 0x82b   : > { %11719 = vmatpush3.bf16.msra.mxu1 %v3758_v57  ;;  %v10288_v57 = vld [vmem:[%s15043_s9 + $0x1] ss:$0 sm:$0xff] }
 0x82c   : > { %11724 = vmatprep.subr.bf16.mxu1 %v12860_v18 }
 0x82d   : > { %v12620_v0 = vpop.eup %12619 }
 0x82e   : > { %v3742_v3 = vmul.f32 %v12620_v0, %v12608_v26 }
 0x82f   : > { %v12622_v11 = vpop.eup %12621 }
 0x830   : > { %v3744_v60 = vmul.f32 %v12622_v11, %v12610_v37 }
 0x831   : > { %v12624_v13 = vpop.eup %12623 }
 0x832   : > { %v3746_v16 = vmul.f32 %v12624_v13, %v12612_v25  ;;  %v3747_v17 = vpack.c.bf16 %v3744_v60, %v3742_v3 }
 0x834   : > { %11720 = vmatprep.mubr.msk.bf16.mxu1 %vm3549_vm9, %v3747_v17  ;;  %v3748_v59 = vpack.c.bf16 %v3746_v16, %v3746_v16 }
 0x836   : > { %11721 = vmatmul.mubr.msk.bf16.vlgmr.msra.gmra.mrb[64].mxu1 %vm3549_vm9, %v3748_v59 }
 0x837   : > { %11725 = vmatpush3.bf16.msra.mxu1 %v12311_v19  ;;  %11728 = vmatprep.mubr.msk.bf16.mxu1 %vm12861_vm3, %v12860_v18 }
 0x838   : > { %11726 = vmatprep.subr.bf16.mxu1 %v12860_v18 }
 0x83b   : > { %11727 = vmatpush3.bf16.msra.mxu1 %v12312_v10 }
 0x83c   : > { %11756 = vmatprep.subr.bf16.mxu1 %v12860_v18 }
 0x83e   : > { %11729 = vmatmul.mubr.msk.bf16.vlgmr.msra.gmra.mrb[68].mxu1 %vm2935_vm5, %v13481_v4 }
 0x83f   : > { %11757 = vmatpush3.bf16.msra.mxu1 %v12313_v20  ;;  %11732 = vmatprep.mubr.msk.bf16.mxu1 %vm12861_vm3, %v12860_v18 }
 0x840   : > { %11758 = vmatprep.subr.bf16.mxu1 %v12860_v18 }
 0x843   : > { %11759 = vmatpush3.bf16.msra.mxu1 %v12314_v21 }
 0x844   : > { %12133 = vmatprep.subr.msk.bf16.mxu1 %vm2992_vm6, %v13594_v2 }
 0x846   : > { %11733 = vmatmul.mubr.msk.bf16.gmra.mrb[72].mxu1 %vm2935_vm5, %v13496_v14 }
 0x847   : > { %11736 = vmatprep.mubr.msk.bf16.mxu1 %vm12861_vm3, %v12860_v18 }
 0x84e   : > { %11737 = vmatmul.mubr.msk.bf16.gmra.mrb[76].mxu1 %vm2935_vm5, %v13507_v22 }
 0x84f   : > { %11760 = vmatprep.mubr.msk.bf16.mxu1 %vm12861_vm3, %v12860_v18 }
 0x856   : > { %11761 = vmatmul.mubr.msk.bf16.vlgmr.msra.gmra.mrb[80].mxu1 %vm2935_vm5, %v13481_v4 }
 0x857   : > { %11789 = vmatpush3.bf16.xpose.msra.mxu1 %v4234_v27  ;;  %11764 = vmatprep.mubr.msk.bf16.mxu1 %vm12861_vm3, %v12860_v18 }
 0x858   : > { %12134 = vmatprep.subr.msk.bf16.mxu1 %vm2992_vm6, %v4226_v23 }
 0x85e   : > { %11765 = vmatmul.mubr.msk.bf16.gmra.mrb[84].mxu1 %vm2935_vm5, %v13496_v14 }
 0x85f   : > { %11791 = vmatpush3.bf16.xpose.msra.mxu1 %v4237_v28  ;;  %11768 = vmatprep.mubr.msk.bf16.mxu1 %vm12861_vm3, %v12860_v18 }
 0x860   : > { %11818 = vmatprep.subr.bf16.mxu1 %v12860_v18 }
 0x866   : > { %11769 = vmatmul.mubr.msk.bf16.gmra.mrb[88].mxu1 %vm2935_vm5, %v13507_v22 }
 0x8f9   : > { %v13655_v4 = vpop.f32.mrb[60].mxu1 }
 0x8fa   : > { %v3630_v2 = vpop.f32.mrb[61].mxu1 }
 0x8fb   : > { %v11707_v6 = vpop.f32.mrb[62].mxu1 }
 0x8fc   : > { %v3633_v9 = vpop.f32.mrb[63].mxu1 }
 0x8fd   : > { %v3810_v29 = vpack.c.bf16 %v3633_v9, %v3630_v2 }
 0x909   : > { %v13657_v48 = vpop.f32.mrb[64].mxu1 }
 0x90a   : > { %v3794_v12 = vpop.f32.mrb[65].mxu1 }
 0x90b   : > { %v3811_v14 = vpack.c.bf16 %v3794_v12, %v13655_v4  ;;  %v11723_v31 = vpop.f32.mrb[66].mxu1 }
 0x90c   : > { %v13660_v45 = vpop.f32.mrb[67].mxu1 }
 0x90d   : > { %v3812_v5 = vpack.c.bf16 %v13657_v48, %v13660_v45 }
 0x911   : > { %v3872_v34 = vpop.f32.mrb[68].mxu1 }
 0x912   : > { %v11730_v22 = vpop.f32.mrb[69].mxu1  ;;  %v3873_v35 = vadd.f32 %v10266_v33, %v3872_v34 }
 0x913   : > { %v3875_v26 = vpop.f32.mrb[70].mxu1 }
 0x914   : > { %v3876_v37 = vadd.f32 %v10266_v33, %v3875_v26  ;;  %v11731_v38 = vpop.f32.mrb[71].mxu1 }
 0x916   : > { %v4059_v25 = vpack.c.bf16 %v3876_v37, %v3873_v35 }
 0x918   : > { %11776 = vmatprep.mubr.msk.bf16.mxu0 %vm2992_vm6, %v4059_v25 }
 0x919   : > { %v3880_v39 = vpop.f32.mrb[72].mxu1 }
 0x91a   : > { %v3881_v40 = vadd.f32 %v10266_v33, %v3880_v39  ;;  %v11734_v41 = vpop.f32.mrb[73].mxu1 }
 0x91b   : > { %v3883_v58 = vpop.f32.mrb[74].mxu1 }
 0x91c   : > { %v4060_v42 = vpack.c.bf16 %v3881_v40, %v3881_v40  ;;  %v11735_v43 = vpop.f32.mrb[75].mxu1  ;;  %v3884_v54 = vadd.f32 %v10266_v33, %v3883_v58 }
 0x91e   : > { %11777 = vmatmul.mubr.msk.bf16.vlgmr.msra.gmra.mrb[80].mxu0 %vm2992_vm6, %v4060_v42 }
 0x921   : > { %v3888_v15 = vpop.f32.mrb[76].mxu1 }
 0x922   : > { %v3889_v55 = vadd.f32 %v10266_v33, %v3888_v15  ;;  %v11738_v56 = vpop.f32.mrb[77].mxu1 }
 0x923   : > { %v3891_v61 = vpop.f32.mrb[78].mxu1 }
 0x924   : > { %v4223_v62 = vpack.c.bf16 %v3889_v55, %v3884_v54  ;;  %v3892_v63 = vadd.f32 %v10266_v33, %v3891_v61  ;;  %v11739_v1 = vpop.f32.mrb[79].mxu1 }
 0x926   : > { %v4224_v8 = vpack.c.bf16 %v3892_v63, %v3892_v63  ;;  %11792 = vmatprep.mubr.msk.bf16.mxu1 %vm2992_vm6, %v4223_v62 }
 0x928   : > { %11793 = vmatmul.mubr.msk.bf16.vlgmr.msra.gmra.mrb[92].mxu1 %vm2992_vm6, %v4224_v8 }
 0x929   : > { %v4036_v0 = vpop.f32.mrb[80].mxu1  ;;  %11819 = vmatpush3.bf16.msra.mxu1 %v12315_v7  ;;  %11820 = vmatprep.mubr.msk.bf16.mxu1 %vm12861_vm3, %v12860_v18 }
 0x92a   : > { %v11762_v11 = vpop.f32.mrb[81].mxu1  ;;  %11848 = vmatprep.subr.bf16.mxu1 %v12860_v18  ;;  %v4037_v60 = vadd.f32 %v10288_v57, %v4036_v0 }
 0x92b   : > { %v4039_v3 = vpop.f32.mrb[82].mxu1 }
 0x92c   : > { %v4040_v13 = vadd.f32 %v10288_v57, %v4039_v3  ;;  %v11763_v16 = vpop.f32.mrb[83].mxu1 }
 0x92e   : > { %v4164_v17 = vpack.c.bf16 %v4040_v13, %v4037_v60 }
 0x930   : > { %11780 = vmatprep.subr.bf16.mxu0 %v4164_v17  ;;  %11821 = vmatmul.mubr.msk.bf16.vlgmr.msra.gmra.mrb[96].mxu1 %vm2992_vm6, %v3810_v29 }
 0x931   : > { %v4044_v19 = vpop.f32.mrb[84].mxu1  ;;  %11781 = vmatpush3.bf16.msra.mxu0 %v4164_v17  ;;  %11824 = vmatprep.mubr.msk.bf16.mxu1 %vm12861_vm3, %v12860_v18 }
 0x932   : > { %v4045_v59 = vadd.f32 %v10288_v57, %v4044_v19  ;;  %v11766_v10 = vpop.f32.mrb[85].mxu1 }
 0x933   : > { %v4047_v20 = vpop.f32.mrb[86].mxu1 }
 0x934   : > { %v4165_v21 = vpack.c.bf16 %v4045_v59, %v4045_v59  ;;  %v11767_v23 = vpop.f32.mrb[87].mxu1  ;;  %v4048_v4 = vadd.f32 %v10288_v57, %v4047_v20 }
 0x936   : > { %v4173_v27 = vsel %vm3009_vm7, %v4165_v21, 0  ;;  %12132 = vmatprep.subr.msk.bf16.mxu0 %vm3009_vm7, %v4165_v21 }
 0x937   : > { %11783 = vmatpush3.bf16.msra.mxu0 %v4173_v27 }
 0x938   : > { %11825 = vmatmul.mubr.msk.bf16.gmra.mrb[100].mxu1 %vm2992_vm6, %v3811_v14 }
 0x939   : > { %v4052_v28 = vpop.f32.mrb[88].mxu1  ;;  %11828 = vmatprep.mubr.msk.bf16.mxu1 %vm12861_vm3, %v12860_v18 }
 0x93a   : > { %v4053_v2 = vadd.f32 %v10288_v57, %v4052_v28  ;;  %v11770_v6 = vpop.f32.mrb[89].mxu1 }
 0x93b   : > { %v4055_v9 = vpop.f32.mrb[90].mxu1 }
 0x93c   : > { %v13682_v29 = vpack.c.bf16 %v4053_v2, %v4048_v4  ;;  %v13684_v12 = vadd.f32 %v10288_v57, %v4055_v9  ;;  %v11771_v31 = vpop.f32.mrb[91].mxu1 }
 0x93e   : > { %11796 = vmatprep.subr.bf16.mxu0 %v13682_v29 }
 0x940   : > { %11829 = vmatmul.mubr.msk.bf16.gmra.mrb[104].mxu1 %vm2992_vm6, %v3812_v5 }
 0x941   : > { %11864 = vmatprep.mubr.msk.bf16.mxu1 %vm12861_vm3, %v12860_v18 }
 0x9f1   : > { %v11778_v14 = vpop.f32.mrb[80].mxu0 }
 0x9f2   : > { %v4109_v33 = vpop.f32.mrb[81].mxu0  ;;  %v4125_v34 = vmul.f32 0.25, %v11778_v14 }
 0x9f3   : > { %v4123_v22 = vmul.f32 0.25, %v4109_v33  ;;  %v11779_v26 = vpop.f32.mrb[82].mxu0 }
 0x9f4   : > { %v4112_v35 = vpop.f32.mrb[83].mxu0  ;;  %v4128_v48 = vadd.f32 %v4125_v34, %v13572_v44 }
 0x9f5   : > { %v4124_v37 = vmul.f32 0.25, %v4112_v35  ;;  %v4126_v38 = vadd.f32 %v4123_v22, %v13572_v44 }
 0x9f6   : > { %v4135_v40 = vsel %vm3549_vm9, %v4128_v48, -inf }
 0x9f7   : > { %v4129_v25 = vsel %vm3549_vm9, %v4126_v38, -inf  ;;  %v4127_v39 = vadd.f32 %v4124_v37, %v13572_v44 }
 0x9f8   : > { %4130 = vmax.xlane.f32.xlu1 %v4129_v25 }
 0x9f9   : > { %v4132_v45 = vsel %vm3549_vm9, %v4127_v39, -inf }
 0x9fa   : > { %4133 = vmax.xlane.f32.xlu0 %v4132_v45 }
 0x9fb   : > { %v11794_v5 = vpop.f32.mrb[92].mxu1 }
 0x9fc   : > { %4136 = vmax.xlane.f32.xlu1 %v4135_v40  ;;  %v4273_v41 = vpop.f32.mrb[93].mxu1  ;;  %v4289_v58 = vmul.f32 0.25, %v11794_v5 }
 0x9fd   : > { %v4287_v42 = vmul.f32 0.25, %v4273_v41  ;;  %v11795_v43 = vpop.f32.mrb[94].mxu1 }
 0x9fe   : > { %v4276_v15 = vpop.f32.mrb[95].mxu1  ;;  %v4292_v62 = vadd.f32 %v4289_v58, %v13572_v44 }
 0x9ff   : > { %v4288_v54 = vmul.f32 0.25, %v4276_v15  ;;  %v4290_v55 = vadd.f32 %v4287_v42, %v13572_v44 }
 0xa00   : > { %v4299_v57 = vsel %vm3549_vm9, %v4292_v62, -inf }
 0xa01   : > { %v4293_v56 = vsel %vm3549_vm9, %v4290_v55, -inf  ;;  %v4291_v61 = vadd.f32 %v4288_v54, %v13572_v44 }
 0xa02   : > { %4294 = vmax.xlane.f32.xlu0 %v4293_v56 }
 0xa03   : > { %v13703_v63 = vpop.f32.mrb[96].mxu1  ;;  %v4296_v1 = vsel %vm3549_vm9, %v4291_v61, -inf }
 0xa04   : > { %v11822_v7 = vpop.f32.mrb[97].mxu1  ;;  %4297 = vmax.xlane.f32.xlu1 %v4296_v1 }
 0xa05   : > { %v13706_v8 = vpop.f32.mrb[98].mxu1 }
 0xa06   : > { %4300 = vmax.xlane.f32.xlu0 %v4299_v57  ;;  %v11823_v0 = vpop.f32.mrb[99].mxu1 }
 0xa0b   : > { %v13709_v11 = vpop.f32.mrb[100].mxu1 }
 0xa0c   : > { %v11826_v3 = vpop.f32.mrb[101].mxu1 }
 0xa0d   : > { %v13711_v60 = vpop.f32.mrb[102].mxu1 }
 0xa0e   : > { %v11827_v13 = vpop.f32.mrb[103].mxu1 }
 0xa13   : > { %v13713_v16 = vpop.f32.mrb[104].mxu1 }
 0xa14   : > { %v11830_v17 = vpop.f32.mrb[105].mxu1 }
 0xa15   : > { %v13715_v19 = vpop.f32.mrb[106].mxu1 }
 0xa16   : > { %v11831_v59 = vpop.f32.mrb[107].mxu1 }
 0xa85   : > { %v4131_v10 = vpop.xlane.xlu1 %4130 }
 0xa86   : > { %v4138_v20 = vsub.f32 %v4126_v38, %v4131_v10 }
 0xa87   : > { %v4134_v21 = vpop.xlane.xlu0 %4133 }
 0xa88   : > { %v4141_v23 = vmul.f32 1.442695, %v4138_v20  ;;  %v4139_v27 = vsub.f32 %v4127_v39, %v4134_v21  ;;  %v4329_v20 = vpack.c.bf16 %v13684_v12, %v13684_v12 }
 0xa89   : > { %v4137_v28 = vpop.xlane.xlu1 %4136 }
 0xa8a   : > { %12625 = vpow2.f32 %v4141_v23  ;;  %v4143_v4 = vmul.f32 1.442695, %v4139_v27  ;;  %v4140_v2 = vsub.f32 %v4128_v48, %v4137_v28  ;;  %v4337_v27 = vsel %vm3009_vm7, %v4329_v20, 0 }
 0xa8c   : > { %12627 = vpow2.f32 %v4143_v4  ;;  %v4145_v6 = vmul.f32 1.442695, %v4140_v2 }
 0xa8e   : > { %12629 = vpow2.f32 %v4145_v6 }
 0xa8f   : > { %v4295_v9 = vpop.xlane.xlu0 %4294 }
 0xa90   : > { %v4302_v31 = vsub.f32 %v4290_v55, %v4295_v9 }
 0xa91   : > { %v4298_v14 = vpop.xlane.xlu1 %4297 }
 0xa92   : > { %v4305_v33 = vmul.f32 1.442695, %v4302_v31  ;;  %v4303_v34 = vsub.f32 %v4291_v61, %v4298_v14 }
 0xa93   : > { %v4301_v22 = vpop.xlane.xlu0 %4300 }
 0xa94   : > { %v12626_v26 = vpop.eup %12625  ;;  %12631 = vpow2.f32 %v4305_v33  ;;  %v4307_v35 = vmul.f32 1.442695, %v4303_v34  ;;  %v4304_v37 = vsub.f32 %v4292_v62, %v4301_v22 }
 0xa95   : > { %v4147_v38 = vsel %vm3549_vm9, %v12626_v26, 0.0 }
 0xa96   : > { %v12628_v25 = vpop.eup %12627  ;;  %12633 = vpow2.f32 %v4307_v35  ;;  %v4309_v39 = vmul.f32 1.442695, %v4304_v37  ;;  %4148 = vadd.xlane.f32.xlu1 %v4147_v38 }
 0xa97   : > { %v4150_v48 = vsel %vm3549_vm9, %v12628_v25, 0.0 }
 0xa98   : > { %v12630_v45 = vpop.eup %12629  ;;  %12635 = vpow2.f32 %v4309_v39  ;;  %4151 = vadd.xlane.f32.xlu0 %v4150_v48 }
 0xa99   : > { %v4153_v5 = vsel %vm3549_vm9, %v12630_v45, 0.0 }
 0xa9a   : > { %4154 = vadd.xlane.f32.xlu1 %v4153_v5 }
 0xa9e   : > { %v12632_v40 = vpop.eup %12631 }
 0xa9f   : > { %v4311_v41 = vsel %vm3549_vm9, %v12632_v40, 0.0 }
 0xaa0   : > { %v12634_v58 = vpop.eup %12633  ;;  %4312 = vadd.xlane.f32.xlu0 %v4311_v41 }
 0xaa1   : > { %v4314_v42 = vsel %vm3549_vm9, %v12634_v58, 0.0 }
 0xaa2   : > { %v12636_v43 = vpop.eup %12635  ;;  %4315 = vadd.xlane.f32.xlu1 %v4314_v42 }
 0xaa3   : > { %v4317_v15 = vsel %vm3549_vm9, %v12636_v43, 0.0 }
 0xaa4   : > { %4318 = vadd.xlane.f32.xlu0 %v4317_v15 }
 0xb23   : > { %v4149_v54 = vpop.xlane.xlu1 %4148 }
 0xb24   : > { %12637 = vrcp.f32 %v4149_v54 }
 0xb25   : > { %v4152_v55 = vpop.xlane.xlu0 %4151 }
 0xb26   : > { %12639 = vrcp.f32 %v4152_v55 }
 0xb27   : > { %v4155_v56 = vpop.xlane.xlu1 %4154 }
 0xb28   : > { %12641 = vrcp.f32 %v4155_v56 }
 0xb2d   : > { %v4313_v61 = vpop.xlane.xlu0 %4312 }
 0xb2e   : > { %v12638_v62 = vpop.eup %12637  ;;  %12643 = vrcp.f32 %v4313_v61 }
 0xb2f   : > { %v4316_v1 = vpop.xlane.xlu1 %4315  ;;  %v4157_v0 = vmul.f32 %v12638_v62, %v12626_v26 }
 0xb30   : > { %v12640_v7 = vpop.eup %12639  ;;  %12645 = vrcp.f32 %v4316_v1 }
 0xb31   : > { %v4319_v57 = vpop.xlane.xlu0 %4318  ;;  %v4159_v3 = vmul.f32 %v12640_v7, %v12628_v25 }
 0xb32   : > { %v12642_v13 = vpop.eup %12641  ;;  %12647 = vrcp.f32 %v4319_v57 }
 0xb33   : > { %v4161_v17 = vmul.f32 %v12642_v13, %v12630_v45  ;;  %v4162_v59 = vpack.c.bf16 %v4159_v3, %v4157_v0 }
 0xb35   : > { %11784 = vmatprep.mubr.msk.bf16.mxu0 %vm3549_vm9, %v4162_v59  ;;  %v4163_v10 = vpack.c.bf16 %v4161_v17, %v4161_v17 }
 0xb37   : > { %11785 = vmatmul.mubr.msk.bf16.vlgmr.msra.gmra.mrb[84].mxu0 %vm3549_vm9, %v4163_v10 }
 0xb38   : > { %v12644_v21 = vpop.eup %12643  ;;  %11797 = vmatpush3.bf16.msra.mxu0 %v13682_v29  ;;  %v12316_v29 = vld [vmem:[%s15044_s13 + $0x8] sm:$0xff]  }
 0xb39   : > { %12135 = vmatprep.subr.msk.bf16.mxu0 %vm3009_vm7, %v4329_v20  ;;  %v4321_v28 = vmul.f32 %v12644_v21, %v12632_v40  ;;  %v10312_v40 = vld [vmem:[%s15045_s14] ss:$0 sm:$0xff] }
 0xb3a   : > { %v12646_v23 = vpop.eup %12645 }
 0xb3b   : > { %v4323_v4 = vmul.f32 %v12646_v23, %v12634_v58 }
 0xb3c   : > { %v12648_v2 = vpop.eup %12647  ;;  %11799 = vmatpush3.bf16.msra.mxu0 %v4337_v27 }
 0xb3d   : > { %v4325_v6 = vmul.f32 %v12648_v2, %v12636_v43  ;;  %v4326_v9 = vpack.c.bf16 %v4323_v4, %v4321_v28  ;;  %11804 = vmatprep.subr.bf16.mxu0 %v12860_v18 }
 0xb3f   : > { %11800 = vmatprep.mubr.msk.bf16.mxu0 %vm3549_vm9, %v4326_v9  ;;  %v4327_v12 = vpack.c.bf16 %v4325_v6, %v4325_v6 }
 0xb41   : > { %11801 = vmatmul.mubr.msk.bf16.vlgmr.msra.gmra.mrb[88].mxu0 %vm3549_vm9, %v4327_v12 }
 0xb42   : > { %11806 = vmatprep.mubr.msk.bf16.mxu0 %vm12861_vm3, %v12860_v18  ;;  %11805 = vmatpush3.bf16.msra.mxu0 %v12316_v29 }
 0xb43   : > { %11832 = vmatprep.subr.bf16.mxu0 %v12860_v18 }
 0xc0a   : > { %v11786_v31 = vpop.f32.mrb[84].mxu0 }
 0xc0b   : > { %v4209_v14 = vpop.f32.mrb[85].mxu0 }
 0xc0c   : > { %v11787_v33 = vpop.f32.mrb[86].mxu0 }
 0xc0d   : > { %v4212_v34 = vpop.f32.mrb[87].mxu0 }
 0xc0e   : > { %v4390_v22 = vpack.c.bf16 %v4212_v34, %v4209_v14 }
 0xc10   : > { %11807 = vmatmul.mubr.msk.bf16.vlgmr.msra.gmra.mrb[92].mxu0 %vm2992_vm6, %v4390_v22 }
 0xc11   : > { %11810 = vmatprep.mubr.msk.bf16.mxu0 %vm12861_vm3, %v12860_v18 }
 0xc14   : > { %v11802_v26 = vpop.f32.mrb[88].mxu0 }
 0xc15   : > { %v4373_v35 = vpop.f32.mrb[89].mxu0 }
 0xc16   : > { %v4391_v37 = vpack.c.bf16 %v4373_v35, %v11786_v31  ;;  %v11803_v38 = vpop.f32.mrb[90].mxu0 }
 0xc17   : > { %v4376_v25 = vpop.f32.mrb[91].mxu0 }
 0xc18   : > { %v4392_v39 = vpack.c.bf16 %v11802_v26, %v4376_v25  ;;  %11811 = vmatmul.mubr.msk.bf16.gmra.mrb[96].mxu0 %vm2992_vm6, %v4391_v37 }
 0xc19   : > { %11814 = vmatprep.mubr.msk.bf16.mxu0 %vm12861_vm3, %v12860_v18 }
 0xc20   : > { %11815 = vmatmul.mubr.msk.bf16.gmra.mrb[100].mxu0 %vm2992_vm6, %v4392_v39 }
 0xc21   : > { %11836 = vmatprep.mubr.msk.bf16.mxu0 %vm12861_vm3, %v12860_v18 }
 0xce3   : > { %v4442_v48 = vpop.f32.mrb[92].mxu0 }
 0xce4   : > { %v4515_v45 = vadd.f32 %v13703_v63, %v4442_v48  ;;  %v11808_v5 = vpop.f32.mrb[93].mxu0 }
 0xce5   : > { %v4445_v41 = vpop.f32.mrb[94].mxu0 }
 0xce6   : > { %v4537_v58 = vadd.f32 %v4515_v45, %v13414_v24  ;;  %v4518_v42 = vadd.f32 %v13706_v8, %v4445_v41  ;;  %v11809_v43 = vpop.f32.mrb[95].mxu0 }
 0xce8   : > { %v13750_v15 = vadd.f32 %v10312_v40, %v4537_v58  ;;  %v4538_v54 = vadd.f32 %v4518_v42, %v13416_v49 }
 0xcea   : > { %v13753_v55 = vadd.f32 %v10312_v40, %v4538_v54  ;;  %v4558_v56 = vsel %vm2935_vm5, %v13750_v15, 0.0 }
 0xceb   : > { %4559 = vadd.xlane.f32.xlu1 %v4558_v56  ;;  %v4450_v61 = vpop.f32.mrb[96].mxu0 }
 0xcec   : > { %v4523_v63 = vadd.f32 %v13709_v11, %v4450_v61  ;;  %v11812_v62 = vpop.f32.mrb[97].mxu0  ;;  %v4561_v24 = vsel %vm2935_vm5, %v13753_v55, 0.0  ;;  %v12317_v61 = vld [vmem:[%s15046_s17] sm:$0xff]  }
 0xced   : > { %4562 = vadd.xlane.f32.xlu0 %v4561_v24  ;;  %v4453_v8 = vpop.f32.mrb[98].mxu0  ;;  %11833 = vmatpush3.bf16.msra.mxu0 %v12317_v61  ;;  %v12319_v62 = vld [vmem:[%s15047_s19] sm:$0xff]   ;;  %v12320_v24 = vld [vmem:[%s15047_s19 + $0x8] sm:$0xff]  }
 0xcee   : > { %v4539_v1 = vadd.f32 %v4523_v63, %v13422_v30  ;;  %v4526_v7 = vadd.f32 %v13711_v60, %v4453_v8  ;;  %v11813_v49 = vpop.f32.mrb[99].mxu0  ;;  %11834 = vmatprep.subr.bf16.mxu0 %v12860_v18  ;;  %v12318_v63 = vld [vmem:[%s15046_s17 + $0x8] sm:$0xff]   ;;  %11849 = vmatpush3.bf16.msra.mxu1 %v12319_v62  ;;  %v12321_v8 = vld [vmem:[%s15047_s19 + $0x10] sm:$0xff]  }
 0xcef   : > { %11850 = vmatprep.subr.bf16.mxu1 %v12860_v18  ;;  %v12324_v49 = vld [vmem:[%s15047_s19 + $0x28] sm:$0xff]  }
 0xcf0   : > { %v13762_v57 = vadd.f32 %v10312_v40, %v4539_v1  ;;  %v4540_v0 = vadd.f32 %v4526_v7, %v13424_v32  ;;  %v12322_v1 = vld [vmem:[%s15047_s19 + $0x18] sm:$0xff]   ;;  %v12323_v7 = vld [vmem:[%s15047_s19 + $0x20] sm:$0xff]  }
 0xcf1   : > { %11835 = vmatpush3.bf16.msra.mxu0 %v12318_v63 }
 0xcf2   : > { %v13765_v3 = vadd.f32 %v10312_v40, %v4540_v0  ;;  %v4564_v11 = vsel %vm2935_vm5, %v13762_v57, 0.0  ;;  %11876 = vmatprep.subr.bf16.mxu0 %v12860_v18  ;;  %11851 = vmatpush3.bf16.msra.mxu1 %v12320_v24 }
 0xcf3   : > { %4565 = vadd.xlane.f32.xlu1 %v4564_v11  ;;  %v4458_v13 = vpop.f32.mrb[100].mxu0  ;;  %11852 = vmatprep.subr.bf16.mxu1 %v12860_v18 }
 0xcf4   : > { %v4531_v17 = vadd.f32 %v13713_v16, %v4458_v13  ;;  %v11816_v59 = vpop.f32.mrb[101].mxu0  ;;  %v4567_v30 = vsel %vm2935_vm5, %v13765_v3, 0.0 }
 0xcf5   : > { %4568 = vadd.xlane.f32.xlu0 %v4567_v30  ;;  %v4461_v60 = vpop.f32.mrb[102].mxu0 }
 0xcf6   : > { %v4541_v10 = vadd.f32 %v4531_v17, %v13430_v36  ;;  %v4534_v20 = vadd.f32 %v13715_v19, %v4461_v60  ;;  %v11817_v32 = vpop.f32.mrb[103].mxu0  ;;  %11853 = vmatpush3.bf16.msra.mxu1 %v12321_v8 }
 0xcf7   : > { %11854 = vmatprep.subr.bf16.mxu1 %v12860_v18 }
 0xcf8   : > { %v13774_v21 = vadd.f32 %v10312_v40, %v4541_v10  ;;  %v4542_v23 = vadd.f32 %v4534_v20, %v13432_v53 }
 0xcfa   : > { %v13777_v27 = vadd.f32 %v10312_v40, %v4542_v23  ;;  %v4570_v16 = vsel %vm2935_vm5, %v13774_v21, 0.0  ;;  %11855 = vmatpush3.bf16.msra.mxu1 %v12322_v1 }
 0xcfb   : > { %4571 = vadd.xlane.f32.xlu1 %v4570_v16  ;;  %11856 = vmatprep.subr.bf16.mxu1 %v12860_v18 }
 0xcfc   : > { %v4573_v28 = vsel %vm2935_vm5, %v13777_v27, 0.0 }
 0xcfd   : > { %4574 = vadd.xlane.f32.xlu0 %v4573_v28 }
 0xcfe   : > { %11857 = vmatpush3.bf16.msra.mxu1 %v12323_v7  ;;  %v10315_v7 = vld [vmem:[%s15050_s25] ss:$0 sm:$0xff] }
 0xcff   : > { %11858 = vmatprep.subr.bf16.mxu1 %v12860_v18 }
 0xd02   : > { %11859 = vmatpush3.bf16.msra.mxu1 %v12324_v49 }
 0xd03   : > { %11860 = vmatprep.subr.bf16.mxu1 %v12860_v18 }
 0xd78   : > { %v4560_v4 = vpop.xlane.xlu1 %4559 }
 0xd79   : > { %v4576_v2 = vmul.f32 0.03125, %v4560_v4  ;;  %v10313_v4 = vld [vmem:[%s15048_s21] ss:$0 sm:$0xff] }
 0xd7a   : > { %v4563_v36 = vpop.xlane.xlu0 %4562 }
 0xd7b   : > { %v13784_v19 = vsub.f32 %v13750_v15, %v4576_v2  ;;  %v4577_v6 = vmul.f32 0.03125, %v4563_v36 }
 0xd7d   : > { %v13787_v9 = vsub.f32 %v13753_v55, %v4577_v6  ;;  %v4588_v53 = vmul.f32 %v13784_v19, %v13784_v19 }
 0xd7f   : > { %v4594_v12 = vsel %vm2935_vm5, %v4588_v53, 0.0  ;;  %v4589_v29 = vmul.f32 %v13787_v9, %v13787_v9 }
 0xd80   : > { %v4566_v31 = vpop.xlane.xlu1 %4565  ;;  %4595 = vadd.xlane.f32.xlu1 %v4594_v12 }
 0xd81   : > { %v4578_v14 = vmul.f32 0.03125, %v4566_v31  ;;  %v4597_v33 = vsel %vm2935_vm5, %v4589_v29, 0.0 }
 0xd82   : > { %v4569_v34 = vpop.xlane.xlu0 %4568  ;;  %4598 = vadd.xlane.f32.xlu0 %v4597_v33 }
 0xd83   : > { %v13796_v22 = vsub.f32 %v13762_v57, %v4578_v14  ;;  %v4579_v26 = vmul.f32 0.03125, %v4569_v34  ;;  %v10314_v14 = vld [vmem:[%s15049_s24] ss:$0 sm:$0xff] }
 0xd85   : > { %v13799_v35 = vsub.f32 %v13765_v3, %v4579_v26  ;;  %v4590_v37 = vmul.f32 %v13796_v22, %v13796_v22 }
 0xd87   : > { %v4600_v38 = vsel %vm2935_vm5, %v4590_v37, 0.0  ;;  %v4591_v25 = vmul.f32 %v13799_v35, %v13799_v35 }
 0xd88   : > { %4601 = vadd.xlane.f32.xlu1 %v4600_v38  ;;  %v4572_v39 = vpop.xlane.xlu1 %4571 }
 0xd89   : > { %v4580_v48 = vmul.f32 0.03125, %v4572_v39  ;;  %v4603_v45 = vsel %vm2935_vm5, %v4591_v25, 0.0 }
 0xd8a   : > { %4604 = vadd.xlane.f32.xlu0 %v4603_v45  ;;  %v4575_v5 = vpop.xlane.xlu0 %4574 }
 0xd8b   : > { %v13808_v40 = vsub.f32 %v13774_v21, %v4580_v48  ;;  %v4581_v41 = vmul.f32 0.03125, %v4575_v5 }
 0xd8d   : > { %v13811_v58 = vsub.f32 %v13777_v27, %v4581_v41  ;;  %v4592_v42 = vmul.f32 %v13808_v40, %v13808_v40 }
 0xd8f   : > { %v4606_v43 = vsel %vm2935_vm5, %v4592_v42, 0.0  ;;  %v4593_v54 = vmul.f32 %v13811_v58, %v13811_v58 }
 0xd90   : > { %4607 = vadd.xlane.f32.xlu1 %v4606_v43 }
 0xd91   : > { %v4609_v56 = vsel %vm2935_vm5, %v4593_v54, 0.0 }
 0xd92   : > { %4610 = vadd.xlane.f32.xlu0 %v4609_v56 }
 0xe0d   : > { %v4596_v0 = vpop.xlane.xlu1 %4595 }
 0xe0e   : > { %v4612_v11 = vmul.f32 0.03125, %v4596_v0 }
 0xe0f   : > { %v4599_v13 = vpop.xlane.xlu0 %4598 }
 0xe10   : > { %v4618_v17 = vadd.f32 1e-05, %v4612_v11  ;;  %v4613_v59 = vmul.f32 0.03125, %v4599_v13 }
 0xe12   : > { %12649 = vrsqrt.f32 %v4618_v17  ;;  %v4619_v30 = vadd.f32 1e-05, %v4613_v59 }
 0xe14   : > { %12651 = vrsqrt.f32 %v4619_v30 }
 0xe15   : > { %v4602_v60 = vpop.xlane.xlu1 %4601 }
 0xe16   : > { %v4614_v10 = vmul.f32 0.03125, %v4602_v60 }
 0xe17   : > { %v4605_v20 = vpop.xlane.xlu0 %4604 }
 0xe18   : > { %v4620_v32 = vadd.f32 1e-05, %v4614_v10  ;;  %v4615_v23 = vmul.f32 0.03125, %v4605_v20 }
 0xe1a   : > { %12653 = vrsqrt.f32 %v4620_v32  ;;  %v4621_v16 = vadd.f32 1e-05, %v4615_v23 }
 0xe1c   : > { %v12650_v28 = vpop.eup %12649  ;;  %12655 = vrsqrt.f32 %v4621_v16 }
 0xe1d   : > { %v4630_v2 = vmul.f32 %v12650_v28, %v13784_v19  ;;  %v4608_v36 = vpop.xlane.xlu1 %4607 }
 0xe1e   : > { %v12652_v6 = vpop.eup %12651  ;;  %v4616_v53 = vmul.f32 0.03125, %v4608_v36 }
 0xe1f   : > { %v4642_v12 = vmul.f32 %v10313_v4, %v4630_v2  ;;  %v4631_v29 = vmul.f32 %v12652_v6, %v13787_v9  ;;  %v4611_v31 = vpop.xlane.xlu0 %4610 }
 0xe20   : > { %v4622_v33 = vadd.f32 1e-05, %v4616_v53  ;;  %v4617_v34 = vmul.f32 0.03125, %v4611_v31 }
 0xe21   : > { %v4643_v26 = vmul.f32 %v10313_v4, %v4631_v29  ;;  %v4654_v38 = vadd.f32 %v10314_v14, %v4642_v12 }
 0xe22   : > { %12657 = vrsqrt.f32 %v4622_v33  ;;  %v4623_v37 = vadd.f32 1e-05, %v4617_v34 }
 0xe23   : > { %v4655_v25 = vadd.f32 %v10314_v14, %v4643_v26 }
 0xe24   : > { %v12654_v39 = vpop.eup %12653  ;;  %12659 = vrsqrt.f32 %v4623_v37 }
 0xe25   : > { %v4632_v48 = vmul.f32 %v12654_v39, %v13796_v22  ;;  %v4664_v19 = vpack.c.bf16 %v4655_v25, %v4654_v38  ;;  %v10329_v25 = vld [vmem:[%s15051_s29] ss:$0 sm:$0xff] }
 0xe26   : > { %v12656_v45 = vpop.eup %12655 }
 0xe27   : > { %v4633_v5 = vmul.f32 %v12656_v45, %v13799_v35  ;;  %11837 = vmatmul.mubr.msk.bf16.vlgmr.msra.gmra.mrb[104].mxu0 %vm2935_vm5, %v4664_v19  ;;  %v4644_v9 = vmul.f32 %v10313_v4, %v4632_v48 }
 0xe28   : > { %11840 = vmatprep.mubr.msk.bf16.mxu0 %vm12861_vm3, %v12860_v18 }
 0xe29   : > { %v4645_v41 = vmul.f32 %v10313_v4, %v4633_v5  ;;  %v4656_v42 = vadd.f32 %v10314_v14, %v4644_v9 }
 0xe2b   : > { %v4657_v43 = vadd.f32 %v10314_v14, %v4645_v41 }
 0xe2c   : > { %v12658_v54 = vpop.eup %12657 }
 0xe2d   : > { %v4634_v56 = vmul.f32 %v12658_v54, %v13808_v40  ;;  %v4665_v61 = vpack.c.bf16 %v4657_v43, %v4656_v42  ;;  %v12325_v40 = vld [vmem:[%s15047_s19 + $0x30] sm:$0xff]  }
 0xe2e   : > { %v12660_v22 = vpop.eup %12659  ;;  %11861 = vmatpush3.bf16.msra.mxu1 %v12325_v40 }
 0xe2f   : > { %v4635_v63 = vmul.f32 %v12660_v22, %v13811_v58  ;;  %11841 = vmatmul.mubr.msk.bf16.gmra.mrb[108].mxu0 %vm2935_vm5, %v4665_v61  ;;  %v4646_v35 = vmul.f32 %v10313_v4, %v4634_v56  ;;  %11862 = vmatprep.subr.bf16.mxu1 %v12860_v18  ;;  %v12326_v58 = vld [vmem:[%s15047_s19 + $0x38] sm:$0xff]  }
 0xe30   : > { %11844 = vmatprep.mubr.msk.bf16.mxu0 %vm12861_vm3, %v12860_v18 }
 0xe31   : > { %v4647_v62 = vmul.f32 %v10313_v4, %v4635_v63  ;;  %v4658_v24 = vadd.f32 %v10314_v14, %v4646_v35 }
 0xe32   : > { %11863 = vmatpush3.bf16.msra.mxu1 %v12326_v58 }
 0xe33   : > { %v4659_v8 = vadd.f32 %v10314_v14, %v4647_v62  ;;  %11892 = vmatprep.subr.bf16.mxu1 %v12860_v18 }
 0xe35   : > { %v4666_v1 = vpack.c.bf16 %v4659_v8, %v4658_v24 }
 0xe37   : > { %11845 = vmatmul.mubr.msk.bf16.gmra.mrb[112].mxu0 %vm2935_vm5, %v4666_v1 }
 0xe38   : > { %11880 = vmatprep.mubr.msk.bf16.mxu0 %vm12861_vm3, %v12860_v18 }
 0xefa   : > { %v4729_v49 = vpop.f32.mrb[104].mxu0 }
 0xefb   : > { %v4730_v0 = vadd.f32 %v10315_v7, %v4729_v49  ;;  %v11838_v11 = vpop.f32.mrb[105].mxu0 }
 0xefc   : > { %v4732_v13 = vpop.f32.mrb[106].mxu0 }
 0xefd   : > { %v4733_v17 = vadd.f32 %v10315_v7, %v4732_v13  ;;  %v11839_v59 = vpop.f32.mrb[107].mxu0  ;;  %v4752_v30 = vmax.f32 %v4730_v0, 0.0 }
 0xeff   : > { %v4753_v60 = vmax.f32 %v4733_v17, 0.0 }
 0xf01   : > { %v4774_v10 = vpack.c.bf16 %v4753_v60, %v4752_v30 }
 0xf02   : > { %v4737_v20 = vpop.f32.mrb[108].mxu0 }
 0xf03   : > { %v4738_v32 = vadd.f32 %v10315_v7, %v4737_v20  ;;  %v11842_v23 = vpop.f32.mrb[109].mxu0  ;;  %11865 = vmatmul.mubr.bf16.vlgmr.msra.gmra.mrb[108].mxu1 %v4774_v10 }
 0xf04   : > { %v4740_v16 = vpop.f32.mrb[110].mxu0  ;;  %11868 = vmatprep.mubr.msk.bf16.mxu1 %vm12861_vm3, %v12860_v18 }
 0xf05   : > { %v4741_v28 = vadd.f32 %v10315_v7, %v4740_v16  ;;  %v11843_v4 = vpop.f32.mrb[111].mxu0  ;;  %v4754_v2 = vmax.f32 %v4738_v32, 0.0 }
 0xf07   : > { %v4755_v36 = vmax.f32 %v4741_v28, 0.0 }
 0xf09   : > { %v4775_v6 = vpack.c.bf16 %v4755_v36, %v4754_v2 }
 0xf0a   : > { %v4745_v53 = vpop.f32.mrb[112].mxu0 }
 0xf0b   : > { %v4746_v12 = vadd.f32 %v10315_v7, %v4745_v53  ;;  %v11846_v29 = vpop.f32.mrb[113].mxu0  ;;  %11869 = vmatmul.mubr.bf16.gmra.mrb[112].mxu1 %v4775_v6 }
 0xf0c   : > { %v4748_v31 = vpop.f32.mrb[114].mxu0  ;;  %11872 = vmatprep.mubr.msk.bf16.mxu1 %vm12861_vm3, %v12860_v18 }
 0xf0d   : > { %v4749_v14 = vadd.f32 %v10315_v7, %v4748_v31  ;;  %v11847_v33 = vpop.f32.mrb[115].mxu0  ;;  %v4756_v34 = vmax.f32 %v4746_v12, 0.0 }
 0xf0f   : > { %v4757_v26 = vmax.f32 %v4749_v14, 0.0 }
 0xf11   : > { %v4776_v37 = vpack.c.bf16 %v4757_v26, %v4756_v34 }
 0xf13   : > { %11873 = vmatmul.mubr.bf16.gmra.mrb[116].mxu1 %v4776_v37 }
 0xf14   : > { %11896 = vmatprep.mubr.msk.bf16.mxu1 %vm12861_vm3, %v12860_v18 }
 0xfd6   : > { %v4859_v38 = vpop.f32.mrb[108].mxu1 }
 0xfd7   : > { %v4882_v39 = vadd.f32 %v4859_v38, %v13750_v15  ;;  %v11866_v48 = vpop.f32.mrb[109].mxu1 }
 0xfd8   : > { %v4862_v19 = vpop.f32.mrb[110].mxu1 }
 0xfd9   : > { %v13865_v45 = vadd.f32 %v10329_v25, %v4882_v39  ;;  %v4883_v5 = vadd.f32 %v4862_v19, %v13753_v55  ;;  %v11867_v9 = vpop.f32.mrb[111].mxu1  ;;  %v12327_v19 = vld [vmem:[%s15036_s18 + $0x20] sm:$0xff]  }
 0xfda   : > { %11893 = vmatpush3.bf16.msra.mxu1 %v12327_v19  ;;  %v12329_v9 = vld [vmem:[%s15037_s20 + $0x28] sm:$0xff]  }
 0xfdb   : > { %v13868_v41 = vadd.f32 %v10329_v25, %v4883_v5  ;;  %v4905_v42 = vsel %vm2935_vm5, %v13865_v45, 0.0  ;;  %v12328_v5 = vld [vmem:[%s15037_s20 + $0x20] sm:$0xff]   ;;  %11894 = vmatprep.subr.bf16.mxu1 %v12860_v18 }
 0xfdc   : > { %4906 = vadd.xlane.f32.xlu1 %v4905_v42  ;;  %11877 = vmatpush3.bf16.msra.mxu0 %v12328_v5  ;;  %v12330_v42 = vld [vmem:[%s15036_s18 + $0x28] sm:$0xff]  }
 0xfdd   : > { %v4908_v43 = vsel %vm2935_vm5, %v13868_v41, 0.0  ;;  %11878 = vmatprep.subr.bf16.mxu0 %v12860_v18 }
 0xfde   : > { %4909 = vadd.xlane.f32.xlu0 %v4908_v43  ;;  %v4867_v54 = vpop.f32.mrb[112].mxu1  ;;  %11895 = vmatpush3.bf16.msra.mxu1 %v12330_v42 }
 0xfdf   : > { %v4884_v15 = vadd.f32 %v4867_v54, %v13762_v57  ;;  %v11870_v56 = vpop.f32.mrb[113].mxu1 }
 0xfe0   : > { %v4870_v61 = vpop.f32.mrb[114].mxu1  ;;  %11879 = vmatpush3.bf16.msra.mxu0 %v12329_v9 }
 0xfe1   : > { %v13875_v22 = vadd.f32 %v10329_v25, %v4884_v15  ;;  %v4885_v55 = vadd.f32 %v4870_v61, %v13765_v3  ;;  %v11871_v63 = vpop.f32.mrb[115].mxu1  ;;  %11908 = vmatprep.subr.bf16.mxu0 %v12860_v18 }
 0xfe3   : > { %v13878_v35 = vadd.f32 %v10329_v25, %v4885_v55  ;;  %v4911_v62 = vsel %vm2935_vm5, %v13875_v22, 0.0 }
 0xfe4   : > { %4912 = vadd.xlane.f32.xlu1 %v4911_v62 }
 0xfe5   : > { %v4914_v24 = vsel %vm2935_vm5, %v13878_v35, 0.0 }
 0xfe6   : > { %4915 = vadd.xlane.f32.xlu0 %v4914_v24  ;;  %v4875_v8 = vpop.f32.mrb[116].mxu1 }
 0xfe7   : > { %v4886_v57 = vadd.f32 %v4875_v8, %v13774_v21  ;;  %v11874_v1 = vpop.f32.mrb[117].mxu1 }
 0xfe8   : > { %v4878_v40 = vpop.f32.mrb[118].mxu1 }
 0xfe9   : > { %v13885_v58 = vadd.f32 %v10329_v25, %v4886_v57  ;;  %v4887_v3 = vadd.f32 %v4878_v40, %v13777_v27  ;;  %v11875_v7 = vpop.f32.mrb[119].mxu1 }
 0xfeb   : > { %v13888_v49 = vadd.f32 %v10329_v25, %v4887_v3  ;;  %v4917_v0 = vsel %vm2935_vm5, %v13885_v58, 0.0  ;;  %v10332_v3 = vld [vmem:[%s15038_s15 + $0x1] ss:$0 sm:$0xff] }
 0xfec   : > { %4918 = vadd.xlane.f32.xlu1 %v4917_v0 }
 0xfed   : > { %v4920_v11 = vsel %vm2935_vm5, %v13888_v49, 0.0 }
 0xfee   : > { %4921 = vadd.xlane.f32.xlu0 %v4920_v11 }
0x1069   : > { %v4907_v13 = vpop.xlane.xlu1 %4906 }
0x106a   : > { %v4923_v17 = vmul.f32 0.03125, %v4907_v13 }
0x106b   : > { %v4910_v21 = vpop.xlane.xlu0 %4909 }
0x106c   : > { %v4929_v59 = vsub.f32 %v13865_v45, %v4923_v17  ;;  %v4924_v30 = vmul.f32 0.03125, %v4910_v21 }
0x106e   : > { %v13896_v60 = vsub.f32 %v13868_v41, %v4924_v30  ;;  %v4935_v27 = vmul.f32 %v4929_v59, %v4929_v59 }
0x1070   : > { %v4941_v10 = vsel %vm2935_vm5, %v4935_v27, 0.0  ;;  %v4936_v20 = vmul.f32 %v13896_v60, %v13896_v60  ;;  %v10333_v27 = vld [vmem:[%s15039_s2 + $0x1] ss:$0 sm:$0xff]  ;;  %s15052_s2 = sld [smem:[#allocation35_spill]] }
0x1071   : > { %v4913_v32 = vpop.xlane.xlu1 %4912  ;;  %4942 = vadd.xlane.f32.xlu1 %v4941_v10 }
0x1072   : > { %v4925_v23 = vmul.f32 0.03125, %v4913_v32  ;;  %v4944_v16 = vsel %vm2935_vm5, %v4936_v20, 0.0 }
0x1073   : > { %v4916_v28 = vpop.xlane.xlu0 %4915  ;;  %4945 = vadd.xlane.f32.xlu0 %v4944_v16 }
0x1074   : > { %v13903_v4 = vsub.f32 %v13875_v22, %v4925_v23  ;;  %v4926_v2 = vmul.f32 0.03125, %v4916_v28 }
0x1076   : > { %v13906_v36 = vsub.f32 %v13878_v35, %v4926_v2  ;;  %v4937_v6 = vmul.f32 %v13903_v4, %v13903_v4 }
0x1078   : > { %v4947_v53 = vsel %vm2935_vm5, %v4937_v6, 0.0  ;;  %v4938_v12 = vmul.f32 %v13906_v36, %v13906_v36 }
0x1079   : > { %4948 = vadd.xlane.f32.xlu1 %v4947_v53  ;;  %v4919_v29 = vpop.xlane.xlu1 %4918  ;;  %v12331_v53 = vld [vmem:[%s15040_s3 + $0x20] sm:$0xff]  }
0x107a   : > { %v4927_v31 = vmul.f32 0.03125, %v4919_v29  ;;  %v4950_v14 = vsel %vm2935_vm5, %v4938_v12, 0.0 }
0x107b   : > { %4951 = vadd.xlane.f32.xlu0 %v4950_v14  ;;  %v4922_v33 = vpop.xlane.xlu0 %4921 }
0x107c   : > { %v13915_v34 = vsub.f32 %v13885_v58, %v4927_v31  ;;  %v4928_v26 = vmul.f32 0.03125, %v4922_v33  ;;  %v12332_v31 = vld [vmem:[%s15040_s3 + $0x28] sm:$0xff]  }
0x107e   : > { %v13918_v37 = vsub.f32 %v13888_v49, %v4928_v26  ;;  %v4939_v38 = vmul.f32 %v13915_v34, %v13915_v34 }
0x1080   : > { %v4953_v25 = vsel %vm2935_vm5, %v4939_v38, 0.0  ;;  %v4940_v39 = vmul.f32 %v13918_v37, %v13918_v37 }
0x1081   : > { %4954 = vadd.xlane.f32.xlu1 %v4953_v25 }
0x1082   : > { %v4956_v48 = vsel %vm2935_vm5, %v4940_v39, 0.0 }
0x1083   : > { %4957 = vadd.xlane.f32.xlu0 %v4956_v48 }
0x10fe   : > { %v4943_v43 = vpop.xlane.xlu1 %4942 }
0x10ff   : > { %v4959_v54 = vmul.f32 0.03125, %v4943_v43  ;;  %v10350_v43 = vld [vmem:[%s15042_s8 + $0x2] ss:$0 sm:$0xff] }
0x1100   : > { %v4946_v15 = vpop.xlane.xlu0 %4945 }
0x1101   : > { %v4965_v56 = vadd.f32 1e-05, %v4959_v54  ;;  %v4960_v61 = vmul.f32 0.03125, %v4946_v15 }
0x1103   : > { %12661 = vrsqrt.f32 %v4965_v56  ;;  %v4966_v55 = vadd.f32 1e-05, %v4960_v61 }
0x1105   : > { %12663 = vrsqrt.f32 %v4966_v55 }
0x1106   : > { %v4949_v63 = vpop.xlane.xlu1 %4948 }
0x1107   : > { %v4961_v62 = vmul.f32 0.03125, %v4949_v63 }
0x1108   : > { %v4952_v24 = vpop.xlane.xlu0 %4951 }
0x1109   : > { %v4967_v8 = vadd.f32 1e-05, %v4961_v62  ;;  %v4962_v57 = vmul.f32 0.03125, %v4952_v24 }
0x110b   : > { %12665 = vrsqrt.f32 %v4967_v8  ;;  %v4968_v1 = vadd.f32 1e-05, %v4962_v57 }
0x110d   : > { %v12662_v40 = vpop.eup %12661  ;;  %12667 = vrsqrt.f32 %v4968_v1 }
0x110e   : > { %v4977_v7 = vmul.f32 %v12662_v40, %v4929_v59  ;;  %v4955_v0 = vpop.xlane.xlu1 %4954 }
0x110f   : > { %v12664_v11 = vpop.eup %12663  ;;  %v4963_v13 = vmul.f32 0.03125, %v4955_v0 }
0x1110   : > { %v4989_v17 = vmul.f32 %v10332_v3, %v4977_v7  ;;  %v4978_v21 = vmul.f32 %v12664_v11, %v13896_v60  ;;  %v4958_v30 = vpop.xlane.xlu0 %4957 }
0x1111   : > { %v4969_v10 = vadd.f32 1e-05, %v4963_v13  ;;  %v4964_v20 = vmul.f32 0.03125, %v4958_v30 }
0x1112   : > { %v4990_v32 = vmul.f32 %v10332_v3, %v4978_v21  ;;  %v5001_v16 = vadd.f32 %v10333_v27, %v4989_v17 }
0x1113   : > { %12669 = vrsqrt.f32 %v4969_v10  ;;  %v4970_v23 = vadd.f32 1e-05, %v4964_v20 }
0x1114   : > { %v5002_v28 = vadd.f32 %v10333_v27, %v4990_v32 }
0x1115   : > { %v12666_v2 = vpop.eup %12665  ;;  %12671 = vrsqrt.f32 %v4970_v23 }
0x1116   : > { %v4979_v59 = vmul.f32 %v12666_v2, %v13903_v4  ;;  %v13937_v6 = vpack.c.bf16 %v5002_v28, %v5001_v16 }
0x1117   : > { %v12668_v12 = vpop.eup %12667 }
0x1118   : > { %v4991_v29 = vmul.f32 %v10332_v3, %v4979_v59  ;;  %v4980_v60 = vmul.f32 %v12668_v12, %v13906_v36  ;;  %11881 = vmatmul.mubr.msk.bf16.vlgmr.msra.gmra.mrb[116].mxu0 %vm2935_vm5, %v13937_v6  ;;  %11897 = vmatmul.mubr.msk.bf16.vlgmr.msra.gmra.mrb[120].mxu1 %vm2935_vm5, %v13937_v6 }
0x1119   : > { %11884 = vmatprep.mubr.msk.bf16.mxu0 %vm12861_vm3, %v12860_v18  ;;  %11900 = vmatprep.mubr.msk.bf16.mxu1 %vm12861_vm3, %v12860_v18 }
0x111a   : > { %v4992_v4 = vmul.f32 %v10332_v3, %v4980_v60  ;;  %11909 = vmatpush3.bf16.msra.mxu0 %v12331_v53  ;;  %v5003_v14 = vadd.f32 %v10333_v27, %v4991_v29 }
0x111b   : > { %11910 = vmatprep.subr.bf16.mxu0 %v12860_v18 }
0x111c   : > { %v5004_v33 = vadd.f32 %v10333_v27, %v4992_v4 }
0x111d   : > { %v12670_v36 = vpop.eup %12669 }
0x111e   : > { %v4981_v26 = vmul.f32 %v12670_v36, %v13915_v34  ;;  %v13952_v38 = vpack.c.bf16 %v5004_v33, %v5003_v14  ;;  %11911 = vmatpush3.bf16.msra.mxu0 %v12332_v31 }
0x111f   : > { %v12672_v25 = vpop.eup %12671 }
0x1120   : > { %v4993_v39 = vmul.f32 %v10332_v3, %v4981_v26  ;;  %v4982_v48 = vmul.f32 %v12672_v25, %v13918_v37  ;;  %11885 = vmatmul.mubr.msk.bf16.gmra.mrb[120].mxu0 %vm2935_vm5, %v13952_v38  ;;  %11901 = vmatmul.mubr.msk.bf16.gmra.mrb[124].mxu1 %vm2935_vm5, %v13952_v38  ;;  %v13982_v37 = vld [vmem:[%s15041_s5 + $0x2] ss:$0 sm:$0xff] }
0x1121   : > { %11888 = vmatprep.mubr.msk.bf16.mxu0 %vm12861_vm3, %v12860_v18  ;;  %11904 = vmatprep.mubr.msk.bf16.mxu1 %vm12861_vm3, %v12860_v18 }
0x1122   : > { %v4994_v34 = vmul.f32 %v10332_v3, %v4982_v48  ;;  %v5005_v19 = vadd.f32 %v10333_v27, %v4993_v39 }
0x1124   : > { %v5006_v5 = vadd.f32 %v10333_v27, %v4994_v34 }
0x1126   : > { %v13963_v9 = vpack.c.bf16 %v5006_v5, %v5005_v19  ;;  %v10361_v5 = vld [vmem:[%s15043_s9 + $0x2] ss:$0 sm:$0xff] }
0x1128   : > { %11889 = vmatmul.mubr.msk.bf16.gmra.mrb[124].mxu0 %vm2935_vm5, %v13963_v9  ;;  %11905 = vmatmul.mubr.msk.bf16.gmra.mrb[128].mxu1 %vm2935_vm5, %v13963_v9 }
0x1129   : > { %11912 = vmatprep.mubr.msk.bf16.mxu0 %vm12861_vm3, %v12860_v18 }
0x1130   : > { %11913 = vmatmul.mubr.msk.bf16.vlgmr.msra.gmra.mrb[128].mxu0 %vm2935_vm5, %v13937_v6 }
0x1131   : > { %11916 = vmatprep.mubr.msk.bf16.mxu0 %vm12861_vm3, %v12860_v18 }
0x1138   : > { %11917 = vmatmul.mubr.msk.bf16.gmra.mrb[132].mxu0 %vm2935_vm5, %v13952_v38 }
0x1139   : > { %11920 = vmatprep.mubr.msk.bf16.mxu0 %vm12861_vm3, %v12860_v18 }
0x1140   : > { %11921 = vmatmul.mubr.msk.bf16.gmra.mrb[136].mxu0 %vm2935_vm5, %v13963_v9 }
0x11eb   : > { %v5078_v42 = vpop.f32.mrb[116].mxu0  ;;  %v5160_v54 = vpop.f32.mrb[120].mxu1 }
0x11ec   : > { %v11882_v15 = vpop.f32.mrb[117].mxu0  ;;  %v11898_v56 = vpop.f32.mrb[121].mxu1  ;;  %v5079_v63 = vadd.f32 %v13982_v37, %v5078_v42  ;;  %v5161_v62 = vadd.f32 %v10350_v43, %v5160_v54 }
0x11ed   : > { %v5081_v61 = vpop.f32.mrb[118].mxu0  ;;  %v5163_v55 = vpop.f32.mrb[122].mxu1 }
0x11ee   : > { %v5082_v24 = vadd.f32 %v13982_v37, %v5081_v61  ;;  %v5164_v8 = vadd.f32 %v10350_v43, %v5163_v55  ;;  %v11883_v57 = vpop.f32.mrb[119].mxu0  ;;  %v11899_v1 = vpop.f32.mrb[123].mxu1 }
0x11f0   : > { %v5265_v40 = vpack.c.bf16 %v5082_v24, %v5079_v63  ;;  %v5267_v3 = vpack.c.bf16 %v5164_v8, %v5161_v62 }
0x11f2   : > { %12136 = vmatprep.subr.msk.bf16.mxu1 %vm2992_vm6, %v5267_v3  ;;  %11928 = vmatprep.mubr.msk.bf16.mxu1 %vm2992_vm6, %v5265_v40  ;;  %v5276_v7 = vsel %vm2992_vm6, %v5267_v3, 0  ;;  %v12333_v40 = vld [vmem:[%s15037_s20 + $0x30] sm:$0xff]  }
0x11f3   : > { %v5086_v0 = vpop.f32.mrb[120].mxu0  ;;  %v5168_v11 = vpop.f32.mrb[124].mxu1  ;;  %11925 = vmatpush3.bf16.xpose.msra.mxu1 %v5276_v7 }
0x11f4   : > { %v5169_v13 = vadd.f32 %v10350_v43, %v5168_v11  ;;  %v11886_v17 = vpop.f32.mrb[121].mxu0  ;;  %v11902_v21 = vpop.f32.mrb[125].mxu1  ;;  %v5087_v16 = vadd.f32 %v13982_v37, %v5086_v0 }
0x11f5   : > { %v5089_v30 = vpop.f32.mrb[122].mxu0  ;;  %v5171_v27 = vpop.f32.mrb[126].mxu1 }
0x11f6   : > { %v5268_v10 = vpack.c.bf16 %v5169_v13, %v5169_v13  ;;  %v11887_v20 = vpop.f32.mrb[123].mxu0  ;;  %v11903_v32 = vpop.f32.mrb[127].mxu1  ;;  %v5090_v59 = vadd.f32 %v13982_v37, %v5089_v30  ;;  %v5172_v53 = vadd.f32 %v10350_v43, %v5171_v27  ;;  %v5266_v48 = vpack.c.bf16 %v5087_v16, %v5087_v16  ;;  %v12336_v16 = vld [vmem:[%s15040_s3 + $0x38] sm:$0xff]  }
0x11f8   : > { %12137 = vmatprep.subr.msk.bf16.mxu1 %vm2992_vm6, %v5268_v10  ;;  %v5279_v23 = vsel %vm2992_vm6, %v5268_v10, 0  ;;  %v12335_v10 = vld [vmem:[%s15040_s3 + $0x30] sm:$0xff]   ;;  %s15054_s3 = sld [smem:[#allocation36_spill]] }
0x11fb   : > { %v5094_v28 = vpop.f32.mrb[124].mxu0  ;;  %v5176_v2 = vpop.f32.mrb[128].mxu1  ;;  %11927 = vmatpush3.bf16.xpose.msra.mxu1 %v5279_v23 }
0x11fc   : > { %v5095_v12 = vadd.f32 %v13982_v37, %v5094_v28  ;;  %v5177_v29 = vadd.f32 %v10350_v43, %v5176_v2  ;;  %v11890_v60 = vpop.f32.mrb[125].mxu0  ;;  %v11906_v4 = vpop.f32.mrb[129].mxu1 }
0x11fd   : > { %v5097_v31 = vpop.f32.mrb[126].mxu0  ;;  %v5179_v14 = vpop.f32.mrb[130].mxu1 }
0x11fe   : > { %v5429_v33 = vpack.c.bf16 %v5095_v12, %v5090_v59  ;;  %v5431_v36 = vpack.c.bf16 %v5177_v29, %v5172_v53  ;;  %v5180_v26 = vadd.f32 %v10350_v43, %v5179_v14  ;;  %v11891_v25 = vpop.f32.mrb[127].mxu0  ;;  %v11907_v39 = vpop.f32.mrb[131].mxu1  ;;  %v5098_v62 = vadd.f32 %v13982_v37, %v5097_v31  ;;  %v12334_v37 = vld [vmem:[%s15037_s20 + $0x38] sm:$0xff]  }
0x1200   : > { %v5432_v34 = vpack.c.bf16 %v5180_v26, %v5180_v26  ;;  %12139 = vmatprep.subr.msk.bf16.mxu0 %vm2992_vm6, %v5431_v36  ;;  %11944 = vmatprep.mubr.msk.bf16.mxu0 %vm2992_vm6, %v5429_v33  ;;  %v5440_v19 = vsel %vm2992_vm6, %v5431_v36, 0  ;;  %v5430_v3 = vpack.c.bf16 %v5098_v62, %v5098_v62 }
0x1201   : > { %11941 = vmatpush3.bf16.xpose.msra.mxu0 %v5440_v19 }
0x1202   : > { %11929 = vmatmul.mubr.msk.bf16.vlgmr.msra.gmra.mrb[132].mxu1 %vm2992_vm6, %v5266_v48  ;;  %12140 = vmatprep.subr.msk.bf16.mxu0 %vm2992_vm6, %v5432_v34  ;;  %v5443_v55 = vsel %vm2992_vm6, %v5432_v34, 0 }
0x1203   : > { %v5242_v42 = vpop.f32.mrb[128].mxu0 }
0x1204   : > { %v11914_v54 = vpop.f32.mrb[129].mxu0  ;;  %v5243_v15 = vadd.f32 %v10361_v5, %v5242_v42 }
0x1205   : > { %v5245_v43 = vpop.f32.mrb[130].mxu0 }
0x1206   : > { %v5246_v56 = vadd.f32 %v10361_v5, %v5245_v43  ;;  %v11915_v61 = vpop.f32.mrb[131].mxu0 }
0x1208   : > { %v5370_v63 = vpack.c.bf16 %v5246_v56, %v5243_v15  ;;  %v10382_v15 = vld [vmem:[%s15041_s5 + $0x3] ss:$0 sm:$0xff]  ;;  %s15059_s5 = sand.u32 1, %s12811_s22  }
0x1209   : > { %11943 = vmatpush3.bf16.xpose.msra.mxu0 %v5443_v55 }
0x120a   : > { %11932 = vmatprep.subr.bf16.mxu1 %v5370_v63  ;;  %11956 = vmatprep.subr.bf16.mxu0 %v12860_v18 }
0x120b   : > { %v5250_v24 = vpop.f32.mrb[132].mxu0  ;;  %11933 = vmatpush3.bf16.msra.mxu1 %v5370_v63 }
0x120c   : > { %v5251_v8 = vadd.f32 %v10361_v5, %v5250_v24  ;;  %v11918_v57 = vpop.f32.mrb[133].mxu0 }
0x120d   : > { %v5253_v1 = vpop.f32.mrb[134].mxu0 }
0x120e   : > { %v5371_v7 = vpack.c.bf16 %v5251_v8, %v5251_v8  ;;  %v11919_v0 = vpop.f32.mrb[135].mxu0  ;;  %v5254_v17 = vadd.f32 %v10361_v5, %v5253_v1 }
0x1210   : > { %v5379_v11 = vsel %vm3009_vm7, %v5371_v7, 0  ;;  %12138 = vmatprep.subr.msk.bf16.mxu1 %vm3009_vm7, %v5371_v7  ;;  %11945 = vmatmul.mubr.msk.bf16.vlgmr.msra.gmra.mrb[140].mxu0 %vm2992_vm6, %v5430_v3 }
0x1211   : > { %11935 = vmatpush3.bf16.msra.mxu1 %v5379_v11  ;;  %11957 = vmatpush3.bf16.msra.mxu0 %v12333_v40 }
0x1212   : > { %11958 = vmatprep.subr.bf16.mxu0 %v12860_v18  ;;  %11960 = vmatprep.mubr.msk.bf16.mxu0 %vm12861_vm3, %v12860_v18 }
0x1213   : > { %v5258_v13 = vpop.f32.mrb[136].mxu0 }
0x1214   : > { %v5259_v21 = vadd.f32 %v10361_v5, %v5258_v13  ;;  %v11922_v30 = vpop.f32.mrb[137].mxu0 }
0x1215   : > { %v5261_v27 = vpop.f32.mrb[138].mxu0  ;;  %11959 = vmatpush3.bf16.msra.mxu0 %v12334_v37 }
0x1216   : > { %v14013_v20 = vpack.c.bf16 %v5259_v21, %v5254_v17  ;;  %v14015_v32 = vadd.f32 %v10361_v5, %v5261_v27  ;;  %v11923_v23 = vpop.f32.mrb[139].mxu0  ;;  %11988 = vmatprep.subr.bf16.mxu0 %v12860_v18 }
0x1218   : > { %11948 = vmatprep.subr.bf16.mxu1 %v14013_v20  ;;  %11961 = vmatmul.mubr.msk.bf16.vlgmr.msra.gmra.mrb[144].mxu0 %vm2935_vm5, %v13937_v6 }
0x1219   : > { %11964 = vmatprep.mubr.msk.bf16.mxu0 %vm12861_vm3, %v12860_v18  ;;  %11989 = vmatpush3.bf16.msra.mxu0 %v12335_v10 }
0x121a   : > { %11990 = vmatprep.subr.bf16.mxu0 %v12860_v18 }
0x121d   : > { %11991 = vmatpush3.bf16.msra.mxu0 %v12336_v16 }
0x1220   : > { %11965 = vmatmul.mubr.msk.bf16.gmra.mrb[148].mxu0 %vm2935_vm5, %v13952_v38 }
0x1221   : > { %11968 = vmatprep.mubr.msk.bf16.mxu0 %vm12861_vm3, %v12860_v18 }
0x1228   : > { %11969 = vmatmul.mubr.msk.bf16.gmra.mrb[152].mxu0 %vm2935_vm5, %v13963_v9 }
0x1229   : > { %11992 = vmatprep.mubr.msk.bf16.mxu0 %vm12861_vm3, %v12860_v18 }
0x1230   : > { %11993 = vmatmul.mubr.msk.bf16.vlgmr.msra.gmra.mrb[156].mxu0 %vm2935_vm5, %v13937_v6 }
0x1231   : > { %11996 = vmatprep.mubr.msk.bf16.mxu0 %vm12861_vm3, %v12860_v18 }
0x1238   : > { %11997 = vmatmul.mubr.msk.bf16.gmra.mrb[160].mxu0 %vm2935_vm5, %v13952_v38 }
0x1239   : > { %12000 = vmatprep.mubr.msk.bf16.mxu0 %vm12861_vm3, %v12860_v18 }
0x1240   : > { %12001 = vmatmul.mubr.msk.bf16.gmra.mrb[164].mxu0 %vm2935_vm5, %v13963_v9 }
0x12d5   : > { %v11930_v28 = vpop.f32.mrb[132].mxu1 }
0x12d6   : > { %v5315_v2 = vpop.f32.mrb[133].mxu1  ;;  %v5331_v59 = vmul.f32 0.25, %v11930_v28 }
0x12d7   : > { %v5329_v53 = vmul.f32 0.25, %v5315_v2  ;;  %v11931_v12 = vpop.f32.mrb[134].mxu1  ;;  %v14086_v2 = vld [vmem:[%s15043_s9 + $0x3] ss:$0 sm:$0xff] }
0x12d8   : > { %v5318_v29 = vpop.f32.mrb[135].mxu1  ;;  %v14052_v33 = vadd.f32 %v5331_v59, %v13572_v44 }
0x12d9   : > { %v5330_v60 = vmul.f32 0.25, %v5318_v29  ;;  %v14044_v4 = vadd.f32 %v5329_v53, %v13572_v44 }
0x12da   : > { %v5341_v26 = vsel %vm3549_vm9, %v14052_v33, -inf }
0x12db   : > { %v5335_v31 = vsel %vm3549_vm9, %v14044_v4, -inf  ;;  %v14049_v14 = vadd.f32 %v5330_v60, %v13572_v44 }
0x12dc   : > { %5336 = vmax.xlane.f32.xlu1 %v5335_v31 }
0x12dd   : > { %v5338_v36 = vsel %vm3549_vm9, %v14049_v14, -inf }
0x12de   : > { %5339 = vmax.xlane.f32.xlu0 %v5338_v36 }
0x12e0   : > { %5342 = vmax.xlane.f32.xlu1 %v5341_v26 }
0x12e3   : > { %v11946_v25 = vpop.f32.mrb[140].mxu0 }
0x12e4   : > { %v5479_v39 = vpop.f32.mrb[141].mxu0  ;;  %v5495_v48 = vmul.f32 0.25, %v11946_v25 }
0x12e5   : > { %v5493_v34 = vmul.f32 0.25, %v5479_v39  ;;  %v11947_v19 = vpop.f32.mrb[142].mxu0 }
0x12e6   : > { %v5482_v5 = vpop.f32.mrb[143].mxu0  ;;  %v14068_v61 = vadd.f32 %v5495_v48, %v13572_v44 }
0x12e7   : > { %v5494_v42 = vmul.f32 0.25, %v5482_v5  ;;  %v14059_v54 = vadd.f32 %v5493_v34, %v13572_v44 }
0x12e8   : > { %v5505_v57 = vsel %vm3549_vm9, %v14068_v61, -inf }
0x12e9   : > { %v5499_v43 = vsel %vm3549_vm9, %v14059_v54, -inf  ;;  %v14065_v56 = vadd.f32 %v5494_v42, %v13572_v44 }
0x12ea   : > { %5500 = vmax.xlane.f32.xlu0 %v5499_v43 }
0x12eb   : > { %v5658_v55 = vpop.f32.mrb[144].mxu0  ;;  %v5502_v63 = vsel %vm3549_vm9, %v14065_v56, -inf }
0x12ec   : > { %v14072_v62 = vadd.f32 %v10382_v15, %v5658_v55  ;;  %v11962_v24 = vpop.f32.mrb[145].mxu0  ;;  %5503 = vmax.xlane.f32.xlu1 %v5502_v63 }
0x12ed   : > { %v5661_v8 = vpop.f32.mrb[146].mxu0 }
0x12ee   : > { %v14076_v1 = vadd.f32 %v10382_v15, %v5661_v8  ;;  %v11963_v40 = vpop.f32.mrb[147].mxu0  ;;  %5506 = vmax.xlane.f32.xlu0 %v5505_v57 }
0x12f0   : > { %v5845_v3 = vpack.c.bf16 %v14076_v1, %v14072_v62  ;;  %v10393_v62 = vld [vmem:[%s15042_s8 + $0x3] ss:$0 sm:$0xff]  ;;  %s14911_s8 = scalar_lea.sflag [#allocation4], %s15059_s5 }
0x12f3   : > { %v5666_v7 = vpop.f32.mrb[148].mxu0 }
0x12f4   : > { %v14080_v0 = vadd.f32 %v10382_v15, %v5666_v7  ;;  %v11966_v11 = vpop.f32.mrb[149].mxu0 }
0x12f5   : > { %v5669_v37 = vpop.f32.mrb[150].mxu0 }
0x12f6   : > { %v11967_v13 = vpop.f32.mrb[151].mxu0  ;;  %v5670_v21 = vadd.f32 %v10382_v15, %v5669_v37 }
0x12fb   : > { %v5674_v17 = vpop.f32.mrb[152].mxu0 }
0x12fc   : > { %v5675_v30 = vadd.f32 %v10382_v15, %v5674_v17  ;;  %v11970_v27 = vpop.f32.mrb[153].mxu0 }
0x12fd   : > { %v5677_v10 = vpop.f32.mrb[154].mxu0 }
0x12fe   : > { %v6009_v23 = vpack.c.bf16 %v5675_v30, %v5670_v21  ;;  %v14082_v16 = vadd.f32 %v10382_v15, %v5677_v10  ;;  %v11971_v28 = vpop.f32.mrb[155].mxu0 }
0x1300   : > { %12024 = vmatprep.mubr.msk.bf16.mxu0 %vm2992_vm6, %v6009_v23 }
0x1303   : > { %v5822_v59 = vpop.f32.mrb[156].mxu0 }
0x1304   : > { %v11994_v53 = vpop.f32.mrb[157].mxu0  ;;  %v5823_v29 = vadd.f32 %v14086_v2, %v5822_v59 }
0x1305   : > { %v5825_v12 = vpop.f32.mrb[158].mxu0 }
0x1306   : > { %v5826_v60 = vadd.f32 %v14086_v2, %v5825_v12  ;;  %v11995_v31 = vpop.f32.mrb[159].mxu0 }
0x1308   : > { %v14090_v36 = vpack.c.bf16 %v5826_v60, %v5823_v29 }
0x130b   : > { %v14092_v26 = vpop.f32.mrb[160].mxu0 }
0x130c   : > { %v11998_v25 = vpop.f32.mrb[161].mxu0 }
0x130d   : > { %v5833_v39 = vpop.f32.mrb[162].mxu0 }
0x130e   : > { %v11999_v48 = vpop.f32.mrb[163].mxu0  ;;  %v5834_v19 = vadd.f32 %v14086_v2, %v5833_v39 }
0x1313   : > { %v5838_v34 = vpop.f32.mrb[164].mxu0 }
0x1314   : > { %v5839_v5 = vadd.f32 %v14086_v2, %v5838_v34  ;;  %v12002_v42 = vpop.f32.mrb[165].mxu0 }
0x1315   : > { %v5841_v43 = vpop.f32.mrb[166].mxu0 }
0x1316   : > { %v14096_v15 = vpack.c.bf16 %v5839_v5, %v5834_v19  ;;  %v14099_v55 = vadd.f32 %v14086_v2, %v5841_v43  ;;  %v12003_v63 = vpop.f32.mrb[167].mxu0 }
0x1369   : > { %v5337_v24 = vpop.xlane.xlu1 %5336 }
0x136a   : > { %v5344_v8 = vsub.f32 %v14044_v4, %v5337_v24 }
0x136b   : > { %v5340_v57 = vpop.xlane.xlu0 %5339 }
0x136c   : > { %v5347_v40 = vmul.f32 1.442695, %v5344_v8  ;;  %v5345_v7 = vsub.f32 %v14049_v14, %v5340_v57 }
0x136d   : > { %v5343_v11 = vpop.xlane.xlu1 %5342 }
0x136e   : > { %12673 = vpow2.f32 %v5347_v40  ;;  %v5349_v37 = vmul.f32 1.442695, %v5345_v7  ;;  %v5346_v13 = vsub.f32 %v14052_v33, %v5343_v11 }
0x1370   : > { %12675 = vpow2.f32 %v5349_v37  ;;  %v5351_v17 = vmul.f32 1.442695, %v5346_v13 }
0x1372   : > { %12677 = vpow2.f32 %v5351_v17  ;;  %v5535_v17 = vpack.c.bf16 %v14015_v32, %v14015_v32  ;;  %v12337_v32 = vld [vmem:[%s15036_s18 + $0x30] sm:$0xff]  }
0x1377   : > { %v5501_v21 = vpop.xlane.xlu0 %5500 }
0x1378   : > { %v12674_v30 = vpop.eup %12673  ;;  %v5508_v27 = vsub.f32 %v14059_v54, %v5501_v21  ;;  %v5543_v21 = vsel %vm3009_vm7, %v5535_v17, 0 }
0x1379   : > { %v5504_v10 = vpop.xlane.xlu1 %5503  ;;  %v5353_v23 = vsel %vm3549_vm9, %v12674_v30, 0.0 }
0x137a   : > { %v12676_v4 = vpop.eup %12675  ;;  %v5511_v28 = vmul.f32 1.442695, %v5508_v27  ;;  %v5509_v59 = vsub.f32 %v14065_v56, %v5504_v10  ;;  %5354 = vadd.xlane.f32.xlu1 %v5353_v23 }
0x137b   : > { %v5507_v14 = vpop.xlane.xlu0 %5506  ;;  %v5356_v53 = vsel %vm3549_vm9, %v12676_v4, 0.0 }
0x137c   : > { %v12678_v12 = vpop.eup %12677  ;;  %12679 = vpow2.f32 %v5511_v28  ;;  %v5513_v33 = vmul.f32 1.442695, %v5509_v59  ;;  %v5510_v29 = vsub.f32 %v14068_v61, %v5507_v14  ;;  %5357 = vadd.xlane.f32.xlu0 %v5356_v53 }
0x137d   : > { %v5359_v60 = vsel %vm3549_vm9, %v12678_v12, 0.0 }
0x137e   : > { %12681 = vpow2.f32 %v5513_v33  ;;  %v5515_v54 = vmul.f32 1.442695, %v5510_v29  ;;  %5360 = vadd.xlane.f32.xlu1 %v5359_v60 }
0x1380   : > { %12683 = vpow2.f32 %v5515_v54 }
0x1386   : > { %v12680_v31 = vpop.eup %12679 }
0x1387   : > { %v5517_v25 = vsel %vm3549_vm9, %v12680_v31, 0.0 }
0x1388   : > { %v12682_v56 = vpop.eup %12681  ;;  %5518 = vadd.xlane.f32.xlu0 %v5517_v25 }
0x1389   : > { %v5520_v39 = vsel %vm3549_vm9, %v12682_v56, 0.0 }
0x138a   : > { %v12684_v48 = vpop.eup %12683  ;;  %5521 = vadd.xlane.f32.xlu1 %v5520_v39 }
0x138b   : > { %v5523_v34 = vsel %vm3549_vm9, %v12684_v48, 0.0 }
0x138c   : > { %5524 = vadd.xlane.f32.xlu0 %v5523_v34 }
0x1407   : > { %v5355_v61 = vpop.xlane.xlu1 %5354 }
0x1408   : > { %12685 = vrcp.f32 %v5355_v61 }
0x1409   : > { %v5358_v19 = vpop.xlane.xlu0 %5357 }
0x140a   : > { %12687 = vrcp.f32 %v5358_v19 }
0x140b   : > { %v5361_v5 = vpop.xlane.xlu1 %5360 }
0x140c   : > { %12689 = vrcp.f32 %v5361_v5 }
0x1412   : > { %v12686_v42 = vpop.eup %12685 }
0x1413   : > { %v5363_v24 = vmul.f32 %v12686_v42, %v12674_v30 }
0x1414   : > { %v12688_v43 = vpop.eup %12687 }
0x1415   : > { %v5519_v63 = vpop.xlane.xlu0 %5518  ;;  %v5365_v8 = vmul.f32 %v12688_v43, %v12676_v4 }
0x1416   : > { %v12690_v57 = vpop.eup %12689  ;;  %12691 = vrcp.f32 %v5519_v63 }
0x1417   : > { %v5367_v40 = vmul.f32 %v12690_v57, %v12678_v12  ;;  %v5522_v7 = vpop.xlane.xlu1 %5521  ;;  %v5368_v11 = vpack.c.bf16 %v5365_v8, %v5363_v24 }
0x1418   : > { %12693 = vrcp.f32 %v5522_v7 }
0x1419   : > { %11936 = vmatprep.mubr.msk.bf16.mxu1 %vm3549_vm9, %v5368_v11  ;;  %v5525_v37 = vpop.xlane.xlu0 %5524  ;;  %v5369_v13 = vpack.c.bf16 %v5367_v40, %v5367_v40 }
0x141a   : > { %12695 = vrcp.f32 %v5525_v37 }
0x141b   : > { %11937 = vmatmul.mubr.msk.bf16.vlgmr.msra.gmra.mrb[136].mxu1 %vm3549_vm9, %v5369_v13 }
0x141c   : > { %11949 = vmatpush3.bf16.msra.mxu1 %v14013_v20  ;;  %v12338_v20 = vld [vmem:[%s15036_s18 + $0x38] sm:$0xff]  }
0x141d   : > { %12141 = vmatprep.subr.msk.bf16.mxu1 %vm3009_vm7, %v5535_v17  ;;  %v5831_v17 = vadd.f32 %v14086_v2, %v14092_v26  ;;  %v12339_v26 = vld [vmem:[%s15044_s13 + $0x10] sm:$0xff]  }
0x1420   : > { %v12692_v30 = vpop.eup %12691  ;;  %11951 = vmatpush3.bf16.msra.mxu1 %v5543_v21 }
0x1421   : > { %11972 = vmatprep.subr.bf16.mxu1 %v12860_v18  ;;  %v5527_v10 = vmul.f32 %v12692_v30, %v12680_v31 }
0x1422   : > { %v12694_v27 = vpop.eup %12693 }
0x1423   : > { %v5529_v23 = vmul.f32 %v12694_v27, %v12682_v56 }
0x1424   : > { %v12696_v4 = vpop.eup %12695 }
0x1425   : > { %v5531_v28 = vmul.f32 %v12696_v4, %v12684_v48  ;;  %v5532_v59 = vpack.c.bf16 %v5529_v23, %v5527_v10  ;;  %v5846_v10 = vpack.c.bf16 %v14080_v0, %v14080_v0 }
0x1427   : > { %11952 = vmatprep.mubr.msk.bf16.mxu1 %vm3549_vm9, %v5532_v59  ;;  %v5533_v14 = vpack.c.bf16 %v5531_v28, %v5531_v28  ;;  %v5951_v28 = vpack.c.bf16 %v5831_v17, %v5831_v17  ;;  %v6010_v59 = vpack.c.bf16 %v14082_v16, %v14082_v16 }
0x1429   : > { %11953 = vmatmul.mubr.msk.bf16.vlgmr.msra.gmra.mrb[140].mxu1 %vm3549_vm9, %v5533_v14  ;;  %v5959_v2 = vsel %vm3009_vm7, %v5951_v28, 0 }
0x142a   : > { %11973 = vmatpush3.bf16.msra.mxu1 %v12337_v32  ;;  %11976 = vmatprep.mubr.msk.bf16.mxu1 %vm12861_vm3, %v12860_v18 }
0x142b   : > { %11974 = vmatprep.subr.bf16.mxu1 %v12860_v18 }
0x142e   : > { %11975 = vmatpush3.bf16.msra.mxu1 %v12338_v20 }
0x1431   : > { %11977 = vmatmul.mubr.msk.bf16.vlgmr.msra.gmra.mrb[144].mxu1 %vm2935_vm5, %v13937_v6 }
0x1432   : > { %11980 = vmatprep.mubr.msk.bf16.mxu1 %vm12861_vm3, %v12860_v18 }
0x1439   : > { %11981 = vmatmul.mubr.msk.bf16.gmra.mrb[148].mxu1 %vm2935_vm5, %v13952_v38 }
0x143a   : > { %11984 = vmatprep.mubr.msk.bf16.mxu1 %vm12861_vm3, %v12860_v18 }
0x1441   : > { %11985 = vmatmul.mubr.msk.bf16.gmra.mrb[152].mxu1 %vm2935_vm5, %v13963_v9 }
0x1442   : > { %12008 = vmatprep.mubr.msk.bf16.mxu1 %vm2992_vm6, %v5845_v3 }
0x14ee   : > { %v14142_v53 = vpop.f32.mrb[136].mxu1 }
0x14ef   : > { %v14144_v6 = vpop.f32.mrb[137].mxu1 }
0x14f0   : > { %v11939_v12 = vpop.f32.mrb[138].mxu1 }
0x14f1   : > { %v5418_v33 = vpop.f32.mrb[139].mxu1 }
0x14f2   : > { %v5596_v29 = vpack.c.bf16 %v5418_v33, %v14144_v6 }
0x14fc   : > { %v14147_v38 = vpop.f32.mrb[140].mxu1 }
0x14fd   : > { %v5579_v60 = vpop.f32.mrb[141].mxu1 }
0x14fe   : > { %v5597_v54 = vpack.c.bf16 %v5579_v60, %v14142_v53  ;;  %v11955_v31 = vpop.f32.mrb[142].mxu1 }
0x14ff   : > { %v5582_v9 = vpop.f32.mrb[143].mxu1 }
0x1500   : > { %v5598_v25 = vpack.c.bf16 %v14147_v38, %v5582_v9 }
0x1504   : > { %v5740_v1 = vpop.f32.mrb[144].mxu1 }
0x1505   : > { %v11978_v3 = vpop.f32.mrb[145].mxu1  ;;  %v5741_v39 = vadd.f32 %v10393_v62, %v5740_v1 }
0x1506   : > { %v5743_v56 = vpop.f32.mrb[146].mxu1 }
0x1507   : > { %v5744_v48 = vadd.f32 %v10393_v62, %v5743_v56  ;;  %v11979_v34 = vpop.f32.mrb[147].mxu1 }
0x1509   : > { %v5847_v61 = vpack.c.bf16 %v5744_v48, %v5741_v39 }
0x150b   : > { %12142 = vmatprep.subr.msk.bf16.mxu1 %vm2992_vm6, %v5847_v61  ;;  %v5856_v19 = vsel %vm2992_vm6, %v5847_v61, 0 }
0x150c   : > { %v5748_v5 = vpop.f32.mrb[148].mxu1  ;;  %12005 = vmatpush3.bf16.xpose.msra.mxu1 %v5856_v19 }
0x150d   : > { %v5749_v42 = vadd.f32 %v10393_v62, %v5748_v5  ;;  %v11982_v43 = vpop.f32.mrb[149].mxu1 }
0x150e   : > { %v5751_v63 = vpop.f32.mrb[150].mxu1 }
0x150f   : > { %v5848_v24 = vpack.c.bf16 %v5749_v42, %v5749_v42  ;;  %v11983_v8 = vpop.f32.mrb[151].mxu1  ;;  %v5752_v7 = vadd.f32 %v10393_v62, %v5751_v63 }
0x1511   : > { %12143 = vmatprep.subr.msk.bf16.mxu1 %vm2992_vm6, %v5848_v24  ;;  %v5859_v57 = vsel %vm2992_vm6, %v5848_v24, 0 }
0x1514   : > { %v5756_v40 = vpop.f32.mrb[152].mxu1  ;;  %12007 = vmatpush3.bf16.xpose.msra.mxu1 %v5859_v57 }
0x1515   : > { %v5757_v11 = vadd.f32 %v10393_v62, %v5756_v40  ;;  %v11986_v37 = vpop.f32.mrb[153].mxu1  ;;  %12012 = vmatprep.subr.bf16.mxu1 %v14090_v36 }
0x1516   : > { %v5759_v13 = vpop.f32.mrb[154].mxu1 }
0x1517   : > { %v6011_v21 = vpack.c.bf16 %v5757_v11, %v5752_v7  ;;  %v5760_v30 = vadd.f32 %v10393_v62, %v5759_v13  ;;  %v11987_v27 = vpop.f32.mrb[155].mxu1 }
0x1519   : > { %v6012_v23 = vpack.c.bf16 %v5760_v30, %v5760_v30  ;;  %12145 = vmatprep.subr.msk.bf16.mxu0 %vm2992_vm6, %v6011_v21  ;;  %v6020_v4 = vsel %vm2992_vm6, %v6011_v21, 0 }
0x151a   : > { %12021 = vmatpush3.bf16.xpose.msra.mxu0 %v6020_v4 }
0x151b   : > { %12009 = vmatmul.mubr.msk.bf16.vlgmr.msra.gmra.mrb[156].mxu1 %vm2992_vm6, %v5846_v10  ;;  %12146 = vmatprep.subr.msk.bf16.mxu0 %vm2992_vm6, %v6012_v23  ;;  %v6023_v0 = vsel %vm2992_vm6, %v6012_v23, 0 }
0x151c   : > { %12013 = vmatpush3.bf16.msra.mxu1 %v14090_v36 }
0x151d   : > { %12144 = vmatprep.subr.msk.bf16.mxu1 %vm3009_vm7, %v5951_v28 }
0x1520   : > { %12015 = vmatpush3.bf16.msra.mxu1 %v5959_v2 }
0x1521   : > { %12028 = vmatprep.subr.bf16.mxu1 %v14096_v15 }
0x1522   : > { %12023 = vmatpush3.bf16.xpose.msra.mxu0 %v6023_v0 }
0x1523   : > { %12050 = vmatprep.subr.bf16.mxu0 %v12860_v18 }
0x1529   : > { %12025 = vmatmul.mubr.msk.bf16.vlgmr.msra.gmra.mrb[168].mxu0 %vm2992_vm6, %v6010_v59 }
0x152a   : > { %12051 = vmatpush3.bf16.msra.mxu0 %v12339_v26  ;;  %12052 = vmatprep.mubr.msk.bf16.mxu0 %vm12861_vm3, %v12860_v18 }
0x152b   : > { %12080 = vmatprep.subr.bf16.mxu0 %v12860_v18 }
0x1531   : > { %12053 = vmatmul.mubr.msk.bf16.vlgmr.msra.gmra.mrb[172].mxu0 %vm2992_vm6, %v5596_v29 }
0x1532   : > { %12056 = vmatprep.mubr.msk.bf16.mxu0 %vm12861_vm3, %v12860_v18 }
0x1539   : > { %12057 = vmatmul.mubr.msk.bf16.gmra.mrb[176].mxu0 %vm2992_vm6, %v5597_v54 }
0x153a   : > { %12060 = vmatprep.mubr.msk.bf16.mxu0 %vm12861_vm3, %v12860_v18 }
0x1541   : > { %12061 = vmatmul.mubr.msk.bf16.gmra.mrb[180].mxu0 %vm2992_vm6, %v5598_v25 }
0x1542   : > { %12096 = vmatprep.mubr.msk.bf16.mxu0 %vm12861_vm3, %v12860_v18 }
0x15ee   : > { %v12010_v16 = vpop.f32.mrb[156].mxu1 }
0x15ef   : > { %v5895_v36 = vpop.f32.mrb[157].mxu1  ;;  %v5911_v32 = vmul.f32 0.25, %v12010_v16 }
0x15f0   : > { %v5909_v14 = vmul.f32 0.25, %v5895_v36  ;;  %v12011_v20 = vpop.f32.mrb[158].mxu1 }
0x15f1   : > { %v5898_v53 = vpop.f32.mrb[159].mxu1  ;;  %v5914_v38 = vadd.f32 %v5911_v32, %v13572_v44 }
0x15f2   : > { %v5910_v6 = vmul.f32 0.25, %v5898_v53  ;;  %v5912_v12 = vadd.f32 %v5909_v14, %v13572_v44 }
0x15f3   : > { %v5921_v54 = vsel %vm3549_vm9, %v5914_v38, -inf }
0x15f4   : > { %v5915_v33 = vsel %vm3549_vm9, %v5912_v12, -inf  ;;  %v5913_v29 = vadd.f32 %v5910_v6, %v13572_v44 }
0x15f5   : > { %5916 = vmax.xlane.f32.xlu1 %v5915_v33 }
0x15f6   : > { %v5918_v60 = vsel %vm3549_vm9, %v5913_v29, -inf }
0x15f7   : > { %5919 = vmax.xlane.f32.xlu0 %v5918_v60 }
0x15f9   : > { %5922 = vmax.xlane.f32.xlu1 %v5921_v54 }
0x15fc   : > { %v12026_v31 = vpop.f32.mrb[168].mxu0 }
0x15fd   : > { %v6059_v9 = vpop.f32.mrb[169].mxu0  ;;  %v6075_v25 = vmul.f32 0.25, %v12026_v31 }
0x15fe   : > { %v6073_v62 = vmul.f32 0.25, %v6059_v9  ;;  %v12027_v1 = vpop.f32.mrb[170].mxu0 }
0x15ff   : > { %v6062_v3 = vpop.f32.mrb[171].mxu0  ;;  %v6078_v61 = vadd.f32 %v6075_v25, %v13572_v44 }
0x1600   : > { %v6074_v56 = vmul.f32 0.25, %v6062_v3  ;;  %v6076_v39 = vadd.f32 %v6073_v62, %v13572_v44 }
0x1601   : > { %v6085_v63 = vsel %vm3549_vm9, %v6078_v61, -inf }
0x1602   : > { %v6079_v48 = vsel %vm3549_vm9, %v6076_v39, -inf  ;;  %v6077_v34 = vadd.f32 %v6074_v56, %v13572_v44 }
0x1603   : > { %6080 = vmax.xlane.f32.xlu0 %v6079_v48 }
0x1604   : > { %v14197_v19 = vpop.f32.mrb[172].mxu0  ;;  %v6082_v5 = vsel %vm3549_vm9, %v6077_v34, -inf }
0x1605   : > { %v12054_v42 = vpop.f32.mrb[173].mxu0  ;;  %6083 = vmax.xlane.f32.xlu1 %v6082_v5 }
0x1606   : > { %v14200_v43 = vpop.f32.mrb[174].mxu0 }
0x1607   : > { %v12055_v24 = vpop.f32.mrb[175].mxu0  ;;  %6086 = vmax.xlane.f32.xlu0 %v6085_v63 }
0x160c   : > { %v14203_v8 = vpop.f32.mrb[176].mxu0 }
0x160d   : > { %v12058_v57 = vpop.f32.mrb[177].mxu0 }
0x160e   : > { %v14205_v40 = vpop.f32.mrb[178].mxu0 }
0x160f   : > { %v12059_v7 = vpop.f32.mrb[179].mxu0 }
0x1614   : > { %v14207_v44 = vpop.f32.mrb[180].mxu0 }
0x1615   : > { %v12062_v11 = vpop.f32.mrb[181].mxu0 }
0x1616   : > { %v14209_v37 = vpop.f32.mrb[182].mxu0 }
0x1617   : > { %v12063_v13 = vpop.f32.mrb[183].mxu0 }
0x1682   : > { %v5917_v17 = vpop.xlane.xlu1 %5916 }
0x1683   : > { %v5924_v21 = vsub.f32 %v5912_v12, %v5917_v17  ;;  %v6115_v17 = vpack.c.bf16 %v14099_v55, %v14099_v55 }
0x1684   : > { %v5920_v30 = vpop.xlane.xlu0 %5919 }
0x1685   : > { %v5927_v27 = vmul.f32 1.442695, %v5924_v21  ;;  %v5925_v10 = vsub.f32 %v5913_v29, %v5920_v30  ;;  %v6123_v21 = vsel %vm3009_vm7, %v6115_v17, 0 }
0x1686   : > { %v5923_v23 = vpop.xlane.xlu1 %5922 }
0x1687   : > { %12697 = vpow2.f32 %v5927_v27  ;;  %v5929_v4 = vmul.f32 1.442695, %v5925_v10  ;;  %v5926_v28 = vsub.f32 %v5914_v38, %v5923_v23 }
0x1689   : > { %12699 = vpow2.f32 %v5929_v4  ;;  %v5931_v2 = vmul.f32 1.442695, %v5926_v28 }
0x168b   : > { %12701 = vpow2.f32 %v5931_v2 }
0x1690   : > { %v6081_v0 = vpop.xlane.xlu0 %6080 }
0x1691   : > { %v12698_v26 = vpop.eup %12697  ;;  %v6088_v59 = vsub.f32 %v6076_v39, %v6081_v0 }
0x1692   : > { %v6084_v16 = vpop.xlane.xlu1 %6083  ;;  %v5933_v36 = vsel %vm3549_vm9, %v12698_v26, 0.0 }
0x1693   : > { %v12700_v32 = vpop.eup %12699  ;;  %v6091_v14 = vmul.f32 1.442695, %v6088_v59  ;;  %v6089_v20 = vsub.f32 %v6077_v34, %v6084_v16  ;;  %5934 = vadd.xlane.f32.xlu1 %v5933_v36 }
0x1694   : > { %v6087_v53 = vpop.xlane.xlu0 %6086  ;;  %v5936_v6 = vsel %vm3549_vm9, %v12700_v32, 0.0 }
0x1695   : > { %v12702_v12 = vpop.eup %12701  ;;  %12703 = vpow2.f32 %v6091_v14  ;;  %v6093_v33 = vmul.f32 1.442695, %v6089_v20  ;;  %v6090_v29 = vsub.f32 %v6078_v61, %v6087_v53  ;;  %5937 = vadd.xlane.f32.xlu0 %v5936_v6 }
0x1696   : > { %v5939_v38 = vsel %vm3549_vm9, %v12702_v12, 0.0 }
0x1697   : > { %12705 = vpow2.f32 %v6093_v33  ;;  %v6095_v60 = vmul.f32 1.442695, %v6090_v29  ;;  %5940 = vadd.xlane.f32.xlu1 %v5939_v38 }
0x1699   : > { %12707 = vpow2.f32 %v6095_v60  ;;  %v10429_v60 = vld [vmem:[%s15045_s14 + $0x1] ss:$0 sm:$0xff] }
0x169f   : > { %v12704_v54 = vpop.eup %12703 }
0x16a0   : > { %v6097_v31 = vsel %vm3549_vm9, %v12704_v54, 0.0 }
0x16a1   : > { %v12706_v9 = vpop.eup %12705  ;;  %6098 = vadd.xlane.f32.xlu0 %v6097_v31 }
0x16a2   : > { %v6100_v25 = vsel %vm3549_vm9, %v12706_v9, 0.0 }
0x16a3   : > { %v12708_v62 = vpop.eup %12707  ;;  %6101 = vadd.xlane.f32.xlu1 %v6100_v25 }
0x16a4   : > { %v6103_v1 = vsel %vm3549_vm9, %v12708_v62, 0.0 }
0x16a5   : > { %6104 = vadd.xlane.f32.xlu0 %v6103_v1 }
0x1720   : > { %v5935_v3 = vpop.xlane.xlu1 %5934 }
0x1721   : > { %12709 = vrcp.f32 %v5935_v3 }
0x1722   : > { %v5938_v56 = vpop.xlane.xlu0 %5937 }
0x1723   : > { %12711 = vrcp.f32 %v5938_v56 }
0x1724   : > { %v5941_v39 = vpop.xlane.xlu1 %5940 }
0x1725   : > { %12713 = vrcp.f32 %v5941_v39 }
0x172b   : > { %v12710_v48 = vpop.eup %12709 }
0x172c   : > { %v5943_v5 = vmul.f32 %v12710_v48, %v12698_v26 }
0x172d   : > { %v12712_v34 = vpop.eup %12711 }
0x172e   : > { %v6099_v61 = vpop.xlane.xlu0 %6098  ;;  %v5945_v42 = vmul.f32 %v12712_v34, %v12700_v32 }
0x172f   : > { %v12714_v63 = vpop.eup %12713  ;;  %12715 = vrcp.f32 %v6099_v61 }
0x1730   : > { %v5947_v24 = vmul.f32 %v12714_v63, %v12702_v12  ;;  %v6102_v57 = vpop.xlane.xlu1 %6101  ;;  %v5948_v7 = vpack.c.bf16 %v5945_v42, %v5943_v5 }
0x1731   : > { %12717 = vrcp.f32 %v6102_v57 }
0x1732   : > { %12016 = vmatprep.mubr.msk.bf16.mxu1 %vm3549_vm9, %v5948_v7  ;;  %v6105_v11 = vpop.xlane.xlu0 %6104  ;;  %v5949_v13 = vpack.c.bf16 %v5947_v24, %v5947_v24 }
0x1733   : > { %12719 = vrcp.f32 %v6105_v11 }
0x1734   : > { %12017 = vmatmul.mubr.msk.bf16.vlgmr.msra.gmra.mrb[160].mxu1 %vm3549_vm9, %v5949_v13 }
0x1735   : > { %12029 = vmatpush3.bf16.msra.mxu1 %v14096_v15  ;;  %v12340_v15 = vld [vmem:[%s15044_s13 + $0x18] sm:$0xff]  }
0x1736   : > { %12147 = vmatprep.subr.msk.bf16.mxu1 %vm3009_vm7, %v6115_v17 }
0x1739   : > { %v12716_v30 = vpop.eup %12715  ;;  %12031 = vmatpush3.bf16.msra.mxu1 %v6123_v21 }
0x173a   : > { %12036 = vmatprep.subr.bf16.mxu1 %v12860_v18  ;;  %v6107_v10 = vmul.f32 %v12716_v30, %v12704_v54 }
0x173b   : > { %v12718_v27 = vpop.eup %12717 }
0x173c   : > { %v6109_v23 = vmul.f32 %v12718_v27, %v12706_v9 }
0x173d   : > { %v12720_v4 = vpop.eup %12719 }
0x173e   : > { %v6111_v28 = vmul.f32 %v12720_v4, %v12708_v62  ;;  %v6112_v2 = vpack.c.bf16 %v6109_v23, %v6107_v10 }
0x1740   : > { %12032 = vmatprep.mubr.msk.bf16.mxu1 %vm3549_vm9, %v6112_v2  ;;  %v6113_v55 = vpack.c.bf16 %v6111_v28, %v6111_v28 }
0x1742   : > { %12033 = vmatmul.mubr.msk.bf16.vlgmr.msra.gmra.mrb[164].mxu1 %vm3549_vm9, %v6113_v55 }
0x1743   : > { %12038 = vmatprep.mubr.msk.bf16.mxu1 %vm12861_vm3, %v12860_v18  ;;  %12037 = vmatpush3.bf16.msra.mxu1 %v12340_v15 }
0x1744   : > { %12064 = vmatprep.subr.bf16.mxu1 %v12860_v18 }
0x1807   : > { %v12018_v0 = vpop.f32.mrb[160].mxu1 }
0x1808   : > { %v5995_v26 = vpop.f32.mrb[161].mxu1 }
0x1809   : > { %v12019_v59 = vpop.f32.mrb[162].mxu1 }
0x180a   : > { %v5998_v16 = vpop.f32.mrb[163].mxu1 }
0x180b   : > { %v6176_v36 = vpack.c.bf16 %v5998_v16, %v5995_v26 }
0x180d   : > { %12039 = vmatmul.mubr.msk.bf16.vlgmr.msra.gmra.mrb[168].mxu1 %vm2992_vm6, %v6176_v36 }
0x180e   : > { %12042 = vmatprep.mubr.msk.bf16.mxu1 %vm12861_vm3, %v12860_v18 }
0x1815   : > { %v12034_v32 = vpop.f32.mrb[164].mxu1 }
0x1816   : > { %v6159_v14 = vpop.f32.mrb[165].mxu1 }
0x1817   : > { %v6177_v20 = vpack.c.bf16 %v6159_v14, %v12018_v0  ;;  %v12035_v53 = vpop.f32.mrb[166].mxu1 }
0x1818   : > { %v6162_v6 = vpop.f32.mrb[167].mxu1 }
0x1819   : > { %v6178_v12 = vpack.c.bf16 %v12034_v32, %v6162_v6  ;;  %12043 = vmatmul.mubr.msk.bf16.gmra.mrb[172].mxu1 %vm2992_vm6, %v6177_v20 }
0x181a   : > { %12046 = vmatprep.mubr.msk.bf16.mxu1 %vm12861_vm3, %v12860_v18 }
0x1821   : > { %12047 = vmatmul.mubr.msk.bf16.gmra.mrb[176].mxu1 %vm2992_vm6, %v6178_v12  ;;  %v12341_v12 = vld [vmem:[%s15046_s17 + $0x10] sm:$0xff]  }
0x1822   : > { %12068 = vmatprep.mubr.msk.bf16.mxu1 %vm12861_vm3, %v12860_v18  ;;  %12065 = vmatpush3.bf16.msra.mxu1 %v12341_v12 }
0x1823   : > { %12066 = vmatprep.subr.bf16.mxu1 %v12860_v18 }
0x18e0   : > { %v6228_v33 = vpop.f32.mrb[168].mxu1 }
0x18e1   : > { %v6301_v29 = vadd.f32 %v14197_v19, %v6228_v33  ;;  %v12040_v38 = vpop.f32.mrb[169].mxu1  ;;  %v12342_v33 = vld [vmem:[%s15046_s17 + $0x18] sm:$0xff]  }
0x18e2   : > { %v6231_v54 = vpop.f32.mrb[170].mxu1  ;;  %12067 = vmatpush3.bf16.msra.mxu1 %v12342_v33 }
0x18e3   : > { %v6323_v31 = vadd.f32 %v6301_v29, %v13865_v45  ;;  %v6304_v9 = vadd.f32 %v14200_v43, %v6231_v54  ;;  %v12041_v25 = vpop.f32.mrb[171].mxu1  ;;  %12108 = vmatprep.subr.bf16.mxu1 %v12860_v18 }
0x18e5   : > { %v14244_v62 = vadd.f32 %v10429_v60, %v6323_v31  ;;  %v6324_v1 = vadd.f32 %v6304_v9, %v13868_v41 }
0x18e7   : > { %v14247_v3 = vadd.f32 %v10429_v60, %v6324_v1  ;;  %v6347_v56 = vsel %vm2935_vm5, %v14244_v62, 0.0 }
0x18e8   : > { %6348 = vadd.xlane.f32.xlu1 %v6347_v56 }
0x18e9   : > { %v6350_v19 = vsel %vm2935_vm5, %v14247_v3, 0.0 }
0x18ea   : > { %6351 = vadd.xlane.f32.xlu0 %v6350_v19 }
0x18ec   : > { %v6236_v39 = vpop.f32.mrb[172].mxu1 }
0x18ed   : > { %v6309_v45 = vadd.f32 %v14203_v8, %v6236_v39  ;;  %v12044_v48 = vpop.f32.mrb[173].mxu1 }
0x18ee   : > { %v6239_v43 = vpop.f32.mrb[174].mxu1 }
0x18ef   : > { %v6325_v34 = vadd.f32 %v6309_v45, %v13875_v22  ;;  %v6312_v61 = vadd.f32 %v14205_v40, %v6239_v43  ;;  %v12045_v41 = vpop.f32.mrb[175].mxu1 }
0x18f1   : > { %v14256_v5 = vadd.f32 %v10429_v60, %v6325_v34  ;;  %v6326_v42 = vadd.f32 %v6312_v61, %v13878_v35 }
0x18f3   : > { %v14259_v63 = vadd.f32 %v10429_v60, %v6326_v42  ;;  %v6353_v24 = vsel %vm2935_vm5, %v14256_v5, 0.0 }
0x18f4   : > { %6354 = vadd.xlane.f32.xlu1 %v6353_v24  ;;  %v6244_v57 = vpop.f32.mrb[176].mxu1 }
0x18f5   : > { %v6317_v8 = vadd.f32 %v14207_v44, %v6244_v57  ;;  %v12048_v7 = vpop.f32.mrb[177].mxu1  ;;  %v6356_v22 = vsel %vm2935_vm5, %v14259_v63, 0.0 }
0x18f6   : > { %6357 = vadd.xlane.f32.xlu0 %v6356_v22  ;;  %v6247_v40 = vpop.f32.mrb[178].mxu1 }
0x18f7   : > { %v6327_v11 = vadd.f32 %v6317_v8, %v13885_v58  ;;  %v6320_v13 = vadd.f32 %v14209_v37, %v6247_v40  ;;  %v12049_v35 = vpop.f32.mrb[179].mxu1  ;;  %v14302_v8 = vld [vmem:[%s15048_s21 + $0x1] ss:$0 sm:$0xff] }
0x18f9   : > { %v14268_v17 = vadd.f32 %v10429_v60, %v6327_v11  ;;  %v6328_v21 = vadd.f32 %v6320_v13, %v13888_v49 }
0x18fb   : > { %v14271_v30 = vadd.f32 %v10429_v60, %v6328_v21  ;;  %v6359_v49 = vsel %vm2935_vm5, %v14268_v17, 0.0 }
0x18fd   : > { %v6362_v26 = vsel %vm2935_vm5, %v14271_v30, 0.0 }
0x1975   : > { %v6349_v27 = vpop.xlane.xlu1 %6348 }
0x1976   : > { %v6365_v10 = vmul.f32 0.03125, %v6349_v27  ;;  %v10433_v27 = vld [vmem:[%s15049_s24 + $0x1] ss:$0 sm:$0xff] }
0x1977   : > { %v6352_v44 = vpop.xlane.xlu0 %6351 }
0x1978   : > { %v6371_v23 = vsub.f32 %v14244_v62, %v6365_v10  ;;  %v6366_v4 = vmul.f32 0.03125, %v6352_v44 }
0x197a   : > { %v6372_v28 = vsub.f32 %v14247_v3, %v6366_v4  ;;  %v6377_v2 = vmul.f32 %v6371_v23, %v6371_v23 }
0x197c   : > { %v6383_v58 = vsel %vm2935_vm5, %v6377_v2, 0.0  ;;  %v6378_v55 = vmul.f32 %v6372_v28, %v6372_v28 }
0x197d   : > { %6384 = vadd.xlane.f32.xlu1 %v6383_v58 }
0x197e   : > { %v6386_v37 = vsel %vm2935_vm5, %v6378_v55, 0.0 }
0x197f   : > { %6387 = vadd.xlane.f32.xlu0 %v6386_v37 }
0x1981   : > { %v6355_v15 = vpop.xlane.xlu1 %6354  ;;  %6360 = vadd.xlane.f32.xlu1 %v6359_v49 }
0x1982   : > { %v6367_v0 = vmul.f32 0.03125, %v6355_v15 }
0x1983   : > { %v6358_v59 = vpop.xlane.xlu0 %6357  ;;  %6363 = vadd.xlane.f32.xlu0 %v6362_v26 }
0x1984   : > { %v6373_v16 = vsub.f32 %v14256_v5, %v6367_v0  ;;  %v6368_v36 = vmul.f32 0.03125, %v6358_v59  ;;  %v12343_v59 = vld [vmem:[%s15047_s19 + $0x40] sm:$0xff]  }
0x1985   : > { %12081 = vmatpush3.bf16.msra.mxu0 %v12343_v59 }
0x1986   : > { %v6374_v32 = vsub.f32 %v14259_v63, %v6368_v36  ;;  %v6379_v14 = vmul.f32 %v6373_v16, %v6373_v16  ;;  %12082 = vmatprep.subr.bf16.mxu0 %v12860_v18  ;;  %v12345_v36 = vld [vmem:[%s15047_s19 + $0x50] sm:$0xff]  }
0x1988   : > { %v6389_v20 = vsel %vm2935_vm5, %v6379_v14, 0.0  ;;  %v6380_v53 = vmul.f32 %v6374_v32, %v6374_v32  ;;  %v12347_v14 = vld [vmem:[%s15047_s19 + $0x60] sm:$0xff]  }
0x1989   : > { %6390 = vadd.xlane.f32.xlu1 %v6389_v20  ;;  %v12348_v20 = vld [vmem:[%s15047_s19 + $0x68] sm:$0xff]  }
0x198a   : > { %v6392_v6 = vsel %vm2935_vm5, %v6380_v53, 0.0  ;;  %v12349_v53 = vld [vmem:[%s15047_s19 + $0x70] sm:$0xff]  }
0x198b   : > { %6393 = vadd.xlane.f32.xlu0 %v6392_v6  ;;  %v12350_v6 = vld [vmem:[%s15047_s19 + $0x78] sm:$0xff]  }
0x1a0a   : > { %v6385_v29 = vpop.xlane.xlu1 %6384 }
0x1a0b   : > { %v6401_v38 = vmul.f32 0.03125, %v6385_v29 }
0x1a0c   : > { %v6388_v60 = vpop.xlane.xlu0 %6387 }
0x1a0d   : > { %v6407_v54 = vadd.f32 1e-05, %v6401_v38  ;;  %v6402_v31 = vmul.f32 0.03125, %v6388_v60 }
0x1a0e   : > { %v6361_v9 = vpop.xlane.xlu1 %6360 }
0x1a0f   : > { %12721 = vrsqrt.f32 %v6407_v54  ;;  %v6408_v25 = vadd.f32 1e-05, %v6402_v31  ;;  %v6369_v1 = vmul.f32 0.03125, %v6361_v9 }
0x1a10   : > { %v6364_v56 = vpop.xlane.xlu0 %6363 }
0x1a11   : > { %12723 = vrsqrt.f32 %v6408_v25  ;;  %v14290_v19 = vsub.f32 %v14268_v17, %v6369_v1  ;;  %v6370_v39 = vmul.f32 0.03125, %v6364_v56 }
0x1a13   : > { %v14293_v45 = vsub.f32 %v14271_v30, %v6370_v39  ;;  %v6381_v48 = vmul.f32 %v14290_v19, %v14290_v19 }
0x1a15   : > { %v6395_v43 = vsel %vm2935_vm5, %v6381_v48, 0.0  ;;  %v6382_v34 = vmul.f32 %v14293_v45, %v14293_v45 }
0x1a16   : > { %6396 = vadd.xlane.f32.xlu1 %v6395_v43  ;;  %v6391_v61 = vpop.xlane.xlu1 %6390 }
0x1a17   : > { %v6403_v41 = vmul.f32 0.03125, %v6391_v61  ;;  %v6398_v42 = vsel %vm2935_vm5, %v6382_v34, 0.0  ;;  %v10439_v61 = vld [vmem:[%s15050_s25 + $0x1] ss:$0 sm:$0xff] }
0x1a18   : > { %6399 = vadd.xlane.f32.xlu0 %v6398_v42  ;;  %v6394_v24 = vpop.xlane.xlu0 %6393 }
0x1a19   : > { %v12722_v57 = vpop.eup %12721  ;;  %v6409_v7 = vadd.f32 1e-05, %v6403_v41  ;;  %v6404_v22 = vmul.f32 0.03125, %v6394_v24 }
0x1a1a   : > { %v6419_v40 = vmul.f32 %v12722_v57, %v6371_v23 }
0x1a1b   : > { %v12724_v11 = vpop.eup %12723  ;;  %12725 = vrsqrt.f32 %v6409_v7  ;;  %v6410_v13 = vadd.f32 1e-05, %v6404_v22 }
0x1a1c   : > { %v6431_v35 = vmul.f32 %v14302_v8, %v6419_v40  ;;  %v6420_v21 = vmul.f32 %v12724_v11, %v6372_v28 }
0x1a1d   : > { %12727 = vrsqrt.f32 %v6410_v13 }
0x1a1e   : > { %v6432_v10 = vmul.f32 %v14302_v8, %v6420_v21  ;;  %v6443_v44 = vadd.f32 %v10433_v27, %v6431_v35 }
0x1a20   : > { %v6444_v4 = vadd.f32 %v10433_v27, %v6432_v10 }
0x1a22   : > { %v6454_v2 = vpack.c.bf16 %v6444_v4, %v6443_v44 }
0x1a24   : > { %12069 = vmatmul.mubr.msk.bf16.vlgmr.msra.gmra.mrb[180].mxu1 %vm2935_vm5, %v6454_v2  ;;  %v12351_v2 = vld [vmem:[%s15052_s2] sm:$0xff]  }
0x1a25   : > { %v12726_v58 = vpop.eup %12725  ;;  %12072 = vmatprep.mubr.msk.bf16.mxu1 %vm12861_vm3, %v12860_v18  ;;  %12109 = vmatpush3.bf16.msra.mxu1 %v12351_v2 }
0x1a26   : > { %v6421_v23 = vmul.f32 %v12726_v58, %v6373_v16  ;;  %v12344_v16 = vld [vmem:[%s15047_s19 + $0x48] sm:$0xff]   ;;  %12110 = vmatprep.subr.bf16.mxu1 %v12860_v18 }
0x1a27   : > { %v12728_v55 = vpop.eup %12727  ;;  %12083 = vmatpush3.bf16.msra.mxu0 %v12344_v16  ;;  %v12352_v58 = vld [vmem:[%s15052_s2 + $0x8] sm:$0xff]   ;;  %s15053_s2 = sld [smem:[#allocation37_spill]] }
0x1a28   : > { %v6422_v37 = vmul.f32 %v12728_v55, %v6374_v32  ;;  %v6433_v28 = vmul.f32 %v14302_v8, %v6421_v23  ;;  %12084 = vmatprep.subr.bf16.mxu0 %v12860_v18  ;;  %v12346_v32 = vld [vmem:[%s15047_s19 + $0x58] sm:$0xff]  }
0x1a29   : > { %12111 = vmatpush3.bf16.msra.mxu1 %v12352_v58 }
0x1a2a   : > { %v6434_v49 = vmul.f32 %v14302_v8, %v6422_v37  ;;  %v6445_v15 = vadd.f32 %v10433_v27, %v6433_v28 }
0x1a2b   : > { %12085 = vmatpush3.bf16.msra.mxu0 %v12345_v36 }
0x1a2c   : > { %v6446_v0 = vadd.f32 %v10433_v27, %v6434_v49  ;;  %12086 = vmatprep.subr.bf16.mxu0 %v12860_v18 }
0x1a2e   : > { %v6455_v26 = vpack.c.bf16 %v6446_v0, %v6445_v15 }
0x1a2f   : > { %12087 = vmatpush3.bf16.msra.mxu0 %v12346_v32 }
0x1a30   : > { %12073 = vmatmul.mubr.msk.bf16.gmra.mrb[184].mxu1 %vm2935_vm5, %v6455_v26  ;;  %12088 = vmatprep.subr.bf16.mxu0 %v12860_v18 }
0x1a31   : > { %12076 = vmatprep.mubr.msk.bf16.mxu1 %vm12861_vm3, %v12860_v18 }
0x1a33   : > { %12089 = vmatpush3.bf16.msra.mxu0 %v12347_v14  ;;  %v10470_v14 = vld [vmem:[%s15051_s29 + $0x1] ss:$0 sm:$0xff] }
0x1a34   : > { %12090 = vmatprep.subr.bf16.mxu0 %v12860_v18 }
0x1a37   : > { %12091 = vmatpush3.bf16.msra.mxu0 %v12348_v20 }
0x1a38   : > { %12092 = vmatprep.subr.bf16.mxu0 %v12860_v18 }
0x1a3b   : > { %12093 = vmatpush3.bf16.msra.mxu0 %v12349_v53 }
0x1a3c   : > { %12094 = vmatprep.subr.bf16.mxu0 %v12860_v18 }
0x1a3f   : > { %12095 = vmatpush3.bf16.msra.mxu0 %v12350_v6 }
0x1aa3   : > { %v6397_v12 = vpop.xlane.xlu1 %6396 }
0x1aa4   : > { %v6405_v33 = vmul.f32 0.03125, %v6397_v12 }
0x1aa5   : > { %v6400_v29 = vpop.xlane.xlu0 %6399 }
0x1aa6   : > { %v6411_v38 = vadd.f32 1e-05, %v6405_v33  ;;  %v6406_v60 = vmul.f32 0.03125, %v6400_v29 }
0x1aa8   : > { %12729 = vrsqrt.f32 %v6411_v38  ;;  %v6412_v54 = vadd.f32 1e-05, %v6406_v60 }
0x1aaa   : > { %12731 = vrsqrt.f32 %v6412_v54 }
0x1ab2   : > { %v12730_v31 = vpop.eup %12729 }
0x1ab3   : > { %v6423_v9 = vmul.f32 %v12730_v31, %v14290_v19 }
0x1ab4   : > { %v12732_v25 = vpop.eup %12731 }
0x1ab5   : > { %v6424_v1 = vmul.f32 %v12732_v25, %v14293_v45  ;;  %v6435_v56 = vmul.f32 %v14302_v8, %v6423_v9 }
0x1ab7   : > { %v6436_v39 = vmul.f32 %v14302_v8, %v6424_v1  ;;  %v6447_v48 = vadd.f32 %v10433_v27, %v6435_v56  ;;  %v12353_v56 = vld [vmem:[%s15053_s2] ss:$16 sps:$4 sm:$0xff]  }
0x1ab9   : > { %v6448_v43 = vadd.f32 %v10433_v27, %v6436_v39  ;;  %v12355_v39 = vld [vmem:[%s15053_s2 + $0x4] ss:$16 sps:$4 sm:$0xff]  }
0x1aba   : > { %6868 = vmatprep.subr.bf16.mxu0 %v12355_v39 }
0x1abb   : > { %v6456_v34 = vpack.c.bf16 %v6448_v43, %v6447_v48  ;;  %v12358_v48 = vld [vmem:[%s15053_s2 + $0xc] ss:$16 sps:$4 sm:$0xff]  }
0x1abc   : > { %6931 = vmatprep.subr.bf16.mxu1 %v12358_v48  ;;  %v12364_v43 = vld [vmem:[%s15053_s2 + $0x2c] ss:$16 sps:$4 sm:$0xff]  }
0x1abd   : > { %12077 = vmatmul.mubr.msk.bf16.gmra.mrb[188].mxu1 %vm2935_vm5, %v6456_v34  ;;  %v12359_v34 = vld [vmem:[%s15053_s2 + $0x20] ss:$16 sps:$4 sm:$0xff]  }
0x1abe   : > { %12112 = vmatprep.mubr.msk.bf16.mxu1 %vm12861_vm3, %v12860_v18 }
0x1af7   : > { %v6520_v41 = vpop.f32.mrb[180].mxu1 }
0x1af8   : > { %v6521_v42 = vadd.f32 %v10439_v61, %v6520_v41  ;;  %v12070_v24 = vpop.f32.mrb[181].mxu1  ;;  %v12864_v41 = vmov 0  }
0x1af9   : > { %v6523_v19 = vpop.f32.mrb[182].mxu1  ;;  %12233 = vset.pattern.permute.xlu1 %v12864_v41  ;;  %12234 = vset.pattern.permute.xlu0 %v12864_v41 }
0x1afa   : > { %v6524_v57 = vadd.f32 %v10439_v61, %v6523_v19  ;;  %v12071_v7 = vpop.f32.mrb[183].mxu1  ;;  %v6543_v45 = vmax.f32 %v6521_v42, 0.0 }
0x1afc   : > { %v6544_v22 = vmax.f32 %v6524_v57, 0.0 }
0x1afe   : > { %v6566_v40 = vpack.c.bf16 %v6544_v22, %v6543_v45 }
0x1b00   : > { %12097 = vmatmul.mubr.bf16.vlgmr.msra.gmra.mrb[184].mxu0 %v6566_v40 }
0x1b01   : > { %12100 = vmatprep.mubr.msk.bf16.mxu0 %vm12861_vm3, %v12860_v18  ;;  %6869 = vmatpush1.bf16.msra.mxu0 %v12353_v56 }
0x1b03   : > { %v6528_v8 = vpop.f32.mrb[184].mxu1 }
0x1b04   : > { %v6529_v11 = vadd.f32 %v10439_v61, %v6528_v8  ;;  %v12074_v13 = vpop.f32.mrb[185].mxu1  ;;  %v14368_v8 = vld [vmem:[%s15054_s3] ss:$0 sm:$0xff]  ;;  %s15056_s3 = sld [smem:[#allocation38_spill]] }
0x1b05   : > { %v6531_v35 = vpop.f32.mrb[186].mxu1 }
0x1b06   : > { %v6532_v21 = vadd.f32 %v10439_v61, %v6531_v35  ;;  %v12075_v27 = vpop.f32.mrb[187].mxu1  ;;  %v6545_v10 = vmax.f32 %v6529_v11, 0.0 }
0x1b08   : > { %v6546_v44 = vmax.f32 %v6532_v21, 0.0 }
0x1b0a   : > { %v6567_v4 = vpack.c.bf16 %v6546_v44, %v6545_v10 }
0x1b0c   : > { %12101 = vmatmul.mubr.bf16.gmra.mrb[188].mxu0 %v6567_v4 }
0x1b0d   : > { %12104 = vmatprep.mubr.msk.bf16.mxu0 %vm12861_vm3, %v12860_v18 }
0x1b90   : > { %v6536_v23 = vpop.f32.mrb[188].mxu1 }
0x1b91   : > { %v6537_v55 = vadd.f32 %v10439_v61, %v6536_v23  ;;  %v12078_v37 = vpop.f32.mrb[189].mxu1 }
0x1b92   : > { %v6539_v28 = vpop.f32.mrb[190].mxu1 }
0x1b93   : > { %v6540_v49 = vadd.f32 %v10439_v61, %v6539_v28  ;;  %v12079_v15 = vpop.f32.mrb[191].mxu1  ;;  %v6547_v0 = vmax.f32 %v6537_v55, 0.0  ;;  %v12362_v61 = vld [vmem:[%s15053_s2 + $0x28] ss:$16 sps:$4 sm:$0xff]  }
0x1b95   : > { %v6548_v26 = vmax.f32 %v6540_v49, 0.0 }
0x1b97   : > { %v6568_v59 = vpack.c.bf16 %v6548_v26, %v6547_v0 }
0x1b99   : > { %12105 = vmatmul.mubr.bf16.gmra.mrb[192].mxu0 %v6568_v59 }
0x1b9a   : > { %6900 = vmatprep.mubr.bf16.mxu0 %v12864_v41 }
0x1bd3   : > { %v6651_v16 = vpop.f32.mrb[184].mxu0 }
0x1bd4   : > { %v6674_v36 = vadd.f32 %v6651_v16, %v14244_v62  ;;  %v12098_v32 = vpop.f32.mrb[185].mxu0 }
0x1bd5   : > { %v6654_v20 = vpop.f32.mrb[186].mxu0 }
0x1bd6   : > { %v6675_v53 = vadd.f32 %v6654_v20, %v14247_v3  ;;  %v12099_v6 = vpop.f32.mrb[187].mxu0  ;;  %v6688_v12 = vadd.f32 %v10470_v14, %v6674_v36 }
0x1bd8   : > { %v6689_v33 = vadd.f32 %v10470_v14, %v6675_v53 }
0x1bda   : > { %v6698_v29 = vpack.c.bf16 %v6689_v33, %v6688_v12 }
0x1bdc   : > { %12113 = vmatmul.mubr.msk.bf16.vlgmr.msra.gmra.mrb[192].mxu1 %vm2935_vm5, %v6698_v29 }
0x1bdd   : > { %12116 = vmatprep.mubr.msk.bf16.mxu1 %vm12861_vm3, %v12860_v18 }
0x1bdf   : > { %v6659_v38 = vpop.f32.mrb[188].mxu0 }
0x1be0   : > { %v6676_v62 = vadd.f32 %v6659_v38, %v14256_v5  ;;  %v12102_v60 = vpop.f32.mrb[189].mxu0  ;;  %v12356_v5 = vld [vmem:[%s15053_s2 + $0x8] ss:$16 sps:$4 sm:$0xff]  }
0x1be1   : > { %v6662_v54 = vpop.f32.mrb[190].mxu0  ;;  %6932 = vmatpush1.bf16.msra.mxu1 %v12356_v5 }
0x1be2   : > { %v6677_v3 = vadd.f32 %v6662_v54, %v14259_v63  ;;  %v12103_v31 = vpop.f32.mrb[191].mxu0  ;;  %v6690_v9 = vadd.f32 %v10470_v14, %v6676_v62  ;;  %v12361_v63 = vld [vmem:[%s15053_s2 + $0x24] ss:$16 sps:$4 sm:$0xff]   ;;  %6933 = vmatprep.subr.bf16.mxu1 %v12364_v43  ;;  %s15055_s2 = sld [smem:[#allocation39_spill]] }
0x1be3   : > { %6870 = vmatprep.subr.bf16.mxu0 %v12361_v63 }
0x1be4   : > { %v6691_v25 = vadd.f32 %v10470_v14, %v6677_v3  ;;  %6871 = vmatpush1.bf16.msra.mxu0 %v12359_v34  ;;  %v10491_v34 = vld [vmem:[#allocation2] ss:$0 sm:$0xff] }
0x1be5   : > { %6934 = vmatpush1.bf16.msra.mxu1 %v12362_v61  ;;  %7101 = vperm.xlu1 %12233, %v10491_v34  }
0x1be6   : > { %v6699_v1 = vpack.c.bf16 %v6691_v25, %v6690_v9 }
0x1be8   : > { %12117 = vmatmul.mubr.msk.bf16.gmra.mrb[196].mxu1 %vm2935_vm5, %v6699_v1  ;;  %v12365_v37 = vld [vmem:[%s15055_s2 + $0x40] sm:$0xff]   ;;  %v12369_v0 = vld [vmem:[%s15055_s2 + $0x48] sm:$0xff]   ;;  %v12373_v36 = vld [vmem:[%s15055_s2 + $0x50] sm:$0xff]  }
0x1be9   : > { %12120 = vmatprep.mubr.msk.bf16.mxu1 %vm12861_vm3, %v12860_v18  ;;  %v12366_v28 = vld [vmem:[%s15055_s2 + $0xc0] sm:$0xff]   ;;  %v12370_v26 = vld [vmem:[%s15055_s2 + $0xc8] sm:$0xff]   ;;  %11282 = vmatprep.subr.bf16.mxu0 %v12365_v37  ;;  %v12374_v32 = vld [vmem:[%s15055_s2 + $0xd0] sm:$0xff]  }
0x1bea   : > { %v12367_v49 = vld [vmem:[%s15055_s2] sm:$0xff]   ;;  %11316 = vmatprep.subr.bf16.mxu1 %v12366_v28  ;;  %v12371_v59 = vld [vmem:[%s15055_s2 + $0x8] sm:$0xff]   ;;  %v12376_v20 = vld [vmem:[%s15055_s2 + $0x90] sm:$0xff]  }
0x1beb   : > { %v12368_v15 = vld [vmem:[%s15055_s2 + $0x80] sm:$0xff]   ;;  %v12372_v16 = vld [vmem:[%s15055_s2 + $0x88] sm:$0xff]   ;;  %v12377_v53 = vld [vmem:[%s15055_s2 + $0x58] sm:$0xff]  }
0x1bec   : > { %v12378_v6 = vld [vmem:[%s15055_s2 + $0xd8] sm:$0xff]   ;;  %v12381_v29 = vld [vmem:[%s15055_s2 + $0x60] sm:$0xff]   ;;  %v12385_v54 = vld [vmem:[%s15055_s2 + $0x68] sm:$0xff]  }
0x1bed   : > { %v12379_v12 = vld [vmem:[%s15055_s2 + $0x18] sm:$0xff]   ;;  %v12382_v38 = vld [vmem:[%s15055_s2 + $0xe0] sm:$0xff]   ;;  %v12386_v3 = vld [vmem:[%s15055_s2 + $0xe8] sm:$0xff]  }
0x1bee   : > { %v12380_v33 = vld [vmem:[%s15055_s2 + $0x98] sm:$0xff]   ;;  %v12383_v62 = vld [vmem:[%s15055_s2 + $0x20] sm:$0xff]   ;;  %v12387_v31 = vld [vmem:[%s15055_s2 + $0x28] sm:$0xff]  }
0x1bef   : > { %v12384_v60 = vld [vmem:[%s15055_s2 + $0xa0] sm:$0xff]   ;;  %v12388_v9 = vld [vmem:[%s15055_s2 + $0xa8] sm:$0xff]   ;;  %v12389_v25 = vld [vmem:[%s15055_s2 + $0x70] sm:$0xff]  }
0x1bf0   : > { %v12390_v1 = vld [vmem:[%s15055_s2 + $0xf0] sm:$0xff]   ;;  %v12393_v5 = vld [vmem:[%s15055_s2 + $0x78] sm:$0xff]  }
0x1bf1   : > { %v12391_v56 = vld [vmem:[%s15055_s2 + $0x30] sm:$0xff]   ;;  %v12394_v48 = vld [vmem:[%s15055_s2 + $0xf8] sm:$0xff]  }
0x1bf2   : > { %v12392_v39 = vld [vmem:[%s15055_s2 + $0xb0] sm:$0xff]   ;;  %v12395_v63 = vld [vmem:[%s15055_s2 + $0x38] sm:$0xff]  }
0x1bf3   : > { %v12396_v43 = vld [vmem:[%s15055_s2 + $0xb8] sm:$0xff]  }
0x1c6c   : > { %v6667_v18 = vpop.f32.mrb[192].mxu0 }
0x1c6d   : > { %v6678_v42 = vadd.f32 %v6667_v18, %v14268_v17  ;;  %v12106_v24 = vpop.f32.mrb[193].mxu0 }
0x1c6e   : > { %v6670_v19 = vpop.f32.mrb[194].mxu0 }
0x1c6f   : > { %v6679_v57 = vadd.f32 %v6670_v19, %v14271_v30  ;;  %v12107_v7 = vpop.f32.mrb[195].mxu0  ;;  %v6692_v45 = vadd.f32 %v10470_v14, %v6678_v42 }
0x1c70   : > { %v6797_v7 = vld [vmem:[%s15056_s3] sm:$0xf]  ;;  %s10981_s3 = sshll.u32 %s15068_s10, 4  ;;  %s12865_s10 = smov 64  }
0x1c71   : > { %v6693_v22 = vadd.f32 %v10470_v14, %v6679_v57  ;;  %v12375_v14 = vld [vmem:[%s15055_s2 + $0x10] sm:$0xff]   ;;  %s14519_s2 = scalar_lea.vmem %s15057_s12, %s10981_s3 }
0x1c73   : > { %v6700_v40 = vpack.c.bf16 %v6693_v22, %v6692_v45  ;;  %v14416_v45 = vrot.slane %v6797_v7, %v13304_v50  ;;  %v14420_v22 = vrot.slane %v6797_v7, %v1369_v52 }
0x1c75   : > { %12121 = vmatmul.mubr.msk.bf16.gmra.mrb[200].mxu1 %vm2935_vm5, %v6700_v40  ;;  %v14423_v40 = vrot.slane %v6797_v7, %v13301_v47 }
0x1c76   : > { %6963 = vmatprep.mubr.bf16.mxu1 %v12864_v41 }
0x1caf   : > { %v6763_v11 = vpop.f32.mrb[192].mxu1 }
0x1cb0   : > { %v12114_v13 = vpop.f32.mrb[193].mxu1  ;;  %v6764_v21 = vadd.f32 %v14368_v8, %v6763_v11 }
0x1cb1   : > { %v6766_v35 = vpop.f32.mrb[194].mxu1 }
0x1cb2   : > { %v6767_v17 = vadd.f32 %v14368_v8, %v6766_v35  ;;  %v12115_v27 = vpop.f32.mrb[195].mxu1 }
0x1cb4   : > { %v6794_v10 = vpack.c.bf16 %v6767_v17, %v6764_v21 }
0x1cb6   : > { %10485 = vmatmul.mubr.msk.bf16.vlgmr.msra.gmra.mrb[196].mxu0 %vm2935_vm5, %v6794_v10  ;;  %10488 = vmatmul.mubr.msk.bf16.vlgmr.msra.gmra.mrb[204].mxu1 %vm2935_vm5, %v6794_v10 }
0x1cb7   : > { %6910 = vmatprep.mubr.bf16.mxu0 %v12864_v41  ;;  %6973 = vmatprep.mubr.bf16.mxu1 %v12864_v41 }
0x1cb8   : > { %11283 = vmatpush3.bf16.msra.mxu0 %v12367_v49  ;;  %11317 = vmatpush3.bf16.msra.mxu1 %v12368_v15 }
0x1cb9   : > { %11284 = vmatprep.subr.bf16.mxu0 %v12369_v0  ;;  %11318 = vmatprep.subr.bf16.mxu1 %v12370_v26 }
0x1cbb   : > { %v6771_v30 = vpop.f32.mrb[196].mxu1 }
0x1cbc   : > { %v12118_v44 = vpop.f32.mrb[197].mxu1  ;;  %v6772_v2 = vadd.f32 %v14368_v8, %v6771_v30  ;;  %11285 = vmatpush3.bf16.msra.mxu0 %v12371_v59  ;;  %11319 = vmatpush3.bf16.msra.mxu1 %v12372_v16 }
0x1cbd   : > { %v6774_v4 = vpop.f32.mrb[198].mxu1  ;;  %11286 = vmatprep.subr.bf16.mxu0 %v12373_v36  ;;  %11320 = vmatprep.subr.bf16.mxu1 %v12374_v32 }
0x1cbe   : > { %v6775_v58 = vadd.f32 %v14368_v8, %v6774_v4  ;;  %v12119_v23 = vpop.f32.mrb[199].mxu1 }
0x1cc0   : > { %v6795_v55 = vpack.c.bf16 %v6775_v58, %v6772_v2  ;;  %11287 = vmatpush3.bf16.msra.mxu0 %v12375_v14  ;;  %11321 = vmatpush3.bf16.msra.mxu1 %v12376_v20 }
0x1cc1   : > { %11288 = vmatprep.subr.bf16.mxu0 %v12377_v53  ;;  %11322 = vmatprep.subr.bf16.mxu1 %v12378_v6 }
0x1cc2   : > { %10486 = vmatmul.mubr.msk.bf16.gmra.mrb[200].mxu0 %vm2935_vm5, %v6795_v55  ;;  %10489 = vmatmul.mubr.msk.bf16.gmra.mrb[208].mxu1 %vm2935_vm5, %v6795_v55 }
0x1cc3   : > { %6920 = vmatprep.mubr.bf16.mxu0 %v12864_v41  ;;  %6983 = vmatprep.mubr.bf16.mxu1 %v12864_v41 }
0x1cc4   : > { %11289 = vmatpush3.bf16.msra.mxu0 %v12379_v12  ;;  %11323 = vmatpush3.bf16.msra.mxu1 %v12380_v33 }
0x1cc5   : > { %11290 = vmatprep.subr.bf16.mxu0 %v12381_v29  ;;  %11324 = vmatprep.subr.bf16.mxu1 %v12382_v38 }
0x1cc8   : > { %11291 = vmatpush3.bf16.msra.mxu0 %v12383_v62  ;;  %11325 = vmatpush3.bf16.msra.mxu1 %v12384_v60 }
0x1cc9   : > { %11292 = vmatprep.subr.bf16.mxu0 %v12385_v54  ;;  %11326 = vmatprep.subr.bf16.mxu1 %v12386_v3 }
0x1ccc   : > { %11293 = vmatpush3.bf16.msra.mxu0 %v12387_v31  ;;  %11327 = vmatpush3.bf16.msra.mxu1 %v12388_v9 }
0x1ccd   : > { %11294 = vmatprep.subr.bf16.mxu0 %v12389_v25  ;;  %11328 = vmatprep.subr.bf16.mxu1 %v12390_v1 }
0x1cd0   : > { %11295 = vmatpush3.bf16.msra.mxu0 %v12391_v56  ;;  %11329 = vmatpush3.bf16.msra.mxu1 %v12392_v39 }
0x1cd1   : > { %11296 = vmatprep.subr.bf16.mxu0 %v12393_v5  ;;  %11330 = vmatprep.subr.bf16.mxu1 %v12394_v48 }
0x1cd4   : > { %11297 = vmatpush3.bf16.msra.mxu0 %v12395_v63  ;;  %11331 = vmatpush3.bf16.msra.mxu1 %v12396_v43 }
0x1d48   : > { %v6779_v61 = vpop.f32.mrb[200].mxu1 }
0x1d49   : > { %v12122_v41 = vpop.f32.mrb[201].mxu1  ;;  %v6780_v42 = vadd.f32 %v14368_v8, %v6779_v61 }
0x1d4a   : > { %v6782_v18 = vpop.f32.mrb[202].mxu1 }
0x1d4b   : > { %v6783_v24 = vadd.f32 %v14368_v8, %v6782_v18  ;;  %v12123_v19 = vpop.f32.mrb[203].mxu1  ;;  %v14427_v8 = vrot.slane %v6797_v7, %v1365_v51 }
0x1d4d   : > { %v6796_v57 = vpack.c.bf16 %v6783_v24, %v6780_v42 }
0x1d4f   : > { %10487 = vmatmul.mubr.msk.bf16.gmra.mrb[204].mxu0 %vm2935_vm5, %v6796_v57  ;;  %10490 = vmatmul.mubr.msk.bf16.gmra.mrb[212].mxu1 %vm2935_vm5, %v6796_v57 }
0x1d89   : > { %v6902_v11 = vpop.f32.mrb[196].mxu0  ;;  %v6965_v13 = vpop.f32.mrb[204].mxu1 }
0x1d8a   : > { %v6904_v35 = vpop.f32.mrb[197].mxu0  ;;  %v6967_v21 = vpop.f32.mrb[205].mxu1  ;;  %v6903_v52 = vadd.f32 %v6902_v11, %v14423_v40  ;;  %v6966_v30 = vadd.f32 %v6965_v13, %v14427_v8 }
0x1d8b   : > { %v6905_v17 = vadd.f32 %v6904_v35, %v14416_v45  ;;  %v6968_v50 = vadd.f32 %v6967_v21, %v14420_v22  ;;  %v6906_v27 = vpop.f32.mrb[198].mxu0  ;;  %v6969_v10 = vpop.f32.mrb[206].mxu1 }
0x1d8c   : > { %v6907_v47 = vadd.f32 %v6906_v27, %v14423_v40  ;;  %v6970_v46 = vadd.f32 %v6969_v10, %v14427_v8  ;;  %v6908_v51 = vpop.f32.mrb[199].mxu0  ;;  %v6971_v44 = vpop.f32.mrb[207].mxu1  ;;  %v6994_v15 = vmax.f32 %v6903_v52, 0.0  ;;  %v6996_v0 = vmax.f32 %v6966_v30, 0.0 }
0x1d8d   : > { %v6909_v4 = vadd.f32 %v6908_v51, %v14416_v45  ;;  %v6972_v2 = vadd.f32 %v6971_v44, %v14420_v22  ;;  %v6995_v55 = vmax.f32 %v6905_v17, 0.0  ;;  %v6997_v37 = vmax.f32 %v6968_v50, 0.0 }
0x1d8e   : > { %v14437_v58 = vmax.f32 %v6907_v47, 0.0  ;;  %v14439_v23 = vmax.f32 %v6970_v46, 0.0 }
0x1d8f   : > { %v14441_v28 = vmax.f32 %v6909_v4, 0.0  ;;  %v14443_v49 = vmax.f32 %v6972_v2, 0.0 }
0x1d90   : > { %v7082_v16 = vpack.c.bf16 %v14437_v58, %v6994_v15  ;;  %v7084_v36 = vpack.c.bf16 %v14439_v23, %v6996_v0 }
0x1d91   : > { %v7083_v26 = vpack.c.bf16 %v14441_v28, %v6995_v55  ;;  %v7085_v59 = vpack.c.bf16 %v14443_v49, %v6997_v37 }
0x1d93   : > { %7328 = vmatprep.mubr.bf16.mxu0 %v7083_v26  ;;  %7383 = vmatprep.mubr.bf16.mxu1 %v7085_v59  ;;  %v7102_v26 = vpop.permute.xlu1 %7101 }
0x1d94   : > { %7329 = vmatmul.mubr.bf16.vlgmr.msra.gmra.mrb[208].mxu0 %v7082_v16  ;;  %7384 = vmatmul.mubr.bf16.vlgmr.msra.gmra.mrb[216].mxu1 %v7084_v36 }
0x1d95   : > { %v6912_v32 = vpop.f32.mrb[200].mxu0  ;;  %v6975_v14 = vpop.f32.mrb[208].mxu1 }
0x1d96   : > { %v6914_v20 = vpop.f32.mrb[201].mxu0  ;;  %v6977_v53 = vpop.f32.mrb[209].mxu1  ;;  %v14456_v38 = vadd.f32 %v6912_v32, %v14423_v40  ;;  %v14459_v62 = vadd.f32 %v6975_v14, %v14427_v8 }
0x1d97   : > { %v14450_v6 = vadd.f32 %v6914_v20, %v14416_v45  ;;  %v14453_v12 = vadd.f32 %v6977_v53, %v14420_v22  ;;  %v6916_v33 = vpop.f32.mrb[202].mxu0  ;;  %v6979_v29 = vpop.f32.mrb[210].mxu1 }
0x1d98   : > { %v6917_v60 = vadd.f32 %v6916_v33, %v14423_v40  ;;  %v6980_v54 = vadd.f32 %v6979_v29, %v14427_v8  ;;  %v6918_v3 = vpop.f32.mrb[203].mxu0  ;;  %v6981_v31 = vpop.f32.mrb[211].mxu1  ;;  %v7002_v43 = vmax.f32 %v14456_v38, 0.0  ;;  %v7004_v34 = vmax.f32 %v14459_v62, 0.0  ;;  %v12468_v62 = vld [vmem:[%s13054_s27 + $0x288] sm:$0xff]  }
0x1d99   : > { %v6919_v9 = vadd.f32 %v6918_v3, %v14416_v45  ;;  %v6982_v25 = vadd.f32 %v6981_v31, %v14420_v22  ;;  %v7003_v39 = vmax.f32 %v14450_v6, 0.0  ;;  %v7005_v5 = vmax.f32 %v14453_v12, 0.0  ;;  %v12438_v12 = vld [vmem:[%s13054_s27 + $0xd0] sm:$0xff]  }
0x1d9a   : > { %v7006_v1 = vmax.f32 %v6917_v60, 0.0  ;;  %v7008_v56 = vmax.f32 %v6980_v54, 0.0 }
0x1d9b   : > { %v7007_v48 = vmax.f32 %v6919_v9, 0.0  ;;  %v7009_v63 = vmax.f32 %v6982_v25, 0.0 }
0x1d9c   : > { %v7086_v18 = vpack.c.bf16 %v7006_v1, %v7002_v43  ;;  %v7088_v42 = vpack.c.bf16 %v7008_v56, %v7004_v34 }
0x1d9d   : > { %v7087_v61 = vpack.c.bf16 %v7007_v48, %v7003_v39  ;;  %v7089_v41 = vpack.c.bf16 %v7009_v63, %v7005_v5 }
0x1d9f   : > { %7335 = vmatprep.mubr.bf16.mxu0 %v7087_v61  ;;  %7390 = vmatprep.mubr.bf16.mxu1 %v7089_v41 }
0x1da0   : > { %7336 = vmatmul.mubr.bf16.gmra.mrb[212].mxu0 %v7086_v18  ;;  %7391 = vmatmul.mubr.bf16.gmra.mrb[220].mxu1 %v7088_v42 }
0x1e22   : > { %v6922_v24 = vpop.f32.mrb[204].mxu0  ;;  %v6985_v19 = vpop.f32.mrb[212].mxu1 }
0x1e23   : > { %v6924_v57 = vpop.f32.mrb[205].mxu0  ;;  %v6987_v7 = vpop.f32.mrb[213].mxu1  ;;  %v6923_v17 = vadd.f32 %v6922_v24, %v14423_v40  ;;  %v6986_v50 = vadd.f32 %v6985_v19, %v14427_v8 }
0x1e24   : > { %v6925_v11 = vadd.f32 %v6924_v57, %v14416_v45  ;;  %v6988_v13 = vadd.f32 %v6987_v7, %v14420_v22  ;;  %v6926_v35 = vpop.f32.mrb[206].mxu0  ;;  %v6989_v21 = vpop.f32.mrb[214].mxu1 }
0x1e25   : > { %v14482_v27 = vadd.f32 %v6926_v35, %v14423_v40  ;;  %v14485_v10 = vadd.f32 %v6989_v21, %v14427_v8  ;;  %v6928_v52 = vpop.f32.mrb[207].mxu0  ;;  %v6991_v30 = vpop.f32.mrb[215].mxu1  ;;  %v14501_v55 = vmax.f32 %v6923_v17, 0.0  ;;  %v14503_v37 = vmax.f32 %v6986_v50, 0.0 }
0x1e26   : > { %v14488_v47 = vadd.f32 %v6928_v52, %v14416_v45  ;;  %v14491_v46 = vadd.f32 %v6991_v30, %v14420_v22  ;;  %v14495_v4 = vmax.f32 %v6925_v11, 0.0  ;;  %v14497_v2 = vmax.f32 %v6988_v13, 0.0 }
0x1e27   : > { %v7014_v51 = vmax.f32 %v14482_v27, 0.0  ;;  %v7016_v44 = vmax.f32 %v14485_v10, 0.0  ;;  %v12563_v27 = vld [vmem:[%s13054_s27 + $0x208] sm:$0xff]   ;;  %v12565_v10 = vld [vmem:[%s13054_s27 + $0x250] sm:$0xff]  }
0x1e28   : > { %v7015_v40 = vmax.f32 %v14488_v47, 0.0  ;;  %v7017_v8 = vmax.f32 %v14491_v46, 0.0 }
0x1e29   : > { %v7090_v15 = vpack.c.bf16 %v7014_v51, %v14501_v55  ;;  %v7092_v0 = vpack.c.bf16 %v7016_v44, %v14503_v37 }
0x1e2a   : > { %v7091_v45 = vpack.c.bf16 %v7015_v40, %v14495_v4  ;;  %v7093_v22 = vpack.c.bf16 %v7017_v8, %v14497_v2 }
0x1e2c   : > { %7342 = vmatprep.mubr.bf16.mxu0 %v7091_v45  ;;  %7397 = vmatprep.mubr.bf16.mxu1 %v7093_v22 }
0x1e2d   : > { %7343 = vmatmul.mubr.bf16.gmra.mrb[216].mxu0 %v7090_v15  ;;  %7398 = vmatmul.mubr.bf16.gmra.mrb[224].mxu1 %v7092_v0 }
0x1e67   : > { %v11298_v59 = vpop.f32.mrb[208].mxu0  ;;  %v11332_v16 = vpop.f32.mrb[216].mxu1 }
0x1e68   : > { %v11299_v36 = vpop.f32.mrb[209].mxu0  ;;  %v11333_v32 = vpop.f32.mrb[217].mxu1 }
0x1e69   : > { %v11301_v14 = vpop.f32.mrb[210].mxu0  ;;  %v11335_v20 = vpop.f32.mrb[218].mxu1 }
0x1e6a   : > { %v11302_v53 = vpop.f32.mrb[211].mxu0  ;;  %v11336_v33 = vpop.f32.mrb[219].mxu1 }
0x1e6b   : > { %v11303_v29 = vadd.f32 %v11302_v53, %v11301_v14  ;;  %v11337_v60 = vadd.f32 %v11336_v33, %v11335_v20 }
0x1e6d   : > { %v7333_v54 = vadd.f32 %v11303_v29, %v7102_v26 }
0x1e6f   : > { %v14521_v3 = vadd.f32 %v11337_v60, %v7333_v54 }
0x1e71   : > { %v7541_v31 = vsel %vm7540_vm10, %v14521_v3, -inf  ;;  %7407 = vst.msk [vmem:[%s14519_s2] sm:$0xff] %vm1875_vm0, %v14521_v3  ;;  %v7410_v18 = vsel %vm7408_vm11, %v14521_v3, -inf }
0x1e72   : > { %7542 = vmax.xlane.f32.xlu0 %v7541_v31 }
0x1e73   : > { %v11304_v9 = vpop.f32.mrb[212].mxu0  ;;  %v11338_v25 = vpop.f32.mrb[220].mxu1 }
0x1e74   : > { %v11305_v1 = vpop.f32.mrb[213].mxu0  ;;  %v11339_v56 = vpop.f32.mrb[221].mxu1 }
0x1e75   : > { %v11306_v48 = vadd.f32 %v11305_v1, %v11304_v9  ;;  %v11340_v63 = vadd.f32 %v11339_v56, %v11338_v25  ;;  %v11307_v61 = vpop.f32.mrb[214].mxu0  ;;  %v11341_v41 = vpop.f32.mrb[222].mxu1 }
0x1e76   : > { %v11308_v42 = vpop.f32.mrb[215].mxu0  ;;  %v11342_v24 = vpop.f32.mrb[223].mxu1  ;;  %7411 = vmax.xlane.f32.xlu0 %v7410_v18 }
0x1e77   : > { %v7338_v19 = vadd.f32 %v11306_v48, %v7102_v26 }
0x1e79   : > { %v7393_v57 = vadd.f32 %v11340_v63, %v7338_v19 }
0x1e7b   : > { %7409 = vst.msk [vmem:[%s14519_s2 + $0x8] sm:$0xf] %vm7408_vm11, %v7393_v57  ;;  %v8232_v7 = vsel %vm7408_vm11, %v7393_v57, -inf }
0x1e7c   : > { %8233 = vmax.xlane.f32.xlu0 %v8232_v7 }
0x1eff   : > { %v7543_v11 = vpop.xlane.xlu0 %7542 }
0x1f00   : > { %v7545_v13 = vsel %vm7544_vm12, %v7543_v11, -inf  ;;  %v11310_v35 = vpop.f32.mrb[216].mxu0  ;;  %v11344_v21 = vpop.f32.mrb[224].mxu1 }
0x1f01   : > { %v7546_v17 = vrot.slane %v7545_v13, 4  ;;  %v11311_v50 = vpop.f32.mrb[217].mxu0  ;;  %v11345_v52 = vpop.f32.mrb[225].mxu1 }
0x1f02   : > { %v11312_v30 = vadd.f32 %v11311_v50, %v11310_v35  ;;  %v11346_v45 = vadd.f32 %v11345_v52, %v11344_v21  ;;  %v11313_v22 = vpop.f32.mrb[218].mxu0  ;;  %v11347_v15 = vpop.f32.mrb[226].mxu1 }
0x1f03   : > { %v7547_v0 = vmax.f32 %v7545_v13, %v7546_v17  ;;  %v11314_v59 = vpop.f32.mrb[219].mxu0  ;;  %v11348_v16 = vpop.f32.mrb[227].mxu1 }
0x1f04   : > { %v7345_v36 = vadd.f32 %v11312_v30, %v7102_v26  ;;  %v11315_v32 = vadd.f32 %v11314_v59, %v11313_v22  ;;  %v11349_v14 = vadd.f32 %v11348_v16, %v11347_v15  ;;  %v7412_v20 = vpop.xlane.xlu0 %7411 }
0x1f05   : > { %v7548_v53 = vrot.slane %v7547_v0, 2  ;;  %v7413_v33 = vsel %vm3009_vm7, %v7412_v20, -inf  ;;  %v12399_v20 = vld [vmem:[%s13054_s27 + $0x100] sm:$0xff]  }
0x1f06   : > { %v14535_v29 = vadd.f32 %v11346_v45, %v7345_v36  ;;  %v7348_v60 = vadd.f32 %v11315_v32, %v7102_v26  ;;  %v7414_v54 = vrot.slane %v7413_v33, 4  ;;  %v12397_v32 = vld [vmem:[%s13054_s27 + $0x140] sm:$0xff]  }
0x1f07   : > { %v7549_v31 = vmax.f32 %v7547_v0, %v7548_v53  ;;  %v12400_v53 = vld [vmem:[%s13054_s27 + $0x180] sm:$0xff]   ;;  %11350 = vmatprep.subr.bf16.mxu0 %v12397_v32 }
0x1f08   : > { %10748 = vst.msk [vmem:[%s14519_s2 + $0x10] sm:$0xff] %vm1875_vm0, %v14535_v29  ;;  %v14540_v9 = vadd.f32 %v11349_v14, %v7348_v60  ;;  %v7415_v25 = vmax.f32 %v7413_v33, %v7414_v54  ;;  %v8772_v1 = vsel %vm7540_vm10, %v14535_v29, -inf  ;;  %v8642_v42 = vsel %vm7408_vm11, %v14535_v29, -inf  ;;  %v12398_v14 = vld [vmem:[%s13054_s27 + $0x1c0] sm:$0xff]   ;;  %v12401_v33 = vld [vmem:[%s13054_s27 + $0x148] sm:$0xff]   ;;  %11351 = vmatpush3.bf16.msra.mxu0 %v12399_v20 }
0x1f09   : > { %v7550_v56 = vrot.slane %v7549_v31, 1  ;;  %8773 = vmax.xlane.f32.xlu0 %v8772_v1  ;;  %v8234_v48 = vpop.xlane.xlu0 %8233  ;;  %v12402_v60 = vld [vmem:[%s13054_s27 + $0x1c8] sm:$0xff]   ;;  %11372 = vmatprep.subr.bf16.mxu1 %v12398_v14 }
0x1f0a   : > { %10749 = vst.msk [vmem:[%s14519_s2 + $0x18] sm:$0xf] %vm7408_vm11, %v14540_v9  ;;  %v7416_v63 = vrot.slane %v7415_v25, 2  ;;  %v8235_v26 = vsel %vm3009_vm7, %v8234_v48, -inf  ;;  %11373 = vmatpush3.bf16.msra.mxu1 %v12400_v53  ;;  %v12403_v54 = vld [vmem:[%s13054_s27 + $0x108] sm:$0xff]   ;;  %11352 = vmatprep.subr.bf16.mxu0 %v12401_v33  ;;  %s14980_s2 = sand.u32 1, %s12811_s22  }
0x1f0b   : > { %v7551_v61 = vmax.f32 %v7549_v31, %v7550_v56  ;;  %v8236_v41 = vrot.slane %v8235_v26, 4  ;;  %v12404_v31 = vld [vmem:[%s13054_s27 + $0x188] sm:$0xff]   ;;  %11374 = vmatprep.subr.bf16.mxu1 %v12402_v60  ;;  %s10043_s3 = sshll.u32 %s14980_s2, 1 }
0x1f0c   : > { %v7417_v18 = vmax.f32 %v7415_v25, %v7416_v63  ;;  %11353 = vmatpush3.bf16.msra.mxu0 %v12403_v54 }
0x1f0d   : > { %v7552_v24 = vsub.f32 %v14521_v3, %v7551_v61  ;;  %v8237_v19 = vmax.f32 %v8235_v26, %v8236_v41  ;;  %8643 = vmax.xlane.f32.xlu0 %v8642_v42 }
0x1f0e   : > { %v7418_v7 = vrot.slane %v7417_v18, 1  ;;  %11375 = vmatpush3.bf16.msra.mxu1 %v12404_v31 }
0x1f0f   : > { %v7553_v11 = vmul.f32 1.442695, %v7552_v24  ;;  %v8238_v13 = vrot.slane %v8237_v19, 2 }
0x1f10   : > { %v7419_v35 = vmax.f32 %v7417_v18, %v7418_v7 }
0x1f11   : > { %12733 = vpow2.f32 %v7553_v11  ;;  %v8239_v21 = vmax.f32 %v8237_v19, %v8238_v13 }
0x1f12   : > { %v7420_v17 = vsub.f32 %v14521_v3, %v7419_v35 }
0x1f13   : > { %v8240_v50 = vrot.slane %v8239_v21, 1 }
0x1f14   : > { %v7421_v52 = vmul.f32 1.442695, %v7420_v17 }
0x1f15   : > { %v8241_v30 = vmax.f32 %v8239_v21, %v8240_v50 }
0x1f16   : > { %12735 = vpow2.f32 %v7421_v52 }
0x1f17   : > { %v8242_v45 = vsub.f32 %v7393_v57, %v8241_v30  ;;  %v9461_v57 = vsel %vm7408_vm11, %v14540_v9, -inf }
0x1f19   : > { %v8243_v22 = vmul.f32 1.442695, %v8242_v45 }
0x1f1b   : > { %v14552_v15 = vpop.eup %12733  ;;  %12737 = vpow2.f32 %v8243_v22 }
0x1f1c   : > { %v7555_v0 = vsel %vm7540_vm10, %v14552_v15, 0.0 }
0x1f1d   : > { %7556 = vadd.xlane.f32.xlu1 %v7555_v0 }
0x1f20   : > { %v14556_v3 = vpop.eup %12735 }
0x1f21   : > { %v7423_v59 = vsel %vm7408_vm11, %v14556_v3, 0.0 }
0x1f22   : > { %7424 = vadd.xlane.f32.xlu0 %v7423_v59 }
0x1f25   : > { %v14562_v16 = vpop.eup %12737 }
0x1f26   : > { %9462 = vmax.xlane.f32.xlu0 %v9461_v57  ;;  %v8245_v36 = vsel %vm7408_vm11, %v14562_v16, 0.0 }
0x1f2a   : > { %8246 = vadd.xlane.f32.xlu0 %v8245_v36 }
0x1f96   : > { %v8774_v25 = vpop.xlane.xlu0 %8773 }
0x1f97   : > { %v8775_v1 = vsel %vm7544_vm12, %v8774_v25, -inf }
0x1f98   : > { %v8776_v56 = vrot.slane %v8775_v1, 4 }
0x1f9a   : > { %v8777_v48 = vmax.f32 %v8775_v1, %v8776_v56  ;;  %v8644_v63 = vpop.xlane.xlu0 %8643 }
0x1f9b   : > { %v8645_v26 = vsel %vm3009_vm7, %v8644_v63, -inf }
0x1f9c   : > { %v8778_v61 = vrot.slane %v8777_v48, 2  ;;  %v8646_v41 = vrot.slane %v8645_v26, 4 }
0x1f9e   : > { %v8779_v18 = vmax.f32 %v8777_v48, %v8778_v61  ;;  %v8647_v42 = vmax.f32 %v8645_v26, %v8646_v41 }
0x1fa0   : > { %v8780_v24 = vrot.slane %v8779_v18, 1  ;;  %v8648_v19 = vrot.slane %v8647_v42, 2 }
0x1fa2   : > { %v8781_v7 = vmax.f32 %v8779_v18, %v8780_v24  ;;  %v8649_v11 = vmax.f32 %v8647_v42, %v8648_v19 }
0x1fa4   : > { %v8782_v13 = vsub.f32 %v14535_v29, %v8781_v7  ;;  %v8650_v35 = vrot.slane %v8649_v11, 1 }
0x1fa6   : > { %v8783_v21 = vmul.f32 1.442695, %v8782_v13  ;;  %v8651_v17 = vmax.f32 %v8649_v11, %v8650_v35 }
0x1fa8   : > { %12739 = vpow2.f32 %v8783_v21  ;;  %v8652_v50 = vsub.f32 %v14535_v29, %v8651_v17  ;;  %v12405_v21 = vld [vmem:[%s13054_s27 + $0x150] sm:$0xff]  }
0x1fa9   : > { %v12406_v17 = vld [vmem:[%s13054_s27 + $0x1d0] sm:$0xff]   ;;  %11354 = vmatprep.subr.bf16.mxu0 %v12405_v21  ;;  %v12430_v21 = vld [vmem:[%s13054_s27 + $0xc0] sm:$0xff]  }
0x1faa   : > { %v8653_v52 = vmul.f32 1.442695, %v8652_v50  ;;  %v7557_v30 = vpop.xlane.xlu1 %7556  ;;  %11376 = vmatprep.subr.bf16.mxu1 %v12406_v17 }
0x1fab   : > { %v7559_v45 = vrot.slane %v7557_v30, 4  ;;  %v12407_v30 = vld [vmem:[%s13054_s27 + $0x110] sm:$0xff]  }
0x1fac   : > { %12741 = vpow2.f32 %v8653_v52  ;;  %11355 = vmatpush3.bf16.msra.mxu0 %v12407_v30 }
0x1fad   : > { %v7561_v22 = vsel %vm3009_vm7, %v7559_v45, 0.0  ;;  %v12408_v45 = vld [vmem:[%s13054_s27 + $0x190] sm:$0xff]  }
0x1fae   : > { %v7562_v0 = vrot.slane %v7561_v22, 4  ;;  %11377 = vmatpush3.bf16.msra.mxu1 %v12408_v45 }
0x1faf   : > { %v7425_v59 = vpop.xlane.xlu0 %7424 }
0x1fb0   : > { %v7563_v57 = vadd.f32 %v7562_v0, %v7561_v22  ;;  %v7426_v36 = vsel %vm3009_vm7, %v7425_v59, 0.0  ;;  %v12409_v0 = vld [vmem:[%s13054_s27 + $0x158] sm:$0xff]  }
0x1fb1   : > { %v7427_v32 = vrot.slane %v7426_v36, 4  ;;  %v12410_v59 = vld [vmem:[%s13054_s27 + $0x1d8] sm:$0xff]   ;;  %11356 = vmatprep.subr.bf16.mxu0 %v12409_v0 }
0x1fb2   : > { %v14580_v14 = vpop.eup %12739  ;;  %v7564_v20 = vrot.slane %v7563_v57, 2  ;;  %11378 = vmatprep.subr.bf16.mxu1 %v12410_v59 }
0x1fb3   : > { %v7428_v53 = vadd.f32 %v7427_v32, %v7426_v36  ;;  %v9463_v33 = vpop.xlane.xlu0 %9462  ;;  %v8785_v29 = vsel %vm7540_vm10, %v14580_v14, 0.0  ;;  %v12411_v32 = vld [vmem:[%s13054_s27 + $0x118] sm:$0xff]  }
0x1fb4   : > { %v7565_v60 = vadd.f32 %v7564_v20, %v7563_v57  ;;  %8786 = vadd.xlane.f32.xlu0 %v8785_v29  ;;  %v9464_v26 = vsel %vm3009_vm7, %v9463_v33, -inf  ;;  %v12412_v20 = vld [vmem:[%s13054_s27 + $0x198] sm:$0xff]   ;;  %11357 = vmatpush3.bf16.msra.mxu0 %v12411_v32 }
0x1fb5   : > { %v7429_v54 = vrot.slane %v7428_v53, 2  ;;  %v9465_v24 = vrot.slane %v9464_v26, 4  ;;  %11379 = vmatpush3.bf16.msra.mxu1 %v12412_v20 }
0x1fb6   : > { %v14584_v31 = vpop.eup %12741  ;;  %v7566_v25 = vrot.slane %v7565_v60, 1 }
0x1fb7   : > { %v7430_v1 = vadd.f32 %v7429_v54, %v7428_v53  ;;  %v8247_v56 = vpop.xlane.xlu0 %8246  ;;  %v8655_v48 = vsel %vm7408_vm11, %v14584_v31, 0.0  ;;  %v9466_v11 = vmax.f32 %v9464_v26, %v9465_v24  ;;  %v12416_v54 = vld [vmem:[%s13054_s27 + $0x1a0] sm:$0xff]   ;;  %v12418_v26 = vld [vmem:[%s13054_s27 + $0x1e8] sm:$0xff]   ;;  %v12424_v24 = vld [vmem:[%s13054_s27 + $0x1b0] sm:$0xff]  }
0x1fb8   : > { %v7567_v63 = vadd.f32 %v7566_v25, %v7565_v60  ;;  %v8248_v61 = vsel %vm3009_vm7, %v8247_v56, 0.0  ;;  %8656 = vadd.xlane.f32.xlu1 %v8655_v48  ;;  %v12414_v60 = vld [vmem:[%s13054_s27 + $0x1e0] sm:$0xff]  }
0x1fb9   : > { %v7431_v41 = vrot.slane %v7430_v1, 1  ;;  %v8249_v18 = vrot.slane %v8248_v61, 4  ;;  %v9467_v50 = vrot.slane %v9466_v11, 2  ;;  %11380 = vmatprep.subr.bf16.mxu1 %v12414_v60 }
0x1fba   : > { %12743 = vrcp.f32 %v7567_v63  ;;  %11381 = vmatpush3.bf16.msra.mxu1 %v12416_v54  ;;  %v12417_v63 = vld [vmem:[%s13054_s27 + $0x168] sm:$0xff]  }
0x1fbb   : > { %v7432_v42 = vadd.f32 %v7431_v41, %v7430_v1  ;;  %v8250_v19 = vadd.f32 %v8249_v18, %v8248_v61  ;;  %v9468_v36 = vmax.f32 %v9466_v11, %v9467_v50  ;;  %v12419_v61 = vld [vmem:[%s13054_s27 + $0x128] sm:$0xff]   ;;  %11382 = vmatprep.subr.bf16.mxu1 %v12418_v26  ;;  %v12427_v11 = vld [vmem:[%s13054_s27 + $0x138] sm:$0xff]  }
0x1fbc   : > { %v12420_v41 = vld [vmem:[%s13054_s27 + $0x1a8] sm:$0xff]  }
0x1fbd   : > { %12745 = vrcp.f32 %v7432_v42  ;;  %v8251_v7 = vrot.slane %v8250_v19, 2  ;;  %v9469_v29 = vrot.slane %v9468_v36, 1  ;;  %v12422_v42 = vld [vmem:[%s13054_s27 + $0x1f0] sm:$0xff]  }
0x1fbe   : > { %11383 = vmatpush3.bf16.msra.mxu1 %v12420_v41 }
0x1fbf   : > { %v8252_v13 = vadd.f32 %v8251_v7, %v8250_v19  ;;  %v9470_v25 = vmax.f32 %v9468_v36, %v9469_v29  ;;  %11384 = vmatprep.subr.bf16.mxu1 %v12422_v42  ;;  %v12425_v19 = vld [vmem:[%s13054_s27 + $0x178] sm:$0xff]  }
0x1fc0   : > { %v12426_v7 = vld [vmem:[%s13054_s27 + $0x1f8] sm:$0xff]  }
0x1fc1   : > { %v8253_v35 = vrot.slane %v8252_v13, 1  ;;  %v9471_v48 = vsub.f32 %v14540_v9, %v9470_v25  ;;  %v12423_v9 = vld [vmem:[%s13054_s27 + $0x130] sm:$0xff]  }
0x1fc2   : > { %11385 = vmatpush3.bf16.msra.mxu1 %v12424_v24 }
0x1fc3   : > { %v8254_v52 = vadd.f32 %v8253_v35, %v8252_v13  ;;  %v9472_v18 = vmul.f32 1.442695, %v9471_v48  ;;  %v12428_v13 = vld [vmem:[%s13054_s27 + $0x1b8] sm:$0xff]   ;;  %11386 = vmatprep.subr.bf16.mxu1 %v12426_v7  ;;  %v12429_v35 = vld [vmem:[%s13054_s27 + $0x40] sm:$0xff]  }
0x1fc4   : > { %v12744_v22 = vpop.eup %12743 }
0x1fc5   : > { %12747 = vrcp.f32 %v8254_v52  ;;  %v14602_v33 = vmul.f32 %v12744_v22, %v14552_v15  ;;  %v12415_v15 = vld [vmem:[%s13054_s27 + $0x120] sm:$0xff]  }
0x1fc6   : > { %12749 = vpow2.f32 %v9472_v18  ;;  %11387 = vmatpush3.bf16.msra.mxu1 %v12428_v13 }
0x1fc7   : > { %v12746_v57 = vpop.eup %12745  ;;  %11416 = vmatprep.subr.bf16.mxu1 %v12430_v21 }
0x1fc8   : > { %v14599_v53 = vmul.f32 %v12746_v57, %v14556_v3  ;;  %v12413_v3 = vld [vmem:[%s13054_s27 + $0x160] sm:$0xff]  }
0x1fc9   : > { %11358 = vmatprep.subr.bf16.mxu0 %v12413_v3 }
0x1fca   : > { %7436 = vrot.lane.b32.xlu1 %v14599_v53, %s12865_s10  ;;  %7571 = vrot.lane.b32.xlu0 %v14602_v33, %s12865_s10 }
0x1fcb   : > { %11359 = vmatpush3.bf16.msra.mxu0 %v12415_v15 }
0x1fcc   : > { %11360 = vmatprep.subr.bf16.mxu0 %v12417_v63 }
0x1fcf   : > { %v12748_v1 = vpop.eup %12747  ;;  %11361 = vmatpush3.bf16.msra.mxu0 %v12419_v61 }
0x1fd0   : > { %v14613_v56 = vmul.f32 %v12748_v1, %v14562_v16  ;;  %v12421_v16 = vld [vmem:[%s13054_s27 + $0x170] sm:$0xff]   ;;  %v14632_v17 = vpop.eup %12749 }
0x1fd1   : > { %11362 = vmatprep.subr.bf16.mxu0 %v12421_v16  ;;  %v9474_v50 = vsel %vm7408_vm11, %v14632_v17, 0.0 }
0x1fd2   : > { %8258 = vrot.lane.b32.xlu1 %v14613_v56, %s12865_s10 }
0x1fd3   : > { %11363 = vmatpush3.bf16.msra.mxu0 %v12423_v9 }
0x1fd4   : > { %11364 = vmatprep.subr.bf16.mxu0 %v12425_v19 }
0x1fd7   : > { %11365 = vmatpush3.bf16.msra.mxu0 %v12427_v11 }
0x1fd8   : > { %11394 = vmatprep.subr.bf16.mxu0 %v12429_v35 }
0x1fe9   : > { %9475 = vadd.xlane.f32.xlu0 %v9474_v50 }
0x2041   : > { %v8787_v52 = vpop.xlane.xlu0 %8786 }
0x2042   : > { %v8789_v30 = vrot.slane %v8787_v52, 4 }
0x2044   : > { %v8791_v45 = vsel %vm3009_vm7, %v8789_v30, 0.0 }
0x2045   : > { %v8792_v22 = vrot.slane %v8791_v45, 4  ;;  %v8657_v0 = vpop.xlane.xlu1 %8656  ;;  %v7572_v59 = vpop.permute.xlu0 %7571 }
0x2046   : > { %v8658_v57 = vsel %vm3009_vm7, %v8657_v0, 0.0  ;;  %v7574_v36 = vsel %vm1875_vm0, %v14602_v33, %v7572_v59 }
0x2047   : > { %v8793_v32 = vadd.f32 %v8792_v22, %v8791_v45  ;;  %v8659_v20 = vrot.slane %v8658_v57, 4  ;;  %v7575_v29 = vmul.f32 %v7574_v36, %v14437_v58  ;;  %v7576_v3 = vmul.f32 %v7574_v36, %v14441_v28 }
0x2048   : > { %v7577_v60 = vmul.f32 %v7574_v36, %v14439_v23  ;;  %v7578_v15 = vmul.f32 %v7574_v36, %v14443_v49 }
0x2049   : > { %v8794_v54 = vrot.slane %v8793_v32, 2  ;;  %v8660_v25 = vadd.f32 %v8659_v20, %v8658_v57  ;;  %v7583_v1 = vrot.slane %v7575_v29, 4  ;;  %v7584_v48 = vrot.slane %v7576_v3, 4  ;;  %v7437_v63 = vpop.permute.xlu1 %7436 }
0x204a   : > { %v7585_v26 = vrot.slane %v7577_v60, 4  ;;  %v7586_v18 = vrot.slane %v7578_v15, 4  ;;  %v14648_v9 = vsel %vm1875_vm0, %v14599_v53, %v7437_v63 }
0x204b   : > { %v8795_v61 = vadd.f32 %v8794_v54, %v8793_v32  ;;  %v8661_v41 = vrot.slane %v8660_v25, 2  ;;  %v7591_v33 = vsel %vm3009_vm7, %v7583_v1, 0.0  ;;  %v7598_v7 = vsel %vm3009_vm7, %v7584_v48, 0.0 }
0x204c   : > { %v7592_v16 = vrot.slane %v7591_v33, 4  ;;  %v7605_v42 = vsel %vm3009_vm7, %v7585_v26, 0.0  ;;  %v7441_v52 = vmul.f32 %v14648_v9, %v14441_v28  ;;  %v7599_v45 = vrot.slane %v7598_v7, 4 }
0x204d   : > { %v8796_v24 = vrot.slane %v8795_v61, 1  ;;  %v8662_v19 = vadd.f32 %v8661_v41, %v8660_v25  ;;  %v7606_v11 = vrot.slane %v7605_v42, 4  ;;  %v7612_v22 = vsel %vm3009_vm7, %v7586_v18, 0.0 }
0x204e   : > { %v7593_v13 = vadd.f32 %v7592_v16, %v7591_v33  ;;  %v7443_v53 = vmul.f32 %v14648_v9, %v14443_v49  ;;  %v7613_v36 = vrot.slane %v7612_v22, 4  ;;  %v7451_v32 = vsel %vm3009_vm7, %v7441_v52, 0.0  ;;  %v8259_v16 = vpop.permute.xlu1 %8258 }
0x204f   : > { %v8797_v35 = vadd.f32 %v8796_v24, %v8795_v61  ;;  %v8663_v21 = vrot.slane %v8662_v19, 1  ;;  %v7607_v50 = vadd.f32 %v7606_v11, %v7605_v42  ;;  %v7600_v3 = vadd.f32 %v7599_v45, %v7598_v7 }
0x2050   : > { %v7594_v30 = vrot.slane %v7593_v13, 2  ;;  %v7465_v29 = vsel %vm3009_vm7, %v7443_v53, 0.0  ;;  %v7452_v60 = vrot.slane %v7451_v32, 4  ;;  %v7614_v25 = vadd.f32 %v7613_v36, %v7612_v22  ;;  %v12431_v22 = vld [vmem:[%s13054_s27] sm:$0xff]  }
0x2051   : > { %12751 = vrcp.f32 %v8797_v35  ;;  %v8664_v0 = vadd.f32 %v8663_v21, %v8662_v19  ;;  %v7608_v59 = vrot.slane %v7607_v50, 2  ;;  %v7601_v15 = vrot.slane %v7600_v3, 2 }
0x2052   : > { %v7595_v57 = vadd.f32 %v7594_v30, %v7593_v13  ;;  %v7466_v54 = vrot.slane %v7465_v29, 4  ;;  %v7615_v49 = vrot.slane %v7614_v25, 2  ;;  %v7453_v26 = vadd.f32 %v7452_v60, %v7451_v32  ;;  %v12435_v60 = vld [vmem:[%s13054_s27 + $0x8] sm:$0xff]  }
0x2053   : > { %12753 = vrcp.f32 %v8664_v0  ;;  %v7609_v20 = vadd.f32 %v7608_v59, %v7607_v50  ;;  %v7602_v48 = vadd.f32 %v7601_v15, %v7600_v3  ;;  %v14665_v52 = vsel %vm1875_vm0, %v14613_v56, %v8259_v16  ;;  %v12433_v59 = vld [vmem:[%s13054_s27 + $0x48] sm:$0xff]   ;;  %v12437_v15 = vld [vmem:[%s13054_s27 + $0x50] sm:$0xff]   ;;  %v12443_v16 = vld [vmem:[%s13054_s27 + $0x18] sm:$0xff]  }
0x2054   : > { %v7596_v28 = vrot.slane %v7595_v57, 1  ;;  %v7616_v33 = vadd.f32 %v7615_v49, %v7614_v25  ;;  %v7467_v18 = vadd.f32 %v7466_v54, %v7465_v29  ;;  %v7454_v24 = vrot.slane %v7453_v26, 2 }
0x2055   : > { %v7610_v1 = vrot.slane %v7609_v20, 1  ;;  %v7603_v41 = vrot.slane %v7602_v48, 1  ;;  %v7440_v36 = vmul.f32 %v14648_v9, %v14437_v58  ;;  %v8263_v29 = vmul.f32 %v14665_v52, %v7003_v39 }
0x2056   : > { %v7597_v63 = vadd.f32 %v7596_v28, %v7595_v57  ;;  %v7617_v13 = vrot.slane %v7616_v33, 1  ;;  %v7468_v35 = vrot.slane %v7467_v18, 2  ;;  %v7455_v50 = vadd.f32 %v7454_v24, %v7453_v26  ;;  %v12434_v28 = vld [vmem:[%s13054_s27 + $0xc8] sm:$0xff]   ;;  %v12445_v24 = vld [vmem:[%s13054_s27 + $0x60] sm:$0xff]  }
0x2057   : > { %v7611_v42 = vadd.f32 %v7610_v1, %v7609_v20  ;;  %v7604_v11 = vadd.f32 %v7603_v41, %v7602_v48  ;;  %v12432_v20 = vld [vmem:[%s13054_s27 + $0x80] sm:$0xff]   ;;  %v8265_v6 = vmul.f32 %v14665_v52, %v7005_v5  ;;  %v7444_v54 = vsel %vm3009_vm7, %v7440_v36, 0.0  ;;  %v12439_v1 = vld [vmem:[%s13054_s27 + $0x10] sm:$0xff]  }
0x2058   : > { %v7684_v21 = vpack.c.bf16 %v7597_v63, %v7597_v63  ;;  %v7618_v45 = vadd.f32 %v7617_v13, %v7616_v33  ;;  %v7456_v0 = vrot.slane %v7455_v50, 1  ;;  %v7445_v48 = vrot.slane %v7444_v54, 4  ;;  %v12441_v63 = vld [vmem:[%s13054_s27 + $0x58] sm:$0xff]  }
0x2059   : > { %v7685_v30 = vpack.c.bf16 %v7604_v11, %v7604_v11  ;;  %v7686_v53 = vpack.c.bf16 %v7611_v42, %v7611_v42  ;;  %v8287_v49 = vsel %vm3009_vm7, %v8265_v6, 0.0  ;;  %v12442_v33 = vld [vmem:[%s13054_s27 + $0xd8] sm:$0xff]  }
0x205a   : > { %v7687_v32 = vpack.c.bf16 %v7618_v45, %v7618_v45  ;;  %v7457_v3 = vadd.f32 %v7456_v0, %v7455_v50  ;;  %v7446_v42 = vadd.f32 %v7445_v48, %v7444_v54  ;;  %v12449_v45 = vld [vmem:[%s13054_s27 + $0x68] sm:$0xff]  }
0x205b   : > { %v12752_v61 = vpop.eup %12751  ;;  %7912 = vmatprep.mubr.bf16.mxu0 %v7685_v30  ;;  %v12450_v0 = vld [vmem:[%s13054_s27 + $0xe8] sm:$0xff]  }
0x205c   : > { %v14659_v19 = vmul.f32 %v12752_v61, %v14580_v14  ;;  %v7469_v14 = vadd.f32 %v7468_v35, %v7467_v18  ;;  %7913 = vmatmul.mubr.bf16.vlgmr.msra.gmra.mrb[220].mxu0 %v7684_v21  ;;  %7952 = vmatprep.mubr.bf16.mxu1 %v7687_v32  ;;  %v7537_v39 = vpack.c.bf16 %v7457_v3, %v7457_v3  ;;  %v12440_v61 = vld [vmem:[%s13054_s27 + $0x90] sm:$0xff]   ;;  %v8288_v18 = vrot.slane %v8287_v49, 4  ;;  %v12446_v35 = vld [vmem:[%s13054_s27 + $0xe0] sm:$0xff]  }
0x205d   : > { %v12754_v7 = vpop.eup %12753  ;;  %11395 = vmatpush3.bf16.msra.mxu0 %v12431_v22  ;;  %7953 = vmatmul.mubr.bf16.vlgmr.msra.gmra.mrb[228].mxu1 %v7686_v53  ;;  %v12447_v21 = vld [vmem:[%s13054_s27 + $0x20] sm:$0xff]   ;;  %v7447_v30 = vrot.slane %v7446_v42, 2  ;;  %v12453_v32 = vld [vmem:[%s13054_s27 + $0x70] sm:$0xff]  }
0x205e   : > { %8801 = vrot.lane.b32.xlu1 %v14659_v19, %s12865_s10  ;;  %v14670_v57 = vmul.f32 %v12754_v7, %v14584_v31  ;;  %v7470_v56 = vrot.slane %v7469_v14, 1  ;;  %v7442_v31 = vmul.f32 %v14648_v9, %v14439_v23  ;;  %11396 = vmatprep.subr.bf16.mxu0 %v12433_v59  ;;  %v12436_v23 = vld [vmem:[%s13054_s27 + $0x88] sm:$0xff]   ;;  %v8273_v9 = vsel %vm3009_vm7, %v8263_v29, 0.0  ;;  %v12444_v7 = vld [vmem:[%s13054_s27 + $0x98] sm:$0xff]   ;;  %v12448_v22 = vld [vmem:[%s13054_s27 + $0xa0] sm:$0xff]  }
0x205f   : > { %11417 = vmatpush3.bf16.msra.mxu1 %v12432_v20  ;;  %8184 = vmatprep.mubr.bf16.mxu0 %v7537_v39  ;;  %v8274_v26 = vrot.slane %v8273_v9, 4  ;;  %v8289_v50 = vadd.f32 %v8288_v18, %v8287_v49  ;;  %v12451_v59 = vld [vmem:[%s13054_s27 + $0x28] sm:$0xff]   ;;  %v7448_v20 = vadd.f32 %v7447_v30, %v7446_v42  ;;  %v12454_v3 = vld [vmem:[%s13054_s27 + $0xf0] sm:$0xff]   ;;  %v12457_v39 = vld [vmem:[%s13054_s27 + $0x78] sm:$0xff]  }
0x2060   : > { %v7471_v58 = vadd.f32 %v7470_v56, %v7469_v14  ;;  %11418 = vmatprep.subr.bf16.mxu1 %v12434_v28  ;;  %v7458_v5 = vsel %vm3009_vm7, %v7442_v31, 0.0  ;;  %v12452_v56 = vld [vmem:[%s13054_s27 + $0xa8] sm:$0xff]   ;;  %v12463_v42 = vld [vmem:[%s13054_s27 + $0x200] sm:$0xff]  }
0x2061   : > { %11397 = vmatpush3.bf16.msra.mxu0 %v12435_v60  ;;  %v7459_v41 = vrot.slane %v7458_v5, 4  ;;  %v8275_v11 = vadd.f32 %v8274_v26, %v8273_v9  ;;  %v8290_v36 = vrot.slane %v8289_v50, 2  ;;  %v7449_v54 = vrot.slane %v7448_v20, 1  ;;  %v12458_v9 = vld [vmem:[%s13054_s27 + $0xf8] sm:$0xff]   ;;  %v12461_v26 = vld [vmem:[%s13054_s27 + $0x240] sm:$0xff]  }
0x2062   : > { %8668 = vrot.lane.b32.xlu1 %v14670_v57, %s12865_s10  ;;  %v7539_v25 = vpack.c.bf16 %v7471_v58, %v7471_v58  ;;  %11398 = vmatprep.subr.bf16.mxu0 %v12437_v15  ;;  %v12455_v58 = vld [vmem:[%s13054_s27 + $0x30] sm:$0xff]  }
0x2063   : > { %11419 = vmatpush3.bf16.msra.mxu1 %v12436_v23  ;;  %v7460_v13 = vadd.f32 %v7459_v41, %v7458_v5  ;;  %v8276_v14 = vrot.slane %v8275_v11, 2  ;;  %v8291_v6 = vadd.f32 %v8290_v36, %v8289_v50  ;;  %v12464_v50 = vld [vmem:[%s13054_s27 + $0x280] sm:$0xff]  }
0x2064   : > { %8224 = vmatprep.mubr.bf16.mxu1 %v7539_v25  ;;  %11420 = vmatprep.subr.bf16.mxu1 %v12438_v12  ;;  %v12456_v25 = vld [vmem:[%s13054_s27 + $0xb0] sm:$0xff]  }
0x2065   : > { %11399 = vmatpush3.bf16.msra.mxu0 %v12439_v1  ;;  %v7461_v53 = vrot.slane %v7460_v13, 2  ;;  %v8277_v29 = vadd.f32 %v8276_v14, %v8275_v11  ;;  %v12459_v1 = vld [vmem:[%s13054_s27 + $0x38] sm:$0xff]   ;;  %v8292_v48 = vrot.slane %v8291_v6, 1  ;;  %v8264_v14 = vmul.f32 %v14665_v52, %v7004_v34  ;;  %v12470_v34 = vld [vmem:[%s13054_s27 + $0x2d0] sm:$0xff]  }
0x2066   : > { %11400 = vmatprep.subr.bf16.mxu0 %v12441_v63  ;;  %v7450_v63 = vadd.f32 %v7449_v54, %v7448_v20  ;;  %v12472_v20 = vld [vmem:[%s13054_s27 + $0x290] sm:$0xff]  }
0x2067   : > { %11421 = vmatpush3.bf16.msra.mxu1 %v12440_v61  ;;  %v7462_v31 = vadd.f32 %v7461_v53, %v7460_v13  ;;  %v8278_v23 = vrot.slane %v8277_v29, 1  ;;  %v12460_v61 = vld [vmem:[%s13054_s27 + $0xb8] sm:$0xff]   ;;  %v12465_v13 = vld [vmem:[%s13054_s27 + $0x248] sm:$0xff]   ;;  %v12469_v53 = vld [vmem:[%s13054_s27 + $0x250] sm:$0xff]  }
0x2068   : > { %11422 = vmatprep.subr.bf16.mxu1 %v12442_v33  ;;  %v7536_v11 = vpack.c.bf16 %v7450_v63, %v7450_v63  ;;  %v12486_v63 = vld [vmem:[%s13054_s27 + $0x2f0] sm:$0xff]  }
0x2069   : > { %11401 = vmatpush3.bf16.msra.mxu0 %v12443_v16  ;;  %v7463_v5 = vrot.slane %v7462_v31, 1  ;;  %v8279_v41 = vadd.f32 %v8278_v23, %v8277_v29  ;;  %v12462_v16 = vld [vmem:[%s13054_s27 + $0x2c0] sm:$0xff]   ;;  %v12474_v29 = vld [vmem:[%s13054_s27 + $0x2d8] sm:$0xff]   ;;  %v12481_v23 = vld [vmem:[%s13054_s27 + $0x268] sm:$0xff]  }
0x206a   : > { %11402 = vmatprep.subr.bf16.mxu0 %v12445_v24  ;;  %v8293_v24 = vadd.f32 %v8292_v48, %v8291_v6 }
0x206b   : > { %11423 = vmatpush3.bf16.msra.mxu1 %v12444_v7  ;;  %v7464_v18 = vadd.f32 %v7463_v5, %v7462_v31  ;;  %v12477_v31 = vld [vmem:[%s13054_s27 + $0x260] sm:$0xff]   ;;  %v12482_v5 = vld [vmem:[%s13054_s27 + $0x2e8] sm:$0xff]  }
0x206c   : > { %11424 = vmatprep.subr.bf16.mxu1 %v12446_v35  ;;  %v8262_v35 = vmul.f32 %v14665_v52, %v7002_v43  ;;  %v8362_v38 = vpack.c.bf16 %v8293_v24, %v8293_v24  ;;  %v12467_v43 = vld [vmem:[%s13054_s27 + $0x208] sm:$0xff]   ;;  %v8280_v52 = vsel %vm3009_vm7, %v8264_v14, 0.0  ;;  %v12491_v24 = vld [vmem:[%s13054_s27 + $0x238] sm:$0xff]  }
0x206d   : > { %11403 = vmatpush3.bf16.msra.mxu0 %v12447_v21  ;;  %v8360_v21 = vpack.c.bf16 %v8279_v41, %v8279_v41  ;;  %v12489_v41 = vld [vmem:[%s13054_s27 + $0x278] sm:$0xff]  }
0x206e   : > { %11404 = vmatprep.subr.bf16.mxu0 %v12449_v45  ;;  %v7538_v45 = vpack.c.bf16 %v7464_v18, %v7464_v18  ;;  %v12488_v18 = vld [vmem:[%s13054_s27 + $0x2b0] sm:$0xff]  }
0x206f   : > { %11425 = vmatpush3.bf16.msra.mxu1 %v12448_v22  ;;  %v12466_v22 = vld [vmem:[%s13054_s27 + $0x2c8] sm:$0xff]  }
0x2070   : > { %11426 = vmatprep.subr.bf16.mxu1 %v12450_v0  ;;  %v8266_v0 = vsel %vm3009_vm7, %v8262_v35, 0.0 }
0x2071   : > { %11405 = vmatpush3.bf16.msra.mxu0 %v12451_v59  ;;  %v12471_v59 = vld [vmem:[%s13054_s27 + $0x210] sm:$0xff]   ;;  %v8267_v36 = vrot.slane %v8266_v0, 4 }
0x2072   : > { %11406 = vmatprep.subr.bf16.mxu0 %v12453_v32  ;;  %v12473_v32 = vld [vmem:[%s13054_s27 + $0x258] sm:$0xff]  }
0x2073   : > { %11427 = vmatpush3.bf16.msra.mxu1 %v12452_v56  ;;  %v8281_v56 = vrot.slane %v8280_v52, 4 }
0x2074   : > { %11428 = vmatprep.subr.bf16.mxu1 %v12454_v3  ;;  %v12475_v3 = vld [vmem:[%s13054_s27 + $0x218] sm:$0xff]  }
0x2075   : > { %11407 = vmatpush3.bf16.msra.mxu0 %v12455_v58  ;;  %v12476_v58 = vld [vmem:[%s13054_s27 + $0x298] sm:$0xff]   ;;  %v8282_v6 = vadd.f32 %v8281_v56, %v8280_v52 }
0x2076   : > { %v9476_v28 = vpop.xlane.xlu0 %9475  ;;  %11408 = vmatprep.subr.bf16.mxu0 %v12457_v39  ;;  %v12478_v39 = vld [vmem:[%s13054_s27 + $0x2e0] sm:$0xff]   ;;  %v12505_v52 = vld [vmem:[%s13054_s27 + $0x158] sm:$0xff]  }
0x2077   : > { %v9477_v60 = vsel %vm3009_vm7, %v9476_v28, 0.0  ;;  %11429 = vmatpush3.bf16.msra.mxu1 %v12456_v25  ;;  %v8268_v28 = vadd.f32 %v8267_v36, %v8266_v0  ;;  %v12500_v0 = vld [vmem:[%s13054_s27 + $0x188] sm:$0xff]   ;;  %v12506_v36 = vld [vmem:[%s13054_s27 + $0x1d8] sm:$0xff]  }
0x2078   : > { %v9478_v15 = vrot.slane %v9477_v60, 4  ;;  %11430 = vmatprep.subr.bf16.mxu1 %v12458_v9  ;;  %v12480_v9 = vld [vmem:[%s13054_s27 + $0x2a0] sm:$0xff]   ;;  %v12508_v56 = vld [vmem:[%s13054_s27 + $0x198] sm:$0xff]  }
0x2079   : > { %11409 = vmatpush3.bf16.msra.mxu0 %v12459_v1  ;;  %v8269_v25 = vrot.slane %v8268_v28, 2  ;;  %v12483_v1 = vld [vmem:[%s13054_s27 + $0x228] sm:$0xff]  }
0x207a   : > { %v9479_v12 = vadd.f32 %v9478_v15, %v9477_v60  ;;  %11438 = vmatprep.subr.bf16.mxu0 %v12461_v26  ;;  %v12479_v15 = vld [vmem:[%s13054_s27 + $0x220] sm:$0xff]  }
0x207b   : > { %11431 = vmatpush3.bf16.msra.mxu1 %v12460_v61  ;;  %v8270_v48 = vadd.f32 %v8269_v25, %v8268_v28  ;;  %v12487_v61 = vld [vmem:[%s13054_s27 + $0x230] sm:$0xff]   ;;  %v12513_v28 = vld [vmem:[%s13054_s27 + $0x168] sm:$0xff]  }
0x207c   : > { %v9480_v49 = vrot.slane %v9479_v12, 2  ;;  %8185 = vmatmul.mubr.bf16.vlgmr.msra.gmra.mrb[224].mxu0 %v7536_v11  ;;  %11460 = vmatprep.subr.bf16.mxu1 %v12462_v16  ;;  %v12490_v16 = vld [vmem:[%s13054_s27 + $0x2f8] sm:$0xff]   ;;  %v12493_v11 = vld [vmem:[%s13054_s27 + $0x140] sm:$0xff]   ;;  %v12519_v25 = vld [vmem:[%s13054_s27 + $0x130] sm:$0xff]  }
0x207d   : > { %11439 = vmatpush3.bf16.msra.mxu0 %v12463_v42  ;;  %8587 = vmatprep.mubr.bf16.mxu0 %v8360_v21  ;;  %v12494_v21 = vld [vmem:[%s13054_s27 + $0x1c0] sm:$0xff]  }
0x207e   : > { %v9481_v33 = vadd.f32 %v9480_v49, %v9479_v12  ;;  %8225 = vmatmul.mubr.bf16.vlgmr.msra.gmra.mrb[232].mxu1 %v7538_v45  ;;  %11440 = vmatprep.subr.bf16.mxu0 %v12465_v13  ;;  %v8283_v12 = vrot.slane %v8282_v6, 2  ;;  %v12484_v49 = vld [vmem:[%s13054_s27 + $0x2a8] sm:$0xff]   ;;  %v12492_v13 = vld [vmem:[%s13054_s27 + $0x2b8] sm:$0xff]  }
0x207f   : > { %11461 = vmatpush3.bf16.msra.mxu1 %v12464_v50  ;;  %8627 = vmatprep.mubr.bf16.mxu1 %v8362_v38  ;;  %v12495_v50 = vld [vmem:[%s13054_s27 + $0x100] sm:$0xff]   ;;  %v12497_v45 = vld [vmem:[%s13054_s27 + $0x148] sm:$0xff]  }
0x2080   : > { %v9482_v7 = vrot.slane %v9481_v33, 1  ;;  %11462 = vmatprep.subr.bf16.mxu1 %v12466_v22  ;;  %v8284_v26 = vadd.f32 %v8283_v12, %v8282_v6  ;;  %v12496_v22 = vld [vmem:[%s13054_s27 + $0x180] sm:$0xff]   ;;  %v12498_v38 = vld [vmem:[%s13054_s27 + $0x1c8] sm:$0xff]   ;;  %v12517_v6 = vld [vmem:[%s13054_s27 + $0x170] sm:$0xff]  }
0x2081   : > { %11441 = vmatpush3.bf16.msra.mxu0 %v12467_v43  ;;  %v12499_v43 = vld [vmem:[%s13054_s27 + $0x108] sm:$0xff]   ;;  %v12522_v12 = vld [vmem:[%s13054_s27 + $0x1f8] sm:$0xff]  }
0x2082   : > { %v9483_v30 = vadd.f32 %v9482_v7, %v9481_v33  ;;  %11442 = vmatprep.subr.bf16.mxu0 %v12469_v53  ;;  %v8271_v33 = vrot.slane %v8270_v48, 1  ;;  %v8285_v42 = vrot.slane %v8284_v26, 1  ;;  %v12501_v53 = vld [vmem:[%s13054_s27 + $0x150] sm:$0xff]  }
0x2083   : > { %11463 = vmatpush3.bf16.msra.mxu1 %v12468_v62  ;;  %v12502_v62 = vld [vmem:[%s13054_s27 + $0x1d0] sm:$0xff]  }
0x2084   : > { %12755 = vrcp.f32 %v9483_v30  ;;  %11464 = vmatprep.subr.bf16.mxu1 %v12470_v34  ;;  %v8272_v7 = vadd.f32 %v8271_v33, %v8270_v48  ;;  %v8286_v35 = vadd.f32 %v8285_v42, %v8284_v26  ;;  %v12503_v34 = vld [vmem:[%s13054_s27 + $0x110] sm:$0xff]   ;;  %v12526_v48 = vld [vmem:[%s13054_s27 + $0xc0] sm:$0xff]  }
0x2085   : > { %11443 = vmatpush3.bf16.msra.mxu0 %v12471_v59  ;;  %v12504_v59 = vld [vmem:[%s13054_s27 + $0x190] sm:$0xff]  }
0x2086   : > { %11444 = vmatprep.subr.bf16.mxu0 %v12473_v32  ;;  %v8359_v30 = vpack.c.bf16 %v8272_v7, %v8272_v7  ;;  %v8361_v14 = vpack.c.bf16 %v8286_v35, %v8286_v35  ;;  %v12507_v32 = vld [vmem:[%s13054_s27 + $0x118] sm:$0xff]  }
0x2087   : > { %11465 = vmatpush3.bf16.msra.mxu1 %v12472_v20  ;;  %v12509_v20 = vld [vmem:[%s13054_s27 + $0x160] sm:$0xff]  }
0x2088   : > { %11466 = vmatprep.subr.bf16.mxu1 %v12474_v29  ;;  %v12510_v29 = vld [vmem:[%s13054_s27 + $0x1e0] sm:$0xff]  }
0x2089   : > { %11445 = vmatpush3.bf16.msra.mxu0 %v12475_v3  ;;  %v12511_v3 = vld [vmem:[%s13054_s27 + $0x120] sm:$0xff]  }
0x208a   : > { %11446 = vmatprep.subr.bf16.mxu0 %v12477_v31  ;;  %v12512_v31 = vld [vmem:[%s13054_s27 + $0x1a0] sm:$0xff]  }
0x208b   : > { %11467 = vmatpush3.bf16.msra.mxu1 %v12476_v58  ;;  %v12514_v58 = vld [vmem:[%s13054_s27 + $0x1e8] sm:$0xff]  }
0x208c   : > { %11468 = vmatprep.subr.bf16.mxu1 %v12478_v39  ;;  %v12516_v39 = vld [vmem:[%s13054_s27 + $0x1a8] sm:$0xff]  }
0x208d   : > { %11447 = vmatpush3.bf16.msra.mxu0 %v12479_v15  ;;  %v12518_v15 = vld [vmem:[%s13054_s27 + $0x1f0] sm:$0xff]  }
0x208e   : > { %v12756_v60 = vpop.eup %12755  ;;  %11448 = vmatprep.subr.bf16.mxu0 %v12481_v23  ;;  %v12521_v23 = vld [vmem:[%s13054_s27 + $0x178] sm:$0xff]  }
0x208f   : > { %v14745_v54 = vmul.f32 %v12756_v60, %v14632_v17  ;;  %v12485_v17 = vld [vmem:[%s13054_s27 + $0x270] sm:$0xff]   ;;  %11469 = vmatpush3.bf16.msra.mxu1 %v12480_v9  ;;  %v12515_v60 = vld [vmem:[%s13054_s27 + $0x128] sm:$0xff]  }
0x2090   : > { %11470 = vmatprep.subr.bf16.mxu1 %v12482_v5  ;;  %v12520_v9 = vld [vmem:[%s13054_s27 + $0x1b0] sm:$0xff]   ;;  %v12523_v5 = vld [vmem:[%s13054_s27 + $0x138] sm:$0xff]  }
0x2091   : > { %9487 = vrot.lane.b32.xlu1 %v14745_v54, %s12865_s10  ;;  %11449 = vmatpush3.bf16.msra.mxu0 %v12483_v1  ;;  %v12525_v1 = vld [vmem:[%s13054_s27 + $0x40] sm:$0xff]   ;;  %s14896_s10 = scalar_lea.vmem [#allocation3], %s10043_s3  ;;  %s10982_s3 = sshll.u32 %s13092_s0, 5 }
0x2092   : > { %11450 = vmatprep.subr.bf16.mxu0 %v12485_v17  ;;  %v12524_v17 = vld [vmem:[%s13054_s27 + $0x1b8] sm:$0xff]   ;;  %s9891_s2 = sshll.u32 %s14896_s10, 4  ;;  %s12866_s0 = smov [#allocation3]   ;;  %s14905_s2 = int_to_ptr.vmem [resolvable:$true] %s9891_s2 }
0x2093   : > { %11471 = vmatpush3.bf16.msra.mxu1 %v12484_v49  ;;  %s12757_s9 = scalar_lea.vmem %s14905_s2, 32  ;;  %s12761_s12 = sshll.u32 %s12866_s0, 4  ;;  %s12762_s12 = int_to_ptr.vmem [resolvable:$false] %s12761_s12 }
0x2094   : > { %11472 = vmatprep.subr.bf16.mxu1 %v12486_v63  ;;  %p12758_p12 = scmp.ne.s32.totalorder %s14905_s2, %s12757_s9  ;;  %p12764_p1 = scmp.lt.s32.totalorder %s14905_s2, %s12762_s12 }
0x2095   : > { %11451 = vmatpush3.bf16.msra.mxu0 %v12487_v61 }
0x2096   : > { %11452 = vmatprep.subr.bf16.mxu0 %v12489_v41  ;;  %p12759_p13 = pnand %p12758_p12, %p13109_p5 }
0x2097   : > { %11473 = vmatpush3.bf16.msra.mxu1 %v12488_v18 }
0x2098   : > { %11474 = vmatprep.subr.bf16.mxu1 %v12490_v16  ;;  %p12760_p0 = pneg %p12759_p13 }
0x2099   : > { %11453 = vmatpush3.bf16.msra.mxu0 %v12491_v24 }
0x209a   : > { %11482 = vmatprep.subr.bf16.mxu0 %v12493_v11 }
0x209b   : > { %11475 = vmatpush3.bf16.msra.mxu1 %v12492_v13 }
0x209c   : > { %8588 = vmatmul.mubr.bf16.vlgmr.msra.gmra.mrb[228].mxu0 %v8359_v30  ;;  %11504 = vmatprep.subr.bf16.mxu1 %v12494_v21 }
0x209d   : > { %11483 = vmatpush3.bf16.msra.mxu0 %v12495_v50 }
0x209e   : > { %8628 = vmatmul.mubr.bf16.vlgmr.msra.gmra.mrb[236].mxu1 %v8361_v14  ;;  %11484 = vmatprep.subr.bf16.mxu0 %v12497_v45 }
0x209f   : > { %11505 = vmatpush3.bf16.msra.mxu1 %v12496_v22 }
0x20a0   : > { %11506 = vmatprep.subr.bf16.mxu1 %v12498_v38 }
0x20a1   : > { %11485 = vmatpush3.bf16.msra.mxu0 %v12499_v43 }
0x20a2   : > { %11486 = vmatprep.subr.bf16.mxu0 %v12501_v53 }
0x20a3   : > { %11507 = vmatpush3.bf16.msra.mxu1 %v12500_v0 }
0x20a4   : > { %11508 = vmatprep.subr.bf16.mxu1 %v12502_v62 }
0x20a5   : > { %11487 = vmatpush3.bf16.msra.mxu0 %v12503_v34 }
0x20a6   : > { %11488 = vmatprep.subr.bf16.mxu0 %v12505_v52 }
0x20a7   : > { %11509 = vmatpush3.bf16.msra.mxu1 %v12504_v59 }
0x20a8   : > { %11510 = vmatprep.subr.bf16.mxu1 %v12506_v36 }
0x20a9   : > { %11489 = vmatpush3.bf16.msra.mxu0 %v12507_v32 }
0x20aa   : > { %11490 = vmatprep.subr.bf16.mxu0 %v12509_v20 }
0x20ab   : > { %11511 = vmatpush3.bf16.msra.mxu1 %v12508_v56 }
0x20ac   : > { %11512 = vmatprep.subr.bf16.mxu1 %v12510_v29 }
0x20ad   : > { %11491 = vmatpush3.bf16.msra.mxu0 %v12511_v3 }
0x20ae   : > { %11492 = vmatprep.subr.bf16.mxu0 %v12513_v28 }
0x20af   : > { %11513 = vmatpush3.bf16.msra.mxu1 %v12512_v31 }
0x20b0   : > { %11514 = vmatprep.subr.bf16.mxu1 %v12514_v58 }
0x20b1   : > { %11493 = vmatpush3.bf16.msra.mxu0 %v12515_v60 }
0x20b2   : > { %11494 = vmatprep.subr.bf16.mxu0 %v12517_v6 }
0x20b3   : > { %11515 = vmatpush3.bf16.msra.mxu1 %v12516_v39 }
0x20b4   : > { %11516 = vmatprep.subr.bf16.mxu1 %v12518_v15 }
0x20b5   : > { %11495 = vmatpush3.bf16.msra.mxu0 %v12519_v25 }
0x20b6   : > { %11496 = vmatprep.subr.bf16.mxu0 %v12521_v23 }
0x20b7   : > { %11517 = vmatpush3.bf16.msra.mxu1 %v12520_v9 }
0x20b8   : > { %11518 = vmatprep.subr.bf16.mxu1 %v12522_v12 }
0x20b9   : > { %11497 = vmatpush3.bf16.msra.mxu0 %v12523_v5 }
0x20ba   : > { %11526 = vmatprep.subr.bf16.mxu0 %v12525_v1 }
0x20bb   : > { %11519 = vmatpush3.bf16.msra.mxu1 %v12524_v17 }
0x20bc   : > { %11548 = vmatprep.subr.bf16.mxu1 %v12526_v48 }
0x20d0   : > { %v8802_v49 = vpop.permute.xlu1 %8801 }
0x20d1   : > { %v8804_v63 = vsel %vm1875_vm0, %v14659_v19, %v8802_v49 }
0x20d2   : > { %v8805_v26 = vmul.f32 %v8804_v63, %v14501_v55  ;;  %v8806_v61 = vmul.f32 %v8804_v63, %v14495_v4  ;;  %v8807_v41 = vmul.f32 %v8804_v63, %v14503_v37  ;;  %v8808_v33 = vmul.f32 %v8804_v63, %v14497_v2 }
0x20d4   : > { %v8813_v18 = vrot.slane %v8805_v26, 4  ;;  %v8814_v16 = vrot.slane %v8806_v61, 4  ;;  %v8815_v42 = vrot.slane %v8807_v41, 4  ;;  %v8816_v24 = vrot.slane %v8808_v33, 4  ;;  %v8669_v7 = vpop.permute.xlu1 %8668  ;;  %v12527_v41 = vld [vmem:[%s13054_s27] sm:$0xff]  }
0x20d5   : > { %v8671_v11 = vsel %vm1875_vm0, %v14670_v57, %v8669_v7  ;;  %v12528_v33 = vld [vmem:[%s13054_s27 + $0x80] sm:$0xff]  }
0x20d6   : > { %v8821_v13 = vsel %vm3009_vm7, %v8813_v18, 0.0  ;;  %v8828_v19 = vsel %vm3009_vm7, %v8814_v16, 0.0  ;;  %v8835_v35 = vsel %vm3009_vm7, %v8815_v42, 0.0  ;;  %v8842_v21 = vsel %vm3009_vm7, %v8816_v24, 0.0  ;;  %v12529_v42 = vld [vmem:[%s13054_s27 + $0x48] sm:$0xff]  }
0x20d7   : > { %v8822_v50 = vrot.slane %v8821_v13, 4  ;;  %v8829_v30 = vrot.slane %v8828_v19, 4  ;;  %v8836_v45 = vrot.slane %v8835_v35, 4  ;;  %v8843_v22 = vrot.slane %v8842_v21, 4 }
0x20d8   : > { %v8673_v14 = vmul.f32 %v8671_v11, %v14495_v4  ;;  %v8675_v38 = vmul.f32 %v8671_v11, %v14497_v2  ;;  %v8672_v24 = vmul.f32 %v8671_v11, %v14501_v55  ;;  %v8674_v7 = vmul.f32 %v8671_v11, %v14503_v37  ;;  %v12533_v55 = vld [vmem:[%s13054_s27 + $0x50] sm:$0xff]  }
0x20d9   : > { %v8823_v43 = vadd.f32 %v8822_v50, %v8821_v13  ;;  %v8837_v53 = vadd.f32 %v8836_v45, %v8835_v35  ;;  %v8830_v0 = vadd.f32 %v8829_v30, %v8828_v19  ;;  %v8844_v57 = vadd.f32 %v8843_v22, %v8842_v21  ;;  %v12530_v19 = vld [vmem:[%s13054_s27 + $0xc8] sm:$0xff]   ;;  %v12534_v37 = vld [vmem:[%s13054_s27 + $0xd0] sm:$0xff]  }
0x20da   : > { %v8683_v62 = vsel %vm3009_vm7, %v8673_v14, 0.0  ;;  %v8697_v34 = vsel %vm3009_vm7, %v8675_v38, 0.0  ;;  %v12531_v50 = vld [vmem:[%s13054_s27 + $0x8] sm:$0xff]   ;;  %v8676_v11 = vsel %vm3009_vm7, %v8672_v24, 0.0  ;;  %v8690_v45 = vsel %vm3009_vm7, %v8674_v7, 0.0  ;;  %v12535_v22 = vld [vmem:[%s13054_s27 + $0x10] sm:$0xff]  }
0x20db   : > { %v8824_v52 = vrot.slane %v8823_v43, 2  ;;  %v8838_v59 = vrot.slane %v8837_v53, 2  ;;  %v8684_v36 = vrot.slane %v8683_v62, 4  ;;  %v8698_v32 = vrot.slane %v8697_v34, 4  ;;  %v12532_v30 = vld [vmem:[%s13054_s27 + $0x88] sm:$0xff]   ;;  %v12536_v14 = vld [vmem:[%s13054_s27 + $0x90] sm:$0xff]  }
0x20dc   : > { %v8831_v20 = vrot.slane %v8830_v0, 2  ;;  %v8845_v56 = vrot.slane %v8844_v57, 2  ;;  %v8677_v38 = vrot.slane %v8676_v11, 4  ;;  %v12561_v7 = vld [vmem:[%s13054_s27 + $0x248] sm:$0xff]  }
0x20dd   : > { %v8825_v29 = vadd.f32 %v8824_v52, %v8823_v43  ;;  %v8839_v3 = vadd.f32 %v8838_v59, %v8837_v53  ;;  %v8685_v28 = vadd.f32 %v8684_v36, %v8683_v62  ;;  %v8699_v2 = vadd.f32 %v8698_v32, %v8697_v34  ;;  %v12537_v53 = vld [vmem:[%s13054_s27 + $0x58] sm:$0xff]   ;;  %v12541_v59 = vld [vmem:[%s13054_s27 + $0x60] sm:$0xff]  }
0x20de   : > { %v8832_v4 = vadd.f32 %v8831_v20, %v8830_v0  ;;  %v8846_v31 = vadd.f32 %v8845_v56, %v8844_v57  ;;  %v8691_v43 = vrot.slane %v8690_v45, 4  ;;  %v12538_v0 = vld [vmem:[%s13054_s27 + $0xd8] sm:$0xff]   ;;  %v8678_v34 = vadd.f32 %v8677_v38, %v8676_v11  ;;  %v12542_v36 = vld [vmem:[%s13054_s27 + $0xe0] sm:$0xff]  }
0x20df   : > { %v8826_v58 = vrot.slane %v8825_v29, 1  ;;  %v8840_v60 = vrot.slane %v8839_v3, 1  ;;  %v8686_v6 = vrot.slane %v8685_v28, 2  ;;  %v8700_v25 = vrot.slane %v8699_v2, 2  ;;  %v12539_v57 = vld [vmem:[%s13054_s27 + $0x18] sm:$0xff]   ;;  %v12543_v32 = vld [vmem:[%s13054_s27 + $0x20] sm:$0xff]  }
0x20e0   : > { %v8833_v39 = vrot.slane %v8832_v4, 1  ;;  %v8847_v15 = vrot.slane %v8846_v31, 1  ;;  %v12540_v62 = vld [vmem:[%s13054_s27 + $0x98] sm:$0xff]   ;;  %v8692_v52 = vadd.f32 %v8691_v43, %v8690_v45  ;;  %v12544_v20 = vld [vmem:[%s13054_s27 + $0xa0] sm:$0xff]   ;;  %v8679_v56 = vrot.slane %v8678_v34, 2 }
0x20e1   : > { %v8827_v23 = vadd.f32 %v8826_v58, %v8825_v29  ;;  %v8841_v9 = vadd.f32 %v8840_v60, %v8839_v3  ;;  %v8687_v12 = vadd.f32 %v8686_v6, %v8685_v28  ;;  %v8701_v17 = vadd.f32 %v8700_v25, %v8699_v2  ;;  %v12545_v3 = vld [vmem:[%s13054_s27 + $0x68] sm:$0xff]   ;;  %v12549_v2 = vld [vmem:[%s13054_s27 + $0x70] sm:$0xff]   ;;  %v12553_v25 = vld [vmem:[%s13054_s27 + $0x78] sm:$0xff]  }
0x20e2   : > { %v8834_v5 = vadd.f32 %v8833_v39, %v8832_v4  ;;  %v8848_v1 = vadd.f32 %v8847_v15, %v8846_v31  ;;  %v8693_v29 = vrot.slane %v8692_v52, 2  ;;  %v12546_v28 = vld [vmem:[%s13054_s27 + $0xe8] sm:$0xff]   ;;  %v12550_v58 = vld [vmem:[%s13054_s27 + $0xf0] sm:$0xff]   ;;  %v8680_v60 = vadd.f32 %v8679_v56, %v8678_v34  ;;  %v12569_v38 = vld [vmem:[%s13054_s27 + $0x258] sm:$0xff]  }
0x20e3   : > { %v8913_v48 = vpack.c.bf16 %v8827_v23, %v8827_v23  ;;  %v8915_v49 = vpack.c.bf16 %v8841_v9, %v8841_v9  ;;  %v8688_v63 = vrot.slane %v8687_v12, 1  ;;  %v8702_v18 = vrot.slane %v8701_v17, 1  ;;  %v12547_v4 = vld [vmem:[%s13054_s27 + $0x28] sm:$0xff]   ;;  %v12551_v39 = vld [vmem:[%s13054_s27 + $0x30] sm:$0xff]   ;;  %v12554_v23 = vld [vmem:[%s13054_s27 + $0xf8] sm:$0xff]  }
0x20e4   : > { %v8914_v26 = vpack.c.bf16 %v8834_v5, %v8834_v5  ;;  %v8916_v61 = vpack.c.bf16 %v8848_v1, %v8848_v1  ;;  %v12548_v31 = vld [vmem:[%s13054_s27 + $0xa8] sm:$0xff]   ;;  %v8694_v6 = vadd.f32 %v8693_v29, %v8692_v52  ;;  %v12552_v15 = vld [vmem:[%s13054_s27 + $0xb0] sm:$0xff]   ;;  %v8681_v9 = vrot.slane %v8680_v60, 1  ;;  %v12555_v5 = vld [vmem:[%s13054_s27 + $0x38] sm:$0xff]  }
0x20e5   : > { %v8689_v16 = vadd.f32 %v8688_v63, %v8687_v12  ;;  %v8703_v13 = vadd.f32 %v8702_v18, %v8701_v17  ;;  %v12556_v1 = vld [vmem:[%s13054_s27 + $0xb8] sm:$0xff]   ;;  %v12558_v63 = vld [vmem:[%s13054_s27 + $0x2c0] sm:$0xff]  }
0x20e6   : > { %9141 = vmatprep.mubr.bf16.mxu0 %v8914_v26  ;;  %9181 = vmatprep.mubr.bf16.mxu1 %v8916_v61  ;;  %v8695_v12 = vrot.slane %v8694_v6, 1  ;;  %v8682_v17 = vadd.f32 %v8681_v9, %v8680_v60  ;;  %v12570_v43 = vld [vmem:[%s13054_s27 + $0x2d8] sm:$0xff]   ;;  %v12577_v60 = vld [vmem:[%s13054_s27 + $0x268] sm:$0xff]  }
0x20e7   : > { %9142 = vmatmul.mubr.bf16.vlgmr.msra.gmra.mrb[232].mxu0 %v8913_v48  ;;  %9182 = vmatmul.mubr.bf16.vlgmr.msra.gmra.mrb[240].mxu1 %v8915_v49  ;;  %v8769_v35 = vpack.c.bf16 %v8689_v16, %v8689_v16  ;;  %v8771_v21 = vpack.c.bf16 %v8703_v13, %v8703_v13  ;;  %v12557_v49 = vld [vmem:[%s13054_s27 + $0x240] sm:$0xff]   ;;  %v12562_v13 = vld [vmem:[%s13054_s27 + $0x2c8] sm:$0xff]  }
0x20e8   : > { %11527 = vmatpush3.bf16.msra.mxu0 %v12527_v41  ;;  %11549 = vmatpush3.bf16.msra.mxu1 %v12528_v33  ;;  %v8696_v48 = vadd.f32 %v8695_v12, %v8694_v6  ;;  %v12559_v41 = vld [vmem:[%s13054_s27 + $0x200] sm:$0xff]   ;;  %v12578_v6 = vld [vmem:[%s13054_s27 + $0x2e8] sm:$0xff]  }
0x20e9   : > { %9413 = vmatprep.mubr.bf16.mxu0 %v8769_v35  ;;  %11528 = vmatprep.subr.bf16.mxu0 %v12529_v42  ;;  %v12560_v33 = vld [vmem:[%s13054_s27 + $0x280] sm:$0xff]   ;;  %v8768_v42 = vpack.c.bf16 %v8682_v17, %v8682_v17  ;;  %v12564_v35 = vld [vmem:[%s13054_s27 + $0x288] sm:$0xff]   ;;  %v12585_v17 = vld [vmem:[%s13054_s27 + $0x278] sm:$0xff]  }
0x20ea   : > { %9453 = vmatprep.mubr.bf16.mxu1 %v8771_v21  ;;  %11550 = vmatprep.subr.bf16.mxu1 %v12530_v19  ;;  %v8770_v24 = vpack.c.bf16 %v8696_v48, %v8696_v48  ;;  %v12586_v48 = vld [vmem:[%s13054_s27 + $0x2f8] sm:$0xff]  }
0x20ec   : > { %11529 = vmatpush3.bf16.msra.mxu0 %v12531_v50  ;;  %11551 = vmatpush3.bf16.msra.mxu1 %v12532_v30 }
0x20ed   : > { %11530 = vmatprep.subr.bf16.mxu0 %v12533_v55  ;;  %11552 = vmatprep.subr.bf16.mxu1 %v12534_v37  ;;  %v12567_v55 = vld [vmem:[%s13054_s27 + $0x210] sm:$0xff]  }
0x20ee   : > { %v12568_v37 = vld [vmem:[%s13054_s27 + $0x290] sm:$0xff]  }
0x20f0   : > { %11531 = vmatpush3.bf16.msra.mxu0 %v12535_v22  ;;  %11553 = vmatpush3.bf16.msra.mxu1 %v12536_v14 }
0x20f1   : > { %11532 = vmatprep.subr.bf16.mxu0 %v12537_v53  ;;  %11554 = vmatprep.subr.bf16.mxu1 %v12538_v0 }
0x20f4   : > { %11533 = vmatpush3.bf16.msra.mxu0 %v12539_v57  ;;  %11555 = vmatpush3.bf16.msra.mxu1 %v12540_v62  ;;  %v12571_v57 = vld [vmem:[%s13054_s27 + $0x218] sm:$0xff]  }
0x20f5   : > { %11534 = vmatprep.subr.bf16.mxu0 %v12541_v59  ;;  %11556 = vmatprep.subr.bf16.mxu1 %v12542_v36  ;;  %v12572_v62 = vld [vmem:[%s13054_s27 + $0x298] sm:$0xff]  }
0x20f8   : > { %11535 = vmatpush3.bf16.msra.mxu0 %v12543_v32  ;;  %11557 = vmatpush3.bf16.msra.mxu1 %v12544_v20  ;;  %v12573_v32 = vld [vmem:[%s13054_s27 + $0x260] sm:$0xff]  }
0x20f9   : > { %11536 = vmatprep.subr.bf16.mxu0 %v12545_v3  ;;  %11558 = vmatprep.subr.bf16.mxu1 %v12546_v28  ;;  %v12574_v20 = vld [vmem:[%s13054_s27 + $0x2e0] sm:$0xff]  }
0x20fa   : > { %v12575_v3 = vld [vmem:[%s13054_s27 + $0x220] sm:$0xff]  }
0x20fc   : > { %11537 = vmatpush3.bf16.msra.mxu0 %v12547_v4  ;;  %11559 = vmatpush3.bf16.msra.mxu1 %v12548_v31  ;;  %v12576_v4 = vld [vmem:[%s13054_s27 + $0x2a0] sm:$0xff]  }
0x20fd   : > { %11538 = vmatprep.subr.bf16.mxu0 %v12549_v2  ;;  %11560 = vmatprep.subr.bf16.mxu1 %v12550_v58 }
0x2100   : > { %11539 = vmatpush3.bf16.msra.mxu0 %v12551_v39  ;;  %11561 = vmatpush3.bf16.msra.mxu1 %v12552_v15  ;;  %v12579_v39 = vld [vmem:[%s13054_s27 + $0x228] sm:$0xff]  }
0x2101   : > { %11540 = vmatprep.subr.bf16.mxu0 %v12553_v25  ;;  %11562 = vmatprep.subr.bf16.mxu1 %v12554_v23  ;;  %v12580_v15 = vld [vmem:[%s13054_s27 + $0x2a8] sm:$0xff]   ;;  %v12581_v25 = vld [vmem:[%s13054_s27 + $0x270] sm:$0xff]  }
0x2102   : > { %v12582_v23 = vld [vmem:[%s13054_s27 + $0x2f0] sm:$0xff]  }
0x2103   : > { %v9488_v26 = vpop.permute.xlu1 %9487 }
0x2104   : > { %11541 = vmatpush3.bf16.msra.mxu0 %v12555_v5  ;;  %11563 = vmatpush3.bf16.msra.mxu1 %v12556_v1  ;;  %v9490_v61 = vsel %vm1875_vm0, %v14745_v54, %v9488_v26  ;;  %v12583_v5 = vld [vmem:[%s13054_s27 + $0x230] sm:$0xff]   ;;  %v12587_v26 = vld [vmem:[%s13054_s27 + $0x238] sm:$0xff]  }
0x2105   : > { %v9492_v18 = vmul.f32 %v9490_v61, %v7015_v40  ;;  %v9494_v16 = vmul.f32 %v9490_v61, %v7017_v8  ;;  %11570 = vmatprep.subr.bf16.mxu0 %v12557_v49  ;;  %v9491_v19 = vmul.f32 %v9490_v61, %v7014_v51  ;;  %v9493_v54 = vmul.f32 %v9490_v61, %v7016_v44  ;;  %v12566_v51 = vld [vmem:[%s13054_s27 + $0x2d0] sm:$0xff]   ;;  %v12588_v61 = vld [vmem:[%s13054_s27 + $0x2b8] sm:$0xff]  }
0x2106   : > { %11592 = vmatprep.subr.bf16.mxu1 %v12558_v63  ;;  %v12584_v1 = vld [vmem:[%s13054_s27 + $0x2b0] sm:$0xff]  }
0x2107   : > { %v9502_v47 = vsel %vm3009_vm7, %v9492_v18, 0.0  ;;  %v9516_v46 = vsel %vm3009_vm7, %v9494_v16, 0.0  ;;  %9414 = vmatmul.mubr.bf16.vlgmr.msra.gmra.mrb[236].mxu0 %v8768_v42  ;;  %9454 = vmatmul.mubr.bf16.vlgmr.msra.gmra.mrb[244].mxu1 %v8770_v24  ;;  %v9495_v44 = vsel %vm3009_vm7, %v9491_v19, 0.0  ;;  %v9509_v21 = vsel %vm3009_vm7, %v9493_v54, 0.0 }
0x2108   : > { %v9503_v40 = vrot.slane %v9502_v47, 4  ;;  %v9517_v8 = vrot.slane %v9516_v46, 4  ;;  %11571 = vmatpush3.bf16.msra.mxu0 %v12559_v41  ;;  %11593 = vmatpush3.bf16.msra.mxu1 %v12560_v33  ;;  %v9496_v22 = vrot.slane %v9495_v44, 4  ;;  %v9510_v14 = vrot.slane %v9509_v21, 4 }
0x2109   : > { %11572 = vmatprep.subr.bf16.mxu0 %v12561_v7  ;;  %11594 = vmatprep.subr.bf16.mxu1 %v12562_v13 }
0x210a   : > { %v9504_v50 = vadd.f32 %v9503_v40, %v9502_v47  ;;  %v9518_v30 = vadd.f32 %v9517_v8, %v9516_v46  ;;  %v9497_v59 = vadd.f32 %v9496_v22, %v9495_v44  ;;  %v9511_v36 = vadd.f32 %v9510_v14, %v9509_v21 }
0x210c   : > { %11573 = vmatpush3.bf16.msra.mxu0 %v12563_v27  ;;  %11595 = vmatpush3.bf16.msra.mxu1 %v12564_v35  ;;  %v9505_v11 = vrot.slane %v9504_v50, 2  ;;  %v9519_v45 = vrot.slane %v9518_v30, 2  ;;  %v9498_v2 = vrot.slane %v9497_v59, 2  ;;  %v9512_v58 = vrot.slane %v9511_v36, 2 }
0x210d   : > { %11574 = vmatprep.subr.bf16.mxu0 %v12565_v10  ;;  %11596 = vmatprep.subr.bf16.mxu1 %v12566_v51 }
0x210e   : > { %v9506_v53 = vadd.f32 %v9505_v11, %v9504_v50  ;;  %v9520_v0 = vadd.f32 %v9519_v45, %v9518_v30  ;;  %v9499_v9 = vadd.f32 %v9498_v2, %v9497_v59  ;;  %v9513_v12 = vadd.f32 %v9512_v58, %v9511_v36 }
0x2110   : > { %11575 = vmatpush3.bf16.msra.mxu0 %v12567_v55  ;;  %11597 = vmatpush3.bf16.msra.mxu1 %v12568_v37  ;;  %v9507_v34 = vrot.slane %v9506_v53, 1  ;;  %v9521_v52 = vrot.slane %v9520_v0, 1  ;;  %v9500_v49 = vrot.slane %v9499_v9, 1  ;;  %v9514_v63 = vrot.slane %v9513_v12, 1 }
0x2111   : > { %11576 = vmatprep.subr.bf16.mxu0 %v12569_v38  ;;  %11598 = vmatprep.subr.bf16.mxu1 %v12570_v43 }
0x2112   : > { %v9508_v56 = vadd.f32 %v9507_v34, %v9506_v53  ;;  %v9522_v29 = vadd.f32 %v9521_v52, %v9520_v0  ;;  %v9501_v41 = vadd.f32 %v9500_v49, %v9499_v9  ;;  %v9515_v33 = vadd.f32 %v9514_v63, %v9513_v12 }
0x2114   : > { %11577 = vmatpush3.bf16.msra.mxu0 %v12571_v57  ;;  %11599 = vmatpush3.bf16.msra.mxu1 %v12572_v62  ;;  %v9588_v28 = vpack.c.bf16 %v9508_v56, %v9508_v56  ;;  %v9590_v31 = vpack.c.bf16 %v9522_v29, %v9522_v29  ;;  %v9587_v18 = vpack.c.bf16 %v9501_v41, %v9501_v41 }
0x2115   : > { %11578 = vmatprep.subr.bf16.mxu0 %v12573_v32  ;;  %11600 = vmatprep.subr.bf16.mxu1 %v12574_v20  ;;  %v9589_v16 = vpack.c.bf16 %v9515_v33, %v9515_v33  ;;  %v7406_v32 = vld [vmem:[%s15058_s4] sm:$0x1]  ;;  %s14903_s4 = scalar_lea.hbm %s13069_s6, %s10982_s3  ;;  %s12763_s3 = scalar_lea.vmem %s12762_s12, 64 }
0x2116   : > { %9815 = vmatprep.mubr.bf16.mxu0 %v9588_v28  ;;  %9855 = vmatprep.mubr.bf16.mxu1 %v9590_v31  ;;  %p12765_p2 = scmp.lt.s32.totalorder %s12763_s3, %s12757_s9 }
0x2118   : > { %11579 = vmatpush3.bf16.msra.mxu0 %v12575_v3  ;;  %11601 = vmatpush3.bf16.msra.mxu1 %v12576_v4  ;;  %p12766_p3 = por %p12765_p2, %p12764_p1 }
0x2119   : > { %11580 = vmatprep.subr.bf16.mxu0 %v12577_v60  ;;  %11602 = vmatprep.subr.bf16.mxu1 %v12578_v6 }
0x211a   : > { %p12767_p4 = pnand %p12766_p3, %p12760_p0 }
0x211c   : > { %11581 = vmatpush3.bf16.msra.mxu0 %v12579_v39  ;;  %11603 = vmatpush3.bf16.msra.mxu1 %v12580_v15 }
0x211d   : > { %11582 = vmatprep.subr.bf16.mxu0 %v12581_v25  ;;  %11604 = vmatprep.subr.bf16.mxu1 %v12582_v23 }
0x2120   : > { %11583 = vmatpush3.bf16.msra.mxu0 %v12583_v5  ;;  %11605 = vmatpush3.bf16.msra.mxu1 %v12584_v1 }
0x2121   : > { %11584 = vmatprep.subr.bf16.mxu0 %v12585_v17  ;;  %11606 = vmatprep.subr.bf16.mxu1 %v12586_v48 }
0x2124   : > { %11585 = vmatpush3.bf16.msra.mxu0 %v12587_v26  ;;  %11607 = vmatpush3.bf16.msra.mxu1 %v12588_v61 }
0x2127   : > { %9816 = vmatmul.mubr.bf16.vlgmr.msra.gmra.mrb[240].mxu0 %v9587_v18  ;;  %9856 = vmatmul.mubr.bf16.vlgmr.msra.gmra.mrb[248].mxu1 %v9589_v16 }
0x212f   : > { %v11366_v42 = vpop.f32.mrb[220].mxu0 }
0x2130   : > { %v11367_v24 = vpop.f32.mrb[221].mxu0  ;;  %v11388_v7 = vpop.f32.mrb[228].mxu1 }
0x2131   : > { %v11368_v13 = vadd.f32 %v11367_v24, %v11366_v42  ;;  %v11369_v19 = vpop.f32.mrb[222].mxu0  ;;  %v11389_v54 = vpop.f32.mrb[229].mxu1 }
0x2132   : > { %v11370_v47 = vpop.f32.mrb[223].mxu0  ;;  %v11390_v46 = vadd.f32 %v11389_v54, %v11388_v7  ;;  %v11391_v40 = vpop.f32.mrb[230].mxu1 }
0x2133   : > { %v11392_v8 = vpop.f32.mrb[231].mxu1 }
0x2134   : > { %v7955_v27 = vadd.f32 %v11390_v46, %v11368_v13 }
0x214f   : > { %v11410_v35 = vpop.f32.mrb[224].mxu0 }
0x2150   : > { %v11411_v10 = vpop.f32.mrb[225].mxu0 }
0x2151   : > { %v11432_v51 = vpop.f32.mrb[232].mxu1  ;;  %v11412_v44 = vadd.f32 %v11411_v10, %v11410_v35  ;;  %v11413_v21 = vpop.f32.mrb[226].mxu0 }
0x2152   : > { %v11433_v50 = vpop.f32.mrb[233].mxu1  ;;  %v11414_v30 = vpop.f32.mrb[227].mxu0 }
0x2153   : > { %v8187_v55 = vadd.f32 %v11412_v44, %v7955_v27  ;;  %v11434_v37 = vadd.f32 %v11433_v50, %v11432_v51  ;;  %v11435_v11 = vpop.f32.mrb[234].mxu1 }
0x2154   : > { %v11436_v45 = vpop.f32.mrb[235].mxu1 }
0x2155   : > { %v8227_v22 = vadd.f32 %v11434_v37, %v8187_v55 }
0x216f   : > { %v11454_v14 = vpop.f32.mrb[228].mxu0 }
0x2170   : > { %v11455_v38 = vpop.f32.mrb[229].mxu0 }
0x2171   : > { %v11476_v43 = vpop.f32.mrb[236].mxu1  ;;  %v11456_v53 = vadd.f32 %v11455_v38, %v11454_v14  ;;  %v11457_v0 = vpop.f32.mrb[230].mxu0 }
0x2172   : > { %v11477_v57 = vpop.f32.mrb[237].mxu1  ;;  %v11458_v62 = vpop.f32.mrb[231].mxu0 }
0x2173   : > { %v11478_v34 = vadd.f32 %v11477_v57, %v11476_v43  ;;  %v11479_v52 = vpop.f32.mrb[238].mxu1 }
0x2174   : > { %v11480_v59 = vpop.f32.mrb[239].mxu1 }
0x2175   : > { %v8630_v36 = vadd.f32 %v11478_v34, %v11456_v53 }
0x2177   : > { %v8635_v20 = vadd.f32 %v8630_v36, %v8227_v22 }
0x2179   : > { %v8636_v56 = vadd.f32 %v8635_v20, %v7406_v32 }
0x217b   : > { %8638 = vst.msk [vmem:[%s14896_s10] sm:$0x1] %vm8637_vm13, %v8636_v56 }
0x21ba   : > { %v11498_v29 = vpop.f32.mrb[232].mxu0  ;;  %v11520_v3 = vpop.f32.mrb[240].mxu1 }
0x21bb   : > { %v11499_v28 = vpop.f32.mrb[233].mxu0  ;;  %v11521_v4 = vpop.f32.mrb[241].mxu1 }
0x21bc   : > { %v11500_v31 = vadd.f32 %v11499_v28, %v11498_v29  ;;  %v11522_v2 = vadd.f32 %v11521_v4, %v11520_v3  ;;  %v11501_v58 = vpop.f32.mrb[234].mxu0  ;;  %v11523_v60 = vpop.f32.mrb[242].mxu1 }
0x21bd   : > { %v11502_v6 = vpop.f32.mrb[235].mxu0  ;;  %v11524_v39 = vpop.f32.mrb[243].mxu1 }
0x21be   : > { %v9184_v15 = vadd.f32 %v11522_v2, %v11500_v31 }
0x21da   : > { %v11542_v25 = vpop.f32.mrb[236].mxu0  ;;  %v11564_v23 = vpop.f32.mrb[244].mxu1 }
0x21db   : > { %v11543_v9 = vpop.f32.mrb[237].mxu0  ;;  %v11565_v12 = vpop.f32.mrb[245].mxu1 }
0x21dc   : > { %v11544_v5 = vadd.f32 %v11543_v9, %v11542_v25  ;;  %v11566_v1 = vadd.f32 %v11565_v12, %v11564_v23  ;;  %v11545_v17 = vpop.f32.mrb[238].mxu0  ;;  %v11567_v48 = vpop.f32.mrb[246].mxu1 }
0x21dd   : > { %v11546_v49 = vpop.f32.mrb[239].mxu0  ;;  %v11568_v63 = vpop.f32.mrb[247].mxu1 }
0x21de   : > { %v9416_v26 = vadd.f32 %v11544_v5, %v9184_v15 }
0x21e0   : > { %v9456_v61 = vadd.f32 %v11566_v1, %v9416_v26 }
0x21fa   : > { %v11586_v41 = vpop.f32.mrb[240].mxu0  ;;  %v11608_v33 = vpop.f32.mrb[248].mxu1 }
0x21fb   : > { %v11587_v18 = vpop.f32.mrb[241].mxu0  ;;  %v11609_v16 = vpop.f32.mrb[249].mxu1 }
0x21fc   : > { %v11588_v42 = vadd.f32 %v11587_v18, %v11586_v41  ;;  %v11610_v24 = vadd.f32 %v11609_v16, %v11608_v33  ;;  %v11589_v7 = vpop.f32.mrb[242].mxu0  ;;  %v11611_v13 = vpop.f32.mrb[250].mxu1 }
0x21fd   : > { %v11590_v19 = vpop.f32.mrb[243].mxu0  ;;  %v11612_v54 = vpop.f32.mrb[251].mxu1 }
0x21fe   : > { %v9858_v47 = vadd.f32 %v11610_v24, %v11588_v42 }
0x2200   : > { %v9863_v46 = vadd.f32 %v9858_v47, %v9456_v61 }
0x2202   : > { %v9864_v40 = vadd.f32 %v9863_v46, %v7406_v32 }
0x2204   : > { %10974 = vst.msk [vmem:[%s14896_s10 + $0x1] sm:$0x1] %vm8637_vm13, %v9864_v40 }
0x2205   : > { %12770 = shalt.err (!%p12767_p4)
}
0x2206   : > { %s12771_s5 = scalar_lea.hbm %s14903_s4, 32  ;;  %s12775_s10 = scalar_lea.hbm %s13069_s6, 64 }
0x2207   : > { %p12772_p7 = scmp.ne.s32.totalorder %s14903_s4, %s12771_s5  ;;  %p12776_p10 = scmp.lt.u32.totalorder %s14903_s4, %s13069_s6 }
0x2208   : > { %p12777_p11 = scmp.lt.u32.totalorder %s12775_s10, %s12771_s5  ;;  %p12779_p13 = scmp.lt.u32.totalorder %s12771_s5, %s14903_s4 }
0x2209   : > { %p12773_p8 = pnand %p12772_p7, %p13109_p5 }
0x220a   : > { %p12778_p12 = por %p12777_p11, %p12776_p10 }
0x220b   : > { %p12774_p9 = pneg %p12773_p8 }
0x220c   : > { %p12780_p1 = por %p12779_p13, %p12778_p12 }
0x220e   : > { %p12781_p0 = pnand %p12780_p1, %p12774_p9 }
0x2210   : > { %12784 = shalt.err (!%p12781_p0)
}
0x2211   : > { %s12867_s9 = smov 1   ;;  %s15060_s12 = smov 16  }
0x2212   : > { %12148 = dma.vmem_to_hbm [thread:$0]  (%p13109_p5), %s14905_s2, 32, %s14903_s4, %s14911_s8, %s15060_s12, %s15060_s12, %s12867_s9  }
0x2213 PF: > { %p12154_p2 = scmp.ge.s32.totalorder %s12819_s1, 2  ;;  %s9915_s0 = sand.u32 1, %s12807_s23  }
0x2214   : > { %s9916_s3 = scalar_lea.sflag [#allocation4], %s9915_s0 }
0x2215   : > { %p12151_p3 = pnand %p12154_p2, %p13113_p6 }
0x2217   : > { %12802 = dma.done.wait (!%p12151_p3), %s9916_s3, 32  }
0x2218   : > { %12804 = vsyncadd (!%p12151_p3), %s9916_s3, 4294967264  ;;  %p92_p4 = scmp.ge.s32.totalorder %s13096_s28, 4   ;;  %s15061_s23 = smov %s12811_s22 }
0x2219   : > { %s15062_s22 = smov %s12815_s26  ;;  %s15063_s26 = smov %s13107_s7 }
0x221a   : > { %s15064_s1 = smov %s13096_s28  ;;  %94 = sbr.rel (!%p92_p4) target bundleno = 94 (0x5e), region = 298 }
0x2221   :  { %9921 = vsyncpa [#allocation4], 1 }
0x2222   :  { %9923 = vsyncpa [#allocation4 + $0x1], 1 }

</bundles_post_ra>
